<compile_context>
chip_gen: v7x
topology: tpu7x:2x2x1
jax: 0.10.0
libtpu: 0.0.40
codegen_flags: <defaults>
</compile_context>

<pallas_src>
import jax
import jax.numpy as jnp
from jax.experimental import pallas as pl
from jax.experimental.pallas import tpu as pltpu

BN_EPS = 1e-5

# Conv1d kernel sizes / channels and MaxPool1d sizes of the DeepNet stack.
CONV_KS = (9, 5, 3, 3, 3, 10, 1, 1)
CONV1_COUT = 10
POOL_KS = (3, 2, 2)
# "valid" convs / pools (stride 1, no padding) shrink the time axis by sum(K-1).
TOTAL_SHRINK = sum(k - 1 for k in CONV_KS) + sum(k - 1 for k in POOL_KS)   # = 31


def _conv_specs(input_dim):
    # (Cin, Cout, K) per conv layer
    return [(input_dim, 10, CONV_KS[0]), (10, 10, CONV_KS[1]), (10, 10, CONV_KS[2]),
            (10, 40, CONV_KS[3]), (40, 40, CONV_KS[4]),
            (40, 80, CONV_KS[5]), (80, 80, CONV_KS[6]), (80, 80, CONV_KS[7])]


# ------------------------------ kernel helpers -------------------------------
def _shift_up(h, k):
    # out[t] = h[t + k]; rows >= M - k wrap around.  Because every sample's
    # valid window ends at least TOTAL_SHRINK rows before its padded window
    # ends (T_pad >= T), wrapped rows never feed a valid output row.
    if k == 0:
        return h
    return pltpu.roll(h, shift=h.shape[0] - k, axis=0)


def _relu(v):
    return jnp.maximum(v, 0.0)


def _conv_im2col(h, w_ref, b_ref, K):
    # im2col column k*Cin + c holds h[t + k, c]; weight rows are laid out
    # identically host-side, so one MXU matmul computes the whole layer.
    if K == 1:
        cols = h
    else:
        cols = jnp.concatenate([_shift_up(h, k) for k in range(K)], axis=1)
    y = jnp.dot(cols.astype(jnp.bfloat16), w_ref[...],
                preferred_element_type=jnp.float32)
    return y + b_ref[...]


def _maxpool1d(h, K):
    y = h
    for k in range(1, K):
        y = jnp.maximum(y, _shift_up(h, k))
    return y


# ---------------------------------- kernel -----------------------------------
def _deepnet_kernel(x_ref, mask_ref,
                    w1, b1, w2, b2, w3, b3, w4, b4, w5, b5, w6, b6, w7, b7, w8, b8,
                    wa, ba, wo1, bo1, wo2, bo2,
                    out_ref):
    x = x_ref[0]                                          # (M, Cin) bf16

    # ---- Conv1 (wide input): one contraction over Cin, then shift-accumulate
    # the K narrow per-tap output slices.  Never duplicates the Cin-wide input.
    K0, C0 = CONV_KS[0], CONV1_COUT
    prod = jnp.dot(x, w1[...], preferred_element_type=jnp.float32)   # (M, K0*C0)
    acc = prod[:, 0:C0]
    for k in range(1, K0):
        acc = acc + _shift_up(prod[:, k * C0:(k + 1) * C0], k)
    h = _relu(acc + b1[...])                              # Conv1d(in,10,9)+ReLU

    h = _relu(_conv_im2col(h, w2, b2, CONV_KS[1]))        # Conv1d(10,10,5)+ReLU
    h = _conv_im2col(h, w3, b3, CONV_KS[2])               # Conv1d(10,10,3)
    h = _relu(_maxpool1d(h, POOL_KS[0]))                  # MaxPool(3,1)+BN*+ReLU
    h = _relu(_conv_im2col(h, w4, b4, CONV_KS[3]))        # Conv1d(10,40,3)+ReLU
    h = _conv_im2col(h, w5, b5, CONV_KS[4])               # Conv1d(40,40,3)
    h = _relu(_maxpool1d(h, POOL_KS[1]))                  # MaxPool(2,1)+BN*+ReLU
    h = _relu(_conv_im2col(h, w6, b6, CONV_KS[5]))        # Conv1d(40,80,10)+ReLU
    h = _conv_im2col(h, w7, b7, CONV_KS[6])               # Conv1d(80,80,1)
    h = _relu(_maxpool1d(h, POOL_KS[2]))                  # MaxPool(2,1)+BN*+ReLU
    h = _conv_im2col(h, w8, b8, CONV_KS[7])               # Conv1d(80,80,1) -> (M,80)
    # (*) the constant eval-mode BatchNorm scales are folded into w4/w6/w8.

    # ---- SelfAttentionPooling: one softmax per sample over its valid rows.
    hb = h.astype(jnp.bfloat16)                           # reused by two matmuls
    logits = jnp.dot(hb, wa[...], preferred_element_type=jnp.float32) + ba[...]  # (M,1)
    lm = logits + mask_ref[...]                           # (M,B), host-built mask
    m = jnp.max(lm, axis=0, keepdims=True)                # (1,B)
    e = jnp.exp(lm - m)                                   # masked rows -> 0
    denom = jnp.sum(e, axis=0, keepdims=True)             # (1,B)
    att = (e * pl.reciprocal(denom, approx=True)).astype(jnp.bfloat16)  # (M,B)
    # pooled[b, c] = sum_t att[t, b] * h[t, c]  -> single MXU contraction over M
    pooled = jax.lax.dot_general(att, hb, (((0,), (0,)), ((), ())),
                                 preferred_element_type=jnp.float32)    # (B,80)

    # ---- out_layer: Linear(80,30) + ReLU + Linear(30,num_classes)
    o = _relu(jnp.dot(pooled.astype(jnp.bfloat16), wo1[...],
                      preferred_element_type=jnp.float32) + bo1[...])
    o = jnp.dot(o.astype(jnp.bfloat16), wo2[...],
                preferred_element_type=jnp.float32) + bo2[...]          # (B,C)
    out_ref[0] = o


# --------------------------- host-side param prep ----------------------------
def init_params(key, input_dim, num_classes):
    """Random params in the reference layout: conv w (K, Cin, Cout), b (1, Cout)."""
    specs = _conv_specs(input_dim)
    keys = jax.random.split(key, 2 * len(specs) + 6)
    ki = iter(keys)
    params = []
    for (cin, cout, k) in specs:
        w = jax.random.normal(next(ki), (k, cin, cout), jnp.float32) / jnp.sqrt(cin * k)
        b = 0.01 * jax.random.normal(next(ki), (1, cout), jnp.float32)
        params += [w, b]
    wa = jax.random.normal(next(ki), (80, 1), jnp.float32) / jnp.sqrt(80.0)
    ba = 0.01 * jax.random.normal(next(ki), (1, 1), jnp.float32)
    wo1 = jax.random.normal(next(ki), (80, 30), jnp.float32) / jnp.sqrt(80.0)
    bo1 = 0.01 * jax.random.normal(next(ki), (1, 30), jnp.float32)
    wo2 = jax.random.normal(next(ki), (30, num_classes), jnp.float32) / jnp.sqrt(30.0)
    bo2 = 0.01 * jax.random.normal(next(ki), (1, num_classes), jnp.float32)
    params += [wa, ba, wo1, bo1, wo2, bo2]
    return params


def prepare_params(params):
    """Convert reference-layout f32 params into kernel params (host-side).

    - conv1 weight (K, Cin, Cout) -> wide weight (Cin, K*Cout) in bf16
      (kernel computes x @ W_all then shift-accumulates per-tap output slices)
    - conv2..8 weights (K, Cin, Cout) -> im2col weights (K*Cin, Cout) in bf16
    - eval-mode BatchNorm1d(affine=False) scale 1/sqrt(var+eps) (fresh stats:
      mean=0, var=1) folded into the conv that consumes each BN output
      # TODO(synk): real checkpoints need the true running mean/var folded
      # (mean adds a bias correction, not just a scale).
    - attention / output-layer weights cast to bf16; all biases kept f32
    """
    (w1, b1, w2, b2, w3, b3, w4, b4, w5, b5, w6, b6, w7, b7, w8, b8,
     wa, ba, wo1, bo1, wo2, bo2) = params
    s = 1.0 / jnp.sqrt(1.0 + BN_EPS)
    w4 = w4 * s          # BN(10) after MaxPool(3);  ReLU commutes with s > 0
    w6 = w6 * s          # BN(40) after MaxPool(2)
    w8 = w8 * s          # BN(80) after MaxPool(2)

    k, cin, cout = w1.shape
    w1_wide = jnp.transpose(w1, (1, 0, 2)).reshape(cin, k * cout).astype(jnp.bfloat16)

    def cw(w):
        kk, ci, co = w.shape
        return w.reshape(kk * ci, co).astype(jnp.bfloat16)

    prepped = [w1_wide, b1.astype(jnp.float32)]
    for w, b in zip((w2, w3, w4, w5, w6, w7, w8),
                    (b2, b3, b4, b5, b6, b7, b8)):
        prepped += [cw(w), b.astype(jnp.float32)]
    prepped += [wa.astype(jnp.bfloat16), ba.astype(jnp.float32),
                wo1.astype(jnp.bfloat16), bo1.astype(jnp.float32),
                wo2.astype(jnp.bfloat16), bo2.astype(jnp.float32)]
    return prepped


# ------------------------------ VMEM bookkeeping ------------------------------
def _vmem_estimate(B, T_pad, Cin):
    """Rough per-step VMEM demand in bytes (generous upper bound)."""
    M = B * T_pad
    specs = _conv_specs(Cin)
    cols_max = max(kk * ci for (ci, _co, kk) in specs[1:])     # widest im2col slab
    per_step = (2 * M * Cin * 2                 # bf16 x block, double-buffered
                + 4 * M * cols_max * 4          # rolled taps + im2col concat (+bf16 copy)
                + M * CONV_KS[0] * CONV1_COUT * 4   # conv1 tap-product slab (f32)
                + 8 * M * 80 * 4)               # misc live activations (f32)
    resident = 2 * (Cin * CONV_KS[0] * CONV1_COUT) + 65536     # bf16 weights etc.
    return per_step + resident


# ---------------------------------- wrapper -----------------------------------
def deepnet_forward(features, att_mask, kernel_params, *, batch_block=None):
    """features: (N, T, input_dim) f32 -> (N, num_classes) logits.

    att_mask is accepted but not applied in the pooling, mirroring the
    reference forward path.
    """
    # TODO(synk): att_mask is ignored (padded frames attend like real ones),
    # matching the baseline implementation; variable-length batches therefore
    # behave exactly like the reference model, not like masked inference.
    del att_mask
    N, T, Cin = features.shape
    Tf = T - TOTAL_SHRINK                 # valid frames left after the conv stack
    assert Tf >= 1, f"need T >= {TOTAL_SHRINK + 1}, got {T}"
    num_classes = kernel_params[-1].shape[-1]

    T_pad = pl.cdiv(T, 16) * 16           # sublane-friendly per-sample row count
    if batch_block is None:
        batch_block = max(1, pl.cdiv(384, T_pad))   # target M = B*T_pad >= ~384 rows
    B = max(1, min(batch_block, N))
    if N >= 2:
        B = min(B, (N + 1) // 2)          # keep >= 2 grid steps (v7x: both TCs busy)
    while B > 1 and _vmem_estimate(B, T_pad, Cin) > 40 * 2**20:
        B -= 1                            # stay well inside v7x's 64 MiB VMEM
    nblk = pl.cdiv(N, B)
    N_pad = nblk * B
    M = B * T_pad

    # bf16 activation slab: halves HBM DMA bytes and its double-buffer footprint.
    x = features.astype(jnp.bfloat16)
    if (N_pad, T_pad) != (N, T):
        x = jnp.pad(x, ((0, N_pad - N), (0, T_pad - T), (0, 0)))
    # Concatenate each block's samples along time: one (B*T_pad, Cin) slab per
    # grid step so every conv matmul has M = B*T_pad rows.
    x = x.reshape(nblk, M, Cin)

    # Host-precomputed additive softmax mask (0 valid / -1e30 invalid), (M, B):
    # sample b's valid rows are [b*T_pad, b*T_pad + Tf).  Constant across steps.
    rows = jnp.arange(M)[:, None]
    cols = jnp.arange(B)[None, :]
    start = cols * T_pad
    valid = jnp.logical_and(rows >= start, rows < start + Tf)
    add_mask = jnp.where(valid, 0.0, -1e30).astype(jnp.float32)

    in_specs = [pl.BlockSpec((1, M, Cin), lambda n: (n, 0, 0)),
                pl.BlockSpec((M, B), lambda n: (0, 0))]
    # Weights/biases/mask: full blocks with constant index maps -> DMA'd once
    # and kept resident in VMEM across the (parallel) batch grid.
    in_specs += [pl.BlockSpec(p.shape, lambda n: (0, 0)) for p in kernel_params]

    vmem_limit = int(min(max(2 * _vmem_estimate(B, T_pad, Cin), 32 * 2**20),
                         48 * 2**20))

    out = pl.pallas_call(
        _deepnet_kernel,
        out_shape=jax.ShapeDtypeStruct((nblk, B, num_classes), jnp.float32),
        grid=(nblk,),
        in_specs=in_specs,
        out_specs=pl.BlockSpec((1, B, num_classes), lambda n: (n, 0, 0)),
        compiler_params=pltpu.CompilerParams(
            dimension_semantics=("parallel",),
            vmem_limit_bytes=vmem_limit,
        ),
    )(x, add_mask, *kernel_params)
    # TODO(synk): for very long utterances the time axis should additionally be
    # tiled in the x BlockSpec (with a K-1 halo); unnecessary at these sizes.
    return out.reshape(N_pad, num_classes)[:N]


# ---------------------------- pure-JAX f32 reference --------------------------
def deepnet_reference(features, params):
    (w1, b1, w2, b2, w3, b3, w4, b4, w5, b5, w6, b6, w7, b7, w8, b8,
     wa, ba, wo1, bo1, wo2, bo2) = params

    def conv(x, w, b):
        K = w.shape[0]
        tout = x.shape[0] - K + 1
        acc = jnp.zeros((tout, w.shape[2]), jnp.float32)
        for k in range(K):
            acc = acc + x[k:k + tout] @ w[k]
        return acc + b

    def pool(x, K):
        tout = x.shape[0] - K + 1
        y = x[:tout]
        for k in range(1, K):
            y = jnp.maximum(y, x[k:k + tout])
        return y

    bn = lambda v: v / jnp.sqrt(1.0 + BN_EPS)
    relu = lambda v: jnp.maximum(v, 0.0)

    outs = []
    for n in range(features.shape[0]):
        h = features[n]
        h = relu(conv(h, w1, b1)); h = relu(conv(h, w2, b2)); h = conv(h, w3, b3)
        h = relu(bn(pool(h, 3)))
        h = relu(conv(h, w4, b4)); h = conv(h, w5, b5)
        h = relu(bn(pool(h, 2)))
        h = relu(conv(h, w6, b6)); h = conv(h, w7, b7)
        h = relu(bn(pool(h, 2)))
        h = conv(h, w8, b8)
        att = jax.nn.softmax(h @ wa + ba, axis=0)
        pooled = jnp.sum(h * att, axis=0, keepdims=True)
        o = relu(pooled @ wo1 + bo1)
        outs.append((o @ wo2 + bo2)[0])
    return jnp.stack(outs)


if __name__ == "__main__":
    key = jax.random.PRNGKey(0)
    k_x, k_p = jax.random.split(key, 2)

    N, T, input_dim, num_classes = 6, 48, 128, 4    # T must be >= 32
    features = jax.random.normal(k_x, (N, T, input_dim), jnp.float32)
    # DeepModel.forward builds an additive mask from features_len; all sequences
    # here are full length so the mask is all zeros (and unused downstream).
    att_mask = jnp.zeros((N, T), jnp.float32)

    params = init_params(k_p, input_dim, num_classes)
    kernel_params = prepare_params(params)

    predicted = deepnet_forward(features, att_mask, kernel_params)
    jax.block_until_ready(predicted)

    assert predicted.shape == (N, num_classes)
    assert bool(jnp.all(jnp.isfinite(predicted)))

    # Validate against the pure-JAX f32 reference (kernel matmuls run in bf16).
    ref = deepnet_reference(features, params)
    err = float(jnp.max(jnp.abs(predicted - ref)))
    tol = 0.1 * (1.0 + float(jnp.max(jnp.abs(ref))))
    assert err <= tol, f"kernel/reference mismatch: max|diff|={err:.4f} > {tol:.4f}"

    print("KERNEL_OK")
</pallas_src>

<mosaic_0001>
module attributes {stable_mosaic.version = 11 : i64} {
  func.func @_deepnet_kernel(%arg0: i32, %arg1: memref<1x144x128xbf16, #tpu.memory_space<vmem>>, %arg2: memref<144x3xf32, #tpu.memory_space<vmem>>, %arg3: memref<128x90xbf16, #tpu.memory_space<vmem>>, %arg4: memref<1x10xf32, #tpu.memory_space<vmem>>, %arg5: memref<50x10xbf16, #tpu.memory_space<vmem>>, %arg6: memref<1x10xf32, #tpu.memory_space<vmem>>, %arg7: memref<30x10xbf16, #tpu.memory_space<vmem>>, %arg8: memref<1x10xf32, #tpu.memory_space<vmem>>, %arg9: memref<30x40xbf16, #tpu.memory_space<vmem>>, %arg10: memref<1x40xf32, #tpu.memory_space<vmem>>, %arg11: memref<120x40xbf16, #tpu.memory_space<vmem>>, %arg12: memref<1x40xf32, #tpu.memory_space<vmem>>, %arg13: memref<400x80xbf16, #tpu.memory_space<vmem>>, %arg14: memref<1x80xf32, #tpu.memory_space<vmem>>, %arg15: memref<80x80xbf16, #tpu.memory_space<vmem>>, %arg16: memref<1x80xf32, #tpu.memory_space<vmem>>, %arg17: memref<80x80xbf16, #tpu.memory_space<vmem>>, %arg18: memref<1x80xf32, #tpu.memory_space<vmem>>, %arg19: memref<80x1xbf16, #tpu.memory_space<vmem>>, %arg20: memref<1x1xf32, #tpu.memory_space<vmem>>, %arg21: memref<80x30xbf16, #tpu.memory_space<vmem>>, %arg22: memref<1x30xf32, #tpu.memory_space<vmem>>, %arg23: memref<30x4xbf16, #tpu.memory_space<vmem>>, %arg24: memref<1x4xf32, #tpu.memory_space<vmem>>, %arg25: memref<1x3x4xf32, #tpu.memory_space<vmem>>) attributes {dimension_semantics = [#tpu.dimension_semantics<parallel>], iteration_bounds = array<i64: 2>, scalar_prefetch = 0 : i64, scratch_operands = 0 : i64, tpu.core_type = #tpu.core_type<tc>, window_params = [{transform_indices = @transform_0, window_bounds = array<i64: 1, 144, 128>}, {pipeline_mode = #tpu.pipeline_mode<synchronous>, transform_indices = @transform_1, window_bounds = array<i64: 144, 3>}, {pipeline_mode = #tpu.pipeline_mode<synchronous>, transform_indices = @transform_2, window_bounds = array<i64: 128, 90>}, {pipeline_mode = #tpu.pipeline_mode<synchronous>, transform_indices = @transform_3, window_bounds = array<i64: 1, 10>}, {pipeline_mode = #tpu.pipeline_mode<synchronous>, transform_indices = @transform_4, window_bounds = array<i64: 50, 10>}, {pipeline_mode = #tpu.pipeline_mode<synchronous>, transform_indices = @transform_5, window_bounds = array<i64: 1, 10>}, {pipeline_mode = #tpu.pipeline_mode<synchronous>, transform_indices = @transform_6, window_bounds = array<i64: 30, 10>}, {pipeline_mode = #tpu.pipeline_mode<synchronous>, transform_indices = @transform_7, window_bounds = array<i64: 1, 10>}, {pipeline_mode = #tpu.pipeline_mode<synchronous>, transform_indices = @transform_8, window_bounds = array<i64: 30, 40>}, {pipeline_mode = #tpu.pipeline_mode<synchronous>, transform_indices = @transform_9, window_bounds = array<i64: 1, 40>}, {pipeline_mode = #tpu.pipeline_mode<synchronous>, transform_indices = @transform_10, window_bounds = array<i64: 120, 40>}, {pipeline_mode = #tpu.pipeline_mode<synchronous>, transform_indices = @transform_11, window_bounds = array<i64: 1, 40>}, {pipeline_mode = #tpu.pipeline_mode<synchronous>, transform_indices = @transform_12, window_bounds = array<i64: 400, 80>}, {pipeline_mode = #tpu.pipeline_mode<synchronous>, transform_indices = @transform_13, window_bounds = array<i64: 1, 80>}, {pipeline_mode = #tpu.pipeline_mode<synchronous>, transform_indices = @transform_14, window_bounds = array<i64: 80, 80>}, {pipeline_mode = #tpu.pipeline_mode<synchronous>, transform_indices = @transform_15, window_bounds = array<i64: 1, 80>}, {pipeline_mode = #tpu.pipeline_mode<synchronous>, transform_indices = @transform_16, window_bounds = array<i64: 80, 80>}, {pipeline_mode = #tpu.pipeline_mode<synchronous>, transform_indices = @transform_17, window_bounds = array<i64: 1, 80>}, {pipeline_mode = #tpu.pipeline_mode<synchronous>, transform_indices = @transform_18, window_bounds = array<i64: 80, 1>}, {pipeline_mode = #tpu.pipeline_mode<synchronous>, transform_indices = @transform_19, window_bounds = array<i64: 1, 1>}, {pipeline_mode = #tpu.pipeline_mode<synchronous>, transform_indices = @transform_20, window_bounds = array<i64: 80, 30>}, {pipeline_mode = #tpu.pipeline_mode<synchronous>, transform_indices = @transform_21, window_bounds = array<i64: 1, 30>}, {pipeline_mode = #tpu.pipeline_mode<synchronous>, transform_indices = @transform_22, window_bounds = array<i64: 30, 4>}, {pipeline_mode = #tpu.pipeline_mode<synchronous>, transform_indices = @transform_23, window_bounds = array<i64: 1, 4>}, {transform_indices = @transform_24, window_bounds = array<i64: 1, 3, 4>}]} {
    %c0 = arith.constant 0 : index
    %c0_0 = arith.constant 0 : index
    %c0_1 = arith.constant 0 : index
    %0 = vector.load %arg1[%c0, %c0_0, %c0_1] : memref<1x144x128xbf16, #tpu.memory_space<vmem>>, vector<1x144x128xbf16>
    %1 = vector.shape_cast %0 : vector<1x144x128xbf16> to vector<144x128xbf16>
    %c0_2 = arith.constant 0 : index
    %c0_3 = arith.constant 0 : index
    %2 = vector.load %arg3[%c0_2, %c0_3] : memref<128x90xbf16, #tpu.memory_space<vmem>>, vector<128x90xbf16>
    %cst = arith.constant dense<0.000000e+00> : vector<144x90xf32>
    %3 = tpu.matmul %1, %2, %cst {dimension_numbers = #tpu.dot_dimension_numbers<[1], [0], [0], [1], [0, 0, 1, 1], [], []>} : vector<144x128xbf16>, vector<128x90xbf16>, vector<144x90xf32> -> vector<144x90xf32>
    %4 = vector.extract_strided_slice %3 {offsets = [0, 0], sizes = [144, 10], strides = [1, 1]} : vector<144x90xf32> to vector<144x10xf32>
    %5 = vector.extract_strided_slice %3 {offsets = [0, 10], sizes = [144, 10], strides = [1, 1]} : vector<144x90xf32> to vector<144x10xf32>
    %c143_i32 = arith.constant 143 : i32
    %6 = tpu.dynamic_rotate %5 by %c143_i32 dim 0 : vector<144x10xf32>, i32 -> vector<144x10xf32>
    %7 = arith.addf %4, %6 : vector<144x10xf32>
    %8 = vector.extract_strided_slice %3 {offsets = [0, 20], sizes = [144, 10], strides = [1, 1]} : vector<144x90xf32> to vector<144x10xf32>
    %c142_i32 = arith.constant 142 : i32
    %9 = tpu.dynamic_rotate %8 by %c142_i32 dim 0 : vector<144x10xf32>, i32 -> vector<144x10xf32>
    %10 = arith.addf %7, %9 : vector<144x10xf32>
    %11 = vector.extract_strided_slice %3 {offsets = [0, 30], sizes = [144, 10], strides = [1, 1]} : vector<144x90xf32> to vector<144x10xf32>
    %c141_i32 = arith.constant 141 : i32
    %12 = tpu.dynamic_rotate %11 by %c141_i32 dim 0 : vector<144x10xf32>, i32 -> vector<144x10xf32>
    %13 = arith.addf %10, %12 : vector<144x10xf32>
    %14 = vector.extract_strided_slice %3 {offsets = [0, 40], sizes = [144, 10], strides = [1, 1]} : vector<144x90xf32> to vector<144x10xf32>
    %c140_i32 = arith.constant 140 : i32
    %15 = tpu.dynamic_rotate %14 by %c140_i32 dim 0 : vector<144x10xf32>, i32 -> vector<144x10xf32>
    %16 = arith.addf %13, %15 : vector<144x10xf32>
    %17 = vector.extract_strided_slice %3 {offsets = [0, 50], sizes = [144, 10], strides = [1, 1]} : vector<144x90xf32> to vector<144x10xf32>
    %c139_i32 = arith.constant 139 : i32
    %18 = tpu.dynamic_rotate %17 by %c139_i32 dim 0 : vector<144x10xf32>, i32 -> vector<144x10xf32>
    %19 = arith.addf %16, %18 : vector<144x10xf32>
    %20 = vector.extract_strided_slice %3 {offsets = [0, 60], sizes = [144, 10], strides = [1, 1]} : vector<144x90xf32> to vector<144x10xf32>
    %c138_i32 = arith.constant 138 : i32
    %21 = tpu.dynamic_rotate %20 by %c138_i32 dim 0 : vector<144x10xf32>, i32 -> vector<144x10xf32>
    %22 = arith.addf %19, %21 : vector<144x10xf32>
    %23 = vector.extract_strided_slice %3 {offsets = [0, 70], sizes = [144, 10], strides = [1, 1]} : vector<144x90xf32> to vector<144x10xf32>
    %c137_i32 = arith.constant 137 : i32
    %24 = tpu.dynamic_rotate %23 by %c137_i32 dim 0 : vector<144x10xf32>, i32 -> vector<144x10xf32>
    %25 = arith.addf %22, %24 : vector<144x10xf32>
    %26 = vector.extract_strided_slice %3 {offsets = [0, 80], sizes = [144, 10], strides = [1, 1]} : vector<144x90xf32> to vector<144x10xf32>
    %c136_i32 = arith.constant 136 : i32
    %27 = tpu.dynamic_rotate %26 by %c136_i32 dim 0 : vector<144x10xf32>, i32 -> vector<144x10xf32>
    %28 = arith.addf %25, %27 : vector<144x10xf32>
    %c0_4 = arith.constant 0 : index
    %c0_5 = arith.constant 0 : index
    %29 = vector.load %arg4[%c0_4, %c0_5] : memref<1x10xf32, #tpu.memory_space<vmem>>, vector<1x10xf32>
    %30 = vector.broadcast %29 : vector<1x10xf32> to vector<144x10xf32>
    %31 = arith.addf %28, %30 : vector<144x10xf32>
    %cst_6 = arith.constant 0.000000e+00 : f32
    %32 = vector.broadcast %cst_6 : f32 to vector<144x10xf32>
    %33 = arith.maximumf %31, %32 : vector<144x10xf32>
    %c143_i32_7 = arith.constant 143 : i32
    %34 = tpu.dynamic_rotate %33 by %c143_i32_7 dim 0 : vector<144x10xf32>, i32 -> vector<144x10xf32>
    %c142_i32_8 = arith.constant 142 : i32
    %35 = tpu.dynamic_rotate %33 by %c142_i32_8 dim 0 : vector<144x10xf32>, i32 -> vector<144x10xf32>
    %c141_i32_9 = arith.constant 141 : i32
    %36 = tpu.dynamic_rotate %33 by %c141_i32_9 dim 0 : vector<144x10xf32>, i32 -> vector<144x10xf32>
    %c140_i32_10 = arith.constant 140 : i32
    %37 = tpu.dynamic_rotate %33 by %c140_i32_10 dim 0 : vector<144x10xf32>, i32 -> vector<144x10xf32>
    %38 = tpu.concatenate %33, %34, %35, %36, %37 in 1 : vector<144x10xf32>, vector<144x10xf32>, vector<144x10xf32>, vector<144x10xf32>, vector<144x10xf32> -> vector<144x50xf32>
    %39 = arith.truncf %38 : vector<144x50xf32> to vector<144x50xbf16>
    %c0_11 = arith.constant 0 : index
    %c0_12 = arith.constant 0 : index
    %40 = vector.load %arg5[%c0_11, %c0_12] : memref<50x10xbf16, #tpu.memory_space<vmem>>, vector<50x10xbf16>
    %cst_13 = arith.constant dense<0.000000e+00> : vector<144x10xf32>
    %41 = tpu.matmul %39, %40, %cst_13 {dimension_numbers = #tpu.dot_dimension_numbers<[1], [0], [0], [1], [0, 0, 1, 1], [], []>} : vector<144x50xbf16>, vector<50x10xbf16>, vector<144x10xf32> -> vector<144x10xf32>
    %c0_14 = arith.constant 0 : index
    %c0_15 = arith.constant 0 : index
    %42 = vector.load %arg6[%c0_14, %c0_15] : memref<1x10xf32, #tpu.memory_space<vmem>>, vector<1x10xf32>
    %43 = vector.broadcast %42 : vector<1x10xf32> to vector<144x10xf32>
    %44 = arith.addf %41, %43 : vector<144x10xf32>
    %cst_16 = arith.constant 0.000000e+00 : f32
    %45 = vector.broadcast %cst_16 : f32 to vector<144x10xf32>
    %46 = arith.maximumf %44, %45 : vector<144x10xf32>
    %c143_i32_17 = arith.constant 143 : i32
    %47 = tpu.dynamic_rotate %46 by %c143_i32_17 dim 0 : vector<144x10xf32>, i32 -> vector<144x10xf32>
    %c142_i32_18 = arith.constant 142 : i32
    %48 = tpu.dynamic_rotate %46 by %c142_i32_18 dim 0 : vector<144x10xf32>, i32 -> vector<144x10xf32>
    %49 = tpu.concatenate %46, %47, %48 in 1 : vector<144x10xf32>, vector<144x10xf32>, vector<144x10xf32> -> vector<144x30xf32>
    %50 = arith.truncf %49 : vector<144x30xf32> to vector<144x30xbf16>
    %c0_19 = arith.constant 0 : index
    %c0_20 = arith.constant 0 : index
    %51 = vector.load %arg7[%c0_19, %c0_20] : memref<30x10xbf16, #tpu.memory_space<vmem>>, vector<30x10xbf16>
    %cst_21 = arith.constant dense<0.000000e+00> : vector<144x10xf32>
    %52 = tpu.matmul %50, %51, %cst_21 {dimension_numbers = #tpu.dot_dimension_numbers<[1], [0], [0], [1], [0, 0, 1, 1], [], []>} : vector<144x30xbf16>, vector<30x10xbf16>, vector<144x10xf32> -> vector<144x10xf32>
    %c0_22 = arith.constant 0 : index
    %c0_23 = arith.constant 0 : index
    %53 = vector.load %arg8[%c0_22, %c0_23] : memref<1x10xf32, #tpu.memory_space<vmem>>, vector<1x10xf32>
    %54 = vector.broadcast %53 : vector<1x10xf32> to vector<144x10xf32>
    %55 = arith.addf %52, %54 : vector<144x10xf32>
    %c143_i32_24 = arith.constant 143 : i32
    %56 = tpu.dynamic_rotate %55 by %c143_i32_24 dim 0 : vector<144x10xf32>, i32 -> vector<144x10xf32>
    %57 = arith.maximumf %55, %56 : vector<144x10xf32>
    %c142_i32_25 = arith.constant 142 : i32
    %58 = tpu.dynamic_rotate %55 by %c142_i32_25 dim 0 : vector<144x10xf32>, i32 -> vector<144x10xf32>
    %59 = arith.maximumf %57, %58 : vector<144x10xf32>
    %cst_26 = arith.constant 0.000000e+00 : f32
    %60 = vector.broadcast %cst_26 : f32 to vector<144x10xf32>
    %61 = arith.maximumf %59, %60 : vector<144x10xf32>
    %c143_i32_27 = arith.constant 143 : i32
    %62 = tpu.dynamic_rotate %61 by %c143_i32_27 dim 0 : vector<144x10xf32>, i32 -> vector<144x10xf32>
    %c142_i32_28 = arith.constant 142 : i32
    %63 = tpu.dynamic_rotate %61 by %c142_i32_28 dim 0 : vector<144x10xf32>, i32 -> vector<144x10xf32>
    %64 = tpu.concatenate %61, %62, %63 in 1 : vector<144x10xf32>, vector<144x10xf32>, vector<144x10xf32> -> vector<144x30xf32>
    %65 = arith.truncf %64 : vector<144x30xf32> to vector<144x30xbf16>
    %c0_29 = arith.constant 0 : index
    %c0_30 = arith.constant 0 : index
    %66 = vector.load %arg9[%c0_29, %c0_30] : memref<30x40xbf16, #tpu.memory_space<vmem>>, vector<30x40xbf16>
    %cst_31 = arith.constant dense<0.000000e+00> : vector<144x40xf32>
    %67 = tpu.matmul %65, %66, %cst_31 {dimension_numbers = #tpu.dot_dimension_numbers<[1], [0], [0], [1], [0, 0, 1, 1], [], []>} : vector<144x30xbf16>, vector<30x40xbf16>, vector<144x40xf32> -> vector<144x40xf32>
    %c0_32 = arith.constant 0 : index
    %c0_33 = arith.constant 0 : index
    %68 = vector.load %arg10[%c0_32, %c0_33] : memref<1x40xf32, #tpu.memory_space<vmem>>, vector<1x40xf32>
    %69 = vector.broadcast %68 : vector<1x40xf32> to vector<144x40xf32>
    %70 = arith.addf %67, %69 : vector<144x40xf32>
    %cst_34 = arith.constant 0.000000e+00 : f32
    %71 = vector.broadcast %cst_34 : f32 to vector<144x40xf32>
    %72 = arith.maximumf %70, %71 : vector<144x40xf32>
    %c143_i32_35 = arith.constant 143 : i32
    %73 = tpu.dynamic_rotate %72 by %c143_i32_35 dim 0 : vector<144x40xf32>, i32 -> vector<144x40xf32>
    %c142_i32_36 = arith.constant 142 : i32
    %74 = tpu.dynamic_rotate %72 by %c142_i32_36 dim 0 : vector<144x40xf32>, i32 -> vector<144x40xf32>
    %75 = tpu.concatenate %72, %73, %74 in 1 : vector<144x40xf32>, vector<144x40xf32>, vector<144x40xf32> -> vector<144x120xf32>
    %76 = arith.truncf %75 : vector<144x120xf32> to vector<144x120xbf16>
    %c0_37 = arith.constant 0 : index
    %c0_38 = arith.constant 0 : index
    %77 = vector.load %arg11[%c0_37, %c0_38] : memref<120x40xbf16, #tpu.memory_space<vmem>>, vector<120x40xbf16>
    %cst_39 = arith.constant dense<0.000000e+00> : vector<144x40xf32>
    %78 = tpu.matmul %76, %77, %cst_39 {dimension_numbers = #tpu.dot_dimension_numbers<[1], [0], [0], [1], [0, 0, 1, 1], [], []>} : vector<144x120xbf16>, vector<120x40xbf16>, vector<144x40xf32> -> vector<144x40xf32>
    %c0_40 = arith.constant 0 : index
    %c0_41 = arith.constant 0 : index
    %79 = vector.load %arg12[%c0_40, %c0_41] : memref<1x40xf32, #tpu.memory_space<vmem>>, vector<1x40xf32>
    %80 = vector.broadcast %79 : vector<1x40xf32> to vector<144x40xf32>
    %81 = arith.addf %78, %80 : vector<144x40xf32>
    %c143_i32_42 = arith.constant 143 : i32
    %82 = tpu.dynamic_rotate %81 by %c143_i32_42 dim 0 : vector<144x40xf32>, i32 -> vector<144x40xf32>
    %83 = arith.maximumf %81, %82 : vector<144x40xf32>
    %cst_43 = arith.constant 0.000000e+00 : f32
    %84 = vector.broadcast %cst_43 : f32 to vector<144x40xf32>
    %85 = arith.maximumf %83, %84 : vector<144x40xf32>
    %c143_i32_44 = arith.constant 143 : i32
    %86 = tpu.dynamic_rotate %85 by %c143_i32_44 dim 0 : vector<144x40xf32>, i32 -> vector<144x40xf32>
    %c142_i32_45 = arith.constant 142 : i32
    %87 = tpu.dynamic_rotate %85 by %c142_i32_45 dim 0 : vector<144x40xf32>, i32 -> vector<144x40xf32>
    %c141_i32_46 = arith.constant 141 : i32
    %88 = tpu.dynamic_rotate %85 by %c141_i32_46 dim 0 : vector<144x40xf32>, i32 -> vector<144x40xf32>
    %c140_i32_47 = arith.constant 140 : i32
    %89 = tpu.dynamic_rotate %85 by %c140_i32_47 dim 0 : vector<144x40xf32>, i32 -> vector<144x40xf32>
    %c139_i32_48 = arith.constant 139 : i32
    %90 = tpu.dynamic_rotate %85 by %c139_i32_48 dim 0 : vector<144x40xf32>, i32 -> vector<144x40xf32>
    %c138_i32_49 = arith.constant 138 : i32
    %91 = tpu.dynamic_rotate %85 by %c138_i32_49 dim 0 : vector<144x40xf32>, i32 -> vector<144x40xf32>
    %c137_i32_50 = arith.constant 137 : i32
    %92 = tpu.dynamic_rotate %85 by %c137_i32_50 dim 0 : vector<144x40xf32>, i32 -> vector<144x40xf32>
    %c136_i32_51 = arith.constant 136 : i32
    %93 = tpu.dynamic_rotate %85 by %c136_i32_51 dim 0 : vector<144x40xf32>, i32 -> vector<144x40xf32>
    %c135_i32 = arith.constant 135 : i32
    %94 = tpu.dynamic_rotate %85 by %c135_i32 dim 0 : vector<144x40xf32>, i32 -> vector<144x40xf32>
    %95 = tpu.concatenate %85, %86, %87, %88, %89, %90, %91, %92, %93, %94 in 1 : vector<144x40xf32>, vector<144x40xf32>, vector<144x40xf32>, vector<144x40xf32>, vector<144x40xf32>, vector<144x40xf32>, vector<144x40xf32>, vector<144x40xf32>, vector<144x40xf32>, vector<144x40xf32> -> vector<144x400xf32>
    %96 = arith.truncf %95 : vector<144x400xf32> to vector<144x400xbf16>
    %c0_52 = arith.constant 0 : index
    %c0_53 = arith.constant 0 : index
    %97 = vector.load %arg13[%c0_52, %c0_53] : memref<400x80xbf16, #tpu.memory_space<vmem>>, vector<400x80xbf16>
    %cst_54 = arith.constant dense<0.000000e+00> : vector<144x80xf32>
    %98 = tpu.matmul %96, %97, %cst_54 {dimension_numbers = #tpu.dot_dimension_numbers<[1], [0], [0], [1], [0, 0, 1, 1], [], []>} : vector<144x400xbf16>, vector<400x80xbf16>, vector<144x80xf32> -> vector<144x80xf32>
    %c0_55 = arith.constant 0 : index
    %c0_56 = arith.constant 0 : index
    %99 = vector.load %arg14[%c0_55, %c0_56] : memref<1x80xf32, #tpu.memory_space<vmem>>, vector<1x80xf32>
    %100 = vector.broadcast %99 : vector<1x80xf32> to vector<144x80xf32>
    %101 = arith.addf %98, %100 : vector<144x80xf32>
    %cst_57 = arith.constant 0.000000e+00 : f32
    %102 = vector.broadcast %cst_57 : f32 to vector<144x80xf32>
    %103 = arith.maximumf %101, %102 : vector<144x80xf32>
    %104 = arith.truncf %103 : vector<144x80xf32> to vector<144x80xbf16>
    %c0_58 = arith.constant 0 : index
    %c0_59 = arith.constant 0 : index
    %105 = vector.load %arg15[%c0_58, %c0_59] : memref<80x80xbf16, #tpu.memory_space<vmem>>, vector<80x80xbf16>
    %cst_60 = arith.constant dense<0.000000e+00> : vector<144x80xf32>
    %106 = tpu.matmul %104, %105, %cst_60 {dimension_numbers = #tpu.dot_dimension_numbers<[1], [0], [0], [1], [0, 0, 1, 1], [], []>} : vector<144x80xbf16>, vector<80x80xbf16>, vector<144x80xf32> -> vector<144x80xf32>
    %c0_61 = arith.constant 0 : index
    %c0_62 = arith.constant 0 : index
    %107 = vector.load %arg16[%c0_61, %c0_62] : memref<1x80xf32, #tpu.memory_space<vmem>>, vector<1x80xf32>
    %108 = vector.broadcast %107 : vector<1x80xf32> to vector<144x80xf32>
    %109 = arith.addf %106, %108 : vector<144x80xf32>
    %c143_i32_63 = arith.constant 143 : i32
    %110 = tpu.dynamic_rotate %109 by %c143_i32_63 dim 0 : vector<144x80xf32>, i32 -> vector<144x80xf32>
    %111 = arith.maximumf %109, %110 : vector<144x80xf32>
    %cst_64 = arith.constant 0.000000e+00 : f32
    %112 = vector.broadcast %cst_64 : f32 to vector<144x80xf32>
    %113 = arith.maximumf %111, %112 : vector<144x80xf32>
    %114 = arith.truncf %113 : vector<144x80xf32> to vector<144x80xbf16>
    %c0_65 = arith.constant 0 : index
    %c0_66 = arith.constant 0 : index
    %115 = vector.load %arg17[%c0_65, %c0_66] : memref<80x80xbf16, #tpu.memory_space<vmem>>, vector<80x80xbf16>
    %cst_67 = arith.constant dense<0.000000e+00> : vector<144x80xf32>
    %116 = tpu.matmul %114, %115, %cst_67 {dimension_numbers = #tpu.dot_dimension_numbers<[1], [0], [0], [1], [0, 0, 1, 1], [], []>} : vector<144x80xbf16>, vector<80x80xbf16>, vector<144x80xf32> -> vector<144x80xf32>
    %c0_68 = arith.constant 0 : index
    %c0_69 = arith.constant 0 : index
    %117 = vector.load %arg18[%c0_68, %c0_69] : memref<1x80xf32, #tpu.memory_space<vmem>>, vector<1x80xf32>
    %118 = vector.broadcast %117 : vector<1x80xf32> to vector<144x80xf32>
    %119 = arith.addf %116, %118 : vector<144x80xf32>
    %120 = arith.truncf %119 : vector<144x80xf32> to vector<144x80xbf16>
    %c0_70 = arith.constant 0 : index
    %c0_71 = arith.constant 0 : index
    %121 = vector.load %arg19[%c0_70, %c0_71] : memref<80x1xbf16, #tpu.memory_space<vmem>>, vector<80x1xbf16>
    %cst_72 = arith.constant dense<0.000000e+00> : vector<144x1xf32>
    %122 = tpu.matmul %120, %121, %cst_72 {dimension_numbers = #tpu.dot_dimension_numbers<[1], [0], [0], [1], [0, 0, 1, 1], [], []>} : vector<144x80xbf16>, vector<80x1xbf16>, vector<144x1xf32> -> vector<144x1xf32>
    %c0_73 = arith.constant 0 : index
    %c0_74 = arith.constant 0 : index
    %123 = vector.load %arg20[%c0_73, %c0_74] : memref<1x1xf32, #tpu.memory_space<vmem>>, vector<1x1xf32>
    %124 = vector.broadcast %123 : vector<1x1xf32> to vector<144x1xf32>
    %125 = arith.addf %122, %124 : vector<144x1xf32>
    %c0_75 = arith.constant 0 : index
    %c0_76 = arith.constant 0 : index
    %126 = vector.load %arg2[%c0_75, %c0_76] : memref<144x3xf32, #tpu.memory_space<vmem>>, vector<144x3xf32>
    %127 = vector.broadcast %125 : vector<144x1xf32> to vector<144x3xf32>
    %128 = arith.addf %127, %126 : vector<144x3xf32>
    %cst_77 = arith.constant dense<0xFF800000> : vector<3xf32>
    %129 = vector.multi_reduction <maximumf>, %128, %cst_77 [0] : vector<144x3xf32> to vector<3xf32>
    %130 = vector.shape_cast %129 : vector<3xf32> to vector<1x3xf32>
    %131 = vector.broadcast %130 : vector<1x3xf32> to vector<144x3xf32>
    %132 = arith.subf %128, %131 : vector<144x3xf32>
    %133 = math.exp %132 : vector<144x3xf32>
    %cst_78 = arith.constant dense<0.000000e+00> : vector<3xf32>
    %134 = vector.multi_reduction <add>, %133, %cst_78 [0] : vector<144x3xf32> to vector<3xf32>
    %135 = vector.shape_cast %134 : vector<3xf32> to vector<1x3xf32>
    %136 = tpu.reciprocal %135 {approx = true} : vector<1x3xf32> -> vector<1x3xf32>
    %137 = vector.broadcast %136 : vector<1x3xf32> to vector<144x3xf32>
    %138 = arith.mulf %133, %137 : vector<144x3xf32>
    %139 = arith.truncf %138 : vector<144x3xf32> to vector<144x3xbf16>
    %cst_79 = arith.constant dense<0.000000e+00> : vector<3x80xf32>
    %140 = tpu.matmul %139, %120, %cst_79 {dimension_numbers = #tpu.dot_dimension_numbers<[0], [0], [1], [1], [0, 1, 1, 1], [], []>} : vector<144x3xbf16>, vector<144x80xbf16>, vector<3x80xf32> -> vector<3x80xf32>
    %141 = arith.truncf %140 : vector<3x80xf32> to vector<3x80xbf16>
    %c0_80 = arith.constant 0 : index
    %c0_81 = arith.constant 0 : index
    %142 = vector.load %arg21[%c0_80, %c0_81] : memref<80x30xbf16, #tpu.memory_space<vmem>>, vector<80x30xbf16>
    %cst_82 = arith.constant dense<0.000000e+00> : vector<3x30xf32>
    %143 = tpu.matmul %141, %142, %cst_82 {dimension_numbers = #tpu.dot_dimension_numbers<[1], [0], [0], [1], [0, 0, 1, 1], [], []>} : vector<3x80xbf16>, vector<80x30xbf16>, vector<3x30xf32> -> vector<3x30xf32>
    %c0_83 = arith.constant 0 : index
    %c0_84 = arith.constant 0 : index
    %144 = vector.load %arg22[%c0_83, %c0_84] : memref<1x30xf32, #tpu.memory_space<vmem>>, vector<1x30xf32>
    %145 = vector.broadcast %144 : vector<1x30xf32> to vector<3x30xf32>
    %146 = arith.addf %143, %145 : vector<3x30xf32>
    %cst_85 = arith.constant 0.000000e+00 : f32
    %147 = vector.broadcast %cst_85 : f32 to vector<3x30xf32>
    %148 = arith.maximumf %146, %147 : vector<3x30xf32>
    %149 = arith.truncf %148 : vector<3x30xf32> to vector<3x30xbf16>
    %c0_86 = arith.constant 0 : index
    %c0_87 = arith.constant 0 : index
    %150 = vector.load %arg23[%c0_86, %c0_87] : memref<30x4xbf16, #tpu.memory_space<vmem>>, vector<30x4xbf16>
    %cst_88 = arith.constant dense<0.000000e+00> : vector<3x4xf32>
    %151 = tpu.matmul %149, %150, %cst_88 {dimension_numbers = #tpu.dot_dimension_numbers<[1], [0], [0], [1], [0, 0, 1, 1], [], []>} : vector<3x30xbf16>, vector<30x4xbf16>, vector<3x4xf32> -> vector<3x4xf32>
    %c0_89 = arith.constant 0 : index
    %c0_90 = arith.constant 0 : index
    %152 = vector.load %arg24[%c0_89, %c0_90] : memref<1x4xf32, #tpu.memory_space<vmem>>, vector<1x4xf32>
    %153 = vector.broadcast %152 : vector<1x4xf32> to vector<3x4xf32>
    %154 = arith.addf %151, %153 : vector<3x4xf32>
    %c0_91 = arith.constant 0 : index
    %c0_92 = arith.constant 0 : index
    %c0_93 = arith.constant 0 : index
    %155 = vector.load %arg25[%c0_91, %c0_92, %c0_93] : memref<1x3x4xf32, #tpu.memory_space<vmem>>, vector<1x3x4xf32>
    %156 = vector.shape_cast %155 : vector<1x3x4xf32> to vector<3x4xf32>
    %157 = vector.shape_cast %154 : vector<3x4xf32> to vector<1x3x4xf32>
    tpu.vector_store %arg25[%c0_91, %c0_92, %c0_93], %157 {strides = array<i32>} : memref<1x3x4xf32, #tpu.memory_space<vmem>>, vector<1x3x4xf32>,
    return
  }
  func.func @transform_0(%arg0: i32) -> (i32, i32, i32) {
    %c0_i32 = arith.constant 0 : i32
    %c0_i32_0 = arith.constant 0 : i32
    %c0_i32_1 = arith.constant 0 : i32
    return %arg0, %c0_i32, %c0_i32_0 : i32, i32, i32
  }
  func.func @transform_1(%arg0: i32) -> (i32, i32) {
    %c0_i32 = arith.constant 0 : i32
    %c0_i32_0 = arith.constant 0 : i32
    %c0_i32_1 = arith.constant 0 : i32
    return %c0_i32, %c0_i32_0 : i32, i32
  }
  func.func @transform_2(%arg0: i32) -> (i32, i32) {
    %c0_i32 = arith.constant 0 : i32
    %c0_i32_0 = arith.constant 0 : i32
    %c0_i32_1 = arith.constant 0 : i32
    return %c0_i32, %c0_i32_0 : i32, i32
  }
  func.func @transform_3(%arg0: i32) -> (i32, i32) {
    %c0_i32 = arith.constant 0 : i32
    %c0_i32_0 = arith.constant 0 : i32
    %c0_i32_1 = arith.constant 0 : i32
    return %c0_i32, %c0_i32_0 : i32, i32
  }
  func.func @transform_4(%arg0: i32) -> (i32, i32) {
    %c0_i32 = arith.constant 0 : i32
    %c0_i32_0 = arith.constant 0 : i32
    %c0_i32_1 = arith.constant 0 : i32
    return %c0_i32, %c0_i32_0 : i32, i32
  }
  func.func @transform_5(%arg0: i32) -> (i32, i32) {
    %c0_i32 = arith.constant 0 : i32
    %c0_i32_0 = arith.constant 0 : i32
    %c0_i32_1 = arith.constant 0 : i32
    return %c0_i32, %c0_i32_0 : i32, i32
  }
  func.func @transform_6(%arg0: i32) -> (i32, i32) {
    %c0_i32 = arith.constant 0 : i32
    %c0_i32_0 = arith.constant 0 : i32
    %c0_i32_1 = arith.constant 0 : i32
    return %c0_i32, %c0_i32_0 : i32, i32
  }
  func.func @transform_7(%arg0: i32) -> (i32, i32) {
    %c0_i32 = arith.constant 0 : i32
    %c0_i32_0 = arith.constant 0 : i32
    %c0_i32_1 = arith.constant 0 : i32
    return %c0_i32, %c0_i32_0 : i32, i32
  }
  func.func @transform_8(%arg0: i32) -> (i32, i32) {
    %c0_i32 = arith.constant 0 : i32
    %c0_i32_0 = arith.constant 0 : i32
    %c0_i32_1 = arith.constant 0 : i32
    return %c0_i32, %c0_i32_0 : i32, i32
  }
  func.func @transform_9(%arg0: i32) -> (i32, i32) {
    %c0_i32 = arith.constant 0 : i32
    %c0_i32_0 = arith.constant 0 : i32
    %c0_i32_1 = arith.constant 0 : i32
    return %c0_i32, %c0_i32_0 : i32, i32
  }
  func.func @transform_10(%arg0: i32) -> (i32, i32) {
    %c0_i32 = arith.constant 0 : i32
    %c0_i32_0 = arith.constant 0 : i32
    %c0_i32_1 = arith.constant 0 : i32
    return %c0_i32, %c0_i32_0 : i32, i32
  }
  func.func @transform_11(%arg0: i32) -> (i32, i32) {
    %c0_i32 = arith.constant 0 : i32
    %c0_i32_0 = arith.constant 0 : i32
    %c0_i32_1 = arith.constant 0 : i32
    return %c0_i32, %c0_i32_0 : i32, i32
  }
  func.func @transform_12(%arg0: i32) -> (i32, i32) {
    %c0_i32 = arith.constant 0 : i32
    %c0_i32_0 = arith.constant 0 : i32
    %c0_i32_1 = arith.constant 0 : i32
    return %c0_i32, %c0_i32_0 : i32, i32
  }
  func.func @transform_13(%arg0: i32) -> (i32, i32) {
    %c0_i32 = arith.constant 0 : i32
    %c0_i32_0 = arith.constant 0 : i32
    %c0_i32_1 = arith.constant 0 : i32
    return %c0_i32, %c0_i32_0 : i32, i32
  }
  func.func @transform_14(%arg0: i32) -> (i32, i32) {
    %c0_i32 = arith.constant 0 : i32
    %c0_i32_0 = arith.constant 0 : i32
    %c0_i32_1 = arith.constant 0 : i32
    return %c0_i32, %c0_i32_0 : i32, i32
  }
  func.func @transform_15(%arg0: i32) -> (i32, i32) {
    %c0_i32 = arith.constant 0 : i32
    %c0_i32_0 = arith.constant 0 : i32
    %c0_i32_1 = arith.constant 0 : i32
    return %c0_i32, %c0_i32_0 : i32, i32
  }
  func.func @transform_16(%arg0: i32) -> (i32, i32) {
    %c0_i32 = arith.constant 0 : i32
    %c0_i32_0 = arith.constant 0 : i32
    %c0_i32_1 = arith.constant 0 : i32
    return %c0_i32, %c0_i32_0 : i32, i32
  }
  func.func @transform_17(%arg0: i32) -> (i32, i32) {
    %c0_i32 = arith.constant 0 : i32
    %c0_i32_0 = arith.constant 0 : i32
    %c0_i32_1 = arith.constant 0 : i32
    return %c0_i32, %c0_i32_0 : i32, i32
  }
  func.func @transform_18(%arg0: i32) -> (i32, i32) {
    %c0_i32 = arith.constant 0 : i32
    %c0_i32_0 = arith.constant 0 : i32
    %c0_i32_1 = arith.constant 0 : i32
    return %c0_i32, %c0_i32_0 : i32, i32
  }
  func.func @transform_19(%arg0: i32) -> (i32, i32) {
    %c0_i32 = arith.constant 0 : i32
    %c0_i32_0 = arith.constant 0 : i32
    %c0_i32_1 = arith.constant 0 : i32
    return %c0_i32, %c0_i32_0 : i32, i32
  }
  func.func @transform_20(%arg0: i32) -> (i32, i32) {
    %c0_i32 = arith.constant 0 : i32
    %c0_i32_0 = arith.constant 0 : i32
    %c0_i32_1 = arith.constant 0 : i32
    return %c0_i32, %c0_i32_0 : i32, i32
  }
  func.func @transform_21(%arg0: i32) -> (i32, i32) {
    %c0_i32 = arith.constant 0 : i32
    %c0_i32_0 = arith.constant 0 : i32
    %c0_i32_1 = arith.constant 0 : i32
    return %c0_i32, %c0_i32_0 : i32, i32
  }
  func.func @transform_22(%arg0: i32) -> (i32, i32) {
    %c0_i32 = arith.constant 0 : i32
    %c0_i32_0 = arith.constant 0 : i32
    %c0_i32_1 = arith.constant 0 : i32
    return %c0_i32, %c0_i32_0 : i32, i32
  }
  func.func @transform_23(%arg0: i32) -> (i32, i32) {
    %c0_i32 = arith.constant 0 : i32
    %c0_i32_0 = arith.constant 0 : i32
    %c0_i32_1 = arith.constant 0 : i32
    return %c0_i32, %c0_i32_0 : i32, i32
  }
  func.func @transform_24(%arg0: i32) -> (i32, i32, i32) {
    %c0_i32 = arith.constant 0 : i32
    %c0_i32_0 = arith.constant 0 : i32
    %c0_i32_1 = arith.constant 0 : i32
    return %arg0, %c0_i32, %c0_i32_0 : i32, i32, i32
  }
}

</mosaic_0001>

<bundles_post_ra>
// kernel: tpu_custom_call.1
= control target key start
LH: loop header
LB: loop body
LE: loop exit
PB: predicated region body
PF: predicated region fallthrough
CT: control target
= control target key end

     0   :  { %s8791_s27 = smov 0   ;;  %s13384_s0 = inlined_call_operand.vmem [shape: bf16[2,144,128], index: 0, kind: input, shape index: {}]   ;;  %s13385_s1 = inlined_call_operand.vmem [shape: f32[144,3], index: 1, kind: input, shape index: {}]   ;;  %s13386_s2 = inlined_call_operand.vmem [shape: bf16[128,90], index: 2, kind: input, shape index: {}]   ;;  %s13387_s3 = inlined_call_operand.vmem [shape: f32[1,10], index: 3, kind: input, shape index: {}]   ;;  %s13388_s4 = inlined_call_operand.vmem [shape: bf16[50,10], index: 4, kind: input, shape index: {}]   ;;  %s13389_s5 = inlined_call_operand.vmem [shape: f32[1,10], index: 5, kind: input, shape index: {}]   ;;  %s13390_s6 = inlined_call_operand.vmem [shape: bf16[30,10], index: 6, kind: input, shape index: {}]   ;;  %s13391_s7 = inlined_call_operand.vmem [shape: f32[1,10], index: 7, kind: input, shape index: {}]   ;;  %s13392_s8 = inlined_call_operand.vmem [shape: bf16[30,40], index: 8, kind: input, shape index: {}]   ;;  %s13393_s9 = inlined_call_operand.vmem [shape: f32[1,40], index: 9, kind: input, shape index: {}]   ;;  %s13394_s10 = inlined_call_operand.vmem [shape: bf16[120,40], index: 10, kind: input, shape index: {}]   ;;  %s13395_s11 = inlined_call_operand.vmem [shape: f32[1,40], index: 11, kind: input, shape index: {}]   ;;  %s13396_s12 = inlined_call_operand.vmem [shape: bf16[400,80], index: 12, kind: input, shape index: {}]   ;;  %s13397_s13 = inlined_call_operand.vmem [shape: f32[1,80], index: 13, kind: input, shape index: {}]   ;;  %s13398_s14 = inlined_call_operand.vmem [shape: bf16[80,80], index: 14, kind: input, shape index: {}]   ;;  %s13399_s15 = inlined_call_operand.vmem [shape: f32[1,80], index: 15, kind: input, shape index: {}]   ;;  %s13400_s16 = inlined_call_operand.vmem [shape: bf16[80,80], index: 16, kind: input, shape index: {}]   ;;  %s13401_s17 = inlined_call_operand.vmem [shape: f32[1,80], index: 17, kind: input, shape index: {}]   ;;  %s13402_s18 = inlined_call_operand.vmem [shape: bf16[80,1], index: 18, kind: input, shape index: {}]   ;;  %s13403_s19 = inlined_call_operand.<no memory space> [shape: f32[1,1], index: 19, kind: input, shape index: {}]   ;;  %s13404_s20 = inlined_call_operand.vmem [shape: bf16[80,30], index: 20, kind: input, shape index: {}]   ;;  %s13405_s21 = inlined_call_operand.vmem [shape: f32[1,30], index: 21, kind: input, shape index: {}]   ;;  %s13406_s22 = inlined_call_operand.vmem [shape: bf16[30,4], index: 22, kind: input, shape index: {}]   ;;  %s13407_s23 = inlined_call_operand.vmem [shape: f32[1,4], index: 23, kind: input, shape index: {}]   ;;  %s13408_s24 = inlined_call_operand.vmem [shape: f32[2,3,4], index: 24, kind: output, shape index: {}]  }
   0x1   :  { %13486 = sst [smem:[#allocation32_spill]] %s13384_s0  ;;  %v29_v0 = vstv %s13403_s19 }
   0x2   :  { %13487 = sst [smem:[#allocation33_spill]] %s13385_s1  ;;  %30 = vst [vmem:[#allocation2] sm:$0x1] %v29_v0 }
   0x3   :  { %13488 = sst [smem:[#allocation34_spill]] %s13386_s2 }
   0x4   :  { %13489 = sst [smem:[#allocation35_spill]] %s13387_s3 }
   0x5   :  { %13490 = sst [smem:[#allocation36_spill]] %s13388_s4 }
   0x6   :  { %13491 = sst [smem:[#allocation37_spill]] %s13389_s5 }
   0x7   :  { %13492 = sst [smem:[#allocation38_spill]] %s13390_s6 }
   0x8   :  { %13493 = sst [smem:[#allocation39_spill]] %s13391_s7 }
   0x9   :  { %13494 = sst [smem:[#allocation40_spill]] %s13392_s8 }
   0xa   :  { %13495 = sst [smem:[#allocation41_spill]] %s13393_s9 }
   0xb LB: > { %s6871_s28 = sadd.s32 4294967295, %s8638_s27   ;;  %p6875_p0 = scmp.ge.s32.totalorder %s8638_s27, 1  ;;  %s8638_s27 = sphi %s8791_s27, %s36_s27  }
   0xc   : > { %p664_p1 = scmp.lt.s32.totalorder %s8638_s27, 3 }
   0xe   : > { %p665_p2 = pnand %p6875_p0, %p664_p1 }
  0x10   : > { %668 = sbr.rel (%p665_p2) target bundleno = 4166 (0x1046), region = 116 }
  0x17   : > { %s13496_s29 = sld [smem:[#allocation34_spill]]  ;;  %v13415_v2 = vmov 0.0   ;;  %vm13479_vm0 = vmmov 0   ;;  %p729_p3 = scmp.lt.s32.totalorder %s6871_s28, 1  ;;  %vm2458_vm8 = vcmask 1040384   ;;  %vm2310_vm9 = vcmask 80896  }
  0x18   : > { %7236 = vmatprep.subr.bf16.mxu0 %v13415_v2  ;;  %7288 = vmatprep.subr.bf16.mxu1 %v13415_v2  ;;  %s13497_s4 = sld [smem:[#allocation32_spill]]  ;;  %s8642_s8 = smov 118   ;;  %vm2329_vm10 = vcmask 162816   ;;  %vm13472_vm11 = vcmask 244736   ;;  %vm2367_vm12 = vcmask 326656   ;;  %vm2430_vm13 = vcmask 408576  }
  0x19   : > { %7252 = vmatprep.mubr.msk.bf16.mxu0 %vm13479_vm0, %v13415_v2  ;;  %7296 = vmatprep.mubr.msk.bf16.mxu1 %vm13479_vm0, %v13415_v2  ;;  %s13690_s28 = smov (!%p729_p3, %s6871_s28), 1  ;;  %s8645_s5 = smov 88   ;;  %vm13477_vm14 = vcmask 1046528   ;;  %vm3923_vm15 = vcmask 1043456  }
  0x1a   : > { %s7624_s3 = smul.u32 72, %s13690_s28  ;;  %s8646_s26 = smov 78  }
  0x1b   : > { %s8647_s6 = smov 68   ;;  %s8648_s2 = smov 58  }
  0x1c   : > { %s8649_s19 = smov 48   ;;  %s13532_s30 = sld [smem:[#allocation35_spill]] }
  0x1d   : > { %v8513_v1 = vld [vmem:[%s13496_s29] sm:$0xff]   ;;  %v8514_v3 = vld [vmem:[%s13496_s29 + $0x8] sm:$0xff]   ;;  %v8515_v4 = vld [vmem:[%s13496_s29 + $0x10] sm:$0xff]   ;;  %s8651_s0 = smov 20   ;;  %s8652_s7 = smov 30  }
  0x1e   : > { %7237 = vmatpush3.bf16.msra.mxu0 %v8513_v1  ;;  %s8822_s1 = scalar_lea.vmem %s13497_s4, %s7624_s3  ;;  %v8516_v5 = vld [vmem:[%s13496_s29 + $0x18] sm:$0xff]   ;;  %v8517_v6 = vld [vmem:[%s13496_s29 + $0x20] sm:$0xff]   ;;  %v8518_v7 = vld [vmem:[%s13496_s29 + $0x28] sm:$0xff]   ;;  %s8643_s4 = smov 108  }
  0x1f   : > { %7238 = vmatprep.subr.bf16.mxu0 %v13415_v2  ;;  %v8519_v8 = vld [vmem:[%s13496_s29 + $0x30] sm:$0xff]   ;;  %v8520_v9 = vld [vmem:[%s13496_s29 + $0x38] sm:$0xff]   ;;  %v8521_v10 = vld [vmem:[%s8822_s1] sm:$0xff]   ;;  %s8653_s3 = smov 40   ;;  %s13624_s25 = sld [smem:[#allocation39_spill]] }
  0x20   : > { %v8522_v11 = vld [vmem:[%s8822_s1 + $0x8] sm:$0xff]   ;;  %v8523_v12 = vld [vmem:[%s8822_s1 + $0x10] sm:$0xff]   ;;  %v8524_v13 = vld [vmem:[%s8822_s1 + $0x18] sm:$0xff]   ;;  %s13625_s9 = sld [smem:[#allocation41_spill]] }
  0x21   : > { %v8525_v14 = vld [vmem:[%s8822_s1 + $0x20] sm:$0xff]   ;;  %v8526_v15 = vld [vmem:[%s8822_s1 + $0x28] sm:$0xff]   ;;  %v8527_v16 = vld [vmem:[%s8822_s1 + $0x30] sm:$0xff]  }
  0x22   : > { %7239 = vmatpush3.bf16.msra.mxu0 %v8514_v3  ;;  %v8528_v17 = vld [vmem:[%s8822_s1 + $0x38] sm:$0xff]   ;;  %v8529_v18 = vld [vmem:[%s8822_s1 + $0x40] sm:$0xff]   ;;  %s8644_s1 = smov 98  }
  0x23   : > { %7240 = vmatprep.subr.bf16.mxu0 %v13415_v2 }
  0x26   : > { %7241 = vmatpush3.bf16.msra.mxu0 %v8515_v4 }
  0x27   : > { %7242 = vmatprep.subr.bf16.mxu0 %v13415_v2 }
  0x2a   : > { %7243 = vmatpush3.bf16.msra.mxu0 %v8516_v5 }
  0x2b   : > { %7244 = vmatprep.subr.bf16.mxu0 %v13415_v2 }
  0x2e   : > { %7245 = vmatpush3.bf16.msra.mxu0 %v8517_v6 }
  0x2f   : > { %7246 = vmatprep.subr.bf16.mxu0 %v13415_v2 }
  0x32   : > { %7247 = vmatpush3.bf16.msra.mxu0 %v8518_v7 }
  0x33   : > { %7248 = vmatprep.subr.bf16.mxu0 %v13415_v2 }
  0x36   : > { %7249 = vmatpush3.bf16.msra.mxu0 %v8519_v8 }
  0x37   : > { %7250 = vmatprep.subr.bf16.mxu0 %v13415_v2 }
  0x3a   : > { %7251 = vmatpush3.bf16.msra.mxu0 %v8520_v9 }
  0x3b   : > { %7372 = vmatprep.subr.bf16.mxu0 %v13415_v2 }
  0x3d   : > { %7253 = vmatmul.mubr.bf16.vlgmr.msra.gmra.mrb[0].mxu0 %v8521_v10 }
  0x3e   : > { %7256 = vmatprep.mubr.msk.bf16.mxu0 %vm13479_vm0, %v13415_v2 }
  0x45   : > { %7257 = vmatmul.mubr.bf16.gmra.mrb[4].mxu0 %v8522_v11 }
  0x46   : > { %7260 = vmatprep.mubr.msk.bf16.mxu0 %vm13479_vm0, %v13415_v2 }
  0x4d   : > { %7261 = vmatmul.mubr.bf16.gmra.mrb[8].mxu0 %v8523_v12 }
  0x4e   : > { %7264 = vmatprep.mubr.msk.bf16.mxu0 %vm13479_vm0, %v13415_v2 }
  0x55   : > { %7265 = vmatmul.mubr.bf16.gmra.mrb[12].mxu0 %v8524_v13 }
  0x56   : > { %7268 = vmatprep.mubr.msk.bf16.mxu0 %vm13479_vm0, %v13415_v2 }
  0x5d   : > { %7269 = vmatmul.mubr.bf16.gmra.mrb[16].mxu0 %v8525_v14 }
  0x5e   : > { %7272 = vmatprep.mubr.msk.bf16.mxu0 %vm13479_vm0, %v13415_v2 }
  0x65   : > { %7273 = vmatmul.mubr.bf16.gmra.mrb[20].mxu0 %v8526_v15 }
  0x66   : > { %7276 = vmatprep.mubr.msk.bf16.mxu0 %vm13479_vm0, %v13415_v2 }
  0x6d   : > { %7277 = vmatmul.mubr.bf16.gmra.mrb[24].mxu0 %v8527_v16 }
  0x6e   : > { %7280 = vmatprep.mubr.msk.bf16.mxu0 %vm13479_vm0, %v13415_v2 }
  0x75   : > { %7281 = vmatmul.mubr.bf16.gmra.mrb[28].mxu0 %v8528_v17 }
  0x76   : > { %7284 = vmatprep.mubr.msk.bf16.mxu0 %vm13479_vm0, %v13415_v2 }
  0x7d   : > { %7285 = vmatmul.mubr.bf16.gmra.mrb[32].mxu0 %v8529_v18 }
  0x7e   : > { %7376 = vmatprep.mubr.msk.bf16.mxu0 %vm13479_vm0, %v13415_v2 }
 0x110   : > { %v8872_v19 = vpop.f32.mrb[0].mxu0 }
 0x111   : > { %13498 = vst [vmem:[#allocation3_spill] sm:$0xff] %v8872_v19  ;;  %998 = vrot.lane.b32.xlu0 %v8872_v19, %s8642_s8  ;;  %v7254_v20 = vpop.f32.mrb[1].mxu0 }
 0x112   : > { %v8876_v21 = vpop.f32.mrb[2].mxu0 }
 0x113   : > { %1111 = vrot.lane.b32.xlu1 %v8876_v21, %s8643_s4  ;;  %v7255_v22 = vpop.f32.mrb[3].mxu0 }
 0x115   : > { %1109 = vrot.lane.b32.xlu0 %v8872_v19, %s8643_s4 }
 0x117   : > { %1220 = vrot.lane.b32.xlu1 %v8876_v21, %s8644_s1 }
 0x118   : > { %v8884_v23 = vpop.f32.mrb[4].mxu0 }
 0x119   : > { %1218 = vrot.lane.b32.xlu0 %v8872_v19, %s8644_s1  ;;  %v7258_v24 = vpop.f32.mrb[5].mxu0 }
 0x11a   : > { %v8888_v25 = vpop.f32.mrb[6].mxu0 }
 0x11b   : > { %1329 = vrot.lane.b32.xlu1 %v8876_v21, %s8645_s5  ;;  %v7259_v26 = vpop.f32.mrb[7].mxu0 }
 0x11d   : > { %1327 = vrot.lane.b32.xlu0 %v8872_v19, %s8645_s5 }
 0x11f   : > { %1438 = vrot.lane.b32.xlu1 %v8876_v21, %s8646_s26 }
 0x120   : > { %v8896_v27 = vpop.f32.mrb[8].mxu0 }
 0x121   : > { %1436 = vrot.lane.b32.xlu0 %v8872_v19, %s8646_s26  ;;  %v7262_v28 = vpop.f32.mrb[9].mxu0 }
 0x122   : > { %v8900_v29 = vpop.f32.mrb[10].mxu0 }
 0x123   : > { %13499 = vst [vmem:[#allocation4_spill] sm:$0xff] %v8900_v29  ;;  %1547 = vrot.lane.b32.xlu1 %v8876_v21, %s8647_s6  ;;  %v7263_v30 = vpop.f32.mrb[11].mxu0 }
 0x125   : > { %1545 = vrot.lane.b32.xlu0 %v8872_v19, %s8647_s6 }
 0x127   : > { %1656 = vrot.lane.b32.xlu1 %v8876_v21, %s8648_s2 }
 0x128   : > { %v8908_v31 = vpop.f32.mrb[12].mxu0 }
 0x129   : > { %13500 = vst [vmem:[#allocation5_spill] sm:$0xff] %v8908_v31  ;;  %1654 = vrot.lane.b32.xlu0 %v8872_v19, %s8648_s2  ;;  %v7266_v32 = vpop.f32.mrb[13].mxu0 }
 0x12a   : > { %v8912_v33 = vpop.f32.mrb[14].mxu0 }
 0x12b   : > { %13501 = vst [vmem:[#allocation6_spill] sm:$0xff] %v8912_v33  ;;  %1002 = vrot.lane.b32.xlu1 %v8884_v23, %s8642_s8  ;;  %v7267_v34 = vpop.f32.mrb[15].mxu0 }
 0x12d   : > { %1000 = vrot.lane.b32.xlu0 %v8876_v21, %s8642_s8 }
 0x12f   : > { %1767 = vrot.lane.b32.xlu1 %v8884_v23, %s8649_s19 }
 0x130   : > { %v8920_v35 = vpop.f32.mrb[16].mxu0 }
 0x131   : > { %13502 = vst [vmem:[#allocation7_spill] sm:$0xff] %v8920_v35  ;;  %1765 = vrot.lane.b32.xlu0 %v8876_v21, %s8649_s19  ;;  %v7270_v36 = vpop.f32.mrb[17].mxu0 }
 0x132   : > { %v8924_v37 = vpop.f32.mrb[18].mxu0 }
 0x133   : > { %13503 = vst [vmem:[#allocation8_spill] sm:$0xff] %v8924_v37  ;;  %1004 = vrot.lane.b32.xlu1 %v8888_v25, %s8642_s8  ;;  %v7271_v38 = vpop.f32.mrb[19].mxu0 }
 0x135   : > { %1113 = vrot.lane.b32.xlu0 %v8884_v23, %s8643_s4 }
 0x137   : > { %1115 = vrot.lane.b32.xlu1 %v8888_v25, %s8643_s4 }
 0x138   : > { %v8932_v39 = vpop.f32.mrb[20].mxu0 }
 0x139   : > { %13504 = vst [vmem:[#allocation9_spill] sm:$0xff] %v8932_v39  ;;  %1222 = vrot.lane.b32.xlu0 %v8884_v23, %s8644_s1  ;;  %v7274_v40 = vpop.f32.mrb[21].mxu0 }
 0x13a   : > { %v8936_v41 = vpop.f32.mrb[22].mxu0 }
 0x13b   : > { %13505 = vst [vmem:[#allocation10_spill] sm:$0xff] %v8936_v41  ;;  %1224 = vrot.lane.b32.xlu1 %v8888_v25, %s8644_s1  ;;  %v7275_v42 = vpop.f32.mrb[23].mxu0 }
 0x13d   : > { %1331 = vrot.lane.b32.xlu0 %v8884_v23, %s8645_s5 }
 0x13f   : > { %1333 = vrot.lane.b32.xlu1 %v8888_v25, %s8645_s5 }
 0x140   : > { %v8956_v43 = vpop.f32.mrb[24].mxu0 }
 0x141   : > { %1440 = vrot.lane.b32.xlu0 %v8884_v23, %s8646_s26  ;;  %13506 = vst [vmem:[#allocation11_spill] sm:$0xff] %v8956_v43  ;;  %v7278_v44 = vpop.f32.mrb[25].mxu0 }
 0x142   : > { %v8960_v45 = vpop.f32.mrb[26].mxu0 }
 0x143   : > { %1442 = vrot.lane.b32.xlu1 %v8888_v25, %s8646_s26  ;;  %13507 = vst [vmem:[#allocation12_spill] sm:$0xff] %v8960_v45  ;;  %v7279_v46 = vpop.f32.mrb[27].mxu0 }
 0x145   : > { %1549 = vrot.lane.b32.xlu0 %v8884_v23, %s8647_s6 }
 0x147   : > { %1551 = vrot.lane.b32.xlu1 %v8888_v25, %s8647_s6 }
 0x148   : > { %v8992_v47 = vpop.f32.mrb[28].mxu0 }
 0x149   : > { %1658 = vrot.lane.b32.xlu0 %v8884_v23, %s8648_s2  ;;  %13508 = vst [vmem:[#allocation13_spill] sm:$0xff] %v8992_v47  ;;  %v7282_v48 = vpop.f32.mrb[29].mxu0 }
 0x14a   : > { %v8996_v49 = vpop.f32.mrb[30].mxu0 }
 0x14b   : > { %1660 = vrot.lane.b32.xlu1 %v8888_v25, %s8648_s2  ;;  %13509 = vst [vmem:[#allocation14_spill] sm:$0xff] %v8996_v49  ;;  %v7283_v50 = vpop.f32.mrb[31].mxu0 }
 0x14d   : > { %1769 = vrot.lane.b32.xlu0 %v8888_v25, %s8649_s19 }
 0x14f   : > { %1553 = vrot.lane.b32.xlu1 %v8896_v27, %s8647_s6 }
 0x150   : > { %v9038_v56 = vpop.f32.mrb[32].mxu0 }
 0x151   : > { %1006 = vrot.lane.b32.xlu0 %v8896_v27, %s8642_s8  ;;  %13513 = vst [vmem:[#allocation18_spill] sm:$0xff] %v9038_v56  ;;  %v7286_v57 = vpop.f32.mrb[33].mxu0 }
 0x152   : > { %v9044_v59 = vpop.f32.mrb[34].mxu0  ;;  %v1070_v57 = vlaneseq }
 0x153   : > { %1662 = vrot.lane.b32.xlu1 %v8896_v27, %s8648_s2  ;;  %13514 = vst [vmem:[#allocation19_spill] sm:$0xff] %v9044_v59  ;;  %v7287_v60 = vpop.f32.mrb[35].mxu0 }
 0x155   : > { %1117 = vrot.lane.b32.xlu0 %v8896_v27, %s8643_s4 }
 0x157   : > { %1771 = vrot.lane.b32.xlu1 %v8896_v27, %s8649_s19 }
 0x159   : > { %1226 = vrot.lane.b32.xlu0 %v8896_v27, %s8644_s1 }
 0x15b   : > { %1008 = vrot.lane.b32.xlu1 %v8900_v29, %s8642_s8 }
 0x15d   : > { %1335 = vrot.lane.b32.xlu0 %v8896_v27, %s8645_s5 }
 0x15f   : > { %1119 = vrot.lane.b32.xlu1 %v8900_v29, %s8643_s4 }
 0x161   : > { %1444 = vrot.lane.b32.xlu0 %v8896_v27, %s8646_s26 }
 0x163   : > { %1228 = vrot.lane.b32.xlu1 %v8900_v29, %s8644_s1 }
 0x165   : > { %1555 = vrot.lane.b32.xlu0 %v8900_v29, %s8647_s6 }
 0x167   : > { %1337 = vrot.lane.b32.xlu1 %v8900_v29, %s8645_s5 }
 0x169   : > { %1664 = vrot.lane.b32.xlu0 %v8900_v29, %s8648_s2 }
 0x16b   : > { %1446 = vrot.lane.b32.xlu1 %v8900_v29, %s8646_s26 }
 0x16d   : > { %1773 = vrot.lane.b32.xlu0 %v8900_v29, %s8649_s19 }
 0x16f   : > { %1121 = vrot.lane.b32.xlu1 %v8908_v31, %s8643_s4 }
 0x171   : > { %1010 = vrot.lane.b32.xlu0 %v8908_v31, %s8642_s8 }
 0x173   : > { %1230 = vrot.lane.b32.xlu1 %v8908_v31, %s8644_s1 }
 0x175   : > { %1123 = vrot.lane.b32.xlu0 %v8912_v33, %s8643_s4 }
 0x177   : > { %1339 = vrot.lane.b32.xlu1 %v8908_v31, %s8645_s5 }
 0x179   : > { %1232 = vrot.lane.b32.xlu0 %v8912_v33, %s8644_s1 }
 0x17b   : > { %1448 = vrot.lane.b32.xlu1 %v8908_v31, %s8646_s26 }
 0x17d   : > { %1341 = vrot.lane.b32.xlu0 %v8912_v33, %s8645_s5 }
 0x17f   : > { %1557 = vrot.lane.b32.xlu1 %v8908_v31, %s8647_s6 }
 0x181   : > { %1450 = vrot.lane.b32.xlu0 %v8912_v33, %s8646_s26 }
 0x183   : > { %v9018_v51 = vpop.permute.xlu0 %998  ;;  %1666 = vrot.lane.b32.xlu1 %v8908_v31, %s8648_s2 }
 0x184   : > { %13510 = vst [vmem:[#allocation15_spill] sm:$0xff] %v9018_v51 }
 0x185   : > { %v9022_v52 = vpop.permute.xlu1 %1111  ;;  %1559 = vrot.lane.b32.xlu0 %v8912_v33, %s8647_s6 }
 0x187   : > { %v9026_v53 = vpop.permute.xlu0 %1109  ;;  %1775 = vrot.lane.b32.xlu1 %v8908_v31, %s8649_s19 }
 0x188   : > { %13511 = vst [vmem:[#allocation16_spill] sm:$0xff] %v9026_v53  ;;  %v13430_v59 = vrot.slane %v9026_v53, 2 }
 0x189   : > { %v9030_v54 = vpop.permute.xlu1 %1220  ;;  %1668 = vrot.lane.b32.xlu0 %v8912_v33, %s8648_s2 }
 0x18b   : > { %v9034_v55 = vpop.permute.xlu0 %1218  ;;  %1012 = vrot.lane.b32.xlu1 %v8912_v33, %s8642_s8 }
 0x18c   : > { %13512 = vst [vmem:[#allocation17_spill] sm:$0xff] %v9034_v55 }
 0x18d   : > { %v9040_v58 = vpop.permute.xlu1 %1329  ;;  %1777 = vrot.lane.b32.xlu0 %v8912_v33, %s8649_s19 }
 0x18e   : > { %v1382_v31 = vrot.slane %v9040_v58, 4 }
 0x18f   : > { %v9046_v61 = vpop.permute.xlu0 %1327  ;;  %1014 = vrot.lane.b32.xlu1 %v8920_v35, %s8642_s8 }
 0x190   : > { %13515 = vst [vmem:[#allocation20_spill] sm:$0xff] %v9046_v61 }
 0x191   : > { %v9050_v62 = vpop.permute.xlu1 %1438  ;;  %1016 = vrot.lane.b32.xlu0 %v8924_v37, %s8642_s8 }
 0x193   : > { %v9054_v63 = vpop.permute.xlu0 %1436  ;;  %1125 = vrot.lane.b32.xlu1 %v8920_v35, %s8643_s4 }
 0x194   : > { %13516 = vst [vmem:[#allocation21_spill] sm:$0xff] %v9054_v63 }
 0x195   : > { %v9058_v0 = vpop.permute.xlu1 %1547  ;;  %1127 = vrot.lane.b32.xlu0 %v8924_v37, %s8643_s4 }
 0x197   : > { %v9062_v1 = vpop.permute.xlu0 %1545  ;;  %1234 = vrot.lane.b32.xlu1 %v8920_v35, %s8644_s1 }
 0x198   : > { %13517 = vst [vmem:[#allocation22_spill] sm:$0xff] %v9062_v1 }
 0x199   : > { %v9066_v3 = vpop.permute.xlu1 %1656  ;;  %1236 = vrot.lane.b32.xlu0 %v8924_v37, %s8644_s1 }
 0x19b   : > { %v9070_v4 = vpop.permute.xlu0 %1654  ;;  %1343 = vrot.lane.b32.xlu1 %v8920_v35, %s8645_s5 }
 0x19c   : > { %13518 = vst [vmem:[#allocation23_spill] sm:$0xff] %v9070_v4 }
 0x19d   : > { %v9074_v5 = vpop.permute.xlu1 %1002  ;;  %1345 = vrot.lane.b32.xlu0 %v8924_v37, %s8645_s5 }
 0x19e   : > { %v1054_v53 = vrot.slane %v9074_v5, 1 }
 0x19f   : > { %v9078_v6 = vpop.permute.xlu0 %1000  ;;  %1452 = vrot.lane.b32.xlu1 %v8920_v35, %s8646_s26 }
 0x1a1   : > { %v9082_v7 = vpop.permute.xlu1 %1767  ;;  %1454 = vrot.lane.b32.xlu0 %v8924_v37, %s8646_s26 }
 0x1a3   : > { %v9086_v8 = vpop.permute.xlu0 %1765  ;;  %1561 = vrot.lane.b32.xlu1 %v8920_v35, %s8647_s6 }
 0x1a5   : > { %v9090_v9 = vpop.permute.xlu1 %1004  ;;  %1563 = vrot.lane.b32.xlu0 %v8924_v37, %s8647_s6 }
 0x1a7   : > { %v9094_v10 = vpop.permute.xlu0 %1113  ;;  %1670 = vrot.lane.b32.xlu1 %v8920_v35, %s8648_s2 }
 0x1a9   : > { %v9098_v11 = vpop.permute.xlu1 %1115  ;;  %1672 = vrot.lane.b32.xlu0 %v8924_v37, %s8648_s2 }
 0x1ab   : > { %v9102_v12 = vpop.permute.xlu0 %1222  ;;  %1779 = vrot.lane.b32.xlu1 %v8920_v35, %s8649_s19  ;;  %v13426_v35 = vrot.slane %v9018_v51, 1  ;;  %v1164_v51 = vrot.slane %v9022_v52, 2  ;;  %v1273_v52 = vrot.slane %v9030_v54, 3  ;;  %v13525_v54 = vrot.slane %v9034_v55, 3 }
 0x1ac   : > { %v13528_v55 = vrot.slane %v9058_v0, 6 }
 0x1ad   : > { %v9106_v13 = vpop.permute.xlu1 %1224  ;;  %1781 = vrot.lane.b32.xlu0 %v8924_v37, %s8649_s19  ;;  %v1053_v37 = vrot.slane %v9078_v6, 1 }
 0x1ae   : > { %v1275_v58 = vrot.slane %v9106_v13, 3 }
 0x1af   : > { %v9110_v14 = vpop.permute.xlu0 %1331  ;;  %1018 = vrot.lane.b32.xlu1 %v8932_v39, %s8642_s8 }
 0x1b1   : > { %v9114_v15 = vpop.permute.xlu1 %1333  ;;  %1020 = vrot.lane.b32.xlu0 %v8936_v41, %s8642_s8 }
 0x1b3   : > { %v9118_v16 = vpop.permute.xlu0 %1440  ;;  %1129 = vrot.lane.b32.xlu1 %v8932_v39, %s8643_s4 }
 0x1b5   : > { %v9122_v17 = vpop.permute.xlu1 %1442  ;;  %1131 = vrot.lane.b32.xlu0 %v8936_v41, %s8643_s4 }
 0x1b7   : > { %v9126_v18 = vpop.permute.xlu0 %1549  ;;  %1238 = vrot.lane.b32.xlu1 %v8932_v39, %s8644_s1 }
 0x1b9   : > { %v9130_v20 = vpop.permute.xlu1 %1551  ;;  %1240 = vrot.lane.b32.xlu0 %v8936_v41, %s8644_s1 }
 0x1bb   : > { %v9134_v22 = vpop.permute.xlu0 %1658  ;;  %1347 = vrot.lane.b32.xlu1 %v8932_v39, %s8645_s5 }
 0x1bd   : > { %v9138_v24 = vpop.permute.xlu1 %1660  ;;  %1349 = vrot.lane.b32.xlu0 %v8936_v41, %s8645_s5 }
 0x1bf   : > { %v9142_v26 = vpop.permute.xlu0 %1769  ;;  %1456 = vrot.lane.b32.xlu1 %v8932_v39, %s8646_s26 }
 0x1c1   : > { %v9146_v28 = vpop.permute.xlu1 %1553  ;;  %1458 = vrot.lane.b32.xlu0 %v8936_v41, %s8646_s26 }
 0x1c3   : > { %v9150_v30 = vpop.permute.xlu0 %1006  ;;  %1565 = vrot.lane.b32.xlu1 %v8932_v39, %s8647_s6 }
 0x1c5   : > { %v9154_v32 = vpop.permute.xlu1 %1662  ;;  %1567 = vrot.lane.b32.xlu0 %v8936_v41, %s8647_s6 }
 0x1c7   : > { %v9158_v34 = vpop.permute.xlu0 %1117  ;;  %1674 = vrot.lane.b32.xlu1 %v8932_v39, %s8648_s2 }
 0x1c9   : > { %v9162_v36 = vpop.permute.xlu1 %1771  ;;  %1676 = vrot.lane.b32.xlu0 %v8936_v41, %s8648_s2 }
 0x1cb   : > { %v9166_v38 = vpop.permute.xlu0 %1226  ;;  %1783 = vrot.lane.b32.xlu1 %v8932_v39, %s8649_s19 }
 0x1cd   : > { %v9170_v40 = vpop.permute.xlu1 %1008  ;;  %1785 = vrot.lane.b32.xlu0 %v8936_v41, %s8649_s19  ;;  %v9202_v41 = vshrl.u32 %v1070_v57, 7 }
 0x1cf   : > { %v9174_v42 = vpop.permute.xlu0 %1335  ;;  %1022 = vrot.lane.b32.xlu1 %v8956_v43, %s8642_s8  ;;  %vm1072_vm1 = vcmp.lt.s32.totalorder %v9202_v41, 7  ;;  %vm1181_vm2 = vcmp.lt.s32.totalorder %v9202_v41, 6  ;;  %vm1290_vm3 = vcmp.lt.s32.totalorder %v9202_v41, 5  ;;  %vm1399_vm4 = vcmp.lt.s32.totalorder %v9202_v41, 4 }
 0x1d0   : > { %v1089_v57 = vsel %vm1072_vm1, %v13426_v35, %v1053_v37  ;;  %v1198_v35 = vsel %vm1181_vm2, %v13430_v59, %v1164_v51  ;;  %vm1508_vm5 = vcmp.lt.s32.totalorder %v9202_v41, 3  ;;  %v1055_v59 = vrot.slane %v9090_v9, 1 }
 0x1d1   : > { %v9178_v44 = vpop.permute.xlu1 %1119  ;;  %1024 = vrot.lane.b32.xlu0 %v8960_v45, %s8642_s8  ;;  %vm1617_vm6 = vcmp.lt.s32.totalorder %v9202_v41, 2  ;;  %v1307_v5 = vsel %vm1290_vm3, %v13525_v54, %v1273_v52  ;;  %vm1726_vm7 = vcmp.lt.s32.totalorder %v9202_v41, 1  ;;  %v1165_v9 = vrot.slane %v9094_v10, 2  ;;  %v13025_v41 = vld [vmem:[%s13401_s17] ss:$0 sm:$0xff] }
 0x1d2   : > { %v1088_v54 = vsel %vm1072_vm1, %v1053_v37, %v1054_v53  ;;  %v1087_v10 = vsel %vm1072_vm1, %v1054_v53, %v1055_v59  ;;  %v13529_v37 = vrot.slane %v9062_v1, 6  ;;  %v1056_v1 = vrot.slane %v9150_v30, 1 }
 0x1d3   : > { %v9182_v46 = vpop.permute.xlu0 %1444  ;;  %1133 = vrot.lane.b32.xlu1 %v8956_v43, %s8643_s4  ;;  %v1384_v30 = vrot.slane %v9114_v15, 4 }
 0x1d4   : > { %v1634_v53 = vsel %vm1617_vm6, %v13529_v37, %v13528_v55  ;;  %v1092_v55 = vadd.f32 %v1088_v54, %v8876_v21  ;;  %v13530_v21 = vrot.slane %v9070_v4, 7 }
 0x1d5   : > { %v9186_v48 = vpop.permute.xlu1 %1228  ;;  %1135 = vrot.lane.b32.xlu0 %v8960_v45, %s8643_s4 }
 0x1d6   : > { %v13549_v4 = vrot.slane %v9186_v48, 3 }
 0x1d7   : > { %v9190_v50 = vpop.permute.xlu0 %1555  ;;  %1242 = vrot.lane.b32.xlu1 %v8956_v43, %s8644_s1 }
 0x1d9   : > { %v9194_v60 = vpop.permute.xlu1 %1337  ;;  %1244 = vrot.lane.b32.xlu0 %v8960_v45, %s8644_s1 }
 0x1db   : > { %v9198_v2 = vpop.permute.xlu0 %1664  ;;  %1351 = vrot.lane.b32.xlu1 %v8956_v43, %s8645_s5 }
 0x1dd   : > { %v9204_v39 = vpop.permute.xlu1 %1446  ;;  %1353 = vrot.lane.b32.xlu0 %v8960_v45, %s8645_s5 }
 0x1df   : > { %v9210_v33 = vpop.permute.xlu0 %1773  ;;  %1460 = vrot.lane.b32.xlu1 %v8956_v43, %s8646_s26 }
 0x1e0   : > { %13519 = vst [vmem:[#allocation24_spill] sm:$0xff] %v9210_v33  ;;  %v1091_v33 = vadd.f32 %v1089_v57, %v8872_v19 }
 0x1e1   : > { %v9215_v29 = vpop.permute.xlu1 %1121  ;;  %1462 = vrot.lane.b32.xlu0 %v8960_v45, %s8646_s26 }
 0x1e2   : > { %13520 = vst [vmem:[#allocation25_spill] sm:$0xff] %v9215_v29  ;;  %v1200_v57 = vadd.f32 %v1198_v35, %v1091_v33  ;;  %v1491_v33 = vrot.slane %v9050_v62, 5  ;;  %v13526_v62 = vrot.slane %v9046_v61, 4  ;;  %v1709_v61 = vrot.slane %v9066_v3, 7 }
 0x1e3   : > { %v9223_v6 = vpop.permute.xlu0 %1010  ;;  %1569 = vrot.lane.b32.xlu1 %v8956_v43, %s8647_s6 }
 0x1e5   : > { %v9230_v56 = vpop.permute.xlu1 %1230  ;;  %1571 = vrot.lane.b32.xlu0 %v8960_v45, %s8647_s6 }
 0x1e6   : > { %13521 = vst [vmem:[#allocation26_spill] sm:$0xff] %v9230_v56  ;;  %v1166_v56 = vrot.slane %v9098_v11, 2  ;;  %v1274_v11 = vrot.slane %v9102_v12, 3  ;;  %v1093_v12 = vadd.f32 %v1087_v10, %v8884_v23  ;;  %v1743_v23 = vsel %vm1726_vm7, %v13530_v21, %v1709_v61 }
 0x1e7   : > { %v9235_v29 = vpop.permute.xlu0 %1123  ;;  %1678 = vrot.lane.b32.xlu1 %v8956_v43, %s8648_s2  ;;  %v1492_v10 = vrot.slane %v9118_v16, 5  ;;  %v1602_v16 = vrot.slane %v9130_v20, 6  ;;  %v1601_v20 = vrot.slane %v9126_v18, 6 }
 0x1e8   : > { %13522 = vst [vmem:[#allocation27_spill] sm:$0xff] %v9235_v29 }
 0x1e9   : > { %v9246_v19 = vpop.permute.xlu1 %1339  ;;  %1680 = vrot.lane.b32.xlu0 %v8960_v45, %s8648_s2  ;;  %v1632_v18 = vsel %vm1617_vm6, %v1601_v20, %v1602_v16 }
 0x1ea   : > { %13523 = vst [vmem:[#allocation28_spill] sm:$0xff] %v9246_v19 }
 0x1eb   : > { %v9258_v35 = vpop.permute.xlu0 %1232  ;;  %1787 = vrot.lane.b32.xlu1 %v8956_v43, %s8649_s19 }
 0x1ec   : > { %13524 = vst [vmem:[#allocation29_spill] sm:$0xff] %v9258_v35  ;;  %v1309_v35 = vadd.f32 %v1307_v5, %v1200_v57  ;;  %v1416_v57 = vsel %vm1399_vm4, %v13526_v62, %v1382_v31  ;;  %v13527_v5 = vrot.slane %v9054_v63, 5  ;;  %v1197_v62 = vsel %vm1181_vm2, %v1164_v51, %v1165_v9 }
 0x1ed   : > { %v9272_v29 = vpop.permute.xlu1 %1448  ;;  %1789 = vrot.lane.b32.xlu0 %v8960_v45, %s8649_s19  ;;  %v1383_v63 = vrot.slane %v9110_v14, 4  ;;  %v1306_v51 = vsel %vm1290_vm3, %v1273_v52, %v1274_v11  ;;  %v1305_v14 = vsel %vm1290_vm3, %v1274_v11, %v1275_v58  ;;  %v1086_v52 = vsel %vm1072_vm1, %v1055_v59, %v1056_v1 }
 0x1ee   : > { %v1525_v19 = vsel %vm1508_vm5, %v13527_v5, %v1491_v33  ;;  %v1196_v5 = vsel %vm1181_vm2, %v1165_v9, %v1166_v56  ;;  %v1418_v37 = vadd.f32 %v1416_v57, %v1309_v35  ;;  %v1167_v9 = vrot.slane %v9158_v34, 2 }
 0x1ef   : > { %v9297_v13 = vpop.permute.xlu0 %1341  ;;  %1026 = vrot.lane.b32.xlu1 %v8992_v47, %s8642_s8  ;;  %v1201_v35 = vadd.f32 %v1197_v62, %v1092_v55  ;;  %v1202_v54 = vadd.f32 %v1196_v5, %v1093_v12  ;;  %v1415_v15 = vsel %vm1399_vm4, %v1382_v31, %v1383_v63  ;;  %v1493_v34 = vrot.slane %v9122_v17, 5 }
 0x1f0   : > { %v1276_v11 = vrot.slane %v9166_v38, 3  ;;  %v1527_v21 = vadd.f32 %v1525_v19, %v1418_v37  ;;  %v1414_v31 = vsel %vm1399_vm4, %v1383_v63, %v1384_v30  ;;  %v1195_v17 = vsel %vm1181_vm2, %v1166_v56, %v1167_v9 }
 0x1f1   : > { %v9310_v45 = vpop.permute.xlu1 %1557  ;;  %1028 = vrot.lane.b32.xlu0 %v8996_v49, %s8642_s8  ;;  %v1310_v62 = vadd.f32 %v1306_v51, %v1201_v35  ;;  %v1311_v12 = vadd.f32 %v1305_v14, %v1202_v54  ;;  %v1057_v59 = vrot.slane %v9170_v40, 1  ;;  %v1385_v38 = vrot.slane %v9174_v42, 4 }
 0x1f2   : > { %v1524_v55 = vsel %vm1508_vm5, %v1491_v33, %v1492_v10  ;;  %v1094_v37 = vadd.f32 %v1086_v52, %v8888_v25  ;;  %v1523_v56 = vsel %vm1508_vm5, %v1492_v10, %v1493_v34  ;;  %v1304_v63 = vsel %vm1290_vm3, %v1275_v58, %v1276_v11 }
 0x1f3   : > { %v9327_v57 = vpop.permute.xlu0 %1450  ;;  %1137 = vrot.lane.b32.xlu1 %v8992_v47, %s8643_s4  ;;  %v1419_v19 = vadd.f32 %v1415_v15, %v1310_v62  ;;  %v1168_v42 = vrot.slane %v9178_v44, 2  ;;  %v1494_v14 = vrot.slane %v9182_v46, 5  ;;  %v1420_v33 = vadd.f32 %v1414_v31, %v1311_v12 }
 0x1f4   : > { %v1711_v25 = vrot.slane %v9138_v24, 7  ;;  %v1203_v35 = vadd.f32 %v1195_v17, %v1094_v37  ;;  %v1710_v10 = vrot.slane %v9134_v22, 7  ;;  %v1085_v58 = vsel %vm1072_vm1, %v1056_v1, %v1057_v59 }
 0x1f5   : > { %v9338_v5 = vpop.permute.xlu1 %1666  ;;  %1139 = vrot.lane.b32.xlu0 %v8996_v49, %s8643_s4  ;;  %v1413_v46 = vsel %vm1399_vm4, %v1384_v30, %v1385_v38  ;;  %v13444_v15 = vrot.slane %v9186_v48, 3  ;;  %v1636_v52 = vadd.f32 %v1634_v53, %v1527_v21  ;;  %v1528_v24 = vadd.f32 %v1524_v55, %v1419_v19 }
 0x1f6   : > { %v1529_v62 = vadd.f32 %v1523_v56, %v1420_v33  ;;  %v1312_v12 = vadd.f32 %v1304_v63, %v1203_v35  ;;  %v13531_v22 = vrot.slane %v9058_v0, 6  ;;  %v1194_v1 = vsel %vm1181_vm2, %v1167_v9, %v1168_v42 }
 0x1f7   : > { %v9352_v51 = vpop.permute.xlu0 %1559  ;;  %1246 = vrot.lane.b32.xlu1 %v8992_v47, %s8644_s1  ;;  %v1522_v53 = vsel %vm1508_vm5, %v1493_v34, %v1494_v14  ;;  %v13443_v30 = vrot.slane %v9194_v60, 4  ;;  %v1741_v19 = vsel %vm1726_vm7, %v1710_v10, %v1711_v25  ;;  %v1095_v55 = vadd.f32 %v1085_v58, %v8896_v27 }
 0x1f8   : > { %v1633_v17 = vsel %vm1617_vm6, %v13531_v22, %v1601_v20  ;;  %v1638_v21 = vadd.f32 %v1632_v18, %v1529_v62  ;;  %v1421_v0 = vadd.f32 %v1413_v46, %v1312_v12  ;;  %v1742_v9 = vsel %vm1726_vm7, %v1709_v61, %v1710_v10 }
 0x1f9   : > { %v9365_v54 = vpop.permute.xlu1 %1775  ;;  %1248 = vrot.lane.b32.xlu0 %v8996_v49, %s8644_s1  ;;  %v1603_v34 = vrot.slane %v9146_v28, 6  ;;  %v1303_v20 = vsel %vm1290_vm3, %v1276_v11, %v13444_v15  ;;  %v13442_v27 = vrot.slane %v9204_v39, 5  ;;  %v1745_v56 = vadd.f32 %v1743_v23, %v1636_v52 }
 0x1fa   : > { %v1637_v63 = vadd.f32 %v1633_v17, %v1528_v24  ;;  %v1204_v33 = vadd.f32 %v1194_v1, %v1095_v55  ;;  %v1530_v18 = vadd.f32 %v1522_v53, %v1421_v0  ;;  %v1747_v3 = vadd.f32 %v1741_v19, %v1638_v21 }
 0x1fb   : > { %v9377_v31 = vpop.permute.xlu0 %1668  ;;  %1355 = vrot.lane.b32.xlu1 %v8992_v47, %s8645_s5  ;;  %v1412_v61 = vsel %vm1399_vm4, %v1385_v38, %v13443_v30  ;;  %v1631_v23 = vsel %vm1617_vm6, %v1602_v16, %v1603_v34  ;;  %v1712_v58 = vrot.slane %v9154_v32, 7  ;;  %v1521_v46 = vsel %vm1508_vm5, %v1494_v14, %v13442_v27  ;;  %v9436_v16 = vld [vmem:[%s13532_s30] ss:$0 sm:$0xff] }
 0x1fc   : > { %v1746_v28 = vadd.f32 %v1742_v9, %v1637_v63  ;;  %v1313_v10 = vadd.f32 %v1303_v20, %v1204_v33  ;;  %v1817_v52 = vadd.f32 %v9086_v8, %v1745_v56  ;;  %v1639_v38 = vadd.f32 %v1631_v23, %v1530_v18  ;;  %v13537_v23 = vld [vmem:[#allocation5_spill] sm:$0xff] }
 0x1fd   : > { %v9395_v37 = vpop.permute.xlu1 %1012  ;;  %1357 = vrot.lane.b32.xlu0 %v8996_v49, %s8645_s5  ;;  %v1819_v32 = vadd.f32 %v9142_v26, %v1747_v3  ;;  %v13440_v12 = vrot.slane %v9190_v50, 6  ;;  %v1740_v17 = vsel %vm1726_vm7, %v1711_v25, %v1712_v58  ;;  %v13438_v55 = vrot.slane %v9198_v2, 7  ;;  %v13535_v3 = vld [vmem:[#allocation27_spill] sm:$0xff] }
 0x1fe   : > { %v1422_v24 = vadd.f32 %v1412_v61, %v1313_v10  ;;  %v1818_v14 = vadd.f32 %v9082_v7, %v1746_v28  ;;  %v13441_v1 = vrot.slane %v9395_v37, 1  ;;  %v1842_v53 = vadd.f32 %v9436_v16, %v1817_v52  ;;  %v13538_v52 = vld [vmem:[#allocation25_spill] sm:$0xff] }
 0x1ff   : > { %v9409_v35 = vpop.permute.xlu0 %1777  ;;  %1464 = vrot.lane.b32.xlu1 %v8992_v47, %s8646_s26  ;;  %v1748_v21 = vadd.f32 %v1740_v17, %v1639_v38  ;;  %v1844_v7 = vadd.f32 %v9436_v16, %v1819_v32  ;;  %v1630_v26 = vsel %vm1617_vm6, %v1603_v34, %v13440_v12  ;;  %v1058_v25 = vrot.slane %v9223_v6, 1 }
 0x200   : > { %v1531_v22 = vadd.f32 %v1521_v46, %v1422_v24  ;;  %v1843_v0 = vadd.f32 %v9436_v16, %v1818_v14  ;;  %v9469_v63 = vmax.f32 %v1842_v53, 0.0  ;;  %v1739_v18 = vsel %vm1726_vm7, %v1712_v58, %v13438_v55  ;;  %v13539_v58 = vld [vmem:[#allocation18_spill] sm:$0xff] }
 0x201   : > { %v9417_v11 = vpop.permute.xlu1 %1014  ;;  %1466 = vrot.lane.b32.xlu0 %v8996_v49, %s8646_s26  ;;  %v1083_v56 = vsel %vm1072_vm1, %v1058_v25, %v13441_v1  ;;  %v1820_v34 = vadd.f32 %v9162_v36, %v1748_v21  ;;  %v9476_v6 = vmax.f32 %v1844_v7, 0.0  ;;  %v13439_v61 = vrot.slane %v13535_v3, 2  ;;  %v13540_v7 = vld [vmem:[#allocation29_spill] sm:$0xff] }
 0x202   : > { %v1640_v9 = vadd.f32 %v1630_v26, %v1531_v22  ;;  %13533 = vst [vmem:[#allocation30_spill] sm:$0xff] %v9469_v63  ;;  %v9483_v28 = vmax.f32 %v1843_v0, 0.0  ;;  %v1097_v46 = vadd.f32 %v1083_v56, %v13537_v23  ;;  %v1169_v38 = vrot.slane %v13538_v52, 2  ;;  %v13542_v23 = vld [vmem:[#allocation19_spill] sm:$0xff] }
 0x203   : > { %v9429_v62 = vpop.permute.xlu0 %1016  ;;  %1573 = vrot.lane.b32.xlu1 %v8992_v47, %s8647_s6  ;;  %13534 = vst [vmem:[#allocation31_spill] sm:$0xff] %v9476_v6  ;;  %v1845_v24 = vadd.f32 %v9436_v16, %v1820_v34  ;;  %v13446_v14 = vrot.slane %v9469_v63, 1  ;;  %v13448_v22 = vrot.slane %v9469_v63, 2  ;;  %v1084_v53 = vsel %vm1072_vm1, %v1057_v59, %v1058_v25  ;;  %v13543_v25 = vld [vmem:[#allocation26_spill] sm:$0xff] }
 0x204   : > { %13536 = vst [vmem:[#allocation27_spill] sm:$0xff] %v9483_v28  ;;  %v1749_v10 = vadd.f32 %v1739_v18, %v1640_v9  ;;  %v1192_v21 = vsel %vm1181_vm2, %v1169_v38, %v13439_v61  ;;  %v13445_v26 = vrot.slane %v13540_v7, 3  ;;  %v1880_v0 = vrot.slane %v9476_v6, 1  ;;  %v13541_v9 = vld [vmem:[#allocation24_spill] sm:$0xff] }
 0x205   : > { %v9441_v8 = vpop.permute.xlu1 %1125  ;;  %1575 = vrot.lane.b32.xlu0 %v8996_v49, %s8647_s6  ;;  %v1206_v34 = vadd.f32 %v1192_v21, %v1097_v46  ;;  %v1879_v40 = vrot.slane %v9483_v28, 1  ;;  %v1915_v59 = vrot.slane %v9483_v28, 2  ;;  %v1278_v52 = vrot.slane %v13543_v25, 3 }
 0x206   : > { %v1821_v56 = vadd.f32 %v13541_v9, %v1749_v10  ;;  %v1916_v55 = vrot.slane %v9476_v6, 2  ;;  %v1951_v61 = vrot.slane %v9483_v28, 3  ;;  %v9520_v1 = vmax.f32 %v1845_v24, 0.0  ;;  %v13544_v10 = vld [vmem:[#allocation4_spill] sm:$0xff] }
 0x207   : > { %v9449_v19 = vpop.permute.xlu0 %1127  ;;  %1682 = vrot.lane.b32.xlu1 %v8992_v47, %s8648_s2  ;;  %v1096_v46 = vadd.f32 %v1084_v53, %v13544_v10  ;;  %v1952_v9 = vrot.slane %v9476_v6, 3  ;;  %v1987_v27 = vrot.slane %v9483_v28, 4  ;;  %v1301_v25 = vsel %vm1290_vm3, %v1278_v52, %v13445_v26 }
 0x208   : > { %v9536_v24 = vsel %vm1072_vm1, %v1879_v40, %v1880_v0  ;;  %v1988_v53 = vrot.slane %v9476_v6, 4  ;;  %v1846_v10 = vadd.f32 %v9436_v16, %v1821_v56  ;;  %v1315_v15 = vadd.f32 %v1301_v25, %v1206_v34  ;;  %v13545_v34 = vld [vmem:[#allocation28_spill] sm:$0xff] }
 0x209   : > { %v9461_v20 = vpop.permute.xlu1 %1234  ;;  %1684 = vrot.lane.b32.xlu0 %v8996_v49, %s8648_s2  ;;  %v9548_v26 = vsel %vm1072_vm1, %v13446_v14, %v1879_v40  ;;  %v9554_v30 = vsel %vm1181_vm2, %v13448_v22, %v1915_v59  ;;  %v1193_v56 = vsel %vm1181_vm2, %v1168_v42, %v1169_v38  ;;  %v1387_v25 = vrot.slane %v13545_v34, 4 }
 0x20a   : > { %v9563_v17 = vsel %vm1181_vm2, %v1915_v59, %v1916_v55  ;;  %v13546_v40 = vrot.slane %v9469_v63, 3  ;;  %v1205_v6 = vadd.f32 %v1193_v56, %v1096_v46  ;;  %v13547_v42 = vrot.slane %v9469_v63, 4 }
 0x20b   : > { %v9472_v33 = vpop.permute.xlu0 %1236  ;;  %1791 = vrot.lane.b32.xlu1 %v8992_v47, %s8649_s19  ;;  %v1881_v59 = vrot.slane %v9520_v1, 1  ;;  %v13548_v34 = vrot.slane %v9297_v13, 4  ;;  %v9595_v44 = vsel %vm1399_vm4, %v1987_v27, %v1988_v53  ;;  %v9597_v63 = vmax.f32 %v1846_v10, 0.0 }
 0x20c   : > { %v9569_v14 = vsel %vm1290_vm3, %v13546_v40, %v1951_v61  ;;  %v9581_v38 = vsel %vm1399_vm4, %v13547_v42, %v1987_v27  ;;  %v9591_v40 = vsel %vm1290_vm3, %v1951_v61, %v1952_v9  ;;  %v1302_v61 = vsel %vm1290_vm3, %v13549_v4, %v1278_v52 }
 0x20d   : > { %v9486_v36 = vpop.permute.xlu1 %1343  ;;  %1793 = vrot.lane.b32.xlu0 %v8996_v49, %s8649_s19  ;;  %v1410_v46 = vsel %vm1399_vm4, %v1387_v25, %v13548_v34  ;;  %v13454_v34 = vrot.slane %v9520_v1, 2  ;;  %v1496_v27 = vrot.slane %v9272_v29, 5  ;;  %v9623_v29 = vsel %vm1072_vm1, %v1880_v0, %v1881_v59 }
 0x20e   : > { %v1424_v42 = vadd.f32 %v1410_v46, %v1315_v15  ;;  %v1314_v46 = vadd.f32 %v1302_v61, %v1205_v6  ;;  %v13550_v4 = vrot.slane %v9194_v60, 4  ;;  %v13551_v52 = vrot.slane %v9327_v57, 5 }
 0x20f   : > { %v9492_v32 = vpop.permute.xlu0 %1345  ;;  %1030 = vrot.lane.b32.xlu1 %v13539_v58, %s8642_s8  ;;  %v9644_v0 = vsel %vm1181_vm2, %v1916_v55, %v13454_v34  ;;  %v13553_v60 = vrot.slane %v9520_v1, 4  ;;  %v13555_v34 = vrot.slane %v9204_v39, 5 }
 0x210   : > { %v1411_v6 = vsel %vm1399_vm4, %v13550_v4, %v1387_v25  ;;  %v1519_v61 = vsel %vm1508_vm5, %v1496_v27, %v13551_v52  ;;  %v13552_v25 = vrot.slane %v9520_v1, 3  ;;  %v1060_v52 = vrot.slane %v9417_v11, 1 }
 0x211   : > { %v9510_v18 = vpop.permute.xlu1 %1452  ;;  %1032 = vrot.lane.b32.xlu0 %v13542_v23, %s8642_s8  ;;  %v1533_v15 = vadd.f32 %v1519_v61, %v1424_v42  ;;  %v1605_v42 = vrot.slane %v9310_v45, 6  ;;  %v13457_v61 = vrot.slane %v9449_v19, 2  ;;  %v9659_v56 = vsel %vm1399_vm4, %v1988_v53, %v13553_v60  ;;  %s13567_s8 = sld [smem:[#allocation36_spill]] }
 0x212   : > { %v9650_v4 = vsel %vm1290_vm3, %v1952_v9, %v13552_v25  ;;  %13554 = vst [vmem:[#allocation5_spill] sm:$0xff] %v9659_v56  ;;  %v1423_v55 = vadd.f32 %v1411_v6, %v1314_v46  ;;  %v1520_v10 = vsel %vm1508_vm5, %v13555_v34, %v1496_v27  ;;  %v13556_v11 = vrot.slane %v9352_v51, 6 }
 0x213   : > { %v9523_v21 = vpop.permute.xlu0 %1454  ;;  %1141 = vrot.lane.b32.xlu1 %v13539_v58, %s8643_s4  ;;  %v13557_v46 = vrot.slane %v9429_v62, 1  ;;  %v1171_v34 = vrot.slane %v9441_v8, 2  ;;  %v1714_v6 = vrot.slane %v9338_v5, 7  ;;  %v13558_v45 = vrot.slane %v9597_v63, 1 }
 0x214   : > { %v1628_v53 = vsel %vm1617_vm6, %v1605_v42, %v13556_v11  ;;  %v13559_v8 = vrot.slane %v9395_v37, 1  ;;  %v1532_v47 = vadd.f32 %v1520_v10, %v1423_v55  ;;  %v13561_v37 = vrot.slane %v9377_v31, 7 }
 0x215   : > { %v9540_v12 = vpop.permute.xlu1 %1561  ;;  %1143 = vrot.lane.b32.xlu0 %v13542_v23, %s8643_s4  ;;  %v1081_v39 = vsel %vm1072_vm1, %v1060_v52, %v13557_v46  ;;  %v1642_v60 = vadd.f32 %v1628_v53, %v1533_v15  ;;  %v9690_v11 = vsel %vm1072_vm1, %v1881_v59, %v13558_v45  ;;  %v1190_v5 = vsel %vm1181_vm2, %v1171_v34, %v13457_v61  ;;  %v13566_v61 = vld [vmem:[#allocation6_spill] sm:$0xff]  ;;  %s8658_s4 = smov 32  }
 0x216   : > { %v1082_v27 = vsel %vm1072_vm1, %v13559_v8, %v1060_v52  ;;  %v1280_v15 = vrot.slane %v9461_v20, 3  ;;  %v13560_v59 = vrot.slane %v9190_v50, 6  ;;  %v1737_v52 = vsel %vm1726_vm7, %v1714_v6, %v13561_v37  ;;  %v13562_v8 = vld [vmem:[#allocation7_spill] sm:$0xff] }
 0x217   : > { %v9571_v22 = vpop.permute.xlu0 %1563  ;;  %1250 = vrot.lane.b32.xlu1 %v13539_v58, %s8644_s1  ;;  %v1099_v46 = vadd.f32 %v1081_v39, %v13562_v8  ;;  %v13563_v20 = vrot.slane %v13535_v3, 2  ;;  %v13564_v10 = vrot.slane %v9472_v33, 3  ;;  %v1389_v55 = vrot.slane %v9486_v36, 4  ;;  %v8530_v36 = vld [vmem:[%s13567_s8] sm:$0xff]  }
 0x218   : > { %v1629_v45 = vsel %vm1617_vm6, %v13560_v59, %v1605_v42  ;;  %v1499_v59 = vrot.slane %v9523_v21, 5  ;;  %v13565_v39 = vrot.slane %v9198_v2, 7  ;;  %v1751_v8 = vadd.f32 %v1737_v52, %v1642_v60  ;;  %7289 = vmatpush3.bf16.msra.mxu1 %v8530_v36 }
 0x219   : > { %v9599_v28 = vpop.permute.xlu1 %1670  ;;  %1252 = vrot.lane.b32.xlu0 %v13542_v23, %s8644_s1  ;;  %v1191_v50 = vsel %vm1181_vm2, %v13563_v20, %v1171_v34  ;;  %v1299_v42 = vsel %vm1290_vm3, %v1280_v15, %v13564_v10  ;;  %v1098_v3 = vadd.f32 %v1082_v27, %v13566_v61  ;;  %v1208_v53 = vadd.f32 %v1190_v5, %v1099_v46  ;;  %s13627_s1 = smov 112  }
 0x21a   : > { %v1738_v37 = vsel %vm1726_vm7, %v13565_v39, %v1714_v6  ;;  %v13568_v34 = vrot.slane %v13540_v7, 3  ;;  %v13569_v6 = vrot.slane %v9492_v32, 4  ;;  %v1498_v27 = vrot.slane %v9510_v18, 5 }
 0x21b   : > { %v9613_v49 = vpop.permute.xlu0 %1672  ;;  %1359 = vrot.lane.b32.xlu1 %v13539_v58, %s8645_s5  ;;  %v1608_v60 = vrot.slane %v9571_v22, 6  ;;  %v1641_v46 = vadd.f32 %v1629_v45, %v1532_v47  ;;  %v1207_v5 = vadd.f32 %v1191_v50, %v1098_v3  ;;  %v1317_v52 = vadd.f32 %v1299_v42, %v1208_v53 }
 0x21c   : > { %v1300_v2 = vsel %vm1290_vm3, %v13568_v34, %v1280_v15  ;;  %v1408_v61 = vsel %vm1399_vm4, %v1389_v55, %v13569_v6  ;;  %v1990_v7 = vrot.slane %v9597_v63, 4  ;;  %v8531_v15 = vld [vmem:[%s13567_s8 + $0x8] sm:$0xff]   ;;  %v13570_v10 = vrot.slane %v9297_v13, 4 }
 0x21d   : > { %v9635_v48 = vpop.permute.xlu1 %1779  ;;  %1361 = vrot.lane.b32.xlu0 %v13542_v23, %s8645_s5  ;;  %v1517_v47 = vsel %vm1508_vm5, %v1498_v27, %v1499_v59  ;;  %v1607_v53 = vrot.slane %v9540_v12, 6  ;;  %v1717_v45 = vrot.slane %v9613_v49, 7  ;;  %v13571_v50 = vmov 0.0   ;;  %s13458_s5 = smov 80  }
 0x21e   : > { %v1409_v18 = vsel %vm1399_vm4, %v13570_v10, %v1389_v55  ;;  %7290 = vmatprep.subr.bf16.mxu1 %v13571_v50  ;;  %v1750_v42 = vadd.f32 %v1738_v37, %v1641_v46  ;;  %v1823_v39 = vadd.f32 %v9409_v35, %v1751_v8  ;;  %v1316_v3 = vadd.f32 %v1300_v2, %v1207_v5 }
 0x21f   : > { %v9666_v25 = vpop.permute.xlu0 %1781  ;;  %1468 = vrot.lane.b32.xlu1 %v13539_v58, %s8646_s26  ;;  %v1426_v36 = vadd.f32 %v1408_v61, %v1317_v52  ;;  %v13572_v55 = vrot.slane %v9327_v57, 5  ;;  %v1626_v12 = vsel %vm1617_vm6, %v1607_v53, %v1608_v60  ;;  %v1716_v37 = vrot.slane %v9599_v28, 7  ;;  %7291 = vmatpush3.bf16.msra.mxu1 %v8531_v15  ;;  %v8532_v28 = vld [vmem:[%s13567_s8 + $0x10] sm:$0xff]  }
 0x220   : > { %v1425_v8 = vadd.f32 %v1409_v18, %v1316_v3  ;;  %v13573_v57 = vrot.slane %v9597_v63, 2  ;;  %v13576_v18 = vrot.slane %v9597_v63, 3  ;;  %v13577_v15 = vrot.slane %v9520_v1, 3  ;;  %7292 = vmatprep.subr.bf16.mxu1 %v13571_v50 }
 0x221   : > { %v9682_v9 = vpop.permute.xlu1 %1018  ;;  %1470 = vrot.lane.b32.xlu0 %v13542_v23, %s8646_s26  ;;  %v1518_v34 = vsel %vm1508_vm5, %v13572_v55, %v1498_v27  ;;  %v1535_v2 = vadd.f32 %v1517_v47, %v1426_v36  ;;  %v13574_v27 = vrot.slane %v9520_v1, 2  ;;  %v1735_v52 = vsel %vm1726_vm7, %v1716_v37, %v1717_v45  ;;  %s13621_s26 = sld [smem:[#allocation38_spill]] }
 0x222   : > { %v1062_v35 = vrot.slane %v9682_v9, 1  ;;  %v13575_v9 = vrot.slane %v9352_v51, 6  ;;  %v9813_v47 = vsel %vm1290_vm3, %v13577_v15, %v13576_v18  ;;  %v1822_v51 = vadd.f32 %v9365_v54, %v1750_v42  ;;  %v13582_v15 = vld [vmem:[#allocation8_spill] sm:$0xff] }
 0x223   : > { %v9712_v43 = vpop.permute.xlu0 %1020  ;;  %1577 = vrot.lane.b32.xlu1 %v13539_v58, %s8647_s6  ;;  %v9793_v46 = vsel %vm1181_vm2, %v13574_v27, %v13573_v57  ;;  %v1534_v3 = vadd.f32 %v1518_v34, %v1425_v8  ;;  %v1644_v36 = vadd.f32 %v1626_v12, %v1535_v2  ;;  %v13579_v27 = vrot.slane %v9429_v62, 1  ;;  %v13580_v62 = vld [vmem:[#allocation3_spill] sm:$0xff]  ;;  %7293 = vmatpush3.bf16.msra.mxu1 %v8532_v28 }
 0x224   : > { %v1063_v6 = vrot.slane %v9712_v43, 1  ;;  %v1627_v5 = vsel %vm1617_vm6, %v13575_v9, %v1607_v53  ;;  %v1848_v53 = vadd.f32 %v9436_v16, %v1823_v39  ;;  %v8533_v39 = vld [vmem:[%s13567_s8 + $0x18] ss:$0 sps:$4 sm:$0x11]   ;;  %7294 = vmatprep.subr.bf16.mxu1 %v13571_v50  ;;  %v7676_v28 = vpack.i.bf16 %v9690_v11, %v9623_v29 }
 0x225   : > { %v9731_v56 = vpop.permute.xlu1 %1129  ;;  %1579 = vrot.lane.b32.xlu0 %v13542_v23, %s8647_s6  ;;  %v1080_v9 = vsel %vm1072_vm1, %v13579_v27, %v1062_v35  ;;  %v1643_v34 = vadd.f32 %v1627_v5, %v1534_v3  ;;  %v1753_v12 = vadd.f32 %v1735_v52, %v1644_v36  ;;  %v2460_v52 = vsel %vm2458_vm8, %v8533_v39, 0  ;;  %s13623_s6 = sld [smem:[#allocation40_spill]] }
 0x226   : > { %v1173_v10 = vrot.slane %v9731_v56, 2  ;;  %v13578_v56 = vrot.slane %v9377_v31, 7  ;;  %v1079_v31 = vsel %vm1072_vm1, %v1062_v35, %v1063_v6  ;;  %v1847_v35 = vadd.f32 %v9436_v16, %v1822_v51 }
 0x227   : > { %v9748_v20 = vpop.permute.xlu0 %1131  ;;  %1686 = vrot.lane.b32.xlu1 %v13539_v58, %s8648_s2  ;;  %v1100_v3 = vadd.f32 %v1080_v9, %v13582_v15  ;;  %v13584_v51 = vrot.slane %v9472_v33, 3  ;;  %v9864_v9 = vmax.f32 %v1848_v53, 0.0  ;;  %v13586_v29 = vpack.i.bf16 %v9563_v17, %v9554_v30  ;;  %7295 = vmatpush3.bf16.msra.mxu1 %v2460_v52 }
 0x228   : > { %v1736_v57 = vsel %vm1726_vm7, %v13578_v56, %v1716_v37  ;;  %v1174_v54 = vrot.slane %v9748_v20, 2  ;;  %v7681_v33 = vpack.i.bf16 %v9793_v46, %v9644_v0  ;;  %v1825_v11 = vadd.f32 %v9666_v25, %v1753_v12  ;;  %7332 = vmatprep.subr.bf16.mxu1 %v13571_v50 }
 0x229   : > { %v9768_v13 = vpop.permute.xlu1 %1238  ;;  %1688 = vrot.lane.b32.xlu0 %v13542_v23, %s8648_s2  ;;  %v1752_v18 = vadd.f32 %v1736_v57, %v1643_v34  ;;  %v13587_v53 = vrot.slane %v9492_v32, 4  ;;  %v9886_v30 = vmax.f32 %v1847_v35, 0.0  ;;  %v13588_v25 = vpack.i.bf16 %v9591_v40, %v9569_v14  ;;  %s13460_s2 = smov 112  }
 0x22a   : > { %v1282_v42 = vrot.slane %v9768_v13, 3  ;;  %v13581_v13 = vrot.slane %v9449_v19, 2  ;;  %v13583_v19 = vpack.i.bf16 %v9536_v24, %v9548_v26  ;;  %v13585_v26 = vld [vmem:[#allocation9_spill] sm:$0xff]  ;;  %v13589_v32 = vrot.slane %v9520_v1, 4 }
 0x22b   : > { %v9783_v61 = vpop.permute.xlu0 %1240  ;;  %1795 = vrot.lane.b32.xlu1 %v13539_v58, %s8649_s19  ;;  %v1101_v24 = vadd.f32 %v1079_v31, %v13585_v26  ;;  %v1824_v12 = vadd.f32 %v9635_v48, %v1752_v18  ;;  %v13590_v48 = vpack.i.bf16 %v9595_v44, %v9581_v38  ;;  %v7686_v18 = vpack.i.bf16 %v9813_v47, %v9650_v4  ;;  %v13591_v4 = vld [vmem:[#allocation5_spill] sm:$0xff] }
 0x22c   : > { %v1189_v8 = vsel %vm1181_vm2, %v13581_v13, %v1173_v10  ;;  %v1283_v2 = vrot.slane %v9783_v61, 3  ;;  %v1298_v56 = vsel %vm1290_vm3, %v13584_v51, %v1282_v42  ;;  %v1850_v21 = vadd.f32 %v9436_v16, %v1825_v11 }
 0x22d   : > { %v1348_v55 = vpop.permute.xlu1 %1347  ;;  %1797 = vrot.lane.b32.xlu0 %v13542_v23, %s8649_s19  ;;  %v1209_v39 = vadd.f32 %v1189_v8, %v1100_v3  ;;  %v1919_v26 = vrot.slane %v9886_v30, 2  ;;  %v1955_v49 = vrot.slane %v9886_v30, 3  ;;  %vm3800_vm8 = vcmask 654336  }
 0x22e   : > { %v1391_v5 = vrot.slane %v1348_v55, 4  ;;  %v1188_v55 = vsel %vm1181_vm2, %v1173_v10, %v1174_v54  ;;  %v1297_v10 = vsel %vm1290_vm3, %v1282_v42, %v1283_v2  ;;  %v2017_v42 = vsel %vm1399_vm4, %v13589_v32, %v1990_v7 }
 0x22f   : > { %v9837_v37 = vpop.permute.xlu0 %1349  ;;  %1763 = vrot.lane.b32.xlu1 %v13580_v62, %s8649_s19  ;;  %s8650_s19 = smov 10   ;;  %v1210_v17 = vadd.f32 %v1188_v55, %v1101_v24  ;;  %v1318_v0 = vadd.f32 %v1298_v56, %v1209_v39  ;;  %v7691_v47 = vpack.i.bf16 %v2017_v42, %v13591_v4  ;;  %v1849_v55 = vadd.f32 %v9436_v16, %v1824_v12 }
 0x230   : > { %v1392_v57 = vrot.slane %v9837_v37, 4  ;;  %v1407_v31 = vsel %vm1399_vm4, %v13587_v53, %v1391_v5  ;;  %v1956_v24 = vrot.slane %v9864_v9, 3  ;;  %v9940_v39 = vmax.f32 %v1850_v21, 0.0 }
 0x231   : > { %v1457_v36 = vpop.permute.xlu1 %1456  ;;  %7657 = vrot.lane.b32.xlu0 %v13583_v19, %s8650_s19  ;;  %v1319_v8 = vadd.f32 %v1297_v10, %v1210_v17  ;;  %v1427_v52 = vadd.f32 %v1407_v31, %v1318_v0  ;;  %v1883_v19 = vrot.slane %v9886_v30, 1  ;;  %v13592_v17 = vrot.slane %v9597_v63, 1 }
 0x232   : > { %v1500_v27 = vrot.slane %v1457_v36, 5  ;;  %v1406_v13 = vsel %vm1399_vm4, %v1391_v5, %v1392_v57  ;;  %v1884_v5 = vrot.slane %v9864_v9, 1  ;;  %v1992_v32 = vrot.slane %v9864_v9, 4 }
 0x233   : > { %v9867_v34 = vpop.permute.xlu0 %1458  ;;  %7662 = vrot.lane.b32.xlu1 %v13586_v29, %s8651_s0  ;;  %v1428_v38 = vadd.f32 %v1406_v13, %v1319_v8  ;;  %v1908_v0 = vsel %vm1072_vm1, %v13592_v17, %v1883_v19 }
 0x234   : > { %v1501_v62 = vrot.slane %v9867_v34, 5  ;;  %v1516_v14 = vsel %vm1508_vm5, %v1499_v59, %v1500_v27  ;;  %v1907_v10 = vsel %vm1072_vm1, %v1883_v19, %v1884_v5  ;;  %v1922_v19 = vrot.slane %v9940_v39, 2 }
 0x235   : > { %v1566_v46 = vpop.permute.xlu1 %1565  ;;  %7667 = vrot.lane.b32.xlu0 %v13588_v25, %s8652_s7  ;;  %v1536_v3 = vadd.f32 %v1516_v14, %v1427_v52  ;;  %v7696_v14 = vpack.i.bf16 %v1907_v10, %v1908_v0  ;;  %v1979_v52 = vsel %vm1290_vm3, %v1955_v49, %v1956_v24 }
 0x236   : > { %v1609_v40 = vrot.slane %v1566_v46, 6  ;;  %v1515_v59 = vsel %vm1508_vm5, %v1500_v27, %v1501_v62  ;;  %v9957_v46 = vmax.f32 %v1849_v55, 0.0 }
 0x237   : > { %v9907_v35 = vpop.permute.xlu0 %1567  ;;  %7672 = vrot.lane.b32.xlu1 %v13590_v48, %s8653_s3  ;;  %v1537_v56 = vadd.f32 %v1515_v59, %v1428_v38  ;;  %v1991_v48 = vrot.slane %v9886_v30, 4  ;;  %v13594_v38 = vrot.slane %v9597_v63, 3 }
 0x238   : > { %v1625_v15 = vsel %vm1617_vm6, %v1608_v60, %v1609_v40  ;;  %v1610_v44 = vrot.slane %v9907_v35, 6  ;;  %v1920_v60 = vrot.slane %v9864_v9, 2 }
 0x239   : > { %v1675_v36 = vpop.permute.xlu1 %1674  ;;  %7677 = vrot.lane.b32.xlu0 %v7676_v28, %s8650_s19  ;;  %v1645_v28 = vadd.f32 %v1625_v15, %v1536_v3  ;;  %v1980_v3 = vsel %vm1290_vm3, %v13594_v38, %v1955_v49  ;;  %v2015_v4 = vsel %vm1399_vm4, %v1991_v48, %v1992_v32  ;;  %v1994_v49 = vrot.slane %v9940_v39, 4 }
 0x23a   : > { %v1624_v22 = vsel %vm1617_vm6, %v1609_v40, %v1610_v44  ;;  %v1718_v51 = vrot.slane %v1675_v36, 7  ;;  %v1943_v25 = vsel %vm1181_vm2, %v1919_v26, %v1920_v60  ;;  %v13593_v40 = vrot.slane %v9597_v63, 2 }
 0x23b   : > { %v9935_v27 = vpop.permute.xlu0 %1676  ;;  %7682 = vrot.lane.b32.xlu1 %v7681_v33, %s8651_s0  ;;  %v1646_v31 = vadd.f32 %v1624_v22, %v1537_v56  ;;  %v2016_v56 = vsel %vm1399_vm4, %v1990_v7, %v1991_v48 }
 0x23c   : > { %v1719_v29 = vrot.slane %v9935_v27, 7  ;;  %v1734_v11 = vsel %vm1726_vm7, %v1717_v45, %v1718_v51  ;;  %v1944_v8 = vsel %vm1181_vm2, %v13593_v40, %v1919_v26  ;;  %v1921_v26 = vrot.slane %v9957_v46, 2 }
 0x23d   : > { %v1754_v33 = vadd.f32 %v1734_v11, %v1645_v28  ;;  %v1784_v53 = vpop.permute.xlu1 %1783  ;;  %7687 = vrot.lane.b32.xlu0 %v7686_v18, %s8652_s7  ;;  %v1886_v18 = vrot.slane %v9940_v39, 1  ;;  %v7701_v15 = vpack.i.bf16 %v1943_v25, %v1944_v8  ;;  %v1958_v11 = vrot.slane %v9940_v39, 3 }
 0x23e   : > { %v1733_v45 = vsel %vm1726_vm7, %v1718_v51, %v1719_v29  ;;  %v7706_v51 = vpack.i.bf16 %v1979_v52, %v1980_v3  ;;  %v1941_v0 = vsel %vm1181_vm2, %v1921_v26, %v1922_v19 }
 0x23f   : > { %v1826_v42 = vadd.f32 %v1784_v53, %v1754_v33  ;;  %v1755_v12 = vadd.f32 %v1733_v45, %v1646_v31  ;;  %v1786_v13 = vpop.permute.xlu0 %1785  ;;  %7692 = vrot.lane.b32.xlu1 %v7691_v47, %s8653_s3  ;;  %v1885_v47 = vrot.slane %v9957_v46, 1  ;;  %v7711_v53 = vpack.i.bf16 %v2015_v4, %v2016_v56 }
 0x240   : > { %v1957_v31 = vrot.slane %v9957_v46, 3 }
 0x241   : > { %v1827_v21 = vadd.f32 %v1786_v13, %v1755_v12  ;;  %v1023_v59 = vpop.permute.xlu1 %1022  ;;  %7697 = vrot.lane.b32.xlu0 %v7696_v14, %s8650_s19  ;;  %v1851_v36 = vadd.f32 %v9436_v16, %v1826_v42  ;;  %v1905_v28 = vsel %vm1072_vm1, %v1885_v47, %v1886_v18  ;;  %v1906_v7 = vsel %vm1072_vm1, %v1884_v5, %v1885_v47 }
 0x242   : > { %v7716_v25 = vpack.i.bf16 %v1905_v28, %v1906_v7  ;;  %v1942_v42 = vsel %vm1181_vm2, %v1920_v60, %v1921_v26  ;;  %v1977_v12 = vsel %vm1290_vm3, %v1957_v31, %v1958_v11  ;;  %v1993_v13 = vrot.slane %v9957_v46, 4 }
 0x243   : > { %v1852_v55 = vadd.f32 %v9436_v16, %v1827_v21  ;;  %v9986_v22 = vpop.permute.xlu0 %1024  ;;  %7702 = vrot.lane.b32.xlu1 %v7701_v15, %s8651_s0  ;;  %v10001_v17 = vmax.f32 %v1851_v36, 0.0  ;;  %v1064_v14 = vrot.slane %v1023_v59, 1  ;;  %v7721_v8 = vpack.i.bf16 %v1941_v0, %v1942_v42 }
 0x244   : > { %v1978_v52 = vsel %vm1290_vm3, %v1956_v24, %v1957_v31  ;;  %v2013_v60 = vsel %vm1399_vm4, %v1993_v13, %v1994_v49  ;;  %v1065_v15 = vrot.slane %v9986_v22, 1  ;;  %v2014_v24 = vsel %vm1399_vm4, %v1992_v32, %v1993_v13  ;;  %v13595_v13 = vld [vmem:[#allocation10_spill] sm:$0xff] }
 0x245   : > { %v9997_v10 = vmax.f32 %v1852_v55, 0.0  ;;  %v1134_v33 = vpop.permute.xlu1 %1133  ;;  %7707 = vrot.lane.b32.xlu0 %v7706_v51, %s8652_s7  ;;  %v1887_v48 = vrot.slane %v10001_v17, 1  ;;  %v7726_v3 = vpack.i.bf16 %v1977_v12, %v1978_v52  ;;  %v1923_v4 = vrot.slane %v10001_v17, 2 }
 0x246   : > { %v1175_v38 = vrot.slane %v1134_v33, 2  ;;  %v1078_v55 = vsel %vm1072_vm1, %v1063_v6, %v1064_v14  ;;  %v7731_v32 = vpack.i.bf16 %v2013_v60, %v2014_v24  ;;  %v1959_v28 = vrot.slane %v10001_v17, 3 }
 0x247   : > { %v10010_v45 = vpop.permute.xlu0 %1135  ;;  %7712 = vrot.lane.b32.xlu1 %v7711_v53, %s8653_s3  ;;  %v1888_v5 = vrot.slane %v9997_v10, 1  ;;  %v1924_v21 = vrot.slane %v9997_v10, 2  ;;  %v1960_v47 = vrot.slane %v9997_v10, 3  ;;  %v1904_v33 = vsel %vm1072_vm1, %v1886_v18, %v1887_v48 }
 0x248   : > { %v1176_v51 = vrot.slane %v10010_v45, 2  ;;  %v1996_v53 = vrot.slane %v9997_v10, 4  ;;  %v1077_v6 = vsel %vm1072_vm1, %v1064_v14, %v1065_v15  ;;  %v1187_v31 = vsel %vm1181_vm2, %v1174_v54, %v1175_v38 }
 0x249   : > { %v1243_v40 = vpop.permute.xlu1 %1242  ;;  %7717 = vrot.lane.b32.xlu0 %v7716_v25, %s8650_s19  ;;  %v1903_v36 = vsel %vm1072_vm1, %v1887_v48, %v1888_v5  ;;  %v1939_v43 = vsel %vm1181_vm2, %v1923_v4, %v1924_v21  ;;  %v1995_v0 = vrot.slane %v10001_v17, 4  ;;  %v1940_v12 = vsel %vm1181_vm2, %v1922_v19, %v1923_v4 }
 0x24a   : > { %v1284_v26 = vrot.slane %v1243_v40, 3  ;;  %v7736_v18 = vpack.i.bf16 %v1903_v36, %v1904_v33  ;;  %v1975_v20 = vsel %vm1290_vm3, %v1959_v28, %v1960_v47  ;;  %v1102_v54 = vadd.f32 %v1078_v55, %v13595_v13 }
 0x24b   : > { %v10029_v59 = vpop.permute.xlu0 %1244  ;;  %7722 = vrot.lane.b32.xlu1 %v7721_v8, %s8651_s0  ;;  %v1186_v14 = vsel %vm1181_vm2, %v1175_v38, %v1176_v51  ;;  %v7741_v8 = vpack.i.bf16 %v1939_v43, %v1940_v12  ;;  %v1976_v52 = vsel %vm1290_vm3, %v1958_v11, %v1959_v28  ;;  %v2011_v38 = vsel %vm1399_vm4, %v1995_v0, %v1996_v53 }
 0x24c   : > { %v1285_v25 = vrot.slane %v10029_v59, 3  ;;  %v1296_v19 = vsel %vm1290_vm3, %v1283_v2, %v1284_v26  ;;  %v1211_v36 = vadd.f32 %v1187_v31, %v1102_v54  ;;  %v7746_v11 = vpack.i.bf16 %v1975_v20, %v1976_v52 }
 0x24d   : > { %v1352_v56 = vpop.permute.xlu1 %1351  ;;  %7727 = vrot.lane.b32.xlu0 %v7726_v3, %s8652_s7  ;;  %v13596_v3 = vld [vmem:[#allocation11_spill] sm:$0xff] }
 0x24e   : > { %v1393_v42 = vrot.slane %v1352_v56, 4  ;;  %v1103_v24 = vadd.f32 %v1077_v6, %v13596_v3  ;;  %v1295_v61 = vsel %vm1290_vm3, %v1284_v26, %v1285_v25  ;;  %v2012_v56 = vsel %vm1399_vm4, %v1994_v49, %v1995_v0 }
 0x24f   : > { %v10062_v7 = vpop.permute.xlu0 %1353  ;;  %7732 = vrot.lane.b32.xlu1 %v7731_v32, %s8653_s3  ;;  %v1320_v28 = vadd.f32 %v1296_v19, %v1211_v36  ;;  %v7751_v43 = vpack.i.bf16 %v2011_v38, %v2012_v56 }
 0x250   : > { %v1394_v60 = vrot.slane %v10062_v7, 4  ;;  %v1405_v2 = vsel %vm1399_vm4, %v1392_v57, %v1393_v42  ;;  %v1212_v32 = vadd.f32 %v1186_v14, %v1103_v24 }
 0x251   : > { %v1461_v40 = vpop.permute.xlu1 %1460  ;;  %7737 = vrot.lane.b32.xlu0 %v7736_v18, %s8650_s19  ;;  %v1429_v31 = vadd.f32 %v1405_v2, %v1320_v28 }
 0x252   : > { %v1502_v48 = vrot.slane %v1461_v40, 5  ;;  %v1404_v37 = vsel %vm1399_vm4, %v1393_v42, %v1394_v60  ;;  %v1321_v6 = vadd.f32 %v1295_v61, %v1212_v32 }
 0x253   : > { %v10091_v4 = vpop.permute.xlu0 %1462  ;;  %7742 = vrot.lane.b32.xlu1 %v7741_v8, %s8651_s0 }
 0x254   : > { %v1503_v55 = vrot.slane %v10091_v4, 5  ;;  %v1514_v57 = vsel %vm1508_vm5, %v1501_v62, %v1502_v48  ;;  %v1430_v62 = vadd.f32 %v1404_v37, %v1321_v6 }
 0x255   : > { %v1570_v33 = vpop.permute.xlu1 %1569  ;;  %7747 = vrot.lane.b32.xlu0 %v7746_v11, %s8652_s7  ;;  %v1538_v42 = vadd.f32 %v1514_v57, %v1429_v31 }
 0x256   : > { %v1611_v26 = vrot.slane %v1570_v33, 6  ;;  %v1513_v18 = vsel %vm1508_vm5, %v1502_v48, %v1503_v55 }
 0x257   : > { %v10116_v49 = vpop.permute.xlu0 %1571  ;;  %7752 = vrot.lane.b32.xlu1 %v7751_v43, %s8653_s3  ;;  %v1539_v54 = vadd.f32 %v1513_v18, %v1430_v62 }
 0x258   : > { %v1623_v34 = vsel %vm1617_vm6, %v1610_v44, %v1611_v26  ;;  %v1612_v0 = vrot.slane %v10116_v49, 6 }
 0x259   : > { %v1679_v12 = vpop.permute.xlu1 %1678  ;;  %v1647_v40 = vadd.f32 %v1623_v34, %v1538_v42 }
 0x25a   : > { %v1622_v20 = vsel %vm1617_vm6, %v1611_v26, %v1612_v0  ;;  %v1720_v13 = vrot.slane %v1679_v12, 7 }
 0x25b   : > { %v10132_v14 = vpop.permute.xlu0 %1680  ;;  %v1648_v19 = vadd.f32 %v1622_v20, %v1539_v54 }
 0x25c   : > { %v1721_v35 = vrot.slane %v10132_v14, 7  ;;  %v1732_v44 = vsel %vm1726_vm7, %v1719_v29, %v1720_v13  ;;  %v10278_v14 = vld [vmem:[%s13532_s30] ss:$0 sm:$0xff] }
 0x25d   : > { %v1756_v8 = vadd.f32 %v1732_v44, %v1647_v40  ;;  %v1788_v52 = vpop.permute.xlu1 %1787 }
 0x25e   : > { %v1731_v48 = vsel %vm1726_vm7, %v1720_v13, %v1721_v35 }
 0x25f   : > { %v1828_v38 = vadd.f32 %v1788_v52, %v1756_v8  ;;  %v1757_v3 = vadd.f32 %v1731_v48, %v1648_v19  ;;  %v1790_v24 = vpop.permute.xlu0 %1789 }
 0x261   : > { %v1853_v36 = vadd.f32 %v9436_v16, %v1828_v38  ;;  %v1829_v11 = vadd.f32 %v1790_v24, %v1757_v3  ;;  %v1027_v61 = vpop.permute.xlu1 %1026 }
 0x262   : > { %v1066_v26 = vrot.slane %v1027_v61, 1 }
 0x263   : > { %v10144_v2 = vmax.f32 %v1853_v36, 0.0  ;;  %v1854_v27 = vadd.f32 %v9436_v16, %v1829_v11  ;;  %v10147_v29 = vpop.permute.xlu0 %1028 }
 0x264   : > { %v1067_v8 = vrot.slane %v10147_v29, 1 }
 0x265   : > { %v10149_v56 = vmax.f32 %v1854_v27, 0.0  ;;  %v1138_v32 = vpop.permute.xlu1 %1137  ;;  %v1925_v28 = vrot.slane %v10144_v2, 2  ;;  %v1889_v33 = vrot.slane %v10144_v2, 1  ;;  %v1997_v6 = vrot.slane %v10144_v2, 4 }
 0x266   : > { %v1961_v18 = vrot.slane %v10144_v2, 3  ;;  %v1177_v52 = vrot.slane %v1138_v32, 2  ;;  %v13597_v32 = vld [vmem:[#allocation12_spill] sm:$0xff] }
 0x267   : > { %v10153_v43 = vpop.permute.xlu0 %1139  ;;  %v1926_v37 = vrot.slane %v10149_v56, 2  ;;  %v1890_v57 = vrot.slane %v10149_v56, 1  ;;  %v1998_v31 = vrot.slane %v10149_v56, 4  ;;  %v1938_v42 = vsel %vm1181_vm2, %v1924_v21, %v1925_v28 }
 0x268   : > { %v1902_v20 = vsel %vm1072_vm1, %v1888_v5, %v1889_v33  ;;  %v1962_v21 = vrot.slane %v10149_v56, 3  ;;  %v1076_v5 = vsel %vm1072_vm1, %v1065_v15, %v1066_v26  ;;  %v2010_v48 = vsel %vm1399_vm4, %v1996_v53, %v1997_v6 }
 0x269   : > { %v1247_v34 = vpop.permute.xlu1 %1246  ;;  %v1937_v62 = vsel %vm1181_vm2, %v1925_v28, %v1926_v37  ;;  %v1901_v12 = vsel %vm1072_vm1, %v1889_v33, %v1890_v57  ;;  %v2009_v44 = vsel %vm1399_vm4, %v1997_v6, %v1998_v31  ;;  %v1974_v3 = vsel %vm1290_vm3, %v1960_v47, %v1961_v18 }
 0x26a   : > { %v7761_v13 = vpack.i.bf16 %v1937_v62, %v1938_v42  ;;  %v7756_v54 = vpack.i.bf16 %v1901_v12, %v1902_v20  ;;  %v1973_v38 = vsel %vm1290_vm3, %v1961_v18, %v1962_v21  ;;  %v1178_v22 = vrot.slane %v10153_v43, 2  ;;  %v13598_v18 = vld [vmem:[#allocation13_spill] sm:$0xff] }
 0x26b   : > { %v10176_v40 = vpop.permute.xlu0 %1248  ;;  %v1286_v24 = vrot.slane %v1247_v34, 3  ;;  %v7771_v15 = vpack.i.bf16 %v2009_v44, %v2010_v48  ;;  %v7766_v36 = vpack.i.bf16 %v1973_v38, %v1974_v3  ;;  %v1075_v53 = vsel %vm1072_vm1, %v1066_v26, %v1067_v8 }
 0x26c   : > { %7762 = vrot.lane.b32.xlu1 %v7761_v13, %s8651_s0  ;;  %7757 = vrot.lane.b32.xlu0 %v7756_v54, %s8650_s19  ;;  %v1185_v61 = vsel %vm1181_vm2, %v1176_v51, %v1177_v52  ;;  %v1287_v27 = vrot.slane %v10176_v40, 3  ;;  %v1104_v28 = vadd.f32 %v1076_v5, %v13597_v32  ;;  %v1184_v26 = vsel %vm1181_vm2, %v1177_v52, %v1178_v22 }
 0x26d   : > { %v1356_v19 = vpop.permute.xlu1 %1355  ;;  %v1294_v45 = vsel %vm1290_vm3, %v1285_v25, %v1286_v24  ;;  %v1105_v34 = vadd.f32 %v1075_v53, %v13598_v18 }
 0x26e   : > { %v1395_v47 = vrot.slane %v1356_v19, 4  ;;  %v1213_v62 = vadd.f32 %v1185_v61, %v1104_v28  ;;  %v1293_v12 = vsel %vm1290_vm3, %v1286_v24, %v1287_v27 }
 0x26f   : > { %v10203_v11 = vpop.permute.xlu0 %1357  ;;  %v1214_v20 = vadd.f32 %v1184_v26, %v1105_v34 }
 0x270   : > { %7772 = vrot.lane.b32.xlu1 %v7771_v15, %s8653_s3  ;;  %7767 = vrot.lane.b32.xlu0 %v7766_v36, %s8652_s7  ;;  %v1396_v51 = vrot.slane %v10203_v11, 4  ;;  %v1403_v59 = vsel %vm1399_vm4, %v1394_v60, %v1395_v47  ;;  %v1322_v13 = vadd.f32 %v1294_v45, %v1213_v62 }
 0x271   : > { %v1465_v33 = vpop.permute.xlu1 %1464  ;;  %v1323_v7 = vadd.f32 %v1293_v12, %v1214_v20 }
 0x272   : > { %v1504_v6 = vrot.slane %v1465_v33, 5  ;;  %v1402_v44 = vsel %vm1399_vm4, %v1395_v47, %v1396_v51  ;;  %v1431_v19 = vadd.f32 %v1403_v59, %v1322_v13 }
 0x273   : > { %v10227_v42 = vpop.permute.xlu0 %1466  ;;  %v1432_v3 = vadd.f32 %v1402_v44, %v1323_v7 }
 0x274   : > { %v1505_v25 = vrot.slane %v10227_v42, 5  ;;  %v1512_v52 = vsel %vm1508_vm5, %v1503_v55, %v1504_v6 }
 0x275   : > { %v1574_v54 = vpop.permute.xlu1 %1573  ;;  %v1540_v24 = vadd.f32 %v1512_v52, %v1431_v19 }
 0x276   : > { %v1613_v5 = vrot.slane %v1574_v54, 6  ;;  %v1511_v60 = vsel %vm1508_vm5, %v1504_v6, %v1505_v25 }
 0x277   : > { %v10246_v48 = vpop.permute.xlu0 %1575  ;;  %v1541_v53 = vadd.f32 %v1511_v60, %v1432_v3 }
 0x278   : > { %v1621_v38 = vsel %vm1617_vm6, %v1612_v0, %v1613_v5  ;;  %v1614_v4 = vrot.slane %v10246_v48, 6 }
 0x279   : > { %v1683_v55 = vpop.permute.xlu1 %1682  ;;  %v1649_v47 = vadd.f32 %v1621_v38, %v1540_v24 }
 0x27a   : > { %v1620_v15 = vsel %vm1617_vm6, %v1613_v5, %v1614_v4  ;;  %v1722_v36 = vrot.slane %v1683_v55, 7 }
 0x27b   : > { %v10261_v61 = vpop.permute.xlu0 %1684  ;;  %v1650_v33 = vadd.f32 %v1620_v15, %v1541_v53 }
 0x27c   : > { %v1723_v49 = vrot.slane %v10261_v61, 7  ;;  %v1730_v0 = vsel %vm1726_vm7, %v1721_v35, %v1722_v36 }
 0x27d   : > { %v1758_v32 = vadd.f32 %v1730_v0, %v1649_v47  ;;  %v1792_v28 = vpop.permute.xlu1 %1791 }
 0x27e   : > { %v1729_v26 = vsel %vm1726_vm7, %v1722_v36, %v1723_v49 }
 0x27f   : > { %v1830_v45 = vadd.f32 %v1792_v28, %v1758_v32  ;;  %v1759_v6 = vadd.f32 %v1729_v26, %v1650_v33  ;;  %v1794_v18 = vpop.permute.xlu0 %1793 }
 0x281   : > { %v1855_v34 = vadd.f32 %v9436_v16, %v1830_v45  ;;  %v1831_v62 = vadd.f32 %v1794_v18, %v1759_v6  ;;  %v1031_v12 = vpop.permute.xlu1 %1030 }
 0x282   : > { %v1068_v55 = vrot.slane %v1031_v12, 1 }
 0x283   : > { %v10273_v59 = vmax.f32 %v1855_v34, 0.0  ;;  %v1856_v35 = vadd.f32 %v10278_v14, %v1831_v62  ;;  %v1033_v20 = vpop.permute.xlu0 %1032 }
 0x284   : > { %v1069_v36 = vrot.slane %v1033_v20, 1  ;;  %v1074_v18 = vsel %vm1072_vm1, %v1067_v8, %v1068_v55 }
 0x285   : > { %v10281_v13 = vmax.f32 %v1856_v35, 0.0  ;;  %v1142_v54 = vpop.permute.xlu1 %1141  ;;  %v1927_v44 = vrot.slane %v10273_v59, 2  ;;  %v1891_v5 = vrot.slane %v10273_v59, 1  ;;  %v1999_v3 = vrot.slane %v10273_v59, 4  ;;  %v13599_v35 = vld [vmem:[#allocation15_spill] sm:$0xff] }
 0x286   : > { %v1179_v32 = vrot.slane %v1142_v54, 2  ;;  %v1963_v6 = vrot.slane %v10273_v59, 3  ;;  %v1073_v12 = vsel %vm1072_vm1, %v1068_v55, %v1069_v36  ;;  %v13600_v20 = vrot.slane %v13599_v35, 1 }
 0x287   : > { %v1144_v52 = vpop.permute.xlu0 %1143  ;;  %v1928_v16 = vrot.slane %v10281_v13, 2  ;;  %v1892_v7 = vrot.slane %v10281_v13, 1  ;;  %v1936_v38 = vsel %vm1181_vm2, %v1926_v37, %v1927_v44  ;;  %v2000_v24 = vrot.slane %v10281_v13, 4 }
 0x288   : > { %v1900_v0 = vsel %vm1072_vm1, %v1890_v57, %v1891_v5  ;;  %v1180_v33 = vrot.slane %v1144_v52, 2  ;;  %v2008_v45 = vsel %vm1399_vm4, %v1998_v31, %v1999_v3  ;;  %v1964_v57 = vrot.slane %v10281_v13, 3 }
 0x289   : > { %v1251_v19 = vpop.permute.xlu1 %1250  ;;  %v1935_v60 = vsel %vm1181_vm2, %v1927_v44, %v1928_v16  ;;  %v1899_v47 = vsel %vm1072_vm1, %v1891_v5, %v1892_v7  ;;  %v2007_v37 = vsel %vm1399_vm4, %v1999_v3, %v2000_v24  ;;  %v1090_v31 = vsel %vm1072_vm1, %v1069_v36, %v13600_v20 }
 0x28a   : > { %v7781_v15 = vpack.i.bf16 %v1935_v60, %v1936_v38  ;;  %v7776_v28 = vpack.i.bf16 %v1899_v47, %v1900_v0  ;;  %v1288_v34 = vrot.slane %v1251_v19, 3  ;;  %v7791_v62 = vpack.i.bf16 %v2007_v37, %v2008_v45  ;;  %v13601_v60 = vld [vmem:[#allocation14_spill] sm:$0xff] }
 0x28b   : > { %v1253_v53 = vpop.permute.xlu0 %1252  ;;  %v1971_v29 = vsel %vm1290_vm3, %v1963_v6, %v1964_v57  ;;  %v1972_v8 = vsel %vm1290_vm3, %v1962_v21, %v1963_v6  ;;  %v1183_v44 = vsel %vm1181_vm2, %v1178_v22, %v1179_v32  ;;  %v1106_v38 = vadd.f32 %v1074_v18, %v13601_v60 }
 0x28c   : > { %7782 = vrot.lane.b32.xlu1 %v7781_v15, %s8651_s0  ;;  %7777 = vrot.lane.b32.xlu0 %v7776_v28, %s8650_s19  ;;  %v1289_v52 = vrot.slane %v1253_v53, 3  ;;  %v7786_v19 = vpack.i.bf16 %v1971_v29, %v1972_v8  ;;  %v1182_v3 = vsel %vm1181_vm2, %v1179_v32, %v1180_v33  ;;  %v13602_v15 = vld [vmem:[#allocation16_spill] sm:$0xff]  ;;  %v1292_v43 = vsel %vm1290_vm3, %v1287_v27, %v1288_v34 }
 0x28d   : > { %v1360_v26 = vpop.permute.xlu1 %1359  ;;  %v13603_v36 = vrot.slane %v13602_v15, 2  ;;  %v1107_v47 = vadd.f32 %v1073_v12, %v13539_v58  ;;  %v1108_v0 = vadd.f32 %v1090_v31, %v13542_v23  ;;  %v1215_v37 = vadd.f32 %v1183_v44, %v1106_v38  ;;  %v13606_v12 = vld [vmem:[#allocation20_spill] sm:$0xff]  ;;  %v13608_v44 = vld [vmem:[#allocation21_spill] sm:$0xff]  ;;  %v13610_v15 = vld [vmem:[#allocation22_spill] sm:$0xff] }
 0x28e   : > { %v1397_v5 = vrot.slane %v1360_v26, 4  ;;  %v1291_v28 = vsel %vm1290_vm3, %v1288_v34, %v1289_v52  ;;  %v13604_v26 = vld [vmem:[#allocation17_spill] sm:$0xff]  ;;  %v13607_v34 = vrot.slane %v13606_v12, 4 }
 0x28f   : > { %v1362_v54 = vpop.permute.xlu0 %1361  ;;  %v1199_v21 = vsel %vm1181_vm2, %v1180_v33, %v13603_v36  ;;  %v13605_v33 = vrot.slane %v13604_v26, 3  ;;  %v1216_v6 = vadd.f32 %v1182_v3, %v1107_v47  ;;  %v1324_v18 = vadd.f32 %v1292_v43, %v1215_v37 }
 0x290   : > { %7792 = vrot.lane.b32.xlu1 %v7791_v62, %s8653_s3  ;;  %v1398_v22 = vrot.slane %v1362_v54, 4  ;;  %7787 = vrot.lane.b32.xlu0 %v7786_v19, %s8652_s7  ;;  %v1401_v27 = vsel %vm1399_vm4, %v1396_v51, %v1397_v5  ;;  %v1217_v58 = vadd.f32 %v1199_v21, %v1108_v0  ;;  %v13611_v36 = vrot.slane %v13610_v15, 6 }
 0x291   : > { %v1469_v55 = vpop.permute.xlu1 %1468  ;;  %v1308_v40 = vsel %vm1290_vm3, %v1289_v52, %v13605_v33  ;;  %v1325_v51 = vadd.f32 %v1291_v28, %v1216_v6  ;;  %v1433_v54 = vadd.f32 %v1401_v27, %v1324_v18  ;;  %v13609_v52 = vrot.slane %v13608_v44, 5 }
 0x292   : > { %v1506_v53 = vrot.slane %v1469_v55, 5  ;;  %v1400_v62 = vsel %vm1399_vm4, %v1397_v5, %v1398_v22  ;;  %v1417_v35 = vsel %vm1399_vm4, %v1398_v22, %v13607_v34  ;;  %v1326_v31 = vadd.f32 %v1308_v40, %v1217_v58  ;;  %v13612_v40 = vld [vmem:[#allocation23_spill] sm:$0xff] }
 0x293   : > { %v1471_v32 = vpop.permute.xlu0 %1470  ;;  %v13613_v27 = vrot.slane %v13612_v40, 7 }
 0x294   : > { %v1507_v45 = vrot.slane %v1471_v32, 5  ;;  %v1510_v11 = vsel %vm1508_vm5, %v1505_v25, %v1506_v53  ;;  %v1434_v25 = vadd.f32 %v1400_v62, %v1325_v51  ;;  %v1435_v60 = vadd.f32 %v1417_v35, %v1326_v31 }
 0x295   : > { %v1578_v23 = vpop.permute.xlu1 %1577  ;;  %v1542_v38 = vadd.f32 %v1510_v11, %v1433_v54 }
 0x296   : > { %v1615_v20 = vrot.slane %v1578_v23, 6  ;;  %v1509_v8 = vsel %vm1508_vm5, %v1506_v53, %v1507_v45  ;;  %v1526_v5 = vsel %vm1508_vm5, %v1507_v45, %v13609_v52 }
 0x297   : > { %v1580_v29 = vpop.permute.xlu0 %1579  ;;  %v1543_v22 = vadd.f32 %v1509_v8, %v1434_v25  ;;  %v1544_v53 = vadd.f32 %v1526_v5, %v1435_v60  ;;  %v13615_v25 = vld [vmem:[#allocation30_spill] sm:$0xff] }
 0x298   : > { %v1619_v42 = vsel %vm1617_vm6, %v1614_v4, %v1615_v20  ;;  %v1616_v19 = vrot.slane %v1580_v29, 6 }
 0x299   : > { %v1687_v3 = vpop.permute.xlu1 %1686  ;;  %v1651_v47 = vadd.f32 %v1619_v42, %v1542_v38  ;;  %v13614_v42 = vld [vmem:[#allocation27_spill] sm:$0xff] }
 0x29a   : > { %v1618_v55 = vsel %vm1617_vm6, %v1615_v20, %v1616_v19  ;;  %v1635_v21 = vsel %vm1617_vm6, %v1616_v19, %v13611_v36  ;;  %v1724_v43 = vrot.slane %v1687_v3, 7 }
 0x29b   : > { %v1689_v48 = vpop.permute.xlu0 %1688  ;;  %v1652_v28 = vadd.f32 %v1618_v55, %v1543_v22  ;;  %v1653_v26 = vadd.f32 %v1635_v21, %v1544_v53 }
 0x29c   : > { %v1725_v0 = vrot.slane %v1689_v48, 7  ;;  %v1728_v4 = vsel %vm1726_vm7, %v1723_v49, %v1724_v43 }
 0x29d   : > { %v1760_v37 = vadd.f32 %v1728_v4, %v1651_v47  ;;  %v1796_v32 = vpop.permute.xlu1 %1795 }
 0x29e   : > { %v1727_v33 = vsel %vm1726_vm7, %v1724_v43, %v1725_v0  ;;  %v1744_v45 = vsel %vm1726_vm7, %v1725_v0, %v13613_v27 }
 0x29f   : > { %v1832_v6 = vadd.f32 %v1796_v32, %v1760_v37  ;;  %v1761_v58 = vadd.f32 %v1727_v33, %v1652_v28  ;;  %v1798_v18 = vpop.permute.xlu0 %1797  ;;  %v1762_v23 = vadd.f32 %v1744_v45, %v1653_v26 }
 0x2a1   : > { %v1857_v61 = vadd.f32 %v10278_v14, %v1832_v6  ;;  %v1833_v62 = vadd.f32 %v1798_v18, %v1761_v58  ;;  %v1764_v49 = vpop.permute.xlu1 %1763 }
 0x2a2   : > { %v1834_v12 = vadd.f32 %v1764_v49, %v1762_v23 }
 0x2a3   : > { %v10401_v34 = vmax.f32 %v1857_v61, 0.0  ;;  %v1858_v35 = vadd.f32 %v10278_v14, %v1833_v62  ;;  %v7658_v11 = vpop.permute.xlu0 %7657 }
 0x2a4   : > { %v1859_v20 = vadd.f32 %v10278_v14, %v1834_v12  ;;  %v7660_v51 = vunpack.i.h.bf16 %v7658_v11  ;;  %v7659_v31 = vunpack.i.l.bf16 %v7658_v11  ;;  %v13616_v11 = vld [vmem:[#allocation31_spill] sm:$0xff] }
 0x2a5   : > { %v10405_v54 = vmax.f32 %v1858_v35, 0.0  ;;  %v7663_v29 = vpop.permute.xlu1 %7662  ;;  %v1929_v8 = vrot.slane %v10401_v34, 2  ;;  %v1893_v44 = vrot.slane %v10401_v34, 1  ;;  %v2001_v52 = vrot.slane %v10401_v34, 4 }
 0x2a6   : > { %v10410_v5 = vmax.f32 %v1859_v20, 0.0  ;;  %v2312_v19 = vsel %vm2310_vm9, %v13614_v42, %v7660_v51  ;;  %v2311_v14 = vsel %vm2310_vm9, %v13615_v25, %v7659_v31  ;;  %v7665_v60 = vunpack.i.h.bf16 %v7663_v29 }
 0x2a7   : > { %v7664_v38 = vunpack.i.l.bf16 %v7663_v29  ;;  %v7668_v3 = vpop.permute.xlu0 %7667  ;;  %v1930_v55 = vrot.slane %v10405_v54, 2  ;;  %v1934_v15 = vsel %vm1181_vm2, %v1928_v16, %v1929_v8  ;;  %v1894_v36 = vrot.slane %v10405_v54, 1 }
 0x2a8   : > { %v2331_v21 = vsel %vm2329_vm10, %v2312_v19, %v7665_v60  ;;  %v7670_v43 = vunpack.i.h.bf16 %v7668_v3  ;;  %v7669_v22 = vunpack.i.l.bf16 %v7668_v3  ;;  %v1898_v53 = vsel %vm1072_vm1, %v1892_v7, %v1893_v44 }
 0x2a9   : > { %v2330_v48 = vsel %vm2329_vm10, %v2311_v14, %v7664_v38  ;;  %v7673_v47 = vpop.permute.xlu1 %7672  ;;  %v1933_v0 = vsel %vm1181_vm2, %v1929_v8, %v1930_v55  ;;  %v1897_v16 = vsel %vm1072_vm1, %v1893_v44, %v1894_v36  ;;  %v2002_v4 = vrot.slane %v10405_v54, 4 }
 0x2aa   : > { %v2349_v37 = vsel %vm13472_vm11, %v2330_v48, %v7669_v22  ;;  %v2350_v32 = vsel %vm13472_vm11, %v2331_v21, %v7670_v43  ;;  %v7675_v28 = vunpack.i.h.bf16 %v7673_v47  ;;  %v7674_v26 = vunpack.i.l.bf16 %v7673_v47 }
 0x2ab   : > { %v7678_v33 = vpop.permute.xlu0 %7677  ;;  %v7801_v40 = vpack.i.bf16 %v1933_v0, %v1934_v15  ;;  %v7796_v7 = vpack.i.bf16 %v1897_v16, %v1898_v53  ;;  %v2005_v27 = vsel %vm1399_vm4, %v2001_v52, %v2002_v4  ;;  %v2006_v45 = vsel %vm1399_vm4, %v2000_v24, %v2001_v52 }
 0x2ac   : > { %v2368_v6 = vsel %vm2367_vm12, %v2349_v37, %v7674_v26  ;;  %v2369_v58 = vsel %vm2367_vm12, %v2350_v32, %v7675_v28  ;;  %v7680_v18 = vunpack.i.h.bf16 %v7678_v33  ;;  %v7679_v23 = vunpack.i.l.bf16 %v7678_v33 }
 0x2ad   : > { %7802 = vrot.lane.b32.xlu1 %v7801_v40, %s8651_s0  ;;  %7797 = vrot.lane.b32.xlu0 %v7796_v7, %s8650_s19  ;;  %v7683_v61 = vpop.permute.xlu1 %7682  ;;  %v2386_v62 = vpack.c.bf16 %v2369_v58, %v2368_v6  ;;  %v7811_v49 = vpack.i.bf16 %v2005_v27, %v2006_v45  ;;  %v1965_v12 = vrot.slane %v10401_v34, 3  ;;  %v1966_v35 = vrot.slane %v10405_v54, 3 }
 0x2ae   : > { %v2314_v24 = vsel %vm2310_vm9, %v9520_v1, %v7680_v18  ;;  %v2313_v20 = vsel %vm2310_vm9, %v13616_v11, %v7679_v23  ;;  %v7685_v51 = vunpack.i.h.bf16 %v7683_v61  ;;  %v7684_v31 = vunpack.i.l.bf16 %v7683_v61 }
 0x2af   : > { %v7688_v29 = vpop.permute.xlu0 %7687  ;;  %7297 = vmatmul.mubr.msk.bf16.vlgmr.msra.gmra.mrb[0].mxu1 %vm2430_vm13, %v2386_v62  ;;  %v1969_v8 = vsel %vm1290_vm3, %v1965_v12, %v1966_v35  ;;  %v1970_v44 = vsel %vm1290_vm3, %v1964_v57, %v1965_v12  ;;  %v1931_v52 = vrot.slane %v10410_v5, 2  ;;  %v1895_v1 = vrot.slane %v10410_v5, 1 }
 0x2b0   : > { %v2332_v42 = vsel %vm2329_vm10, %v2313_v20, %v7684_v31  ;;  %v2333_v19 = vsel %vm2329_vm10, %v2314_v24, %v7685_v51  ;;  %v7690_v14 = vunpack.i.h.bf16 %v7688_v29  ;;  %v7689_v60 = vunpack.i.l.bf16 %v7688_v29  ;;  %7300 = vmatprep.mubr.msk.bf16.mxu1 %vm13479_vm0, %v13571_v50 }
 0x2b1   : > { %7812 = vrot.lane.b32.xlu1 %v7811_v49, %s8653_s3  ;;  %v7806_v38 = vpack.i.bf16 %v1969_v8, %v1970_v44  ;;  %v7693_v3 = vpop.permute.xlu1 %7692  ;;  %v1932_v57 = vsel %vm1181_vm2, %v1930_v55, %v1931_v52  ;;  %v13617_v15 = vrot.slane %v13615_v25, 2  ;;  %v1896_v43 = vsel %vm1072_vm1, %v1894_v36, %v1895_v1 }
 0x2b2   : > { %v2351_v22 = vsel %vm13472_vm11, %v2332_v42, %v7689_v60  ;;  %v2352_v53 = vsel %vm13472_vm11, %v2333_v19, %v7690_v14  ;;  %v7695_v48 = vunpack.i.h.bf16 %v7693_v3  ;;  %v7694_v47 = vunpack.i.l.bf16 %v7693_v3 }
 0x2b3   : > { %v1949_v21 = vsel %vm1181_vm2, %v1931_v52, %v13617_v15  ;;  %7807 = vrot.lane.b32.xlu0 %v7806_v38, %s8652_s7  ;;  %v7698_v0 = vpop.permute.xlu0 %7697  ;;  %v13618_v55 = vrot.slane %v13615_v25, 1  ;;  %v2003_v32 = vrot.slane %v10410_v5, 4  ;;  %v1967_v28 = vrot.slane %v10410_v5, 3 }
 0x2b4   : > { %v7821_v16 = vpack.i.bf16 %v1949_v21, %v1932_v57  ;;  %v2370_v36 = vsel %vm2367_vm12, %v2351_v22, %v7694_v47  ;;  %v2371_v26 = vsel %vm2367_vm12, %v2352_v53, %v7695_v48  ;;  %v7700_v33 = vunpack.i.h.bf16 %v7698_v0 }
 0x2b5   : > { %v1913_v37 = vsel %vm1072_vm1, %v1895_v1, %v13618_v55  ;;  %v7699_v40 = vunpack.i.l.bf16 %v7698_v0  ;;  %v7703_v27 = vpop.permute.xlu1 %7702  ;;  %v2387_v45 = vpack.c.bf16 %v2371_v26, %v2370_v36  ;;  %v2004_v6 = vsel %vm1399_vm4, %v2002_v4, %v2003_v32 }
 0x2b6   : > { %7822 = vrot.lane.b32.xlu1 %v7821_v16, %s8651_s0  ;;  %v7816_v7 = vpack.i.bf16 %v1913_v37, %v1896_v43  ;;  %v13619_v58 = vrot.slane %v13615_v25, 4  ;;  %v2316_v23 = vsel %vm2310_vm9, %v9886_v30, %v7700_v33  ;;  %v7705_v62 = vunpack.i.h.bf16 %v7703_v27 }
 0x2b7   : > { %v2315_v61 = vsel %vm2310_vm9, %v9597_v63, %v7699_v40  ;;  %v7704_v49 = vunpack.i.l.bf16 %v7703_v27  ;;  %v7708_v12 = vpop.permute.xlu0 %7707  ;;  %7301 = vmatmul.mubr.msk.bf16.gmra.mrb[4].mxu1 %vm2430_vm13, %v2387_v45  ;;  %v1968_v4 = vsel %vm1290_vm3, %v1966_v35, %v1967_v28  ;;  %v13620_v11 = vrot.slane %v13615_v25, 3 }
 0x2b8   : > { %v2021_v18 = vsel %vm1399_vm4, %v2003_v32, %v13619_v58  ;;  %7817 = vrot.lane.b32.xlu0 %v7816_v7, %s8650_s19  ;;  %v2335_v63 = vsel %vm2329_vm10, %v2316_v23, %v7705_v62  ;;  %v7710_v51 = vunpack.i.h.bf16 %v7708_v12  ;;  %v7709_v31 = vunpack.i.l.bf16 %v7708_v12  ;;  %7304 = vmatprep.mubr.msk.bf16.mxu1 %vm13479_vm0, %v13571_v50 }
 0x2b9   : > { %v7831_v24 = vpack.i.bf16 %v2021_v18, %v2004_v6  ;;  %v1985_v20 = vsel %vm1290_vm3, %v1967_v28, %v13620_v11  ;;  %v2334_v30 = vsel %vm2329_vm10, %v2315_v61, %v7704_v49  ;;  %v7713_v8 = vpop.permute.xlu1 %7712 }
 0x2ba   : > { %v7826_v29 = vpack.i.bf16 %v1985_v20, %v1968_v4  ;;  %v2353_v35 = vsel %vm13472_vm11, %v2334_v30, %v7709_v31  ;;  %v2354_v25 = vsel %vm13472_vm11, %v2335_v63, %v7710_v51  ;;  %v7715_v44 = vunpack.i.h.bf16 %v7713_v8 }
 0x2bb   : > { %7832 = vrot.lane.b32.xlu1 %v7831_v24, %s8653_s3  ;;  %v7714_v52 = vunpack.i.l.bf16 %v7713_v8  ;;  %v7718_v1 = vpop.permute.xlu0 %7717 }
 0x2bc   : > { %7827 = vrot.lane.b32.xlu0 %v7826_v29, %s8652_s7  ;;  %v2373_v19 = vsel %vm2367_vm12, %v2354_v25, %v7715_v44  ;;  %v7720_v14 = vunpack.i.h.bf16 %v7718_v1  ;;  %v7719_v60 = vunpack.i.l.bf16 %v7718_v1  ;;  %s13622_s7 = sld [smem:[#allocation37_spill]] }
 0x2bd   : > { %v2372_v42 = vsel %vm2367_vm12, %v2353_v35, %v7714_v52  ;;  %v7723_v38 = vpop.permute.xlu1 %7722 }
 0x2be   : > { %v2388_v3 = vpack.c.bf16 %v2373_v19, %v2372_v42  ;;  %v2318_v57 = vsel %vm2310_vm9, %v9957_v46, %v7720_v14  ;;  %v2317_v15 = vsel %vm2310_vm9, %v9864_v9, %v7719_v60  ;;  %v7725_v21 = vunpack.i.h.bf16 %v7723_v38 }
 0x2bf   : > { %v7724_v43 = vunpack.i.l.bf16 %v7723_v38  ;;  %v7728_v22 = vpop.permute.xlu0 %7727 }
 0x2c0   : > { %7305 = vmatmul.mubr.msk.bf16.gmra.mrb[8].mxu1 %vm2430_vm13, %v2388_v3  ;;  %v2337_v48 = vsel %vm2329_vm10, %v2318_v57, %v7725_v21  ;;  %v7730_v47 = vunpack.i.h.bf16 %v7728_v22  ;;  %v7729_v0 = vunpack.i.l.bf16 %v7728_v22 }
 0x2c1   : > { %v2336_v53 = vsel %vm2329_vm10, %v2317_v15, %v7724_v43  ;;  %7308 = vmatprep.mubr.msk.bf16.mxu1 %vm13479_vm0, %v13571_v50  ;;  %v7733_v16 = vpop.permute.xlu1 %7732 }
 0x2c2   : > { %v2355_v46 = vsel %vm13472_vm11, %v2336_v53, %v7729_v0  ;;  %v2356_v55 = vsel %vm13472_vm11, %v2337_v48, %v7730_v47  ;;  %v7735_v9 = vunpack.i.h.bf16 %v7733_v16  ;;  %v7734_v37 = vunpack.i.l.bf16 %v7733_v16 }
 0x2c3   : > { %v7738_v32 = vpop.permute.xlu0 %7737 }
 0x2c4   : > { %v2374_v28 = vsel %vm2367_vm12, %v2355_v46, %v7734_v37  ;;  %v2375_v36 = vsel %vm2367_vm12, %v2356_v55, %v7735_v9  ;;  %v7740_v26 = vunpack.i.h.bf16 %v7738_v32  ;;  %v7739_v33 = vunpack.i.l.bf16 %v7738_v32 }
 0x2c5   : > { %v7743_v40 = vpop.permute.xlu1 %7742  ;;  %v2389_v7 = vpack.c.bf16 %v2375_v36, %v2374_v28 }
 0x2c6   : > { %v2320_v27 = vsel %vm2310_vm9, %v10001_v17, %v7740_v26  ;;  %v2319_v45 = vsel %vm2310_vm9, %v9940_v39, %v7739_v33  ;;  %v7745_v6 = vunpack.i.h.bf16 %v7743_v40  ;;  %v7744_v58 = vunpack.i.l.bf16 %v7743_v40 }
 0x2c7   : > { %v7748_v18 = vpop.permute.xlu0 %7747 }
 0x2c8   : > { %7309 = vmatmul.mubr.msk.bf16.gmra.mrb[12].mxu1 %vm2430_vm13, %v2389_v7  ;;  %v2338_v23 = vsel %vm2329_vm10, %v2319_v45, %v7744_v58  ;;  %v2339_v61 = vsel %vm2329_vm10, %v2320_v27, %v7745_v6  ;;  %v7750_v62 = vunpack.i.h.bf16 %v7748_v18  ;;  %v7749_v49 = vunpack.i.l.bf16 %v7748_v18 }
 0x2c9   : > { %7312 = vmatprep.mubr.msk.bf16.mxu1 %vm13479_vm0, %v13571_v50  ;;  %v7753_v12 = vpop.permute.xlu1 %7752 }
 0x2ca   : > { %v2357_v17 = vsel %vm13472_vm11, %v2338_v23, %v7749_v49  ;;  %v2358_v24 = vsel %vm13472_vm11, %v2339_v61, %v7750_v62  ;;  %v7755_v39 = vunpack.i.h.bf16 %v7753_v12  ;;  %v7754_v4 = vunpack.i.l.bf16 %v7753_v12 }
 0x2cc   : > { %v2376_v11 = vsel %vm2367_vm12, %v2357_v17, %v7754_v4  ;;  %v2377_v20 = vsel %vm2367_vm12, %v2358_v24, %v7755_v39 }
 0x2cd   : > { %v2390_v30 = vpack.c.bf16 %v2377_v20, %v2376_v11 }
 0x2d0   : > { %7313 = vmatmul.mubr.msk.bf16.gmra.mrb[16].mxu1 %vm2430_vm13, %v2390_v30 }
 0x2d1   : > { %7316 = vmatprep.mubr.msk.bf16.mxu1 %vm13479_vm0, %v13571_v50 }
 0x2de   : > { %v7763_v63 = vpop.permute.xlu1 %7762  ;;  %v7758_v51 = vpop.permute.xlu0 %7757 }
 0x2df   : > { %v7760_v31 = vunpack.i.h.bf16 %v7758_v51  ;;  %v7759_v29 = vunpack.i.l.bf16 %v7758_v51  ;;  %v7765_v8 = vunpack.i.h.bf16 %v7763_v63  ;;  %v7764_v35 = vunpack.i.l.bf16 %v7763_v63 }
 0x2e1   : > { %v2322_v25 = vsel %vm2310_vm9, %v10144_v2, %v7760_v31  ;;  %v2321_v44 = vsel %vm2310_vm9, %v9997_v10, %v7759_v29 }
 0x2e2   : > { %v7773_v52 = vpop.permute.xlu1 %7772  ;;  %v7768_v1 = vpop.permute.xlu0 %7767  ;;  %v2340_v38 = vsel %vm2329_vm10, %v2321_v44, %v7764_v35  ;;  %v2341_v3 = vsel %vm2329_vm10, %v2322_v25, %v7765_v8 }
 0x2e3   : > { %v7775_v42 = vunpack.i.h.bf16 %v7773_v52  ;;  %v7774_v19 = vunpack.i.l.bf16 %v7773_v52  ;;  %v7770_v14 = vunpack.i.h.bf16 %v7768_v1  ;;  %v7769_v60 = vunpack.i.l.bf16 %v7768_v1 }
 0x2e5   : > { %v2359_v57 = vsel %vm13472_vm11, %v2340_v38, %v7769_v60  ;;  %v2360_v15 = vsel %vm13472_vm11, %v2341_v3, %v7770_v14 }
 0x2e6   : > { %v2378_v21 = vsel %vm2367_vm12, %v2359_v57, %v7774_v19  ;;  %v2379_v2 = vsel %vm2367_vm12, %v2360_v15, %v7775_v42 }
 0x2e7   : > { %v2391_v43 = vpack.c.bf16 %v2379_v2, %v2378_v21 }
 0x2e9   : > { %7317 = vmatmul.mubr.msk.bf16.gmra.mrb[20].mxu1 %vm2430_vm13, %v2391_v43 }
 0x2ea   : > { %7320 = vmatprep.mubr.msk.bf16.mxu1 %vm13479_vm0, %v13571_v50 }
 0x2fe   : > { %v7783_v10 = vpop.permute.xlu1 %7782  ;;  %v7778_v22 = vpop.permute.xlu0 %7777 }
 0x2ff   : > { %v7780_v53 = vunpack.i.h.bf16 %v7778_v22  ;;  %v7779_v48 = vunpack.i.l.bf16 %v7778_v22  ;;  %v7785_v47 = vunpack.i.h.bf16 %v7783_v10  ;;  %v7784_v0 = vunpack.i.l.bf16 %v7783_v10  ;;  %v8534_v22 = vld [vmem:[%s13621_s26] sm:$0xff]  }
 0x300   : > { %7333 = vmatpush3.bf16.msra.mxu1 %v8534_v22 }
 0x301   : > { %v2324_v46 = vsel %vm2310_vm9, %v10273_v59, %v7780_v53  ;;  %v2323_v55 = vsel %vm2310_vm9, %v10149_v56, %v7779_v48  ;;  %7334 = vmatprep.subr.bf16.mxu1 %v13571_v50  ;;  %v10601_v48 = vld [vmem:[%s13622_s7] ss:$0 sm:$0xff]  ;;  %s8659_s7 = smov 72  }
 0x302   : > { %v7793_v16 = vpop.permute.xlu1 %7792  ;;  %v7788_v32 = vpop.permute.xlu0 %7787  ;;  %v2342_v26 = vsel %vm2329_vm10, %v2323_v55, %v7784_v0  ;;  %v2343_v33 = vsel %vm2329_vm10, %v2324_v46, %v7785_v47 }
 0x303   : > { %v7795_v9 = vunpack.i.h.bf16 %v7793_v16  ;;  %v7794_v37 = vunpack.i.l.bf16 %v7793_v16  ;;  %v7790_v28 = vunpack.i.h.bf16 %v7788_v32  ;;  %v7789_v36 = vunpack.i.l.bf16 %v7788_v32 }
 0x305   : > { %v2361_v40 = vsel %vm13472_vm11, %v2342_v26, %v7789_v36  ;;  %v2362_v7 = vsel %vm13472_vm11, %v2343_v33, %v7790_v28 }
 0x306   : > { %v2380_v27 = vsel %vm2367_vm12, %v2361_v40, %v7794_v37  ;;  %v2381_v59 = vsel %vm2367_vm12, %v2362_v7, %v7795_v9 }
 0x307   : > { %v2392_v45 = vpack.c.bf16 %v2381_v59, %v2380_v27 }
 0x309   : > { %7321 = vmatmul.mubr.msk.bf16.gmra.mrb[24].mxu1 %vm2430_vm13, %v2392_v45 }
 0x30a   : > { %7324 = vmatprep.mubr.msk.bf16.mxu1 %vm13479_vm0, %v13571_v50 }
 0x31f   : > { %v7803_v56 = vpop.permute.xlu1 %7802  ;;  %v7798_v6 = vpop.permute.xlu0 %7797 }
 0x320   : > { %v7800_v58 = vunpack.i.h.bf16 %v7798_v6  ;;  %v7799_v18 = vunpack.i.l.bf16 %v7798_v6  ;;  %v7805_v23 = vunpack.i.h.bf16 %v7803_v56  ;;  %v7804_v61 = vunpack.i.l.bf16 %v7803_v56  ;;  %v8535_v56 = vld [vmem:[%s13621_s26 + $0x8] sm:$0x7f]  }
 0x322   : > { %v2326_v49 = vsel %vm2310_vm9, %v10401_v34, %v7800_v58  ;;  %v2325_v12 = vsel %vm2310_vm9, %v10281_v13, %v7799_v18 }
 0x323   : > { %v7813_v62 = vpop.permute.xlu1 %7812  ;;  %v2344_v20 = vsel %vm2329_vm10, %v2325_v12, %v7804_v61  ;;  %v2345_v30 = vsel %vm2329_vm10, %v2326_v49, %v7805_v23  ;;  %v2897_v61 = vsel %vm13477_vm14, %v8535_v56, 0 }
 0x324   : > { %v7815_v17 = vunpack.i.h.bf16 %v7813_v62  ;;  %v7814_v24 = vunpack.i.l.bf16 %v7813_v62  ;;  %7335 = vmatpush3.bf16.msra.mxu1 %v2897_v61 }
 0x325   : > { %v7808_v39 = vpop.permute.xlu0 %7807  ;;  %7412 = vmatprep.subr.bf16.mxu1 %v13571_v50 }
 0x326   : > { %v7810_v4 = vunpack.i.h.bf16 %v7808_v39  ;;  %v7809_v11 = vunpack.i.l.bf16 %v7808_v39 }
 0x328   : > { %v7823_v63 = vpop.permute.xlu1 %7822  ;;  %v2363_v51 = vsel %vm13472_vm11, %v2344_v20, %v7809_v11  ;;  %v2364_v31 = vsel %vm13472_vm11, %v2345_v30, %v7810_v4 }
 0x329   : > { %v2382_v34 = vsel %vm2367_vm12, %v2363_v51, %v7814_v24  ;;  %v2383_v8 = vsel %vm2367_vm12, %v2364_v31, %v7815_v17  ;;  %v7825_v44 = vunpack.i.h.bf16 %v7823_v63  ;;  %v7824_v52 = vunpack.i.l.bf16 %v7823_v63 }
 0x32a   : > { %v7818_v29 = vpop.permute.xlu0 %7817  ;;  %v2393_v25 = vpack.c.bf16 %v2383_v8, %v2382_v34 }
 0x32b   : > { %v7820_v13 = vunpack.i.h.bf16 %v7818_v29  ;;  %v7819_v35 = vunpack.i.l.bf16 %v7818_v29 }
 0x32c   : > { %7325 = vmatmul.mubr.msk.bf16.gmra.mrb[28].mxu1 %vm2430_vm13, %v2393_v25 }
 0x32d   : > { %v7833_v1 = vpop.permute.xlu1 %7832  ;;  %v2328_v42 = vsel %vm2310_vm9, %v10410_v5, %v7820_v13  ;;  %v2327_v19 = vsel %vm2310_vm9, %v10405_v54, %v7819_v35  ;;  %7328 = vmatprep.mubr.msk.bf16.mxu1 %vm13479_vm0, %v13571_v50 }
 0x32e   : > { %v7835_v14 = vunpack.i.h.bf16 %v7833_v1  ;;  %v7834_v60 = vunpack.i.l.bf16 %v7833_v1  ;;  %v7828_v38 = vpop.permute.xlu0 %7827  ;;  %v2346_v15 = vsel %vm2329_vm10, %v2327_v19, %v7824_v52  ;;  %v2347_v21 = vsel %vm2329_vm10, %v2328_v42, %v7825_v44 }
 0x32f   : > { %v7830_v3 = vunpack.i.h.bf16 %v7828_v38  ;;  %v7829_v57 = vunpack.i.l.bf16 %v7828_v38 }
 0x331   : > { %v2365_v2 = vsel %vm13472_vm11, %v2346_v15, %v7829_v57  ;;  %v2366_v5 = vsel %vm13472_vm11, %v2347_v21, %v7830_v3 }
 0x332   : > { %v2384_v54 = vsel %vm2367_vm12, %v2365_v2, %v7834_v60  ;;  %v2385_v43 = vsel %vm2367_vm12, %v2366_v5, %v7835_v14 }
 0x333   : > { %v2394_v10 = vpack.c.bf16 %v2385_v43, %v2384_v54 }
 0x335   : > { %7329 = vmatmul.mubr.msk.bf16.gmra.mrb[32].mxu1 %vm2430_vm13, %v2394_v10  ;;  %vm13483_vm13 = vcmask 588800  }
 0x336   : > { %7336 = vmatprep.mubr.msk.bf16.mxu1 %vm13479_vm0, %v13571_v50 }
 0x382   : > { %v2496_v53 = vpop.f32.mrb[0].mxu1 }
 0x383   : > { %v7298_v47 = vpop.f32.mrb[1].mxu1  ;;  %v2497_v55 = vadd.f32 %v10601_v48, %v2496_v53 }
 0x384   : > { %v2499_v0 = vpop.f32.mrb[2].mxu1 }
 0x385   : > { %v2500_v16 = vadd.f32 %v10601_v48, %v2499_v0  ;;  %v7299_v46 = vpop.f32.mrb[3].mxu1  ;;  %v10607_v37 = vmax.f32 %v2497_v55, 0.0 }
 0x387   : > { %v10605_v9 = vmax.f32 %v2500_v16, 0.0  ;;  %v2621_v45 = vrot.slane %v10607_v37, 2  ;;  %v2585_v6 = vrot.slane %v10607_v37, 1 }
 0x389   : > { %v2622_v26 = vrot.slane %v10605_v9, 2  ;;  %v2586_v40 = vrot.slane %v10605_v9, 1 }
 0x38a   : > { %v2504_v32 = vpop.f32.mrb[4].mxu1 }
 0x38b   : > { %v2505_v28 = vadd.f32 %v10601_v48, %v2504_v32  ;;  %v7302_v36 = vpop.f32.mrb[5].mxu1  ;;  %v2655_v23 = vsel %vm1181_vm2, %v2621_v45, %v2622_v26  ;;  %v2619_v17 = vsel %vm1072_vm1, %v2585_v6, %v2586_v40 }
 0x38c   : > { %v2507_v33 = vpop.f32.mrb[6].mxu1 }
 0x38d   : > { %v10612_v7 = vmax.f32 %v2505_v28, 0.0  ;;  %v2508_v27 = vadd.f32 %v10601_v48, %v2507_v33  ;;  %v7303_v59 = vpop.f32.mrb[7].mxu1 }
 0x38f   : > { %v2587_v58 = vrot.slane %v10612_v7, 1  ;;  %v2623_v18 = vrot.slane %v10612_v7, 2  ;;  %v10627_v62 = vmax.f32 %v2508_v27, 0.0 }
 0x391   : > { %v2654_v49 = vsel %vm1181_vm2, %v2622_v26, %v2623_v18  ;;  %v2618_v12 = vsel %vm1072_vm1, %v2586_v40, %v2587_v58  ;;  %v2588_v63 = vrot.slane %v10627_v62, 1  ;;  %v2624_v51 = vrot.slane %v10627_v62, 2 }
 0x392   : > { %v7841_v39 = vpack.i.bf16 %v2654_v49, %v2655_v23  ;;  %v7836_v4 = vpack.i.bf16 %v2618_v12, %v2619_v17 }
 0x393   : > { %v2512_v24 = vpop.f32.mrb[8].mxu1  ;;  %v2653_v44 = vsel %vm1181_vm2, %v2623_v18, %v2624_v51  ;;  %v2617_v1 = vsel %vm1072_vm1, %v2587_v58, %v2588_v63 }
 0x394   : > { %v2513_v11 = vadd.f32 %v10601_v48, %v2512_v24  ;;  %v7306_v20 = vpop.f32.mrb[9].mxu1  ;;  %7842 = vrot.lane.b32.xlu1 %v7841_v39, %s8651_s0  ;;  %7837 = vrot.lane.b32.xlu0 %v7836_v4, %s8650_s19 }
 0x395   : > { %v2515_v30 = vpop.f32.mrb[10].mxu1 }
 0x396   : > { %v10643_v31 = vmax.f32 %v2513_v11, 0.0  ;;  %v2516_v29 = vadd.f32 %v10601_v48, %v2515_v30  ;;  %v7307_v34 = vpop.f32.mrb[11].mxu1 }
 0x398   : > { %v2589_v8 = vrot.slane %v10643_v31, 1  ;;  %v2625_v13 = vrot.slane %v10643_v31, 2  ;;  %v10648_v35 = vmax.f32 %v2516_v29, 0.0 }
 0x39a   : > { %v2652_v25 = vsel %vm1181_vm2, %v2624_v51, %v2625_v13  ;;  %v2616_v52 = vsel %vm1072_vm1, %v2588_v63, %v2589_v8  ;;  %v2626_v3 = vrot.slane %v10648_v35, 2  ;;  %v2590_v15 = vrot.slane %v10648_v35, 1 }
 0x39b   : > { %v2520_v42 = vpop.f32.mrb[12].mxu1  ;;  %v7851_v19 = vpack.i.bf16 %v2652_v25, %v2653_v44  ;;  %v7846_v14 = vpack.i.bf16 %v2616_v52, %v2617_v1 }
 0x39c   : > { %v2521_v60 = vadd.f32 %v10601_v48, %v2520_v42  ;;  %v7310_v38 = vpop.f32.mrb[13].mxu1  ;;  %v2651_v10 = vsel %vm1181_vm2, %v2625_v13, %v2626_v3  ;;  %v2615_v0 = vsel %vm1072_vm1, %v2589_v8, %v2590_v15 }
 0x39d   : > { %7852 = vrot.lane.b32.xlu1 %v7851_v19, %s8651_s0  ;;  %7847 = vrot.lane.b32.xlu0 %v7846_v14, %s8650_s19  ;;  %v2523_v57 = vpop.f32.mrb[14].mxu1 }
 0x39e   : > { %v10663_v21 = vmax.f32 %v2521_v60, 0.0  ;;  %v2524_v2 = vadd.f32 %v10601_v48, %v2523_v57  ;;  %v7311_v5 = vpop.f32.mrb[15].mxu1 }
 0x3a0   : > { %v2591_v54 = vrot.slane %v10663_v21, 1  ;;  %v2627_v43 = vrot.slane %v10663_v21, 2  ;;  %v10670_v22 = vmax.f32 %v2524_v2, 0.0 }
 0x3a2   : > { %v2650_v53 = vsel %vm1181_vm2, %v2626_v3, %v2627_v43  ;;  %v2614_v47 = vsel %vm1072_vm1, %v2590_v15, %v2591_v54  ;;  %v2592_v26 = vrot.slane %v10670_v22, 1  ;;  %v2628_v33 = vrot.slane %v10670_v22, 2 }
 0x3a3   : > { %v2528_v16 = vpop.f32.mrb[16].mxu1  ;;  %v7861_v46 = vpack.i.bf16 %v2650_v53, %v2651_v10  ;;  %v7856_v55 = vpack.i.bf16 %v2614_v47, %v2615_v0 }
 0x3a4   : > { %v2529_v32 = vadd.f32 %v10601_v48, %v2528_v16  ;;  %v7314_v28 = vpop.f32.mrb[17].mxu1  ;;  %v2649_v18 = vsel %vm1181_vm2, %v2627_v43, %v2628_v33  ;;  %v2613_v61 = vsel %vm1072_vm1, %v2591_v54, %v2592_v26 }
 0x3a5   : > { %7862 = vrot.lane.b32.xlu1 %v7861_v46, %s8651_s0  ;;  %7857 = vrot.lane.b32.xlu0 %v7856_v55, %s8650_s19  ;;  %v2531_v36 = vpop.f32.mrb[18].mxu1 }
 0x3a6   : > { %v10683_v40 = vmax.f32 %v2529_v32, 0.0  ;;  %v7315_v27 = vpop.f32.mrb[19].mxu1  ;;  %v2532_v17 = vadd.f32 %v10601_v48, %v2531_v36 }
 0x3a8   : > { %v2593_v59 = vrot.slane %v10683_v40, 1  ;;  %v2629_v56 = vrot.slane %v10683_v40, 2  ;;  %v10698_v24 = vmax.f32 %v2532_v17, 0.0 }
 0x3aa   : > { %v2648_v58 = vsel %vm1181_vm2, %v2628_v33, %v2629_v56  ;;  %v2612_v23 = vsel %vm1072_vm1, %v2592_v26, %v2593_v59  ;;  %v2594_v30 = vrot.slane %v10698_v24, 1  ;;  %v2630_v63 = vrot.slane %v10698_v24, 2 }
 0x3ab   : > { %v7871_v49 = vpack.i.bf16 %v2648_v58, %v2649_v18  ;;  %v7866_v12 = vpack.i.bf16 %v2612_v23, %v2613_v61 }
 0x3ac   : > { %v2647_v25 = vsel %vm1181_vm2, %v2629_v56, %v2630_v63  ;;  %v2611_v52 = vsel %vm1072_vm1, %v2593_v59, %v2594_v30 }
 0x3ad   : > { %7872 = vrot.lane.b32.xlu1 %v7871_v49, %s8651_s0  ;;  %7867 = vrot.lane.b32.xlu0 %v7866_v12, %s8650_s19 }
 0x3bc   : > { %v2536_v39 = vpop.f32.mrb[20].mxu1 }
 0x3bd   : > { %v2537_v4 = vadd.f32 %v10601_v48, %v2536_v39  ;;  %v7318_v11 = vpop.f32.mrb[21].mxu1 }
 0x3be   : > { %v2539_v20 = vpop.f32.mrb[22].mxu1 }
 0x3bf   : > { %v10703_v51 = vmax.f32 %v2537_v4, 0.0  ;;  %v7319_v29 = vpop.f32.mrb[23].mxu1  ;;  %v2540_v19 = vadd.f32 %v10601_v48, %v2539_v20 }
 0x3c1   : > { %v2595_v34 = vrot.slane %v10703_v51, 1  ;;  %v2631_v8 = vrot.slane %v10703_v51, 2  ;;  %v10718_v14 = vmax.f32 %v2540_v19, 0.0 }
 0x3c3   : > { %v2646_v13 = vsel %vm1181_vm2, %v2630_v63, %v2631_v8  ;;  %v2610_v44 = vsel %vm1072_vm1, %v2594_v30, %v2595_v34  ;;  %v2596_v15 = vrot.slane %v10718_v14, 1  ;;  %v2632_v2 = vrot.slane %v10718_v14, 2 }
 0x3c4   : > { %v7881_v1 = vpack.i.bf16 %v2646_v13, %v2647_v25  ;;  %v7876_v42 = vpack.i.bf16 %v2610_v44, %v2611_v52 }
 0x3c5   : > { %v2645_v47 = vsel %vm1181_vm2, %v2631_v8, %v2632_v2  ;;  %v2609_v16 = vsel %vm1072_vm1, %v2595_v34, %v2596_v15 }
 0x3c6   : > { %7882 = vrot.lane.b32.xlu1 %v7881_v1, %s8651_s0  ;;  %7877 = vrot.lane.b32.xlu0 %v7876_v42, %s8650_s19 }
 0x3dc   : > { %v2544_v60 = vpop.f32.mrb[24].mxu1 }
 0x3dd   : > { %v2545_v38 = vadd.f32 %v10601_v48, %v2544_v60  ;;  %v7322_v3 = vpop.f32.mrb[25].mxu1 }
 0x3de   : > { %v2547_v57 = vpop.f32.mrb[26].mxu1 }
 0x3df   : > { %v10723_v5 = vmax.f32 %v2545_v38, 0.0  ;;  %v7323_v54 = vpop.f32.mrb[27].mxu1  ;;  %v2548_v32 = vadd.f32 %v10601_v48, %v2547_v57 }
 0x3e1   : > { %v2597_v43 = vrot.slane %v10723_v5, 1  ;;  %v2633_v10 = vrot.slane %v10723_v5, 2  ;;  %v10738_v28 = vmax.f32 %v2548_v32, 0.0 }
 0x3e3   : > { %v2644_v53 = vsel %vm1181_vm2, %v2632_v2, %v2633_v10  ;;  %v2608_v0 = vsel %vm1072_vm1, %v2596_v15, %v2597_v43  ;;  %v2598_v59 = vrot.slane %v10738_v28, 1  ;;  %v2634_v56 = vrot.slane %v10738_v28, 2 }
 0x3e4   : > { %v7891_v46 = vpack.i.bf16 %v2644_v53, %v2645_v47  ;;  %v7886_v55 = vpack.i.bf16 %v2608_v0, %v2609_v16 }
 0x3e5   : > { %v2643_v11 = vsel %vm1181_vm2, %v2633_v10, %v2634_v56  ;;  %v2607_v30 = vsel %vm1072_vm1, %v2597_v43, %v2598_v59 }
 0x3e6   : > { %7892 = vrot.lane.b32.xlu1 %v7891_v46, %s8651_s0  ;;  %7887 = vrot.lane.b32.xlu0 %v7886_v55, %s8650_s19 }
 0x3ff   : > { %v2552_v36 = vpop.f32.mrb[28].mxu1 }
 0x400   : > { %v2553_v26 = vadd.f32 %v10601_v48, %v2552_v36  ;;  %v7326_v33 = vpop.f32.mrb[29].mxu1 }
 0x401   : > { %v2555_v27 = vpop.f32.mrb[30].mxu1 }
 0x402   : > { %v10743_v58 = vmax.f32 %v2553_v26, 0.0  ;;  %v2556_v18 = vadd.f32 %v10601_v48, %v2555_v27  ;;  %v7327_v23 = vpop.f32.mrb[31].mxu1 }
 0x404   : > { %v2599_v61 = vrot.slane %v10743_v58, 1  ;;  %v2635_v49 = vrot.slane %v10743_v58, 2  ;;  %v10748_v12 = vmax.f32 %v2556_v18, 0.0 }
 0x406   : > { %v7843_v17 = vpop.permute.xlu1 %7842  ;;  %v7838_v39 = vpop.permute.xlu0 %7837  ;;  %v2642_v4 = vsel %vm1181_vm2, %v2634_v56, %v2635_v49  ;;  %v2606_v20 = vsel %vm1072_vm1, %v2598_v59, %v2599_v61  ;;  %v2600_v42 = vrot.slane %v10748_v12, 1  ;;  %v2636_v19 = vrot.slane %v10748_v12, 2 }
 0x407   : > { %v7845_v29 = vunpack.i.h.bf16 %v7843_v17  ;;  %v7844_v34 = vunpack.i.l.bf16 %v7843_v17  ;;  %v7840_v8 = vunpack.i.h.bf16 %v7838_v39  ;;  %v7839_v13 = vunpack.i.l.bf16 %v7838_v39 }
 0x408   : > { %v2560_v63 = vpop.f32.mrb[32].mxu1  ;;  %v7901_v52 = vpack.i.bf16 %v2642_v4, %v2643_v11  ;;  %v7896_v1 = vpack.i.bf16 %v2606_v20, %v2607_v30  ;;  %v2641_v0 = vsel %vm1181_vm2, %v2635_v49, %v2636_v19  ;;  %v2605_v16 = vsel %vm1072_vm1, %v2599_v61, %v2600_v42 }
 0x409   : > { %v2561_v25 = vadd.f32 %v10601_v48, %v2560_v63  ;;  %v7330_v44 = vpop.f32.mrb[33].mxu1  ;;  %v2802_v60 = vsel %vm2310_vm9, %v10605_v9, %v7840_v8  ;;  %v2801_v38 = vsel %vm2310_vm9, %v10607_v37, %v7839_v13 }
 0x40a   : > { %v2563_v3 = vpop.f32.mrb[34].mxu1  ;;  %v2820_v15 = vsel %vm2329_vm10, %v2802_v60, %v7845_v29  ;;  %v2819_v2 = vsel %vm2329_vm10, %v2801_v38, %v7844_v34  ;;  %7902 = vrot.lane.b32.xlu1 %v7901_v52, %s8651_s0  ;;  %7897 = vrot.lane.b32.xlu0 %v7896_v1, %s8650_s19 }
 0x40b   : > { %v10765_v57 = vmax.f32 %v2561_v25, 0.0  ;;  %v2564_v54 = vadd.f32 %v10601_v48, %v2563_v3  ;;  %v7331_v43 = vpop.f32.mrb[35].mxu1  ;;  %v2837_v10 = vpack.c.bf16 %v2820_v15, %v2819_v2 }
 0x40d   : > { %v2601_v9 = vrot.slane %v10765_v57, 1  ;;  %v2637_v53 = vrot.slane %v10765_v57, 2  ;;  %v10774_v47 = vmax.f32 %v2564_v54, 0.0  ;;  %7337 = vmatmul.mubr.msk.bf16.vlgmr.msra.gmra.mrb[36].mxu1 %vm13472_vm11, %v2837_v10 }
 0x40e   : > { %7340 = vmatprep.mubr.msk.bf16.mxu1 %vm13479_vm0, %v13571_v50 }
 0x40f   : > { %v2602_v46 = vrot.slane %v10774_v47, 1  ;;  %v2638_v48 = vrot.slane %v10774_v47, 2  ;;  %v7853_v55 = vpop.permute.xlu1 %7852  ;;  %v7848_v32 = vpop.permute.xlu0 %7847  ;;  %v2640_v36 = vsel %vm1181_vm2, %v2636_v19, %v2637_v53  ;;  %v2604_v26 = vsel %vm1072_vm1, %v2600_v42, %v2601_v9 }
 0x410   : > { %v7855_v33 = vunpack.i.h.bf16 %v7853_v55  ;;  %v7854_v27 = vunpack.i.l.bf16 %v7853_v55  ;;  %v7850_v59 = vunpack.i.h.bf16 %v7848_v32  ;;  %v7849_v56 = vunpack.i.l.bf16 %v7848_v32 }
 0x411   : > { %v7911_v18 = vpack.i.bf16 %v2640_v36, %v2641_v0  ;;  %v7906_v23 = vpack.i.bf16 %v2604_v26, %v2605_v16  ;;  %v2639_v61 = vsel %vm1181_vm2, %v2637_v53, %v2638_v48  ;;  %v2656_v39 = vsel %vm1181_vm2, %v2638_v48, %v2621_v45 }
 0x412   : > { %v2804_v49 = vsel %vm2310_vm9, %v10627_v62, %v7850_v59  ;;  %v2803_v17 = vsel %vm2310_vm9, %v10612_v7, %v7849_v56  ;;  %v2603_v4 = vsel %vm1072_vm1, %v2601_v9, %v2602_v46  ;;  %v2620_v62 = vsel %vm1072_vm1, %v2602_v46, %v2585_v6 }
 0x413   : > { %7912 = vrot.lane.b32.xlu1 %v7911_v18, %s8651_s0  ;;  %7907 = vrot.lane.b32.xlu0 %v7906_v23, %s8650_s19  ;;  %v2821_v11 = vsel %vm2329_vm10, %v2803_v17, %v7854_v27  ;;  %v2822_v7 = vsel %vm2329_vm10, %v2804_v49, %v7855_v33  ;;  %v7921_v30 = vpack.i.bf16 %v2656_v39, %v2639_v61 }
 0x414   : > { %v2838_v20 = vpack.c.bf16 %v2822_v7, %v2821_v11  ;;  %v7916_v63 = vpack.i.bf16 %v2620_v62, %v2603_v4 }
 0x416   : > { %7341 = vmatmul.mubr.msk.bf16.gmra.mrb[40].mxu1 %vm13472_vm11, %v2838_v20 }
 0x417   : > { %7922 = vrot.lane.b32.xlu1 %v7921_v30, %s8651_s0  ;;  %7917 = vrot.lane.b32.xlu0 %v7916_v63, %s8650_s19  ;;  %v7863_v45 = vpop.permute.xlu1 %7862  ;;  %v7858_v29 = vpop.permute.xlu0 %7857 }
 0x418   : > { %v7865_v34 = vunpack.i.h.bf16 %v7863_v45  ;;  %v7864_v37 = vunpack.i.l.bf16 %v7863_v45  ;;  %v7860_v8 = vunpack.i.h.bf16 %v7858_v29  ;;  %v7859_v13 = vunpack.i.l.bf16 %v7858_v29  ;;  %7344 = vmatprep.mubr.msk.bf16.mxu1 %vm13479_vm0, %v13571_v50 }
 0x41a   : > { %v2806_v6 = vsel %vm2310_vm9, %v10648_v35, %v7860_v8  ;;  %v2805_v25 = vsel %vm2310_vm9, %v10643_v31, %v7859_v13 }
 0x41b   : > { %v2823_v44 = vsel %vm2329_vm10, %v2805_v25, %v7864_v37  ;;  %v2824_v52 = vsel %vm2329_vm10, %v2806_v6, %v7865_v34 }
 0x41c   : > { %v2839_v1 = vpack.c.bf16 %v2824_v52, %v2823_v44 }
 0x41e   : > { %7345 = vmatmul.mubr.msk.bf16.gmra.mrb[44].mxu1 %vm13472_vm11, %v2839_v1 }
 0x41f   : > { %v7873_v42 = vpop.permute.xlu1 %7872  ;;  %v7868_v19 = vpop.permute.xlu0 %7867  ;;  %7348 = vmatprep.mubr.msk.bf16.mxu1 %vm13479_vm0, %v13571_v50 }
 0x420   : > { %v7875_v60 = vunpack.i.h.bf16 %v7873_v42  ;;  %v7874_v38 = vunpack.i.l.bf16 %v7873_v42  ;;  %v7870_v3 = vunpack.i.h.bf16 %v7868_v19  ;;  %v7869_v15 = vunpack.i.l.bf16 %v7868_v19 }
 0x422   : > { %v2808_v35 = vsel %vm2310_vm9, %v10670_v22, %v7870_v3  ;;  %v2807_v31 = vsel %vm2310_vm9, %v10663_v21, %v7869_v15 }
 0x423   : > { %v2825_v2 = vsel %vm2329_vm10, %v2807_v31, %v7874_v38  ;;  %v2826_v54 = vsel %vm2329_vm10, %v2808_v35, %v7875_v60 }
 0x424   : > { %v2840_v43 = vpack.c.bf16 %v2826_v54, %v2825_v2 }
 0x426   : > { %7349 = vmatmul.mubr.msk.bf16.gmra.mrb[48].mxu1 %vm13472_vm11, %v2840_v43 }
 0x427   : > { %7352 = vmatprep.mubr.msk.bf16.mxu1 %vm13479_vm0, %v13571_v50 }
 0x438   : > { %v7883_v10 = vpop.permute.xlu1 %7882  ;;  %v7878_v9 = vpop.permute.xlu0 %7877 }
 0x439   : > { %v7885_v53 = vunpack.i.h.bf16 %v7883_v10  ;;  %v7884_v0 = vunpack.i.l.bf16 %v7883_v10  ;;  %v7880_v16 = vunpack.i.h.bf16 %v7878_v9  ;;  %v7879_v46 = vunpack.i.l.bf16 %v7878_v9 }
 0x43b   : > { %v2810_v22 = vsel %vm2310_vm9, %v10698_v24, %v7880_v16  ;;  %v2809_v21 = vsel %vm2310_vm9, %v10683_v40, %v7879_v46 }
 0x43c   : > { %v2827_v48 = vsel %vm2329_vm10, %v2809_v21, %v7884_v0  ;;  %v2828_v55 = vsel %vm2329_vm10, %v2810_v22, %v7885_v53 }
 0x43d   : > { %v2841_v32 = vpack.c.bf16 %v2828_v55, %v2827_v48 }
 0x43f   : > { %7353 = vmatmul.mubr.msk.bf16.gmra.mrb[52].mxu1 %vm13472_vm11, %v2841_v32 }
 0x440   : > { %7356 = vmatprep.mubr.msk.bf16.mxu1 %vm13479_vm0, %v13571_v50 }
 0x458   : > { %v7893_v36 = vpop.permute.xlu1 %7892  ;;  %v7888_v26 = vpop.permute.xlu0 %7887 }
 0x459   : > { %v7895_v33 = vunpack.i.h.bf16 %v7893_v36  ;;  %v7894_v27 = vunpack.i.l.bf16 %v7893_v36  ;;  %v7890_v59 = vunpack.i.h.bf16 %v7888_v26  ;;  %v7889_v56 = vunpack.i.l.bf16 %v7888_v26 }
 0x45b   : > { %v2812_v24 = vsel %vm2310_vm9, %v10718_v14, %v7890_v59  ;;  %v2811_v40 = vsel %vm2310_vm9, %v10703_v51, %v7889_v56 }
 0x45c   : > { %v2829_v18 = vsel %vm2329_vm10, %v2811_v40, %v7894_v27  ;;  %v2830_v23 = vsel %vm2329_vm10, %v2812_v24, %v7895_v33 }
 0x45d   : > { %v2842_v61 = vpack.c.bf16 %v2830_v23, %v2829_v18 }
 0x45f   : > { %7357 = vmatmul.mubr.msk.bf16.gmra.mrb[56].mxu1 %vm13472_vm11, %v2842_v61 }
 0x460   : > { %7360 = vmatprep.mubr.msk.bf16.mxu1 %vm13479_vm0, %v13571_v50 }
 0x47c   : > { %v7903_v49 = vpop.permute.xlu1 %7902  ;;  %v7898_v17 = vpop.permute.xlu0 %7897 }
 0x47d   : > { %v7905_v39 = vunpack.i.h.bf16 %v7903_v49  ;;  %v7904_v4 = vunpack.i.l.bf16 %v7903_v49  ;;  %v7900_v62 = vunpack.i.h.bf16 %v7898_v17  ;;  %v7899_v11 = vunpack.i.l.bf16 %v7898_v17 }
 0x47f   : > { %v2814_v14 = vsel %vm2310_vm9, %v10738_v28, %v7900_v62  ;;  %v2813_v51 = vsel %vm2310_vm9, %v10723_v5, %v7899_v11 }
 0x480   : > { %v2831_v7 = vsel %vm2329_vm10, %v2813_v51, %v7904_v4  ;;  %v2832_v20 = vsel %vm2329_vm10, %v2814_v14, %v7905_v39 }
 0x481   : > { %v2843_v30 = vpack.c.bf16 %v2832_v20, %v2831_v7 }
 0x483   : > { %7361 = vmatmul.mubr.msk.bf16.gmra.mrb[60].mxu1 %vm13472_vm11, %v2843_v30 }
 0x484   : > { %7364 = vmatprep.mubr.msk.bf16.mxu1 %vm13479_vm0, %v13571_v50 }
 0x485   : > { %v7913_v63 = vpop.permute.xlu1 %7912  ;;  %v7908_v45 = vpop.permute.xlu0 %7907 }
 0x486   : > { %v7915_v29 = vunpack.i.h.bf16 %v7913_v63  ;;  %v7914_v34 = vunpack.i.l.bf16 %v7913_v63  ;;  %v7910_v37 = vunpack.i.h.bf16 %v7908_v45  ;;  %v7909_v8 = vunpack.i.l.bf16 %v7908_v45 }
 0x488   : > { %v2816_v28 = vsel %vm2310_vm9, %v10748_v12, %v7910_v37  ;;  %v2815_v5 = vsel %vm2310_vm9, %v10743_v58, %v7909_v8 }
 0x489   : > { %v7923_v13 = vpop.permute.xlu1 %7922  ;;  %v7918_v6 = vpop.permute.xlu0 %7917  ;;  %v2833_v25 = vsel %vm2329_vm10, %v2815_v5, %v7914_v34  ;;  %v2834_v44 = vsel %vm2329_vm10, %v2816_v28, %v7915_v29 }
 0x48a   : > { %v7920_v52 = vunpack.i.h.bf16 %v7918_v6  ;;  %v7919_v1 = vunpack.i.l.bf16 %v7918_v6  ;;  %v2844_v42 = vpack.c.bf16 %v2834_v44, %v2833_v25  ;;  %v7925_v19 = vunpack.i.h.bf16 %v7923_v13 }
 0x48b   : > { %v7924_v60 = vunpack.i.l.bf16 %v7923_v13 }
 0x48c   : > { %v2818_v38 = vsel %vm2310_vm9, %v10774_v47, %v7920_v52  ;;  %v2817_v12 = vsel %vm2310_vm9, %v10765_v57, %v7919_v1  ;;  %7365 = vmatmul.mubr.msk.bf16.gmra.mrb[64].mxu1 %vm13472_vm11, %v2844_v42  ;;  %v8536_v47 = vld [vmem:[%s13623_s6] sm:$0xff]  }
 0x48d   : > { %7368 = vmatprep.mubr.msk.bf16.mxu1 %vm13479_vm0, %v13571_v50  ;;  %v2835_v58 = vsel %vm2329_vm10, %v2817_v12, %v7924_v60  ;;  %v2836_v3 = vsel %vm2329_vm10, %v2818_v38, %v7925_v19  ;;  %7373 = vmatpush3.bf16.msra.mxu0 %v8536_v47  ;;  %v10884_v57 = vld [vmem:[%s13624_s25] ss:$0 sm:$0xff]  ;;  %v8537_v60 = vld [vmem:[%s13623_s6 + $0x8] sm:$0x7f]   ;;  %s13462_s25 = smov 64  }
 0x48e   : > { %v2845_v15 = vpack.c.bf16 %v2836_v3, %v2835_v58  ;;  %7374 = vmatprep.subr.bf16.mxu0 %v13571_v50 }
 0x494   : > { %7369 = vmatmul.mubr.msk.bf16.gmra.mrb[68].mxu1 %vm13472_vm11, %v2845_v15 }
 0x495   : > { %7428 = vmatprep.mubr.msk.bf16.mxu1 %vm13479_vm0, %v13571_v50 }
 0x4e0   : > { %v2933_v35 = vpop.f32.mrb[36].mxu1 }
 0x4e1   : > { %v10887_v31 = vadd.f32 %v10884_v57, %v2933_v35  ;;  %v7338_v2 = vpop.f32.mrb[37].mxu1 }
 0x4e2   : > { %v2936_v54 = vpop.f32.mrb[38].mxu1 }
 0x4e3   : > { %v2937_v43 = vadd.f32 %v10884_v57, %v2936_v54  ;;  %v7339_v10 = vpop.f32.mrb[39].mxu1  ;;  %v3004_v9 = vrot.slane %v10887_v31, 1  ;;  %v3058_v16 = vrot.slane %v10887_v31, 2 }
 0x4e5   : > { %v3005_v53 = vrot.slane %v2937_v43, 1  ;;  %v3059_v0 = vrot.slane %v2937_v43, 2 }
 0x4e7   : > { %v3038_v46 = vsel %vm1072_vm1, %v3004_v9, %v3005_v53  ;;  %v3092_v48 = vsel %vm1181_vm2, %v3058_v16, %v3059_v0 }
 0x4e8   : > { %v3040_v22 = vmax.f32 %v10887_v31, %v3038_v46  ;;  %v3441_v46 = vsel %vm13477_vm14, %v8537_v60, 0  ;;  %vm5116_vm14 = vcmask 523264  }
 0x4e9   : > { %v2941_v21 = vpop.f32.mrb[40].mxu1  ;;  %7375 = vmatpush3.bf16.msra.mxu0 %v3441_v46 }
 0x4ea   : > { %v2942_v55 = vadd.f32 %v10884_v57, %v2941_v21  ;;  %v7342_v32 = vpop.f32.mrb[41].mxu1  ;;  %v3094_v36 = vmax.f32 %v3040_v22, %v3092_v48 }
 0x4eb   : > { %v2944_v26 = vpop.f32.mrb[42].mxu1 }
 0x4ec   : > { %v3006_v33 = vrot.slane %v2942_v55, 1  ;;  %v3060_v27 = vrot.slane %v2942_v55, 2  ;;  %v2945_v59 = vadd.f32 %v10884_v57, %v2944_v26  ;;  %v7343_v56 = vpop.f32.mrb[43].mxu1  ;;  %v10907_v49 = vmax.f32 %v3094_v36, 0.0 }
 0x4ee   : > { %v3037_v24 = vsel %vm1072_vm1, %v3005_v53, %v3006_v33  ;;  %v3091_v40 = vsel %vm1181_vm2, %v3059_v0, %v3060_v27  ;;  %v3007_v18 = vrot.slane %v2945_v59, 1  ;;  %v3061_v23 = vrot.slane %v2945_v59, 2 }
 0x4ef   : > { %v3041_v61 = vmax.f32 %v2937_v43, %v3037_v24  ;;  %v3166_v37 = vrot.slane %v10907_v49, 2  ;;  %v3130_v5 = vrot.slane %v10907_v49, 1 }
 0x4f0   : > { %v3036_v17 = vsel %vm1072_vm1, %v3006_v33, %v3007_v18  ;;  %v3090_v39 = vsel %vm1181_vm2, %v3060_v27, %v3061_v23 }
 0x4f1   : > { %v3095_v4 = vmax.f32 %v3041_v61, %v3091_v40  ;;  %v3042_v62 = vmax.f32 %v2942_v55, %v3036_v17  ;;  %v2949_v11 = vpop.f32.mrb[44].mxu1 }
 0x4f2   : > { %v2950_v14 = vadd.f32 %v10884_v57, %v2949_v11  ;;  %v7346_v51 = vpop.f32.mrb[45].mxu1 }
 0x4f3   : > { %v10914_v7 = vmax.f32 %v3095_v4, 0.0  ;;  %v3096_v20 = vmax.f32 %v3042_v62, %v3090_v39  ;;  %v2952_v30 = vpop.f32.mrb[46].mxu1 }
 0x4f4   : > { %v3008_v63 = vrot.slane %v2950_v14, 1  ;;  %v3062_v45 = vrot.slane %v2950_v14, 2  ;;  %v2953_v29 = vadd.f32 %v10884_v57, %v2952_v30  ;;  %v7347_v34 = vpop.f32.mrb[47].mxu1 }
 0x4f5   : > { %v10918_v8 = vmax.f32 %v3096_v20, 0.0  ;;  %v3167_v28 = vrot.slane %v10914_v7, 2  ;;  %v3131_v13 = vrot.slane %v10914_v7, 1 }
 0x4f6   : > { %v3035_v6 = vsel %vm1072_vm1, %v3007_v18, %v3008_v63  ;;  %v3089_v25 = vsel %vm1181_vm2, %v3061_v23, %v3062_v45  ;;  %v3009_v44 = vrot.slane %v2953_v29, 1  ;;  %v3063_v52 = vrot.slane %v2953_v29, 2 }
 0x4f7   : > { %v3043_v1 = vmax.f32 %v2945_v59, %v3035_v6  ;;  %v3168_v42 = vrot.slane %v10918_v8, 2  ;;  %v3132_v19 = vrot.slane %v10918_v8, 1  ;;  %v3200_v58 = vsel %vm1181_vm2, %v3166_v37, %v3167_v28 }
 0x4f8   : > { %v3034_v38 = vsel %vm1072_vm1, %v3008_v63, %v3009_v44  ;;  %v3088_v12 = vsel %vm1181_vm2, %v3062_v45, %v3063_v52  ;;  %v3164_v3 = vsel %vm1072_vm1, %v3130_v5, %v3131_v13 }
 0x4f9   : > { %v3097_v15 = vmax.f32 %v3043_v1, %v3089_v25  ;;  %v3044_v47 = vmax.f32 %v2950_v14, %v3034_v38  ;;  %v2957_v35 = vpop.f32.mrb[48].mxu1  ;;  %v3199_v2 = vsel %vm1181_vm2, %v3167_v28, %v3168_v42  ;;  %v3163_v54 = vsel %vm1072_vm1, %v3131_v13, %v3132_v19 }
 0x4fa   : > { %v2958_v43 = vadd.f32 %v10884_v57, %v2957_v35  ;;  %v7350_v10 = vpop.f32.mrb[49].mxu1  ;;  %v7931_v53 = vpack.i.bf16 %v3199_v2, %v3200_v58  ;;  %v7926_v0 = vpack.i.bf16 %v3163_v54, %v3164_v3 }
 0x4fb   : > { %v10950_v22 = vmax.f32 %v3097_v15, 0.0  ;;  %v3098_v21 = vmax.f32 %v3044_v47, %v3088_v12  ;;  %v2960_v48 = vpop.f32.mrb[50].mxu1 }
 0x4fc   : > { %v3010_v55 = vrot.slane %v2958_v43, 1  ;;  %v3064_v32 = vrot.slane %v2958_v43, 2  ;;  %v2961_v36 = vadd.f32 %v10884_v57, %v2960_v48  ;;  %7932 = vrot.lane.b32.xlu1 %v7931_v53, %s8651_s0  ;;  %7927 = vrot.lane.b32.xlu0 %v7926_v0, %s8650_s19  ;;  %v7351_v26 = vpop.f32.mrb[51].mxu1 }
 0x4fd   : > { %v10955_v33 = vmax.f32 %v3098_v21, 0.0  ;;  %v3169_v27 = vrot.slane %v10950_v22, 2  ;;  %v3133_v59 = vrot.slane %v10950_v22, 1 }
 0x4fe   : > { %v3033_v56 = vsel %vm1072_vm1, %v3009_v44, %v3010_v55  ;;  %v3087_v24 = vsel %vm1181_vm2, %v3063_v52, %v3064_v32  ;;  %v3011_v40 = vrot.slane %v2961_v36, 1  ;;  %v3065_v18 = vrot.slane %v2961_v36, 2 }
 0x4ff   : > { %v3045_v23 = vmax.f32 %v2953_v29, %v3033_v56  ;;  %v3170_v61 = vrot.slane %v10955_v33, 2  ;;  %v3134_v17 = vrot.slane %v10955_v33, 1  ;;  %v3198_v62 = vsel %vm1181_vm2, %v3168_v42, %v3169_v27 }
 0x500   : > { %v3032_v39 = vsel %vm1072_vm1, %v3010_v55, %v3011_v40  ;;  %v3086_v4 = vsel %vm1181_vm2, %v3064_v32, %v3065_v18  ;;  %v3162_v11 = vsel %vm1072_vm1, %v3132_v19, %v3133_v59 }
 0x501   : > { %v3099_v14 = vmax.f32 %v3045_v23, %v3087_v24  ;;  %v3046_v51 = vmax.f32 %v2958_v43, %v3032_v39  ;;  %v3197_v20 = vsel %vm1181_vm2, %v3169_v27, %v3170_v61  ;;  %v3161_v30 = vsel %vm1072_vm1, %v3133_v59, %v3134_v17 }
 0x502   : > { %v7941_v63 = vpack.i.bf16 %v3197_v20, %v3198_v62  ;;  %v7936_v45 = vpack.i.bf16 %v3161_v30, %v3162_v11 }
 0x503   : > { %v10977_v29 = vmax.f32 %v3099_v14, 0.0  ;;  %v3100_v34 = vmax.f32 %v3046_v51, %v3086_v4 }
 0x504   : > { %7942 = vrot.lane.b32.xlu1 %v7941_v63, %s8651_s0  ;;  %7937 = vrot.lane.b32.xlu0 %v7936_v45, %s8650_s19 }
 0x505   : > { %v10981_v28 = vmax.f32 %v3100_v34, 0.0  ;;  %v3171_v13 = vrot.slane %v10977_v29, 2  ;;  %v3135_v6 = vrot.slane %v10977_v29, 1 }
 0x507   : > { %v3172_v25 = vrot.slane %v10981_v28, 2  ;;  %v3136_v44 = vrot.slane %v10981_v28, 1  ;;  %v3196_v1 = vsel %vm1181_vm2, %v3170_v61, %v3171_v13  ;;  %v3160_v19 = vsel %vm1072_vm1, %v3134_v17, %v3135_v6 }
 0x509   : > { %v3195_v52 = vsel %vm1181_vm2, %v3171_v13, %v3172_v25  ;;  %v3159_v42 = vsel %vm1072_vm1, %v3135_v6, %v3136_v44 }
 0x50a   : > { %v7951_v60 = vpack.i.bf16 %v3195_v52, %v3196_v1  ;;  %v7946_v38 = vpack.i.bf16 %v3159_v42, %v3160_v19 }
 0x50c   : > { %7952 = vrot.lane.b32.xlu1 %v7951_v60, %s8651_s0  ;;  %7947 = vrot.lane.b32.xlu0 %v7946_v38, %s8650_s19 }
 0x512   : > { %v2965_v12 = vpop.f32.mrb[52].mxu1 }
 0x513   : > { %v2966_v58 = vadd.f32 %v10884_v57, %v2965_v12  ;;  %v7354_v3 = vpop.f32.mrb[53].mxu1 }
 0x514   : > { %v2968_v15 = vpop.f32.mrb[54].mxu1 }
 0x515   : > { %v3012_v47 = vrot.slane %v2966_v58, 1  ;;  %v3066_v35 = vrot.slane %v2966_v58, 2  ;;  %v2969_v2 = vadd.f32 %v10884_v57, %v2968_v15  ;;  %v7355_v54 = vpop.f32.mrb[55].mxu1 }
 0x517   : > { %v3031_v43 = vsel %vm1072_vm1, %v3011_v40, %v3012_v47  ;;  %v3085_v10 = vsel %vm1181_vm2, %v3065_v18, %v3066_v35  ;;  %v3013_v53 = vrot.slane %v2969_v2, 1  ;;  %v3067_v0 = vrot.slane %v2969_v2, 2 }
 0x518   : > { %v3047_v46 = vmax.f32 %v2961_v36, %v3031_v43 }
 0x519   : > { %v3030_v21 = vsel %vm1072_vm1, %v3012_v47, %v3013_v53  ;;  %v3084_v48 = vsel %vm1181_vm2, %v3066_v35, %v3067_v0 }
 0x51a   : > { %v3101_v55 = vmax.f32 %v3047_v46, %v3085_v10  ;;  %v3048_v32 = vmax.f32 %v2966_v58, %v3030_v21 }
 0x51c   : > { %v11007_v26 = vmax.f32 %v3101_v55, 0.0  ;;  %v3102_v27 = vmax.f32 %v3048_v32, %v3084_v48 }
 0x51e   : > { %v11009_v59 = vmax.f32 %v3102_v27, 0.0  ;;  %v3173_v56 = vrot.slane %v11007_v26, 2  ;;  %v3137_v24 = vrot.slane %v11007_v26, 1 }
 0x520   : > { %v3174_v40 = vrot.slane %v11009_v59, 2  ;;  %v3138_v36 = vrot.slane %v11009_v59, 1  ;;  %v3194_v23 = vsel %vm1181_vm2, %v3172_v25, %v3173_v56  ;;  %v3158_v17 = vsel %vm1072_vm1, %v3136_v44, %v3137_v24 }
 0x522   : > { %v3193_v18 = vsel %vm1181_vm2, %v3173_v56, %v3174_v40  ;;  %v3157_v61 = vsel %vm1072_vm1, %v3137_v24, %v3138_v36 }
 0x523   : > { %v7961_v39 = vpack.i.bf16 %v3193_v18, %v3194_v23  ;;  %v7956_v4 = vpack.i.bf16 %v3157_v61, %v3158_v17 }
 0x525   : > { %7962 = vrot.lane.b32.xlu1 %v7961_v39, %s8651_s0  ;;  %7957 = vrot.lane.b32.xlu0 %v7956_v4, %s8650_s19 }
 0x532   : > { %v2973_v62 = vpop.f32.mrb[56].mxu1 }
 0x533   : > { %v2974_v11 = vadd.f32 %v10884_v57, %v2973_v62  ;;  %v7358_v14 = vpop.f32.mrb[57].mxu1 }
 0x534   : > { %v2976_v51 = vpop.f32.mrb[58].mxu1 }
 0x535   : > { %v3014_v20 = vrot.slane %v2974_v11, 1  ;;  %v3068_v30 = vrot.slane %v2974_v11, 2  ;;  %v2977_v63 = vadd.f32 %v10884_v57, %v2976_v51  ;;  %v7359_v45 = vpop.f32.mrb[59].mxu1 }
 0x537   : > { %v3029_v34 = vsel %vm1072_vm1, %v3013_v53, %v3014_v20  ;;  %v3083_v13 = vsel %vm1181_vm2, %v3067_v0, %v3068_v30  ;;  %v3015_v6 = vrot.slane %v2977_v63, 1  ;;  %v3069_v25 = vrot.slane %v2977_v63, 2 }
 0x538   : > { %v3049_v44 = vmax.f32 %v2969_v2, %v3029_v34 }
 0x539   : > { %v3028_v52 = vsel %vm1072_vm1, %v3014_v20, %v3015_v6  ;;  %v3082_v1 = vsel %vm1181_vm2, %v3068_v30, %v3069_v25 }
 0x53a   : > { %v3103_v42 = vmax.f32 %v3049_v44, %v3083_v13  ;;  %v3050_v19 = vmax.f32 %v2974_v11, %v3028_v52 }
 0x53c   : > { %v11035_v60 = vmax.f32 %v3103_v42, 0.0  ;;  %v3104_v38 = vmax.f32 %v3050_v19, %v3082_v1 }
 0x53e   : > { %v11037_v12 = vmax.f32 %v3104_v38, 0.0  ;;  %v3175_v58 = vrot.slane %v11035_v60, 2  ;;  %v3139_v3 = vrot.slane %v11035_v60, 1 }
 0x540   : > { %v3176_v15 = vrot.slane %v11037_v12, 2  ;;  %v3140_v47 = vrot.slane %v11037_v12, 1  ;;  %v3192_v2 = vsel %vm1181_vm2, %v3174_v40, %v3175_v58  ;;  %v3156_v43 = vsel %vm1072_vm1, %v3138_v36, %v3139_v3 }
 0x542   : > { %v3191_v35 = vsel %vm1181_vm2, %v3175_v58, %v3176_v15  ;;  %v3155_v54 = vsel %vm1072_vm1, %v3139_v3, %v3140_v47 }
 0x543   : > { %v7971_v10 = vpack.i.bf16 %v3191_v35, %v3192_v2  ;;  %v7966_v53 = vpack.i.bf16 %v3155_v54, %v3156_v43 }
 0x545   : > { %7972 = vrot.lane.b32.xlu1 %v7971_v10, %s8651_s0  ;;  %7967 = vrot.lane.b32.xlu0 %v7966_v53, %s8650_s19 }
 0x556   : > { %v2981_v0 = vpop.f32.mrb[60].mxu1 }
 0x557   : > { %v2982_v46 = vadd.f32 %v10884_v57, %v2981_v0  ;;  %v7362_v21 = vpop.f32.mrb[61].mxu1 }
 0x558   : > { %v2984_v48 = vpop.f32.mrb[62].mxu1 }
 0x559   : > { %v3016_v55 = vrot.slane %v2982_v46, 1  ;;  %v3070_v32 = vrot.slane %v2982_v46, 2  ;;  %v2985_v27 = vadd.f32 %v10884_v57, %v2984_v48  ;;  %v7363_v56 = vpop.f32.mrb[63].mxu1 }
 0x55b   : > { %v3027_v24 = vsel %vm1072_vm1, %v3015_v6, %v3016_v55  ;;  %v3081_v40 = vsel %vm1181_vm2, %v3069_v25, %v3070_v32  ;;  %v3017_v36 = vrot.slane %v2985_v27, 1  ;;  %v3071_v18 = vrot.slane %v2985_v27, 2 }
 0x55c   : > { %v3051_v23 = vmax.f32 %v2977_v63, %v3027_v24 }
 0x55d   : > { %v3026_v61 = vsel %vm1072_vm1, %v3016_v55, %v3017_v36  ;;  %v3080_v17 = vsel %vm1181_vm2, %v3070_v32, %v3071_v18 }
 0x55e   : > { %v3105_v39 = vmax.f32 %v3051_v23, %v3081_v40  ;;  %v3052_v4 = vmax.f32 %v2982_v46, %v3026_v61 }
 0x55f   : > { %v2989_v62 = vpop.f32.mrb[64].mxu1 }
 0x560   : > { %v11063_v11 = vmax.f32 %v3105_v39, 0.0  ;;  %v3106_v14 = vmax.f32 %v3052_v4, %v3080_v17  ;;  %v2990_v51 = vadd.f32 %v10884_v57, %v2989_v62  ;;  %v7366_v20 = vpop.f32.mrb[65].mxu1 }
 0x561   : > { %v2992_v30 = vpop.f32.mrb[66].mxu1 }
 0x562   : > { %v11066_v45 = vmax.f32 %v3106_v14, 0.0  ;;  %v3018_v34 = vrot.slane %v2990_v51, 1  ;;  %v3072_v63 = vrot.slane %v2990_v51, 2  ;;  %v2993_v13 = vadd.f32 %v10884_v57, %v2992_v30  ;;  %v7367_v6 = vpop.f32.mrb[67].mxu1 }
 0x563   : > { %v3177_v25 = vrot.slane %v11063_v11, 2  ;;  %v3141_v44 = vrot.slane %v11063_v11, 1 }
 0x564   : > { %v3025_v52 = vsel %vm1072_vm1, %v3017_v36, %v3018_v34  ;;  %v3079_v1 = vsel %vm1181_vm2, %v3071_v18, %v3072_v63  ;;  %v3019_v42 = vrot.slane %v2993_v13, 1  ;;  %v3073_v19 = vrot.slane %v2993_v13, 2 }
 0x565   : > { %v3053_v38 = vmax.f32 %v2985_v27, %v3025_v52  ;;  %v3178_v58 = vrot.slane %v11066_v45, 2  ;;  %v3142_v3 = vrot.slane %v11066_v45, 1  ;;  %v3190_v54 = vsel %vm1181_vm2, %v3176_v15, %v3177_v25 }
 0x566   : > { %v3024_v35 = vsel %vm1072_vm1, %v3018_v34, %v3019_v42  ;;  %v3078_v2 = vsel %vm1181_vm2, %v3072_v63, %v3073_v19  ;;  %v3154_v43 = vsel %vm1072_vm1, %v3140_v47, %v3141_v44 }
 0x567   : > { %v3107_v10 = vmax.f32 %v3053_v38, %v3079_v1  ;;  %v3054_v53 = vmax.f32 %v2990_v51, %v3024_v35  ;;  %v2997_v0 = vpop.f32.mrb[68].mxu1  ;;  %v3189_v46 = vsel %vm1181_vm2, %v3177_v25, %v3178_v58  ;;  %v3153_v21 = vsel %vm1072_vm1, %v3141_v44, %v3142_v3 }
 0x568   : > { %v2998_v48 = vadd.f32 %v10884_v57, %v2997_v0  ;;  %v7370_v55 = vpop.f32.mrb[69].mxu1  ;;  %v7981_v32 = vpack.i.bf16 %v3189_v46, %v3190_v54  ;;  %v7976_v27 = vpack.i.bf16 %v3153_v21, %v3154_v43 }
 0x569   : > { %v11090_v56 = vmax.f32 %v3107_v10, 0.0  ;;  %v3108_v15 = vmax.f32 %v3054_v53, %v3078_v2  ;;  %v3000_v24 = vpop.f32.mrb[70].mxu1 }
 0x56a   : > { %v3020_v40 = vrot.slane %v2998_v48, 1  ;;  %v3074_v47 = vrot.slane %v2998_v48, 2  ;;  %v3001_v36 = vadd.f32 %v10884_v57, %v3000_v24  ;;  %7982 = vrot.lane.b32.xlu1 %v7981_v32, %s8651_s0  ;;  %7977 = vrot.lane.b32.xlu0 %v7976_v27, %s8650_s19  ;;  %v7371_v18 = vpop.f32.mrb[71].mxu1 }
 0x56b   : > { %v11095_v23 = vmax.f32 %v3108_v15, 0.0  ;;  %v3179_v61 = vrot.slane %v11090_v56, 2  ;;  %v3143_v17 = vrot.slane %v11090_v56, 1 }
 0x56c   : > { %v3023_v39 = vsel %vm1072_vm1, %v3019_v42, %v3020_v40  ;;  %v3077_v4 = vsel %vm1181_vm2, %v3073_v19, %v3074_v47  ;;  %v3021_v62 = vrot.slane %v3001_v36, 1  ;;  %v3075_v14 = vrot.slane %v3001_v36, 2 }
 0x56d   : > { %v3055_v57 = vmax.f32 %v2993_v13, %v3023_v39  ;;  %v3180_v30 = vrot.slane %v11095_v23, 2  ;;  %v3188_v34 = vsel %vm1181_vm2, %v3178_v58, %v3179_v61  ;;  %v3144_v63 = vrot.slane %v11095_v23, 1 }
 0x56e   : > { %v7933_v51 = vpop.permute.xlu1 %7932  ;;  %v7928_v20 = vpop.permute.xlu0 %7927  ;;  %v3022_v6 = vsel %vm1072_vm1, %v3020_v40, %v3021_v62  ;;  %v3039_v25 = vsel %vm1072_vm1, %v3021_v62, %v3004_v9  ;;  %v3076_v13 = vsel %vm1181_vm2, %v3074_v47, %v3075_v14  ;;  %v3093_v44 = vsel %vm1181_vm2, %v3075_v14, %v3058_v16 }
 0x56f   : > { %v3109_v52 = vmax.f32 %v3055_v57, %v3077_v4  ;;  %v3056_v1 = vmax.f32 %v2998_v48, %v3022_v6  ;;  %v3057_v42 = vmax.f32 %v3001_v36, %v3039_v25  ;;  %v7935_v19 = vunpack.i.h.bf16 %v7933_v51 }
 0x570   : > { %v7934_v38 = vunpack.i.l.bf16 %v7933_v51  ;;  %v7930_v58 = vunpack.i.h.bf16 %v7928_v20  ;;  %v7929_v35 = vunpack.i.l.bf16 %v7928_v20  ;;  %v3187_v2 = vsel %vm1181_vm2, %v3179_v61, %v3180_v30 }
 0x571   : > { %v11121_v54 = vmax.f32 %v3109_v52, 0.0  ;;  %v3110_v9 = vmax.f32 %v3056_v1, %v3076_v13  ;;  %v3111_v43 = vmax.f32 %v3057_v42, %v3093_v44  ;;  %v7991_v10 = vpack.i.bf16 %v3187_v2, %v3188_v34 }
 0x572   : > { %v3347_v31 = vsel %vm2310_vm9, %v10914_v7, %v7930_v58  ;;  %v3346_v16 = vsel %vm2310_vm9, %v10907_v49, %v7929_v35  ;;  %v3151_v53 = vsel %vm1072_vm1, %v3143_v17, %v3144_v63  ;;  %v3152_v0 = vsel %vm1072_vm1, %v3142_v3, %v3143_v17 }
 0x573   : > { %v11131_v46 = vmax.f32 %v3110_v9, 0.0  ;;  %v11133_v21 = vmax.f32 %v3111_v43, 0.0  ;;  %v3365_v48 = vsel %vm2329_vm10, %v3347_v31, %v7935_v19  ;;  %v3364_v55 = vsel %vm2329_vm10, %v3346_v16, %v7934_v38  ;;  %7992 = vrot.lane.b32.xlu1 %v7991_v10, %s8651_s0 }
 0x574   : > { %v3382_v7 = vpack.c.bf16 %v3365_v48, %v3364_v55  ;;  %v7986_v32 = vpack.i.bf16 %v3151_v53, %v3152_v0  ;;  %v3181_v27 = vrot.slane %v11121_v54, 2  ;;  %v3145_v15 = vrot.slane %v11121_v54, 1 }
 0x575   : > { %v3147_v24 = vrot.slane %v11133_v21, 1  ;;  %v3183_v3 = vrot.slane %v11133_v21, 2  ;;  %v3182_v36 = vrot.slane %v11131_v46, 2  ;;  %v3146_v18 = vrot.slane %v11131_v46, 1 }
 0x576   : > { %v7943_v40 = vpop.permute.xlu1 %7942  ;;  %v7938_v47 = vpop.permute.xlu0 %7937  ;;  %7987 = vrot.lane.b32.xlu0 %v7986_v32, %s8650_s19  ;;  %7377 = vmatmul.mubr.msk.bf16.vlgmr.msra.gmra.mrb[36].mxu0 %vm13472_vm11, %v3382_v7  ;;  %v3186_v14 = vsel %vm1181_vm2, %v3180_v30, %v3181_v27  ;;  %v3150_v51 = vsel %vm1072_vm1, %v3144_v63, %v3145_v15 }
 0x577   : > { %v7945_v61 = vunpack.i.h.bf16 %v7943_v40  ;;  %v7944_v17 = vunpack.i.l.bf16 %v7943_v40  ;;  %v7940_v39 = vunpack.i.h.bf16 %v7938_v47  ;;  %v7939_v4 = vunpack.i.l.bf16 %v7938_v47  ;;  %7380 = vmatprep.mubr.msk.bf16.mxu0 %vm13479_vm0, %v13571_v50 }
 0x578   : > { %v3185_v62 = vsel %vm1181_vm2, %v3181_v27, %v3182_v36  ;;  %v3149_v57 = vsel %vm1072_vm1, %v3145_v15, %v3146_v18  ;;  %v3184_v30 = vsel %vm1181_vm2, %v3182_v36, %v3183_v3  ;;  %v3201_v13 = vsel %vm1181_vm2, %v3183_v3, %v3166_v37 }
 0x579   : > { %v3349_v20 = vsel %vm2310_vm9, %v10950_v22, %v7940_v39  ;;  %v3348_v34 = vsel %vm2310_vm9, %v10918_v8, %v7939_v4  ;;  %v8001_v6 = vpack.i.bf16 %v3185_v62, %v3186_v14  ;;  %v7996_v25 = vpack.i.bf16 %v3149_v57, %v3150_v51 }
 0x57a   : > { %v3148_v63 = vsel %vm1072_vm1, %v3146_v18, %v3147_v24  ;;  %v3165_v22 = vsel %vm1072_vm1, %v3147_v24, %v3130_v5  ;;  %v3366_v8 = vsel %vm2329_vm10, %v3348_v34, %v7944_v17  ;;  %v3367_v44 = vsel %vm2329_vm10, %v3349_v20, %v7945_v61 }
 0x57b   : > { %8002 = vrot.lane.b32.xlu1 %v8001_v6, %s8651_s0  ;;  %7997 = vrot.lane.b32.xlu0 %v7996_v25, %s8650_s19  ;;  %v8011_v52 = vpack.i.bf16 %v3201_v13, %v3184_v30  ;;  %v8006_v1 = vpack.i.bf16 %v3165_v22, %v3148_v63  ;;  %v3383_v42 = vpack.c.bf16 %v3367_v44, %v3366_v8 }
 0x57e   : > { %v7953_v37 = vpop.permute.xlu1 %7952  ;;  %v7948_v19 = vpop.permute.xlu0 %7947  ;;  %7381 = vmatmul.mubr.msk.bf16.gmra.mrb[40].mxu0 %vm13472_vm11, %v3383_v42 }
 0x57f   : > { %8012 = vrot.lane.b32.xlu1 %v8011_v52, %s8651_s0  ;;  %8007 = vrot.lane.b32.xlu0 %v8006_v1, %s8650_s19  ;;  %v7955_v49 = vunpack.i.h.bf16 %v7953_v37  ;;  %v7954_v38 = vunpack.i.l.bf16 %v7953_v37  ;;  %v7950_v5 = vunpack.i.h.bf16 %v7948_v19  ;;  %v7949_v58 = vunpack.i.l.bf16 %v7948_v19  ;;  %s13626_s0 = smov 80   ;;  %s13628_s19 = smov 64  }
 0x580   : > { %7384 = vmatprep.mubr.msk.bf16.mxu0 %vm13479_vm0, %v13571_v50 }
 0x581   : > { %v3351_v35 = vsel %vm2310_vm9, %v10977_v29, %v7950_v5  ;;  %v3350_v2 = vsel %vm2310_vm9, %v10955_v33, %v7949_v58 }
 0x582   : > { %v3368_v9 = vsel %vm2329_vm10, %v3350_v2, %v7954_v38  ;;  %v3369_v43 = vsel %vm2329_vm10, %v3351_v35, %v7955_v49 }
 0x583   : > { %v3384_v10 = vpack.c.bf16 %v3369_v43, %v3368_v9 }
 0x586   : > { %7385 = vmatmul.mubr.msk.bf16.gmra.mrb[44].mxu0 %vm13472_vm11, %v3384_v10 }
 0x587   : > { %7388 = vmatprep.mubr.msk.bf16.mxu0 %vm13479_vm0, %v13571_v50 }
 0x597   : > { %v7963_v31 = vpop.permute.xlu1 %7962  ;;  %v7958_v16 = vpop.permute.xlu0 %7957 }
 0x598   : > { %v7965_v53 = vunpack.i.h.bf16 %v7963_v31  ;;  %v7964_v29 = vunpack.i.l.bf16 %v7963_v31  ;;  %v7960_v0 = vunpack.i.h.bf16 %v7958_v16  ;;  %v7959_v48 = vunpack.i.l.bf16 %v7958_v16 }
 0x59a   : > { %v3353_v33 = vsel %vm2310_vm9, %v11007_v26, %v7960_v0  ;;  %v3352_v55 = vsel %vm2310_vm9, %v10981_v28, %v7959_v48 }
 0x59b   : > { %v3370_v7 = vsel %vm2329_vm10, %v3352_v55, %v7964_v29  ;;  %v3371_v32 = vsel %vm2329_vm10, %v3353_v33, %v7965_v53  ;;  %v8538_v33 = vld [vmem:[%s13394_s10] sm:$0xff]  }
 0x59c   : > { %v3385_v27 = vpack.c.bf16 %v3371_v32, %v3370_v7  ;;  %7413 = vmatpush3.bf16.msra.mxu1 %v8538_v33  ;;  %v8541_v7 = vld [vmem:[%s13394_s10 + $0x18] sm:$0xff]  }
 0x59d   : > { %7414 = vmatprep.subr.bf16.mxu1 %v13571_v50 }
 0x59e   : > { %7389 = vmatmul.mubr.msk.bf16.gmra.mrb[48].mxu0 %vm13472_vm11, %v3385_v27  ;;  %v11260_v27 = vld [vmem:[%s13625_s9] ss:$0 sm:$0xff] }
 0x59f   : > { %7392 = vmatprep.mubr.msk.bf16.mxu0 %vm13479_vm0, %v13571_v50 }
 0x5b7   : > { %v7973_v15 = vpop.permute.xlu1 %7972  ;;  %v7968_v24 = vpop.permute.xlu0 %7967 }
 0x5b8   : > { %v7975_v3 = vunpack.i.h.bf16 %v7973_v15  ;;  %v7974_v40 = vunpack.i.l.bf16 %v7973_v15  ;;  %v7970_v47 = vunpack.i.h.bf16 %v7968_v24  ;;  %v7969_v36 = vunpack.i.l.bf16 %v7968_v24 }
 0x5ba   : > { %v3355_v26 = vsel %vm2310_vm9, %v11035_v60, %v7970_v47  ;;  %v3354_v28 = vsel %vm2310_vm9, %v11009_v59, %v7969_v36  ;;  %v8542_v47 = vld [vmem:[%s13394_s10 + $0x20] sm:$0xff]  }
 0x5bb   : > { %v3372_v18 = vsel %vm2329_vm10, %v3354_v28, %v7974_v40  ;;  %v3373_v61 = vsel %vm2329_vm10, %v3355_v26, %v7975_v3  ;;  %v8543_v26 = vld [vmem:[%s13394_s10 + $0x28] sm:$0xff]  }
 0x5bc   : > { %v3386_v17 = vpack.c.bf16 %v3373_v61, %v3372_v18 }
 0x5be   : > { %7393 = vmatmul.mubr.msk.bf16.gmra.mrb[52].mxu0 %vm13472_vm11, %v3386_v17 }
 0x5bf   : > { %7396 = vmatprep.mubr.msk.bf16.mxu0 %vm13479_vm0, %v13571_v50 }
 0x5dc   : > { %v7983_v39 = vpop.permute.xlu1 %7982  ;;  %v7978_v4 = vpop.permute.xlu0 %7977 }
 0x5dd   : > { %v7985_v62 = vunpack.i.h.bf16 %v7983_v39  ;;  %v7984_v14 = vunpack.i.l.bf16 %v7983_v39  ;;  %v7980_v57 = vunpack.i.h.bf16 %v7978_v4  ;;  %v7979_v51 = vunpack.i.l.bf16 %v7978_v4 }
 0x5df   : > { %v3357_v60 = vsel %vm2310_vm9, %v11063_v11, %v7980_v57  ;;  %v3356_v59 = vsel %vm2310_vm9, %v11037_v12, %v7979_v51 }
 0x5e0   : > { %v3374_v20 = vsel %vm2329_vm10, %v3356_v59, %v7984_v14  ;;  %v3375_v34 = vsel %vm2329_vm10, %v3357_v60, %v7985_v62 }
 0x5e1   : > { %v3387_v6 = vpack.c.bf16 %v3375_v34, %v3374_v20 }
 0x5e3   : > { %7397 = vmatmul.mubr.msk.bf16.gmra.mrb[56].mxu0 %vm13472_vm11, %v3387_v6  ;;  %v8544_v6 = vld [vmem:[%s13394_s10 + $0x30] sm:$0xff]  }
 0x5e4   : > { %7400 = vmatprep.mubr.msk.bf16.mxu0 %vm13479_vm0, %v13571_v50 }
 0x5e5   : > { %v7993_v25 = vpop.permute.xlu1 %7992 }
 0x5e6   : > { %v7995_v30 = vunpack.i.h.bf16 %v7993_v25  ;;  %v7994_v13 = vunpack.i.l.bf16 %v7993_v25 }
 0x5e8   : > { %v7988_v63 = vpop.permute.xlu0 %7987 }
 0x5e9   : > { %v7990_v22 = vunpack.i.h.bf16 %v7988_v63  ;;  %v7989_v8 = vunpack.i.l.bf16 %v7988_v63 }
 0x5eb   : > { %v3359_v11 = vsel %vm2310_vm9, %v11090_v56, %v7990_v22  ;;  %v3358_v12 = vsel %vm2310_vm9, %v11066_v45, %v7989_v8  ;;  %v8545_v8 = vld [vmem:[%s13394_s10 + $0x38] ss:$0 sps:$4 sm:$0xff]  }
 0x5ec   : > { %v3376_v44 = vsel %vm2329_vm10, %v3358_v12, %v7994_v13  ;;  %v3377_v52 = vsel %vm2329_vm10, %v3359_v11, %v7995_v30 }
 0x5ed   : > { %v8003_v1 = vpop.permute.xlu1 %8002  ;;  %v7998_v42 = vpop.permute.xlu0 %7997  ;;  %v3388_v37 = vpack.c.bf16 %v3377_v52, %v3376_v44 }
 0x5ee   : > { %v8005_v19 = vunpack.i.h.bf16 %v8003_v1  ;;  %v8000_v49 = vunpack.i.h.bf16 %v7998_v42  ;;  %v8004_v38 = vunpack.i.l.bf16 %v8003_v1  ;;  %v7999_v5 = vunpack.i.l.bf16 %v7998_v42 }
 0x5ef   : > { %7401 = vmatmul.mubr.msk.bf16.gmra.mrb[60].mxu0 %vm13472_vm11, %v3388_v37  ;;  %v3925_v42 = vsel %vm3923_vm15, %v8545_v8, 0  ;;  %vm13481_vm15 = vcmask 916480  }
 0x5f0   : > { %v3361_v58 = vsel %vm2310_vm9, %v11121_v54, %v8000_v49  ;;  %v3360_v56 = vsel %vm2310_vm9, %v11095_v23, %v7999_v5  ;;  %7404 = vmatprep.mubr.msk.bf16.mxu0 %vm13479_vm0, %v13571_v50 }
 0x5f1   : > { %v8008_v45 = vpop.permute.xlu0 %8007  ;;  %v3379_v35 = vsel %vm2329_vm10, %v3361_v58, %v8005_v19  ;;  %v3378_v2 = vsel %vm2329_vm10, %v3360_v56, %v8004_v38  ;;  %v8013_v9 = vpop.permute.xlu1 %8012 }
 0x5f2   : > { %v8010_v43 = vunpack.i.h.bf16 %v8008_v45  ;;  %v8009_v10 = vunpack.i.l.bf16 %v8008_v45  ;;  %v3389_v31 = vpack.c.bf16 %v3379_v35, %v3378_v2  ;;  %v8015_v16 = vunpack.i.h.bf16 %v8013_v9 }
 0x5f3   : > { %v8014_v53 = vunpack.i.l.bf16 %v8013_v9 }
 0x5f4   : > { %v3363_v54 = vsel %vm2310_vm9, %v11133_v21, %v8010_v43  ;;  %v3362_v23 = vsel %vm2310_vm9, %v11131_v46, %v8009_v10  ;;  %v8539_v46 = vld [vmem:[%s13394_s10 + $0x8] sm:$0xff]   ;;  %v8540_v21 = vld [vmem:[%s13394_s10 + $0x10] sm:$0xff]   ;;  %vm3895_vm9 = vcmask 982016  }
 0x5f5   : > { %v3380_v29 = vsel %vm2329_vm10, %v3362_v23, %v8014_v53  ;;  %v3381_v0 = vsel %vm2329_vm10, %v3363_v54, %v8015_v16  ;;  %7415 = vmatpush3.bf16.msra.mxu1 %v8539_v46  ;;  %vm13482_vm10 = vcmask 261120  }
 0x5f6   : > { %v3390_v48 = vpack.c.bf16 %v3381_v0, %v3380_v29  ;;  %7416 = vmatprep.subr.bf16.mxu1 %v13571_v50 }
 0x5f7   : > { %7405 = vmatmul.mubr.msk.bf16.gmra.mrb[64].mxu0 %vm13472_vm11, %v3389_v31 }
 0x5f8   : > { %7408 = vmatprep.mubr.msk.bf16.mxu0 %vm13479_vm0, %v13571_v50 }
 0x5f9   : > { %7417 = vmatpush3.bf16.msra.mxu1 %v8540_v21 }
 0x5fa   : > { %7418 = vmatprep.subr.bf16.mxu1 %v13571_v50 }
 0x5fd   : > { %7419 = vmatpush3.bf16.msra.mxu1 %v8541_v7 }
 0x5fe   : > { %7420 = vmatprep.subr.bf16.mxu1 %v13571_v50 }
 0x5ff   : > { %7409 = vmatmul.mubr.msk.bf16.gmra.mrb[68].mxu0 %vm13472_vm11, %v3390_v48  ;;  %vm5097_vm11 = vcmask 195584  }
 0x601   : > { %7421 = vmatpush3.bf16.msra.mxu1 %v8542_v47 }
 0x602   : > { %7422 = vmatprep.subr.bf16.mxu1 %v13571_v50 }
 0x605   : > { %7423 = vmatpush3.bf16.msra.mxu1 %v8543_v26 }
 0x606   : > { %7424 = vmatprep.subr.bf16.mxu1 %v13571_v50 }
 0x609   : > { %7425 = vmatpush3.bf16.msra.mxu1 %v8544_v6 }
 0x60a   : > { %7426 = vmatprep.subr.bf16.mxu1 %v13571_v50 }
 0x60d   : > { %7427 = vmatpush3.bf16.msra.mxu1 %v3925_v42 }
 0x649   : > { %v3477_v55 = vpop.f32.mrb[36].mxu0 }
 0x64a   : > { %v7378_v32 = vpop.f32.mrb[37].mxu0  ;;  %v3478_v40 = vadd.f32 %v11260_v27, %v3477_v55 }
 0x64b   : > { %v3480_v15 = vpop.f32.mrb[38].mxu0 }
 0x64c   : > { %v3481_v24 = vadd.f32 %v11260_v27, %v3480_v15  ;;  %v7379_v3 = vpop.f32.mrb[39].mxu0  ;;  %v11273_v28 = vmax.f32 %v3478_v40, 0.0 }
 0x64e   : > { %v11268_v36 = vmax.f32 %v3481_v24, 0.0  ;;  %v3602_v60 = vrot.slane %v11273_v28, 2  ;;  %v3566_v59 = vrot.slane %v11273_v28, 1 }
 0x650   : > { %v3603_v39 = vrot.slane %v11268_v36, 2  ;;  %v3567_v62 = vrot.slane %v11268_v36, 1 }
 0x651   : > { %v3485_v18 = vpop.f32.mrb[40].mxu0 }
 0x652   : > { %v3486_v61 = vadd.f32 %v11260_v27, %v3485_v18  ;;  %v7382_v17 = vpop.f32.mrb[41].mxu0  ;;  %v3636_v25 = vsel %vm1181_vm2, %v3602_v60, %v3603_v39  ;;  %v3600_v22 = vsel %vm1072_vm1, %v3566_v59, %v3567_v62 }
 0x653   : > { %v3488_v4 = vpop.f32.mrb[42].mxu0 }
 0x654   : > { %v11279_v14 = vmax.f32 %v3486_v61, 0.0  ;;  %v3489_v57 = vadd.f32 %v11260_v27, %v3488_v4  ;;  %v7383_v51 = vpop.f32.mrb[43].mxu0 }
 0x656   : > { %v3568_v20 = vrot.slane %v11279_v14, 1  ;;  %v3604_v34 = vrot.slane %v11279_v14, 2  ;;  %v11294_v30 = vmax.f32 %v3489_v57, 0.0 }
 0x658   : > { %v3635_v13 = vsel %vm1181_vm2, %v3603_v39, %v3604_v34  ;;  %v3599_v63 = vsel %vm1072_vm1, %v3567_v62, %v3568_v20  ;;  %v3569_v19 = vrot.slane %v11294_v30, 1  ;;  %v3605_v49 = vrot.slane %v11294_v30, 2 }
 0x659   : > { %v3493_v11 = vpop.f32.mrb[44].mxu0  ;;  %v8021_v12 = vpack.i.bf16 %v3635_v13, %v3636_v25  ;;  %v8016_v44 = vpack.i.bf16 %v3599_v63, %v3600_v22 }
 0x65a   : > { %v3494_v52 = vadd.f32 %v11260_v27, %v3493_v11  ;;  %v7386_v1 = vpop.f32.mrb[45].mxu0  ;;  %v3634_v35 = vsel %vm1181_vm2, %v3604_v34, %v3605_v49  ;;  %v3598_v9 = vsel %vm1072_vm1, %v3568_v20, %v3569_v19 }
 0x65b   : > { %8022 = vrot.lane.b32.xlu1 %v8021_v12, %s13458_s5  ;;  %8017 = vrot.lane.b32.xlu0 %v8016_v44, %s8653_s3  ;;  %v3496_v37 = vpop.f32.mrb[46].mxu0 }
 0x65c   : > { %v11313_v38 = vmax.f32 %v3494_v52, 0.0  ;;  %v7387_v5 = vpop.f32.mrb[47].mxu0  ;;  %v3497_v31 = vadd.f32 %v11260_v27, %v3496_v37 }
 0x65e   : > { %v3570_v58 = vrot.slane %v11313_v38, 1  ;;  %v3606_v56 = vrot.slane %v11313_v38, 2  ;;  %v11328_v16 = vmax.f32 %v3497_v31, 0.0 }
 0x660   : > { %v3633_v45 = vsel %vm1181_vm2, %v3605_v49, %v3606_v56  ;;  %v3597_v2 = vsel %vm1072_vm1, %v3569_v19, %v3570_v58  ;;  %v3571_v0 = vrot.slane %v11328_v16, 1  ;;  %v3607_v48 = vrot.slane %v11328_v16, 2 }
 0x661   : > { %v8031_v43 = vpack.i.bf16 %v3633_v45, %v3634_v35  ;;  %v8026_v10 = vpack.i.bf16 %v3597_v2, %v3598_v9 }
 0x662   : > { %v3632_v32 = vsel %vm1181_vm2, %v3606_v56, %v3607_v48  ;;  %v3596_v24 = vsel %vm1072_vm1, %v3570_v58, %v3571_v0 }
 0x663   : > { %8032 = vrot.lane.b32.xlu1 %v8031_v43, %s13458_s5  ;;  %8027 = vrot.lane.b32.xlu0 %v8026_v10, %s8653_s3 }
 0x671   : > { %v3501_v53 = vpop.f32.mrb[48].mxu0 }
 0x672   : > { %v3502_v54 = vadd.f32 %v11260_v27, %v3501_v53  ;;  %v7390_v23 = vpop.f32.mrb[49].mxu0 }
 0x673   : > { %v3504_v29 = vpop.f32.mrb[50].mxu0 }
 0x674   : > { %v11333_v33 = vmax.f32 %v3502_v54, 0.0  ;;  %v7391_v46 = vpop.f32.mrb[51].mxu0  ;;  %v3505_v47 = vadd.f32 %v11260_v27, %v3504_v29 }
 0x676   : > { %v3572_v21 = vrot.slane %v11333_v33, 1  ;;  %v3608_v55 = vrot.slane %v11333_v33, 2  ;;  %v11348_v26 = vmax.f32 %v3505_v47, 0.0 }
 0x678   : > { %v3631_v7 = vsel %vm1181_vm2, %v3607_v48, %v3608_v55  ;;  %v3595_v15 = vsel %vm1072_vm1, %v3571_v0, %v3572_v21  ;;  %v3573_v4 = vrot.slane %v11348_v26, 1  ;;  %v3609_v62 = vrot.slane %v11348_v26, 2 }
 0x679   : > { %v8041_v3 = vpack.i.bf16 %v3631_v7, %v3632_v32  ;;  %v8036_v40 = vpack.i.bf16 %v3595_v15, %v3596_v24 }
 0x67a   : > { %v3630_v25 = vsel %vm1181_vm2, %v3608_v55, %v3609_v62  ;;  %v3594_v63 = vsel %vm1072_vm1, %v3572_v21, %v3573_v4 }
 0x67b   : > { %8042 = vrot.lane.b32.xlu1 %v8041_v3, %s13458_s5  ;;  %8037 = vrot.lane.b32.xlu0 %v8036_v40, %s8653_s3 }
 0x691   : > { %v3509_v18 = vpop.f32.mrb[52].mxu0 }
 0x692   : > { %v3510_v61 = vadd.f32 %v11260_v27, %v3509_v18  ;;  %v7394_v17 = vpop.f32.mrb[53].mxu0 }
 0x693   : > { %v3512_v39 = vpop.f32.mrb[54].mxu0 }
 0x694   : > { %v11353_v57 = vmax.f32 %v3510_v61, 0.0  ;;  %v7395_v51 = vpop.f32.mrb[55].mxu0  ;;  %v3513_v11 = vadd.f32 %v11260_v27, %v3512_v39 }
 0x696   : > { %v3574_v20 = vrot.slane %v11353_v57, 1  ;;  %v3610_v34 = vrot.slane %v11353_v57, 2  ;;  %v11368_v12 = vmax.f32 %v3513_v11, 0.0 }
 0x698   : > { %v3629_v6 = vsel %vm1181_vm2, %v3609_v62, %v3610_v34  ;;  %v3593_v13 = vsel %vm1072_vm1, %v3573_v4, %v3574_v20  ;;  %v3611_v42 = vrot.slane %v11368_v12, 2  ;;  %v3575_v19 = vrot.slane %v11368_v12, 1 }
 0x699   : > { %v8051_v22 = vpack.i.bf16 %v3629_v6, %v3630_v25  ;;  %v8046_v8 = vpack.i.bf16 %v3593_v13, %v3594_v63 }
 0x69a   : > { %v3628_v45 = vsel %vm1181_vm2, %v3610_v34, %v3611_v42  ;;  %v3592_v43 = vsel %vm1072_vm1, %v3574_v20, %v3575_v19 }
 0x69b   : > { %8052 = vrot.lane.b32.xlu1 %v8051_v22, %s13458_s5  ;;  %8047 = vrot.lane.b32.xlu0 %v8046_v8, %s8653_s3 }
 0x6b6   : > { %v3517_v44 = vpop.f32.mrb[56].mxu0 }
 0x6b7   : > { %v3518_v52 = vadd.f32 %v11260_v27, %v3517_v44  ;;  %v7398_v1 = vpop.f32.mrb[57].mxu0 }
 0x6b8   : > { %v3520_v37 = vpop.f32.mrb[58].mxu0 }
 0x6b9   : > { %v11373_v49 = vmax.f32 %v3518_v52, 0.0  ;;  %v7399_v5 = vpop.f32.mrb[59].mxu0  ;;  %v3521_v35 = vadd.f32 %v11260_v27, %v3520_v37 }
 0x6bb   : > { %v3576_v58 = vrot.slane %v11373_v49, 1  ;;  %v3612_v56 = vrot.slane %v11373_v49, 2  ;;  %v11388_v53 = vmax.f32 %v3521_v35, 0.0 }
 0x6bd   : > { %v3627_v2 = vsel %vm1181_vm2, %v3611_v42, %v3612_v56  ;;  %v3591_v9 = vsel %vm1072_vm1, %v3575_v19, %v3576_v58  ;;  %v3577_v48 = vrot.slane %v11388_v53, 1  ;;  %v3613_v46 = vrot.slane %v11388_v53, 2 }
 0x6be   : > { %v8061_v10 = vpack.i.bf16 %v3627_v2, %v3628_v45  ;;  %v8056_v31 = vpack.i.bf16 %v3591_v9, %v3592_v43 }
 0x6bf   : > { %v3626_v40 = vsel %vm1181_vm2, %v3612_v56, %v3613_v46  ;;  %v3590_v18 = vsel %vm1072_vm1, %v3576_v58, %v3577_v48 }
 0x6c0   : > { %8062 = vrot.lane.b32.xlu1 %v8061_v10, %s13458_s5  ;;  %8057 = vrot.lane.b32.xlu0 %v8056_v31, %s8653_s3 }
 0x6c2   : > { %v3525_v54 = vpop.f32.mrb[60].mxu0 }
 0x6c3   : > { %v3526_v23 = vadd.f32 %v11260_v27, %v3525_v54  ;;  %v7402_v29 = vpop.f32.mrb[61].mxu0 }
 0x6c4   : > { %v3528_v0 = vpop.f32.mrb[62].mxu0 }
 0x6c5   : > { %v11393_v21 = vmax.f32 %v3526_v23, 0.0  ;;  %v3529_v55 = vadd.f32 %v11260_v27, %v3528_v0  ;;  %v7403_v7 = vpop.f32.mrb[63].mxu0 }
 0x6c7   : > { %v3578_v32 = vrot.slane %v11393_v21, 1  ;;  %v3614_v15 = vrot.slane %v11393_v21, 2  ;;  %v11398_v24 = vmax.f32 %v3529_v55, 0.0 }
 0x6c9   : > { %v3625_v3 = vsel %vm1181_vm2, %v3613_v46, %v3614_v15  ;;  %v3589_v47 = vsel %vm1072_vm1, %v3577_v48, %v3578_v32  ;;  %v3615_v51 = vrot.slane %v11398_v24, 2  ;;  %v3579_v34 = vrot.slane %v11398_v24, 1 }
 0x6ca   : > { %v3533_v61 = vpop.f32.mrb[64].mxu0  ;;  %v8071_v17 = vpack.i.bf16 %v3625_v3, %v3626_v40  ;;  %v8066_v39 = vpack.i.bf16 %v3589_v47, %v3590_v18 }
 0x6cb   : > { %v3534_v4 = vadd.f32 %v11260_v27, %v3533_v61  ;;  %v7406_v62 = vpop.f32.mrb[65].mxu0  ;;  %v3624_v19 = vsel %vm1181_vm2, %v3614_v15, %v3615_v51  ;;  %v3588_v45 = vsel %vm1072_vm1, %v3578_v32, %v3579_v34 }
 0x6cc   : > { %8072 = vrot.lane.b32.xlu1 %v8071_v17, %s13458_s5  ;;  %8067 = vrot.lane.b32.xlu0 %v8066_v39, %s8653_s3  ;;  %v3536_v20 = vpop.f32.mrb[66].mxu0 }
 0x6cd   : > { %v11413_v6 = vmax.f32 %v3534_v4, 0.0  ;;  %v3537_v25 = vadd.f32 %v11260_v27, %v3536_v20  ;;  %v7407_v13 = vpop.f32.mrb[67].mxu0  ;;  %v8023_v63 = vpop.permute.xlu1 %8022 }
 0x6ce   : > { %v8018_v22 = vpop.permute.xlu0 %8017  ;;  %v8025_v52 = vunpack.i.h.bf16 %v8023_v63  ;;  %v8024_v1 = vunpack.i.l.bf16 %v8023_v63 }
 0x6cf   : > { %v3580_v8 = vrot.slane %v11413_v6, 1  ;;  %v3616_v11 = vrot.slane %v11413_v6, 2  ;;  %v11418_v44 = vmax.f32 %v3537_v25, 0.0  ;;  %v8020_v42 = vunpack.i.h.bf16 %v8018_v22 }
 0x6d0   : > { %v8019_v37 = vunpack.i.l.bf16 %v8018_v22 }
 0x6d1   : > { %v3617_v5 = vrot.slane %v11418_v44, 2  ;;  %v3623_v58 = vsel %vm1181_vm2, %v3615_v51, %v3616_v11  ;;  %v3587_v56 = vsel %vm1072_vm1, %v3579_v34, %v3580_v8  ;;  %v3783_v2 = vsel %vm2367_vm12, %v11268_v36, %v8020_v42 }
 0x6d2   : > { %v3541_v35 = vpop.f32.mrb[68].mxu0  ;;  %v3782_v9 = vsel %vm2367_vm12, %v11273_v28, %v8019_v37  ;;  %v8081_v43 = vpack.i.bf16 %v3623_v58, %v3624_v19  ;;  %v8076_v10 = vpack.i.bf16 %v3587_v56, %v3588_v45  ;;  %v3581_v31 = vrot.slane %v11418_v44, 1 }
 0x6d3   : > { %v3542_v54 = vadd.f32 %v11260_v27, %v3541_v35  ;;  %v7410_v23 = vpop.f32.mrb[69].mxu0  ;;  %v3802_v29 = vsel %vm3800_vm8, %v3783_v2, %v8025_v52  ;;  %v3801_v0 = vsel %vm3800_vm8, %v3782_v9, %v8024_v1  ;;  %v3622_v3 = vsel %vm1181_vm2, %v3616_v11, %v3617_v5 }
 0x6d4   : > { %v3819_v48 = vpack.c.bf16 %v3802_v29, %v3801_v0  ;;  %8082 = vrot.lane.b32.xlu1 %v8081_v43, %s13458_s5  ;;  %8077 = vrot.lane.b32.xlu0 %v8076_v10, %s8653_s3  ;;  %v3544_v36 = vpop.f32.mrb[70].mxu0  ;;  %v3586_v61 = vsel %vm1072_vm1, %v3580_v8, %v3581_v31 }
 0x6d5   : > { %v11439_v46 = vmax.f32 %v3542_v54, 0.0  ;;  %v3545_v55 = vadd.f32 %v11260_v27, %v3544_v36  ;;  %v7411_v7 = vpop.f32.mrb[71].mxu0  ;;  %v8033_v32 = vpop.permute.xlu1 %8032 }
 0x6d6   : > { %7429 = vmatmul.mubr.msk.bf16.vlgmr.msra.gmra.mrb[72].mxu1 %vm3895_vm9, %v3819_v48  ;;  %v8028_v15 = vpop.permute.xlu0 %8027  ;;  %v8035_v27 = vunpack.i.h.bf16 %v8033_v32  ;;  %v8034_v17 = vunpack.i.l.bf16 %v8033_v32 }
 0x6d7   : > { %v3582_v40 = vrot.slane %v11439_v46, 1  ;;  %v3618_v47 = vrot.slane %v11439_v46, 2  ;;  %v11447_v18 = vmax.f32 %v3545_v55, 0.0  ;;  %7432 = vmatprep.mubr.msk.bf16.mxu1 %vm13479_vm0, %v13571_v50  ;;  %v8030_v39 = vunpack.i.h.bf16 %v8028_v15 }
 0x6d8   : > { %v8029_v4 = vunpack.i.l.bf16 %v8028_v15 }
 0x6d9   : > { %v3583_v62 = vrot.slane %v11447_v18, 1  ;;  %v3619_v51 = vrot.slane %v11447_v18, 2  ;;  %v3621_v20 = vsel %vm1181_vm2, %v3617_v5, %v3618_v47  ;;  %v3585_v34 = vsel %vm1072_vm1, %v3581_v31, %v3582_v40 }
 0x6da   : > { %v3785_v25 = vsel %vm2367_vm12, %v11294_v30, %v8030_v39  ;;  %v3784_v13 = vsel %vm2367_vm12, %v11279_v14, %v8029_v4  ;;  %v8091_v63 = vpack.i.bf16 %v3621_v20, %v3622_v3  ;;  %v8086_v22 = vpack.i.bf16 %v3585_v34, %v3586_v61 }
 0x6db   : > { %v3620_v8 = vsel %vm1181_vm2, %v3618_v47, %v3619_v51  ;;  %v3637_v11 = vsel %vm1181_vm2, %v3619_v51, %v3602_v60  ;;  %v3584_v52 = vsel %vm1072_vm1, %v3582_v40, %v3583_v62  ;;  %v3601_v30 = vsel %vm1072_vm1, %v3583_v62, %v3566_v59 }
 0x6dc   : > { %8092 = vrot.lane.b32.xlu1 %v8091_v63, %s13458_s5  ;;  %8087 = vrot.lane.b32.xlu0 %v8086_v22, %s8653_s3  ;;  %v3803_v14 = vsel %vm3800_vm8, %v3784_v13, %v8034_v17  ;;  %v3804_v1 = vsel %vm3800_vm8, %v3785_v25, %v8035_v27  ;;  %v8101_v42 = vpack.i.bf16 %v3637_v11, %v3620_v8 }
 0x6dd   : > { %v8096_v37 = vpack.i.bf16 %v3601_v30, %v3584_v52  ;;  %v3820_v19 = vpack.c.bf16 %v3804_v1, %v3803_v14 }
 0x6df   : > { %7433 = vmatmul.mubr.msk.bf16.gmra.mrb[76].mxu1 %vm3895_vm9, %v3820_v19 }
 0x6e0   : > { %8102 = vrot.lane.b32.xlu1 %v8101_v42, %s13458_s5  ;;  %8097 = vrot.lane.b32.xlu0 %v8096_v37, %s8653_s3  ;;  %s8657_s5 = smov 120  }
 0x6e1   : > { %7436 = vmatprep.mubr.msk.bf16.mxu1 %vm13479_vm0, %v13571_v50 }
 0x6ed   : > { %v8043_v28 = vpop.permute.xlu1 %8042  ;;  %v8038_v60 = vpop.permute.xlu0 %8037 }
 0x6ee   : > { %v8045_v59 = vunpack.i.h.bf16 %v8043_v28  ;;  %v8044_v5 = vunpack.i.l.bf16 %v8043_v28  ;;  %v8040_v58 = vunpack.i.h.bf16 %v8038_v60  ;;  %v8039_v56 = vunpack.i.l.bf16 %v8038_v60 }
 0x6f0   : > { %v3787_v45 = vsel %vm2367_vm12, %v11328_v16, %v8040_v58  ;;  %v3786_v35 = vsel %vm2367_vm12, %v11313_v38, %v8039_v56 }
 0x6f1   : > { %v3805_v2 = vsel %vm3800_vm8, %v3786_v35, %v8044_v5  ;;  %v3806_v9 = vsel %vm3800_vm8, %v3787_v45, %v8045_v59 }
 0x6f2   : > { %v3821_v43 = vpack.c.bf16 %v3806_v9, %v3805_v2 }
 0x6f4   : > { %7437 = vmatmul.mubr.msk.bf16.gmra.mrb[80].mxu1 %vm3895_vm9, %v3821_v43 }
 0x6f5   : > { %7440 = vmatprep.mubr.msk.bf16.mxu1 %vm13479_vm0, %v13571_v50 }
 0x70d   : > { %v8053_v10 = vpop.permute.xlu1 %8052  ;;  %v8048_v31 = vpop.permute.xlu0 %8047 }
 0x70e   : > { %v8055_v54 = vunpack.i.h.bf16 %v8053_v10  ;;  %v8054_v23 = vunpack.i.l.bf16 %v8053_v10  ;;  %v8050_v29 = vunpack.i.h.bf16 %v8048_v31  ;;  %v8049_v0 = vunpack.i.l.bf16 %v8048_v31 }
 0x710   : > { %v3789_v16 = vsel %vm2367_vm12, %v11348_v26, %v8050_v29  ;;  %v3788_v38 = vsel %vm2367_vm12, %v11333_v33, %v8049_v0 }
 0x711   : > { %v3807_v48 = vsel %vm3800_vm8, %v3788_v38, %v8054_v23  ;;  %v3808_v36 = vsel %vm3800_vm8, %v3789_v16, %v8055_v54  ;;  %v11548_v16 = vld [vmem:[%s13395_s11] ss:$0 sm:$0xff] }
 0x712   : > { %v3822_v55 = vpack.c.bf16 %v3808_v36, %v3807_v48 }
 0x714   : > { %7441 = vmatmul.mubr.msk.bf16.gmra.mrb[84].mxu1 %vm3895_vm9, %v3822_v55 }
 0x715   : > { %7444 = vmatprep.mubr.msk.bf16.mxu1 %vm13479_vm0, %v13571_v50 }
 0x732   : > { %v8063_v7 = vpop.permute.xlu1 %8062  ;;  %v8058_v32 = vpop.permute.xlu0 %8057 }
 0x733   : > { %v8065_v15 = vunpack.i.h.bf16 %v8063_v7  ;;  %v8064_v3 = vunpack.i.l.bf16 %v8063_v7  ;;  %v8060_v40 = vunpack.i.h.bf16 %v8058_v32  ;;  %v8059_v47 = vunpack.i.l.bf16 %v8058_v32  ;;  %v8546_v7 = vld [vmem:[%s13396_s12 + $0x40] sm:$0xff]  }
 0x734   : > { %v8547_v32 = vld [vmem:[%s13396_s12] sm:$0xff]   ;;  %7115 = vmatprep.subr.bf16.mxu0 %v8546_v7 }
 0x735   : > { %v3791_v26 = vsel %vm2367_vm12, %v11368_v12, %v8060_v40  ;;  %v3790_v33 = vsel %vm2367_vm12, %v11353_v57, %v8059_v47  ;;  %7116 = vmatpush3.bf16.msra.mxu0 %v8547_v32  ;;  %v8548_v47 = vld [vmem:[%s13396_s12 + $0x48] sm:$0xff]  }
 0x736   : > { %v3809_v61 = vsel %vm3800_vm8, %v3790_v33, %v8064_v3  ;;  %v3810_v27 = vsel %vm3800_vm8, %v3791_v26, %v8065_v15  ;;  %v8549_v33 = vld [vmem:[%s13396_s12 + $0x8] sm:$0xff]   ;;  %7117 = vmatprep.subr.bf16.mxu0 %v8548_v47 }
 0x737   : > { %v3823_v17 = vpack.c.bf16 %v3810_v27, %v3809_v61  ;;  %v8550_v27 = vld [vmem:[%s13396_s12 + $0x50] sm:$0xff]  }
 0x739   : > { %7445 = vmatmul.mubr.msk.bf16.gmra.mrb[88].mxu1 %vm3895_vm9, %v3823_v17  ;;  %7118 = vmatpush3.bf16.msra.mxu0 %v8549_v33 }
 0x73a   : > { %7448 = vmatprep.mubr.msk.bf16.mxu1 %vm13479_vm0, %v13571_v50  ;;  %7119 = vmatprep.subr.bf16.mxu0 %v8550_v27 }
 0x73e   : > { %v8073_v39 = vpop.permute.xlu1 %8072  ;;  %v8068_v4 = vpop.permute.xlu0 %8067 }
 0x73f   : > { %v8075_v62 = vunpack.i.h.bf16 %v8073_v39  ;;  %v8074_v51 = vunpack.i.l.bf16 %v8073_v39  ;;  %v8070_v20 = vunpack.i.h.bf16 %v8068_v4  ;;  %v8069_v34 = vunpack.i.l.bf16 %v8068_v4  ;;  %v8551_v4 = vld [vmem:[%s13396_s12 + $0x10] sm:$0xff]  }
 0x740   : > { %7120 = vmatpush3.bf16.msra.mxu0 %v8551_v4 }
 0x741   : > { %v3793_v12 = vsel %vm2367_vm12, %v11388_v53, %v8070_v20  ;;  %v3792_v57 = vsel %vm2367_vm12, %v11373_v49, %v8069_v34 }
 0x742   : > { %v3811_v25 = vsel %vm3800_vm8, %v3792_v57, %v8074_v51  ;;  %v3812_v13 = vsel %vm3800_vm8, %v3793_v12, %v8075_v62  ;;  %v8552_v12 = vld [vmem:[%s13396_s12 + $0x58] sm:$0xff]  }
 0x743   : > { %v3824_v63 = vpack.c.bf16 %v3812_v13, %v3811_v25  ;;  %v8553_v13 = vld [vmem:[%s13396_s12 + $0x18] sm:$0xff]   ;;  %7121 = vmatprep.subr.bf16.mxu0 %v8552_v12  ;;  %v8566_v12 = vld [vmem:[%s13396_s12 + $0xa0] sm:$0xff]  }
 0x744   : > { %7122 = vmatpush3.bf16.msra.mxu0 %v8553_v13 }
 0x745   : > { %7449 = vmatmul.mubr.msk.bf16.gmra.mrb[92].mxu1 %vm3895_vm9, %v3824_v63 }
 0x746   : > { %v8083_v22 = vpop.permute.xlu1 %8082  ;;  %v8078_v8 = vpop.permute.xlu0 %8077  ;;  %7452 = vmatprep.mubr.msk.bf16.mxu1 %vm13479_vm0, %v13571_v50 }
 0x747   : > { %v8085_v11 = vunpack.i.h.bf16 %v8083_v22  ;;  %v8084_v52 = vunpack.i.l.bf16 %v8083_v22  ;;  %v8080_v30 = vunpack.i.h.bf16 %v8078_v8  ;;  %v8079_v14 = vunpack.i.l.bf16 %v8078_v8  ;;  %v8554_v22 = vld [vmem:[%s13396_s12 + $0x80] sm:$0xff]  }
 0x749   : > { %v3795_v53 = vsel %vm2367_vm12, %v11398_v24, %v8080_v30  ;;  %v3794_v49 = vsel %vm2367_vm12, %v11393_v21, %v8079_v14  ;;  %v8555_v30 = vld [vmem:[%s13396_s12 + $0x60] sm:$0xff]  }
 0x74a   : > { %v3813_v1 = vsel %vm3800_vm8, %v3794_v49, %v8084_v52  ;;  %v3814_v42 = vsel %vm3800_vm8, %v3795_v53, %v8085_v11  ;;  %v13464_v52 = vmov 0   ;;  %v8556_v14 = vld [vmem:[%s13396_s12 + $0x20] sm:$0xff]   ;;  %7123 = vmatprep.subr.bf16.mxu0 %v8555_v30 }
 0x74b   : > { %v3825_v37 = vpack.c.bf16 %v3814_v42, %v3813_v1  ;;  %5530 = vmatprep.subr.bf16.mxu1 %v13464_v52  ;;  %v8557_v1 = vld [vmem:[%s13396_s12 + $0x88] sm:$0xff]   ;;  %8511 = vset.pattern.permute.xlu1 %v13464_v52 }
 0x74c   : > { %5531 = vmatpush1.bf16.msra.mxu1 %v8554_v22  ;;  %v8558_v42 = vld [vmem:[%s13396_s12 + $0x68] sm:$0xff]   ;;  %8512 = vset.pattern.permute.xlu0 %v13464_v52 }
 0x74d   : > { %7453 = vmatmul.mubr.msk.bf16.gmra.mrb[96].mxu1 %vm3895_vm9, %v3825_v37  ;;  %5532 = vmatprep.subr.bf16.mxu1 %v13464_v52 }
 0x74e   : > { %v8093_v19 = vpop.permute.xlu1 %8092  ;;  %v8088_v28 = vpop.permute.xlu0 %8087  ;;  %7456 = vmatprep.mubr.msk.bf16.mxu1 %vm13479_vm0, %v13571_v50  ;;  %7124 = vmatpush3.bf16.msra.mxu0 %v8556_v14 }
 0x74f   : > { %v8095_v60 = vunpack.i.h.bf16 %v8093_v19  ;;  %v8094_v59 = vunpack.i.l.bf16 %v8093_v19  ;;  %v8090_v5 = vunpack.i.h.bf16 %v8088_v28  ;;  %v8089_v58 = vunpack.i.l.bf16 %v8088_v28  ;;  %7125 = vmatprep.subr.bf16.mxu0 %v8558_v42 }
 0x750   : > { %5533 = vmatpush1.bf16.msra.mxu1 %v8557_v1 }
 0x751   : > { %v3797_v24 = vsel %vm2367_vm12, %v11418_v44, %v8090_v5  ;;  %v3796_v21 = vsel %vm2367_vm12, %v11413_v6, %v8089_v58  ;;  %5534 = vmatprep.subr.bf16.mxu1 %v13464_v52 }
 0x752   : > { %v8103_v56 = vpop.permute.xlu1 %8102  ;;  %v8098_v45 = vpop.permute.xlu0 %8097  ;;  %v3815_v35 = vsel %vm3800_vm8, %v3796_v21, %v8094_v59  ;;  %v3816_v2 = vsel %vm3800_vm8, %v3797_v24, %v8095_v60  ;;  %v8559_v59 = vld [vmem:[%s13396_s12 + $0x28] sm:$0xff]  }
 0x753   : > { %v8100_v9 = vunpack.i.h.bf16 %v8098_v45  ;;  %v8099_v43 = vunpack.i.l.bf16 %v8098_v45  ;;  %v3826_v10 = vpack.c.bf16 %v3816_v2, %v3815_v35  ;;  %v8105_v31 = vunpack.i.h.bf16 %v8103_v56  ;;  %7126 = vmatpush3.bf16.msra.mxu0 %v8559_v59 }
 0x754   : > { %v8104_v54 = vunpack.i.l.bf16 %v8103_v56  ;;  %v8560_v56 = vld [vmem:[%s13396_s12 + $0x90] sm:$0xff]  }
 0x755   : > { %v3799_v23 = vsel %vm2367_vm12, %v11447_v18, %v8100_v9  ;;  %v3798_v44 = vsel %vm2367_vm12, %v11439_v46, %v8099_v43  ;;  %7457 = vmatmul.mubr.msk.bf16.gmra.mrb[100].mxu1 %vm3895_vm9, %v3826_v10  ;;  %v8561_v9 = vld [vmem:[%s13396_s12 + $0x70] sm:$0xff]  }
 0x756   : > { %7460 = vmatprep.mubr.msk.bf16.mxu1 %vm13479_vm0, %v13571_v50  ;;  %v3817_v6 = vsel %vm3800_vm8, %v3798_v44, %v8104_v54  ;;  %v3818_v29 = vsel %vm3800_vm8, %v3799_v23, %v8105_v31  ;;  %5535 = vmatpush1.bf16.msra.mxu1 %v8560_v56  ;;  %vm5135_vm0 = vcmask 850944  }
 0x757   : > { %v3827_v0 = vpack.c.bf16 %v3818_v29, %v3817_v6  ;;  %7127 = vmatprep.subr.bf16.mxu0 %v8561_v9  ;;  %5536 = vmatprep.subr.bf16.mxu1 %v13464_v52 }
 0x75d   : > { %7461 = vmatmul.mubr.msk.bf16.gmra.mrb[104].mxu1 %vm3895_vm9, %v3827_v0 }
 0x7a9   : > { %v3961_v18 = vpop.f32.mrb[72].mxu1 }
 0x7aa   : > { %v11551_v46 = vadd.f32 %v11548_v16, %v3961_v18  ;;  %v7430_v38 = vpop.f32.mrb[73].mxu1 }
 0x7ab   : > { %v3964_v48 = vpop.f32.mrb[74].mxu1  ;;  %v8562_v38 = vld [vmem:[%s13396_s12 + $0x30] sm:$0xff]  }
 0x7ac   : > { %v3965_v36 = vadd.f32 %v11548_v16, %v3964_v48  ;;  %v7431_v55 = vpop.f32.mrb[75].mxu1  ;;  %v13475_v15 = vrot.slane %v11551_v46, 1  ;;  %v8563_v48 = vld [vmem:[%s13396_s12 + $0x98] sm:$0xff]   ;;  %7128 = vmatpush3.bf16.msra.mxu0 %v8562_v38 }
 0x7ad   : > { %5537 = vmatpush1.bf16.msra.mxu1 %v8563_v48 }
 0x7ae   : > { %v4033_v3 = vrot.slane %v3965_v36, 1  ;;  %5538 = vmatprep.subr.bf16.mxu1 %v13464_v52 }
 0x7b0   : > { %v4066_v40 = vsel %vm1072_vm1, %v13475_v15, %v4033_v3 }
 0x7b1   : > { %v4068_v26 = vmax.f32 %v11551_v46, %v4066_v40  ;;  %5539 = vmatpush1.bf16.msra.mxu1 %v8566_v12 }
 0x7b2   : > { %v3969_v61 = vpop.f32.mrb[76].mxu1  ;;  %5540 = vmatprep.subr.bf16.mxu1 %v13464_v52 }
 0x7b3   : > { %v3970_v17 = vadd.f32 %v11548_v16, %v3969_v61  ;;  %v7434_v39 = vpop.f32.mrb[77].mxu1  ;;  %v11594_v8 = vmax.f32 %v4068_v26, 0.0 }
 0x7b4   : > { %v3972_v62 = vpop.f32.mrb[78].mxu1 }
 0x7b5   : > { %v4034_v51 = vrot.slane %v3970_v17, 1  ;;  %v11580_v20 = vadd.f32 %v11548_v16, %v3972_v62  ;;  %v7435_v34 = vpop.f32.mrb[79].mxu1  ;;  %v13473_v60 = vrot.slane %v11594_v8, 3  ;;  %v13471_v24 = vrot.slane %v11594_v8, 4 }
 0x7b6   : > { %v13470_v29 = vrot.slane %v11594_v8, 1  ;;  %v13469_v55 = vrot.slane %v11594_v8, 5  ;;  %v13468_v33 = vrot.slane %v11594_v8, 2 }
 0x7b7   : > { %v4065_v57 = vsel %vm1072_vm1, %v4033_v3, %v4034_v51  ;;  %v4035_v25 = vrot.slane %v11580_v20, 1 }
 0x7b8   : > { %v4069_v63 = vmax.f32 %v3965_v36, %v4065_v57  ;;  %v8564_v36 = vld [vmem:[%s13396_s12 + $0x78] sm:$0xff]   ;;  %v13467_v57 = vrot.slane %v11594_v8, 6 }
 0x7b9   : > { %v4064_v11 = vsel %vm1072_vm1, %v4034_v51, %v4035_v25  ;;  %7129 = vmatprep.subr.bf16.mxu0 %v8564_v36 }
 0x7ba   : > { %v11607_v53 = vmax.f32 %v4069_v63, 0.0  ;;  %v4070_v49 = vmax.f32 %v3970_v17, %v4064_v11  ;;  %v8565_v17 = vld [vmem:[%s13396_s12 + $0x38] sm:$0xff]  }
 0x7bb   : > { %7130 = vmatpush3.bf16.msra.mxu0 %v8565_v17 }
 0x7bc   : > { %v11617_v37 = vmax.f32 %v4070_v49, 0.0  ;;  %v4177_v19 = vrot.slane %v11607_v53, 3  ;;  %v4213_v28 = vrot.slane %v11607_v53, 4  ;;  %v4105_v45 = vrot.slane %v11607_v53, 1  ;;  %7464 = vmatprep.subr.bf16.mxu0 %v13571_v50 }
 0x7bd   : > { %v4249_v6 = vrot.slane %v11607_v53, 5  ;;  %v4141_v40 = vrot.slane %v11607_v53, 2  ;;  %v4285_v27 = vrot.slane %v11607_v53, 6  ;;  %v4321_v49 = vrot.slane %v11607_v53, 7 }
 0x7be   : > { %v8106_v5 = vpack.i.bf16 %v11617_v37, %v11607_v53  ;;  %v4178_v58 = vrot.slane %v11617_v37, 3  ;;  %v4214_v21 = vrot.slane %v11617_v37, 4  ;;  %v4106_v35 = vrot.slane %v11617_v37, 1 }
 0x7bf   : > { %v4250_v2 = vrot.slane %v11617_v37, 5  ;;  %v4210_v10 = vsel %vm1290_vm3, %v13473_v60, %v4177_v19  ;;  %v4246_v54 = vsel %vm1399_vm4, %v13471_v24, %v4213_v28  ;;  %v4142_v18 = vrot.slane %v11617_v37, 2 }
 0x7c0   : > { %8107 = vrot.lane.b32.xlu1 %v8106_v5, %s13462_s25  ;;  %v4209_v43 = vsel %vm1290_vm3, %v4177_v19, %v4178_v58  ;;  %v4245_v31 = vsel %vm1399_vm4, %v4213_v28, %v4214_v21  ;;  %v11664_v0 = vsel %vm1072_vm1, %v4105_v45, %v4106_v35  ;;  %v4286_v32 = vrot.slane %v11617_v37, 6 }
 0x7c1   : > { %v8111_v23 = vpack.i.bf16 %v4209_v43, %v4210_v10  ;;  %v8116_v44 = vpack.i.bf16 %v4245_v31, %v4246_v54  ;;  %v4281_v7 = vsel %vm1508_vm5, %v4249_v6, %v4250_v2  ;;  %v11688_v3 = vsel %vm1072_vm1, %v13470_v29, %v4105_v45  ;;  %v8567_v45 = vld [vmem:[%s13396_s12 + $0xa8] sm:$0xff]  }
 0x7c2   : > { %v8121_v47 = vpack.i.bf16 %v11664_v0, %v11688_v3  ;;  %v4282_v26 = vsel %vm1508_vm5, %v13469_v55, %v4249_v6  ;;  %v4173_v4 = vsel %vm1181_vm2, %v4141_v40, %v4142_v18  ;;  %v4322_v34 = vrot.slane %v11617_v37, 7  ;;  %5541 = vmatpush1.bf16.msra.mxu1 %v8567_v45 }
 0x7c3   : > { %8112 = vrot.lane.b32.xlu0 %v8111_v23, %s8657_s5  ;;  %v8126_v39 = vpack.i.bf16 %v4281_v7, %v4282_v26  ;;  %v4317_v13 = vsel %vm1617_vm6, %v4285_v27, %v4286_v32  ;;  %v4174_v22 = vsel %vm1181_vm2, %v13468_v33, %v4141_v40  ;;  %v4318_v42 = vsel %vm1617_vm6, %v13467_v57, %v4285_v27 }
 0x7c4   : > { %8117 = vrot.lane.b32.xlu1 %v8116_v44, %s8658_s4  ;;  %v8131_v1 = vpack.i.bf16 %v4173_v4, %v4174_v22  ;;  %v13466_v19 = vrot.slane %v11594_v8, 7  ;;  %v8136_v59 = vpack.i.bf16 %v4317_v13, %v4318_v42  ;;  %v4353_v56 = vsel %vm1726_vm7, %v4321_v49, %v4322_v34  ;;  %5542 = vmatprep.subr.bf16.mxu1 %v13464_v52 }
 0x7c6   : > { %v4354_v43 = vsel %vm1726_vm7, %v13466_v19, %v4321_v49 }
 0x7c7   : > { %v3977_v61 = vpop.f32.mrb[80].mxu1  ;;  %8122 = vrot.lane.b32.xlu0 %v8121_v47, %s8653_s3  ;;  %v8141_v54 = vpack.i.bf16 %v4353_v56, %v4354_v43  ;;  %v8569_v47 = vld [vmem:[%s13396_s12 + $0xb8] sm:$0xff]  }
 0x7c8   : > { %v3978_v62 = vadd.f32 %v11548_v16, %v3977_v61  ;;  %v7438_v51 = vpop.f32.mrb[81].mxu1  ;;  %8127 = vrot.lane.b32.xlu1 %v8126_v39, %s8659_s7 }
 0x7c9   : > { %v3980_v63 = vpop.f32.mrb[82].mxu1 }
 0x7ca   : > { %v4036_v11 = vrot.slane %v3978_v62, 1  ;;  %v11725_v30 = vadd.f32 %v11548_v16, %v3980_v63  ;;  %v7439_v14 = vpop.f32.mrb[83].mxu1 }
 0x7cb   : > { %8132 = vrot.lane.b32.xlu0 %v8131_v1, %s13626_s0 }
 0x7cc   : > { %v4063_v28 = vsel %vm1072_vm1, %v4035_v25, %v4036_v11  ;;  %v4037_v5 = vrot.slane %v11725_v30, 1  ;;  %8137 = vrot.lane.b32.xlu1 %v8136_v59, %s13460_s2  ;;  %s8661_s2 = smov 24  }
 0x7cd   : > { %v4071_v9 = vmax.f32 %v11580_v20, %v4063_v28  ;;  %v8568_v20 = vld [vmem:[%s13396_s12 + $0xb0] sm:$0xff]  }
 0x7ce   : > { %v4062_v25 = vsel %vm1072_vm1, %v4036_v11, %v4037_v5  ;;  %5543 = vmatpush1.bf16.msra.mxu1 %v8568_v20 }
 0x7cf   : > { %v11758_v10 = vmax.f32 %v4071_v9, 0.0  ;;  %v4072_v31 = vmax.f32 %v3978_v62, %v4062_v25  ;;  %8142 = vrot.lane.b32.xlu0 %v8141_v54, %s8661_s2  ;;  %5544 = vmatprep.subr.bf16.mxu1 %v13464_v52 }
 0x7d1   : > { %v11763_v23 = vmax.f32 %v4072_v31, 0.0  ;;  %v4215_v44 = vrot.slane %v11758_v10, 4  ;;  %v4107_v6 = vrot.slane %v11758_v10, 1  ;;  %v4179_v27 = vrot.slane %v11758_v10, 3 }
 0x7d2   : > { %5545 = vmatpush1.bf16.msra.mxu1 %v8569_v47  ;;  %v4143_v51 = vrot.slane %v11758_v10, 2  ;;  %v4251_v63 = vrot.slane %v11758_v10, 5  ;;  %v4323_v42 = vrot.slane %v11758_v10, 7  ;;  %v4287_v56 = vrot.slane %v11758_v10, 6 }
 0x7d3   : > { %v8146_v38 = vpack.i.bf16 %v11763_v23, %v11758_v10  ;;  %v4216_v48 = vrot.slane %v11763_v23, 4  ;;  %v4136_v36 = vsel %vm1072_vm1, %v4106_v35, %v4107_v6  ;;  %v4108_v7 = vrot.slane %v11763_v23, 1  ;;  %5546 = vmatprep.subr.bf16.mxu1 %v13464_v52 }
 0x7d4   : > { %v4180_v40 = vrot.slane %v11763_v23, 3  ;;  %v4244_v35 = vsel %vm1399_vm4, %v4214_v21, %v4215_v44  ;;  %v8151_v17 = vpack.i.bf16 %v4136_v36, %v11664_v0  ;;  %v4144_v4 = vrot.slane %v11763_v23, 2  ;;  %v8570_v0 = vld [vmem:[%s13396_s12 + $0xc0] sm:$0xff]  }
 0x7d5   : > { %8147 = vrot.lane.b32.xlu0 %v8146_v38, %s13462_s25  ;;  %v4243_v26 = vsel %vm1399_vm4, %v4215_v44, %v4216_v48  ;;  %v11797_v39 = vsel %vm1072_vm1, %v4107_v6, %v4108_v7  ;;  %v4252_v62 = vrot.slane %v11763_v23, 5  ;;  %s8662_s25 = smov 104   ;;  %v4208_v13 = vsel %vm1290_vm3, %v4178_v58, %v4179_v27 }
 0x7d6   : > { %v8161_v61 = vpack.i.bf16 %v4243_v26, %v4244_v35  ;;  %v4207_v21 = vsel %vm1290_vm3, %v4179_v27, %v4180_v40  ;;  %v8166_v12 = vpack.i.bf16 %v11797_v39, %v4136_v36  ;;  %v4171_v11 = vsel %vm1181_vm2, %v4143_v51, %v4144_v4  ;;  %5547 = vmatpush1.bf16.msra.mxu1 %v8570_v0 }
 0x7d7   : > { %v8156_v22 = vpack.i.bf16 %v4207_v21, %v4208_v13  ;;  %v4324_v14 = vrot.slane %v11763_v23, 7  ;;  %v4279_v49 = vsel %vm1508_vm5, %v4251_v63, %v4252_v62  ;;  %v4288_v1 = vrot.slane %v11763_v23, 6  ;;  %7510 = vmatprep.subr.bf16.mxu1 %v13571_v50 }
 0x7d8   : > { %8162 = vrot.lane.b32.xlu1 %v8161_v61, %s8658_s4  ;;  %v4172_v58 = vsel %vm1181_vm2, %v4142_v18, %v4143_v51  ;;  %v4280_v59 = vsel %vm1508_vm5, %v4250_v2, %v4251_v63  ;;  %v4352_v2 = vsel %vm1726_vm7, %v4322_v34, %v4323_v42  ;;  %v4316_v43 = vsel %vm1617_vm6, %v4286_v32, %v4287_v56 }
 0x7d9   : > { %8152 = vrot.lane.b32.xlu0 %v8151_v17, %s8662_s25  ;;  %v8176_v28 = vpack.i.bf16 %v4171_v11, %v4172_v58  ;;  %v8171_v45 = vpack.i.bf16 %v4279_v49, %v4280_v59  ;;  %v4351_v9 = vsel %vm1726_vm7, %v4323_v42, %v4324_v14  ;;  %v4315_v18 = vsel %vm1617_vm6, %v4287_v56, %v4288_v1 }
 0x7da   : > { %v8186_v25 = vpack.i.bf16 %v4351_v9, %v4352_v2  ;;  %v8181_v31 = vpack.i.bf16 %v4315_v18, %v4316_v43 }
 0x7dc   : > { %8167 = vrot.lane.b32.xlu1 %v8166_v12, %s8653_s3 }
 0x7dd   : > { %8157 = vrot.lane.b32.xlu0 %v8156_v22, %s8657_s5 }
 0x7e0   : > { %8177 = vrot.lane.b32.xlu1 %v8176_v28, %s13626_s0 }
 0x7e1   : > { %8172 = vrot.lane.b32.xlu0 %v8171_v45, %s8659_s7 }
 0x7e4   : > { %8187 = vrot.lane.b32.xlu1 %v8186_v25, %s8661_s2 }
 0x7e5   : > { %8182 = vrot.lane.b32.xlu0 %v8181_v31, %s13627_s1 }
 0x7e7   : > { %v3985_v54 = vpop.f32.mrb[84].mxu1 }
 0x7e8   : > { %v3986_v20 = vadd.f32 %v11548_v16, %v3985_v54  ;;  %v7442_v44 = vpop.f32.mrb[85].mxu1 }
 0x7e9   : > { %v3988_v6 = vpop.f32.mrb[86].mxu1 }
 0x7ea   : > { %v4038_v38 = vrot.slane %v3986_v20, 1  ;;  %v11863_v36 = vadd.f32 %v11548_v16, %v3988_v6  ;;  %v7443_v34 = vpop.f32.mrb[87].mxu1 }
 0x7ec   : > { %v4061_v32 = vsel %vm1072_vm1, %v4037_v5, %v4038_v38  ;;  %v4039_v47 = vrot.slane %v11863_v36, 1 }
 0x7ed   : > { %v4073_v26 = vmax.f32 %v11725_v30, %v4061_v32 }
 0x7ee   : > { %v4060_v35 = vsel %vm1072_vm1, %v4038_v38, %v4039_v47 }
 0x7ef   : > { %v11873_v61 = vmax.f32 %v4073_v26, 0.0  ;;  %v4074_v27 = vmax.f32 %v3986_v20, %v4060_v35 }
 0x7f1   : > { %v11875_v17 = vmax.f32 %v4074_v27, 0.0  ;;  %v4217_v21 = vrot.slane %v11873_v61, 4  ;;  %v4109_v0 = vrot.slane %v11873_v61, 1  ;;  %v4181_v49 = vrot.slane %v11873_v61, 3 }
 0x7f2   : > { %v4253_v45 = vrot.slane %v11873_v61, 5  ;;  %v4325_v31 = vrot.slane %v11873_v61, 7  ;;  %v4289_v44 = vrot.slane %v11873_v61, 6 }
 0x7f3   : > { %v8191_v51 = vpack.i.bf16 %v11875_v17, %v11873_v61  ;;  %v4218_v5 = vrot.slane %v11875_v17, 4  ;;  %v4134_v30 = vsel %vm1072_vm1, %v4108_v7, %v4109_v0  ;;  %v4110_v12 = vrot.slane %v11875_v17, 1 }
 0x7f4   : > { %v4182_v13 = vrot.slane %v11875_v17, 3  ;;  %v4242_v22 = vsel %vm1399_vm4, %v4216_v48, %v4217_v21  ;;  %v8196_v7 = vpack.i.bf16 %v4134_v30, %v11797_v39  ;;  %v4146_v42 = vrot.slane %v11875_v17, 2 }
 0x7f5   : > { %8192 = vrot.lane.b32.xlu1 %v8191_v51, %s13628_s19  ;;  %v4241_v63 = vsel %vm1399_vm4, %v4217_v21, %v4218_v5  ;;  %v11903_v58 = vsel %vm1072_vm1, %v4109_v0, %v4110_v12  ;;  %v4254_v28 = vrot.slane %v11875_v17, 5  ;;  %v4145_v39 = vrot.slane %v11873_v61, 2 }
 0x7f6   : > { %v8206_v11 = vpack.i.bf16 %v4241_v63, %v4242_v22  ;;  %v4205_v48 = vsel %vm1290_vm3, %v4181_v49, %v4182_v13  ;;  %v8211_v59 = vpack.i.bf16 %v11903_v58, %v4134_v30  ;;  %v4206_v56 = vsel %vm1290_vm3, %v4180_v40, %v4181_v49 }
 0x7f7   : > { %v8201_v9 = vpack.i.bf16 %v4205_v48, %v4206_v56  ;;  %v4169_v18 = vsel %vm1181_vm2, %v4145_v39, %v4146_v42  ;;  %v4326_v2 = vrot.slane %v11875_v17, 7  ;;  %v4277_v25 = vsel %vm1508_vm5, %v4253_v45, %v4254_v28 }
 0x7f8   : > { %8207 = vrot.lane.b32.xlu0 %v8206_v11, %s8658_s4  ;;  %v4290_v43 = vrot.slane %v11875_v17, 6  ;;  %v4170_v40 = vsel %vm1181_vm2, %v4144_v4, %v4145_v39  ;;  %v4278_v20 = vsel %vm1508_vm5, %v4252_v62, %v4253_v45  ;;  %v4350_v62 = vsel %vm1726_vm7, %v4324_v14, %v4325_v31 }
 0x7f9   : > { %8197 = vrot.lane.b32.xlu1 %v8196_v7, %s8662_s25  ;;  %v8221_v54 = vpack.i.bf16 %v4169_v18, %v4170_v40  ;;  %v8216_v6 = vpack.i.bf16 %v4277_v25, %v4278_v20  ;;  %v4349_v38 = vsel %vm1726_vm7, %v4325_v31, %v4326_v2  ;;  %v4314_v32 = vsel %vm1617_vm6, %v4288_v1, %v4289_v44 }
 0x7fa   : > { %v4313_v4 = vsel %vm1617_vm6, %v4289_v44, %v4290_v43  ;;  %v8231_v34 = vpack.i.bf16 %v4349_v38, %v4350_v62 }
 0x7fb   : > { %v8226_v26 = vpack.i.bf16 %v4313_v4, %v4314_v32 }
 0x7fc   : > { %8212 = vrot.lane.b32.xlu0 %v8211_v59, %s8653_s3 }
 0x7fd   : > { %8202 = vrot.lane.b32.xlu1 %v8201_v9, %s8657_s5 }
 0x800   : > { %8222 = vrot.lane.b32.xlu0 %v8221_v54, %s13626_s0 }
 0x801   : > { %8217 = vrot.lane.b32.xlu1 %v8216_v6, %s8659_s7 }
 0x804   : > { %8232 = vrot.lane.b32.xlu0 %v8231_v34, %s8661_s2 }
 0x805   : > { %8227 = vrot.lane.b32.xlu1 %v8226_v26, %s13627_s1 }
 0x80c   : > { %v3993_v35 = vpop.f32.mrb[88].mxu1 }
 0x80d   : > { %v3994_v27 = vadd.f32 %v11548_v16, %v3993_v35  ;;  %v7446_v21 = vpop.f32.mrb[89].mxu1 }
 0x80e   : > { %v3996_v0 = vpop.f32.mrb[90].mxu1 }
 0x80f   : > { %v4040_v51 = vrot.slane %v3994_v27, 1  ;;  %v3997_v30 = vadd.f32 %v11548_v16, %v3996_v0  ;;  %v7447_v14 = vpop.f32.mrb[91].mxu1 }
 0x811   : > { %v4059_v63 = vsel %vm1072_vm1, %v4039_v47, %v4040_v51  ;;  %v4041_v22 = vrot.slane %v3997_v30, 1 }
 0x812   : > { %v4075_v1 = vmax.f32 %v11863_v36, %v4059_v63 }
 0x813   : > { %v4058_v11 = vsel %vm1072_vm1, %v4040_v51, %v4041_v22 }
 0x814   : > { %v11969_v49 = vmax.f32 %v4075_v1, 0.0  ;;  %v4076_v7 = vmax.f32 %v3994_v27, %v4058_v11 }
 0x816   : > { %v11971_v48 = vmax.f32 %v4076_v7, 0.0  ;;  %v4219_v39 = vrot.slane %v11969_v49, 4  ;;  %v4111_v59 = vrot.slane %v11969_v49, 1  ;;  %v4183_v44 = vrot.slane %v11969_v49, 3 }
 0x817   : > { %v4255_v0 = vrot.slane %v11969_v49, 5 }
 0x818   : > { %v4001_v56 = vpop.f32.mrb[92].mxu1  ;;  %v8236_v45 = vpack.i.bf16 %v11971_v48, %v11969_v49  ;;  %v4220_v47 = vrot.slane %v11971_v48, 4  ;;  %v4132_v18 = vsel %vm1072_vm1, %v4110_v12, %v4111_v59  ;;  %v4112_v25 = vrot.slane %v11971_v48, 1 }
 0x819   : > { %v4002_v36 = vadd.f32 %v11548_v16, %v4001_v56  ;;  %v7450_v9 = vpop.f32.mrb[93].mxu1  ;;  %v4184_v40 = vrot.slane %v11971_v48, 3  ;;  %v4240_v20 = vsel %vm1399_vm4, %v4218_v5, %v4219_v39  ;;  %v4148_v62 = vrot.slane %v11971_v48, 2 }
 0x81a   : > { %v4004_v31 = vpop.f32.mrb[94].mxu1  ;;  %8237 = vrot.lane.b32.xlu0 %v8236_v45, %s13628_s19  ;;  %v4239_v54 = vsel %vm1399_vm4, %v4219_v39, %v4220_v47  ;;  %v8241_v34 = vpack.i.bf16 %v4132_v18, %v11903_v58  ;;  %v12004_v32 = vsel %vm1072_vm1, %v4111_v59, %v4112_v25  ;;  %v4147_v5 = vrot.slane %v11969_v49, 2 }
 0x81b   : > { %v4042_v12 = vrot.slane %v4002_v36, 1  ;;  %v11996_v6 = vadd.f32 %v11548_v16, %v4004_v31  ;;  %v7451_v38 = vpop.f32.mrb[95].mxu1  ;;  %v8251_v4 = vpack.i.bf16 %v4239_v54, %v4240_v20  ;;  %v4203_v58 = vsel %vm1290_vm3, %v4183_v44, %v4184_v40 }
 0x81c   : > { %v4256_v27 = vrot.slane %v11971_v48, 5  ;;  %v8256_v14 = vpack.i.bf16 %v12004_v32, %v4132_v18  ;;  %v4204_v63 = vsel %vm1290_vm3, %v4182_v13, %v4183_v44  ;;  %v4328_v7 = vrot.slane %v11971_v48, 7 }
 0x81d   : > { %v4057_v26 = vsel %vm1072_vm1, %v4041_v22, %v4042_v12  ;;  %v4043_v35 = vrot.slane %v11996_v6, 1  ;;  %8252 = vrot.lane.b32.xlu1 %v8251_v4, %s8658_s4  ;;  %v4167_v22 = vsel %vm1181_vm2, %v4147_v5, %v4148_v62  ;;  %v8246_v11 = vpack.i.bf16 %v4203_v58, %v4204_v63 }
 0x81e   : > { %v4077_v21 = vmax.f32 %v3997_v30, %v4057_v26  ;;  %8242 = vrot.lane.b32.xlu0 %v8241_v34, %s8662_s25  ;;  %v4168_v13 = vsel %vm1181_vm2, %v4146_v42, %v4147_v5  ;;  %v4275_v56 = vsel %vm1508_vm5, %v4255_v0, %v4256_v27  ;;  %v4292_v45 = vrot.slane %v11971_v48, 6 }
 0x81f   : > { %v4056_v51 = vsel %vm1072_vm1, %v4042_v12, %v4043_v35  ;;  %v8266_v18 = vpack.i.bf16 %v4167_v22, %v4168_v13  ;;  %v4327_v31 = vrot.slane %v11969_v49, 7  ;;  %v4291_v54 = vrot.slane %v11969_v49, 6 }
 0x820   : > { %v4078_v30 = vmax.f32 %v4002_v36, %v4056_v51  ;;  %v4009_v1 = vpop.f32.mrb[96].mxu1  ;;  %v12048_v20 = vmax.f32 %v4077_v21, 0.0  ;;  %v4276_v38 = vsel %vm1508_vm5, %v4254_v28, %v4255_v0 }
 0x821   : > { %v12031_v39 = vadd.f32 %v11548_v16, %v4009_v1  ;;  %v7454_v59 = vpop.f32.mrb[97].mxu1  ;;  %8257 = vrot.lane.b32.xlu1 %v8256_v14, %s8653_s3  ;;  %v8261_v4 = vpack.i.bf16 %v4275_v56, %v4276_v38  ;;  %v4347_v34 = vsel %vm1726_vm7, %v4327_v31, %v4328_v7  ;;  %v4311_v58 = vsel %vm1617_vm6, %v4291_v54, %v4292_v45 }
 0x822   : > { %v12043_v36 = vmax.f32 %v4078_v30, 0.0  ;;  %v4012_v9 = vpop.f32.mrb[98].mxu1  ;;  %8247 = vrot.lane.b32.xlu0 %v8246_v11, %s8657_s5  ;;  %v4312_v0 = vsel %vm1617_vm6, %v4290_v43, %v4291_v54  ;;  %v4221_v63 = vrot.slane %v12048_v20, 4  ;;  %v4185_v13 = vrot.slane %v12048_v20, 3 }
 0x823   : > { %v4044_v42 = vrot.slane %v12031_v39, 1  ;;  %v12052_v44 = vadd.f32 %v11548_v16, %v4012_v9  ;;  %v7455_v12 = vpop.f32.mrb[99].mxu1  ;;  %v8271_v30 = vpack.i.bf16 %v4311_v58, %v4312_v0  ;;  %v4149_v58 = vrot.slane %v12048_v20, 2 }
 0x824   : > { %v4222_v28 = vrot.slane %v12043_v36, 4  ;;  %v4114_v43 = vrot.slane %v12043_v36, 1  ;;  %v8281_v56 = vpack.i.bf16 %v12043_v36, %v12048_v20  ;;  %v4238_v9 = vsel %vm1399_vm4, %v4220_v47, %v4221_v63 }
 0x825   : > { %v4055_v5 = vsel %vm1072_vm1, %v4043_v35, %v4044_v42  ;;  %v4045_v26 = vrot.slane %v12052_v44, 1  ;;  %8267 = vrot.lane.b32.xlu1 %v8266_v18, %s13626_s0  ;;  %v4348_v35 = vsel %vm1726_vm7, %v4326_v2, %v4327_v31  ;;  %v4186_v31 = vrot.slane %v12043_v36, 3 }
 0x826   : > { %v4079_v21 = vmax.f32 %v11996_v6, %v4055_v5  ;;  %8262 = vrot.lane.b32.xlu0 %v8261_v4, %s8659_s7  ;;  %v8276_v14 = vpack.i.bf16 %v4347_v34, %v4348_v35  ;;  %v4113_v6 = vrot.slane %v12048_v20, 1  ;;  %v4237_v2 = vsel %vm1399_vm4, %v4221_v63, %v4222_v28 }
 0x827   : > { %v4054_v51 = vsel %vm1072_vm1, %v4044_v42, %v4045_v26  ;;  %v8296_v38 = vpack.i.bf16 %v4237_v2, %v4238_v9  ;;  %v4150_v4 = vrot.slane %v12043_v36, 2  ;;  %v4201_v0 = vsel %vm1290_vm3, %v4185_v13, %v4186_v31 }
 0x828   : > { %v4080_v22 = vmax.f32 %v12031_v39, %v4054_v51  ;;  %v4017_v1 = vpop.f32.mrb[100].mxu1  ;;  %v4130_v18 = vsel %vm1072_vm1, %v4112_v25, %v4113_v6  ;;  %v12118_v47 = vsel %vm1072_vm1, %v4113_v6, %v4114_v43  ;;  %v4258_v51 = vrot.slane %v12043_v36, 5 }
 0x829   : > { %8277 = vrot.lane.b32.xlu1 %v8276_v14, %s8661_s2  ;;  %v12093_v11 = vadd.f32 %v11548_v16, %v4017_v1  ;;  %v7458_v59 = vpop.f32.mrb[101].mxu1  ;;  %v8286_v5 = vpack.i.bf16 %v4130_v18, %v12004_v32  ;;  %v12136_v14 = vmax.f32 %v4079_v21, 0.0  ;;  %v4165_v63 = vsel %vm1181_vm2, %v4149_v58, %v4150_v4 }
 0x82a   : > { %8272 = vrot.lane.b32.xlu0 %v8271_v30, %s13627_s1  ;;  %v4020_v39 = vpop.f32.mrb[102].mxu1  ;;  %v12147_v6 = vmax.f32 %v4080_v22, 0.0  ;;  %v4257_v21 = vrot.slane %v12048_v20, 5  ;;  %v4330_v1 = vrot.slane %v12043_v36, 7  ;;  %v4166_v22 = vsel %vm1181_vm2, %v4148_v62, %v4149_v58 }
 0x82b   : > { %v4046_v54 = vrot.slane %v12093_v11, 1  ;;  %v12110_v42 = vadd.f32 %v11548_v16, %v4020_v39  ;;  %v7459_v12 = vpop.f32.mrb[103].mxu1  ;;  %v4329_v9 = vrot.slane %v12048_v20, 7  ;;  %v4293_v62 = vrot.slane %v12048_v20, 6 }
 0x82c   : > { %v4274_v58 = vsel %vm1508_vm5, %v4256_v27, %v4257_v21  ;;  %v4116_v27 = vrot.slane %v12147_v6, 1  ;;  %v4332_v60 = vrot.slane %v12147_v6, 7 }
 0x82d   : > { %8282 = vrot.lane.b32.xlu1 %v8281_v56, %s13628_s19  ;;  %v4053_v25 = vsel %vm1072_vm1, %v4045_v26, %v4046_v54  ;;  %v4047_v34 = vrot.slane %v12110_v42, 1  ;;  %v4202_v26 = vsel %vm1290_vm3, %v4184_v40, %v4185_v13  ;;  %v4273_v56 = vsel %vm1508_vm5, %v4257_v21, %v4258_v51 }
 0x82e   : > { %8297 = vrot.lane.b32.xlu0 %v8296_v38, %s8658_s4  ;;  %v4081_v35 = vmax.f32 %v12052_v44, %v4053_v25  ;;  %v8301_v44 = vpack.i.bf16 %v12118_v47, %v4130_v18  ;;  %v8291_v13 = vpack.i.bf16 %v4201_v0, %v4202_v26  ;;  %v4294_v18 = vrot.slane %v12043_v36, 6 }
 0x82f   : > { %v12140_v32 = vsel %vm1072_vm1, %v4046_v54, %v4047_v34  ;;  %v13478_v0 = vrot.slane %v12147_v6, 4  ;;  %v4115_v26 = vrot.slane %v12136_v14, 1 }
 0x830   : > { %v4082_v40 = vmax.f32 %v12093_v11, %v12140_v32  ;;  %v4025_v30 = vpop.f32.mrb[104].mxu1 }
 0x831   : > { %8287 = vrot.lane.b32.xlu1 %v8286_v5, %s8662_s25  ;;  %v12155_v2 = vadd.f32 %v11548_v16, %v4025_v30  ;;  %v7462_v59 = vpop.f32.mrb[105].mxu1  ;;  %v8311_v5 = vpack.i.bf16 %v4165_v63, %v4166_v22  ;;  %v8306_v30 = vpack.i.bf16 %v4273_v56, %v4274_v58  ;;  %v4187_v58 = vrot.slane %v12136_v14, 3 }
 0x832   : > { %8302 = vrot.lane.b32.xlu0 %v8301_v44, %s8653_s3  ;;  %v4028_v39 = vpop.f32.mrb[106].mxu1  ;;  %v12172_v25 = vpop.permute.xlu1 %8107 }
 0x833   : > { %v4048_v54 = vrot.slane %v12155_v2, 1  ;;  %v12170_v12 = vadd.f32 %v11548_v16, %v4028_v39  ;;  %v7463_v38 = vpop.f32.mrb[107].mxu1  ;;  %v4345_v16 = vsel %vm1726_vm7, %v4329_v9, %v4330_v1  ;;  %v4223_v39 = vrot.slane %v12136_v14, 4 }
 0x835   : > { %8292 = vrot.lane.b32.xlu1 %v8291_v13, %s8657_s5  ;;  %v12188_v44 = vsel %vm1072_vm1, %v4047_v34, %v4048_v54  ;;  %v13474_v63 = vrot.slane %v12170_v12, 1  ;;  %v12195_v59 = vpop.permute.xlu0 %8112  ;;  %v4346_v13 = vsel %vm1726_vm7, %v4328_v7, %v4329_v9  ;;  %v4309_v34 = vsel %vm1617_vm6, %v4293_v62, %v4294_v18 }
 0x836   : > { %8312 = vrot.lane.b32.xlu0 %v8311_v5, %s13626_s0  ;;  %v4083_v21 = vmax.f32 %v12110_v42, %v12188_v44  ;;  %v8118_v56 = vpop.permute.xlu1 %8117  ;;  %v8321_v38 = vpack.i.bf16 %v4345_v16, %v4346_v13  ;;  %v4310_v7 = vsel %vm1617_vm6, %v4292_v45, %v4293_v62  ;;  %v4235_v5 = vsel %vm1399_vm4, %v4223_v39, %v13478_v0 }
 0x837   : > { %v12210_v22 = vsel %vm1072_vm1, %v4048_v54, %v13474_v63  ;;  %v4128_v54 = vsel %vm1072_vm1, %v4114_v43, %v4115_v26  ;;  %v12228_v16 = vmax.f32 %v4081_v35, 0.0  ;;  %v8316_v45 = vpack.i.bf16 %v4309_v34, %v4310_v7 }
 0x838   : > { %v8326_v62 = vpack.i.bf16 %v12147_v6, %v12136_v14  ;;  %v8115_v13 = vunpack.i.h.bf16 %v12195_v59  ;;  %v8120_v52 = vunpack.i.h.bf16 %v8118_v56  ;;  %v4236_v35 = vsel %vm1399_vm4, %v4222_v28, %v4223_v39 }
 0x839   : > { %8307 = vrot.lane.b32.xlu1 %v8306_v30, %s8659_s7  ;;  %v12237_v30 = vsel %vm1072_vm1, %v4115_v26, %v4116_v27  ;;  %v8123_v43 = vpop.permute.xlu0 %8122  ;;  %v13476_v34 = vrot.slane %v12147_v6, 3  ;;  %v8119_v7 = vunpack.i.l.bf16 %v8118_v56  ;;  %v8341_v57 = vpack.i.bf16 %v4235_v5, %v4236_v35 }
 0x83a   : > { %8322 = vrot.lane.b32.xlu0 %v8321_v38, %s8661_s2  ;;  %v8114_v38 = vunpack.i.l.bf16 %v12195_v59  ;;  %v8128_v19 = vpop.permute.xlu1 %8127  ;;  %v8331_v33 = vpack.i.bf16 %v4128_v54, %v12118_v47  ;;  %v8125_v26 = vunpack.i.h.bf16 %v8123_v43  ;;  %v8124_v55 = vunpack.i.l.bf16 %v8123_v43 }
 0x83b   : > { %v8346_v29 = vpack.i.bf16 %v12237_v30, %v4128_v54  ;;  %v4200_v28 = vsel %vm1290_vm3, %v4186_v31, %v4187_v58  ;;  %v8130_v39 = vunpack.i.h.bf16 %v8128_v19  ;;  %v8129_v24 = vunpack.i.l.bf16 %v8128_v19 }
 0x83c   : > { %v4151_v59 = vrot.slane %v12136_v14, 2  ;;  %v4152_v56 = vrot.slane %v12147_v6, 2  ;;  %v5042_v47 = vsel %vm13482_vm10, %v8115_v13, %v8120_v52  ;;  %v4199_v54 = vsel %vm1290_vm3, %v4187_v58, %v13476_v34 }
 0x83d   : > { %8317 = vrot.lane.b32.xlu1 %v8316_v45, %s13627_s1  ;;  %v8133_v5 = vpop.permute.xlu0 %8132  ;;  %v4259_v45 = vrot.slane %v12136_v14, 5  ;;  %v4260_v31 = vrot.slane %v12147_v6, 5  ;;  %v5041_v19 = vsel %vm13482_vm10, %v8114_v38, %v8119_v7  ;;  %v4987_v52 = vsel %vm2367_vm12, %v11607_v53, %v8125_v26 }
 0x83e   : > { %8327 = vrot.lane.b32.xlu0 %v8326_v62, %s13628_s19  ;;  %v8135_v62 = vunpack.i.h.bf16 %v8133_v5  ;;  %v8134_v43 = vunpack.i.l.bf16 %v8133_v5  ;;  %v8138_v35 = vpop.permute.xlu1 %8137  ;;  %v4986_v63 = vsel %vm2367_vm12, %v11594_v8, %v8124_v55  ;;  %v5060_v58 = vsel %vm13483_vm13, %v5041_v19, %v8129_v24 }
 0x83f   : > { %v8140_v15 = vunpack.i.h.bf16 %v8138_v35  ;;  %v8139_v9 = vunpack.i.l.bf16 %v8138_v35  ;;  %v5061_v34 = vsel %vm13483_vm13, %v5042_v47, %v8130_v39  ;;  %v8336_v19 = vpack.i.bf16 %v4199_v54, %v4200_v28 }
 0x840   : > { %v5004_v7 = vsel %vm3800_vm8, %v4986_v63, %v8134_v43  ;;  %v5005_v5 = vsel %vm3800_vm8, %v4987_v52, %v8135_v62  ;;  %v4163_v63 = vsel %vm1181_vm2, %v4151_v59, %v4152_v56  ;;  %v4164_v11 = vsel %vm1181_vm2, %v4150_v4, %v4151_v59 }
 0x841   : > { %8342 = vrot.lane.b32.xlu1 %v8341_v57, %s8658_s4  ;;  %v5022_v53 = vsel %vm3895_vm9, %v5004_v7, %v8114_v38  ;;  %v5023_v26 = vsel %vm3895_vm9, %v5005_v5, %v8115_v13  ;;  %v8143_v55 = vpop.permute.xlu0 %8142  ;;  %v5079_v35 = vsel %vm13481_vm15, %v5060_v58, %v8139_v9  ;;  %v5080_v57 = vsel %vm13481_vm15, %v5061_v34, %v8140_v15 }
 0x842   : > { %8332 = vrot.lane.b32.xlu0 %v8331_v33, %s8662_s25  ;;  %v5154_v0 = vpack.c.bf16 %v5023_v26, %v5022_v53  ;;  %v5155_v24 = vpack.c.bf16 %v5080_v57, %v5079_v35  ;;  %v12286_v33 = vmax.f32 %v4082_v40, 0.0  ;;  %v4271_v13 = vsel %vm1508_vm5, %v4259_v45, %v4260_v31 }
 0x843   : > { %v4331_v34 = vrot.slane %v12136_v14, 7  ;;  %v4296_v38 = vrot.slane %v12147_v6, 6  ;;  %v8145_v28 = vunpack.i.h.bf16 %v8143_v55  ;;  %v8144_v39 = vunpack.i.l.bf16 %v8143_v55 }
 0x844   : > { %5457 = vmatprep.mubr.bf16.mxu0 %v5155_v24  ;;  %v4272_v32 = vsel %vm1508_vm5, %v4258_v51, %v4259_v45  ;;  %v4295_v54 = vrot.slane %v12136_v14, 6  ;;  %v8110_v62 = vunpack.i.h.bf16 %v12172_v25  ;;  %v8109_v4 = vunpack.i.l.bf16 %v12172_v25 }
 0x845   : > { %8347 = vrot.lane.b32.xlu1 %v8346_v29, %s8653_s3  ;;  %5458 = vmatmul.mubr.bf16.vlgmr.msra.gmra.mrb[72].mxu0 %v5154_v0  ;;  %v8356_v29 = vpack.i.bf16 %v4163_v63, %v4164_v11  ;;  %v4343_v47 = vsel %vm1726_vm7, %v4331_v34, %v4332_v60  ;;  %v8351_v0 = vpack.i.bf16 %v4271_v13, %v4272_v32  ;;  %vm5397_vm15 = vcmask 130048  }
 0x846   : > { %8337 = vrot.lane.b32.xlu0 %v8336_v19, %s8657_s5  ;;  %v4344_v51 = vsel %vm1726_vm7, %v4330_v1, %v4331_v34  ;;  %v4307_v59 = vsel %vm1617_vm6, %v4295_v54, %v4296_v38  ;;  %v4226_v45 = vrot.slane %v12286_v33, 4  ;;  %v4117_v43 = vrot.slane %v12228_v16, 1 }
 0x847   : > { %v12304_v40 = vpop.permute.xlu0 %8147  ;;  %v12327_v25 = vmax.f32 %v4083_v21, 0.0  ;;  %v5099_v52 = vsel %vm5097_vm11, %v8140_v15, %v8145_v28  ;;  %v5098_v58 = vsel %vm5097_vm11, %v8139_v9, %v8144_v39  ;;  %v8366_v1 = vpack.i.bf16 %v4343_v47, %v4344_v51 }
 0x848   : > { %v4308_v5 = vsel %vm1617_vm6, %v4294_v18, %v4295_v54  ;;  %v4225_v26 = vrot.slane %v12228_v16, 4  ;;  %v4118_v42 = vrot.slane %v12286_v33, 1  ;;  %v4190_v44 = vrot.slane %v12286_v33, 3 }
 0x849   : > { %8357 = vrot.lane.b32.xlu1 %v8356_v29, %s13626_s0  ;;  %v8361_v15 = vpack.i.bf16 %v4307_v59, %v4308_v5  ;;  %v4189_v55 = vrot.slane %v12228_v16, 3  ;;  %v5117_v35 = vsel %vm5116_vm14, %v5098_v58, %v8109_v4  ;;  %v5118_v57 = vsel %vm5116_vm14, %v5099_v52, %v8110_v62 }
 0x84a   : > { %8352 = vrot.lane.b32.xlu0 %v8351_v0, %s8659_s7  ;;  %v12332_v7 = vpop.permute.xlu1 %8162  ;;  %v4233_v18 = vsel %vm1399_vm4, %v4225_v26, %v4226_v45  ;;  %v4126_v24 = vsel %vm1072_vm1, %v4116_v27, %v4117_v43  ;;  %v8371_v34 = vpack.i.bf16 %v12286_v33, %v12228_v16  ;;  %v13629_v11 = vrot.slane %v12147_v6, 4 }
 0x84b   : > { %v8153_v53 = vpop.permute.xlu0 %8152  ;;  %v12366_v27 = vsel %vm1072_vm1, %v4117_v43, %v4118_v42  ;;  %v4197_v47 = vsel %vm1290_vm3, %v4189_v55, %v4190_v44  ;;  %v13630_v54 = vmax.f32 %v12155_v2, %v12210_v22  ;;  %v8376_v0 = vpack.i.bf16 %v4126_v24, %v12237_v30 }
 0x84c   : > { %v8155_v21 = vunpack.i.h.bf16 %v8153_v53  ;;  %v8154_v9 = vunpack.i.l.bf16 %v8153_v53  ;;  %v4234_v29 = vsel %vm1399_vm4, %v13629_v11, %v4225_v26  ;;  %v4154_v51 = vrot.slane %v12286_v33, 2 }
 0x84d   : > { %8367 = vrot.lane.b32.xlu1 %v8366_v1, %s8661_s2  ;;  %v12375_v62 = vmax.f32 %v13630_v54, 0.0  ;;  %v8386_v4 = vpack.i.bf16 %v4233_v18, %v4234_v29  ;;  %v13631_v52 = vrot.slane %v12147_v6, 3  ;;  %v4153_v2 = vrot.slane %v12228_v16, 2 }
 0x84e   : > { %8362 = vrot.lane.b32.xlu0 %v8361_v15, %s13627_s1  ;;  %v5136_v19 = vsel %vm5135_vm0, %v5117_v35, %v8154_v9  ;;  %v5137_v63 = vsel %vm5135_vm0, %v5118_v57, %v8155_v21  ;;  %v5157_v13 = vpack.c.bf16 %v8155_v21, %v8154_v9  ;;  %v8168_v28 = vpop.permute.xlu1 %8167  ;;  %v8165_v22 = vunpack.i.h.bf16 %v12332_v7 }
 0x84f   : > { %v5156_v39 = vpack.c.bf16 %v5137_v63, %v5136_v19  ;;  %v8158_v32 = vpop.permute.xlu0 %8157  ;;  %v8170_v59 = vunpack.i.h.bf16 %v8168_v28  ;;  %v8169_v43 = vunpack.i.l.bf16 %v8168_v28  ;;  %v4198_v58 = vsel %vm1290_vm3, %v13631_v52, %v4189_v55 }
 0x850   : > { %6978 = vmatprep.mubr.msk.bf16.mxu1 %vm5397_vm15, %v5157_v13  ;;  %v8391_v30 = vpack.i.bf16 %v12366_v27, %v4126_v24  ;;  %v8381_v5 = vpack.i.bf16 %v4197_v47, %v4198_v58  ;;  %v4261_v53 = vrot.slane %v12228_v16, 5  ;;  %v4262_v9 = vrot.slane %v12286_v33, 5 }
 0x851   : > { %8372 = vrot.lane.b32.xlu1 %v8371_v34, %s13628_s19  ;;  %5563 = vmatmul.mubr.bf16.vlgmr.msra.gmra.mrb[108].mxu1 %v5156_v39  ;;  %v4334_v35 = vrot.slane %v12286_v33, 7  ;;  %v8160_v55 = vunpack.i.h.bf16 %v8158_v32  ;;  %v8159_v57 = vunpack.i.l.bf16 %v8158_v32  ;;  %v4161_v18 = vsel %vm1181_vm2, %v4153_v2, %v4154_v51 }
 0x852   : > { %8387 = vrot.lane.b32.xlu0 %v8386_v4, %s8658_s4  ;;  %v8178_v1 = vpop.permute.xlu1 %8177  ;;  %v4333_v24 = vrot.slane %v12228_v16, 7  ;;  %v4989_v19 = vsel %vm2367_vm12, %v11758_v10, %v8170_v59  ;;  %v4988_v63 = vsel %vm2367_vm12, %v11617_v37, %v8169_v43  ;;  %v8164_v28 = vunpack.i.l.bf16 %v12332_v7 }
 0x853   : > { %v8180_v26 = vunpack.i.h.bf16 %v8178_v1  ;;  %v8179_v15 = vunpack.i.l.bf16 %v8178_v1  ;;  %v8173_v21 = vpop.permute.xlu0 %8172  ;;  %v4162_v10 = vsel %vm1181_vm2, %v4152_v56, %v4153_v2  ;;  %v4269_v37 = vsel %vm1508_vm5, %v4261_v53, %v4262_v9 }
 0x854   : > { %v8175_v13 = vunpack.i.h.bf16 %v8173_v21  ;;  %v8174_v34 = vunpack.i.l.bf16 %v8173_v21  ;;  %v8401_v29 = vpack.i.bf16 %v4161_v18, %v4162_v10  ;;  %v4341_v7 = vsel %vm1726_vm7, %v4333_v24, %v4334_v35 }
 0x855   : > { %8377 = vrot.lane.b32.xlu1 %v8376_v0, %s8662_s25  ;;  %v5006_v39 = vsel %vm3800_vm8, %v4988_v63, %v8179_v15  ;;  %v5007_v11 = vsel %vm3800_vm8, %v4989_v19, %v8180_v26  ;;  %v4298_v47 = vrot.slane %v12286_v33, 6  ;;  %v5044_v54 = vsel %vm13482_vm10, %v8160_v55, %v8165_v22 }
 0x856   : > { %8392 = vrot.lane.b32.xlu0 %v8391_v30, %s8653_s3  ;;  %v5043_v4 = vsel %vm13482_vm10, %v8159_v57, %v8164_v28  ;;  %v5063_v43 = vsel %vm13483_vm13, %v5044_v54, %v8175_v13  ;;  %v5024_v52 = vsel %vm3895_vm9, %v5006_v39, %v8159_v57  ;;  %v5025_v58 = vsel %vm3895_vm9, %v5007_v11, %v8160_v55  ;;  %v8188_v54 = vpop.permute.xlu1 %8187 }
 0x857   : > { %v12410_v32 = vpop.permute.xlu0 %8182  ;;  %v5062_v59 = vsel %vm13483_vm13, %v5043_v4, %v8174_v34  ;;  %v4270_v2 = vsel %vm1508_vm5, %v4260_v31, %v4261_v53  ;;  %v4297_v22 = vrot.slane %v12228_v16, 6  ;;  %vm13632_vm10 = vcmask 916480  }
 0x858   : > { %v8185_v56 = vunpack.i.h.bf16 %v12410_v32  ;;  %v8184_v0 = vunpack.i.l.bf16 %v12410_v32  ;;  %vm13633_vm13 = vmmov %vm13632_vm10  ;;  %v4342_v26 = vsel %vm1726_vm7, %v4332_v60, %v4333_v24  ;;  %v5158_v53 = vpack.c.bf16 %v5025_v58, %v5024_v52 }
 0x859   : > { %8382 = vrot.lane.b32.xlu1 %v8381_v5, %s8657_s5  ;;  %v8396_v5 = vpack.i.bf16 %v4269_v37, %v4270_v2  ;;  %v8411_v21 = vpack.i.bf16 %v4341_v7, %v4342_v26  ;;  %v4305_v31 = vsel %vm1617_vm6, %v4297_v22, %v4298_v47  ;;  %v4228_v55 = vrot.slane %v12375_v62, 4 }
 0x85a   : > { %8402 = vrot.lane.b32.xlu0 %v8401_v29, %s13626_s0  ;;  %v5081_v30 = vsel %vm13632_vm10, %v5062_v59, %v8184_v0  ;;  %v5082_v1 = vsel %vm13633_vm13, %v5063_v43, %v8185_v56  ;;  %v4119_v57 = vrot.slane %v12327_v25, 1  ;;  %v4306_v60 = vsel %vm1617_vm6, %v4296_v38, %v4297_v22  ;;  %vm13646_vm13 = vmmov %vm13632_vm10 }
 0x85b   : > { %v5159_v15 = vpack.c.bf16 %v5082_v1, %v5081_v30  ;;  %v4227_v18 = vrot.slane %v12327_v25, 4  ;;  %v13634_v24 = vrot.slane %v11551_v46, 1  ;;  %v13635_v19 = vrot.slane %v12170_v12, 1 }
 0x85c   : > { %v8406_v13 = vpack.i.bf16 %v4305_v31, %v4306_v60  ;;  %v4120_v34 = vrot.slane %v12375_v62, 1  ;;  %v8416_v28 = vpack.i.bf16 %v12375_v62, %v12327_v25  ;;  %v4124_v46 = vsel %vm1072_vm1, %v4118_v42, %v4119_v57 }
 0x85d   : > { %8397 = vrot.lane.b32.xlu1 %v8396_v5, %s8659_s7  ;;  %5465 = vmatprep.mubr.bf16.mxu0 %v5159_v15  ;;  %v4067_v63 = vsel %vm1072_vm1, %v13635_v19, %v13634_v24  ;;  %v4231_v38 = vsel %vm1399_vm4, %v4227_v18, %v4228_v55  ;;  %v4192_v39 = vrot.slane %v12375_v62, 3  ;;  %v4232_v10 = vsel %vm1399_vm4, %v4226_v45, %v4227_v18 }
 0x85e   : > { %8412 = vrot.lane.b32.xlu0 %v8411_v21, %s8661_s2  ;;  %5466 = vmatmul.mubr.bf16.gmra.mrb[76].mxu0 %v5158_v53  ;;  %v4085_v11 = vmax.f32 %v12170_v12, %v4067_v63  ;;  %v4191_v29 = vrot.slane %v12327_v25, 3  ;;  %v8431_v37 = vpack.i.bf16 %v4231_v38, %v4232_v10  ;;  %v12489_v7 = vsel %vm1072_vm1, %v4119_v57, %v4120_v34 }
 0x85f   : > { %v4156_v42 = vrot.slane %v12375_v62, 2  ;;  %v8421_v12 = vpack.i.bf16 %v4124_v46, %v12366_v27  ;;  %v4155_v45 = vrot.slane %v12327_v25, 2  ;;  %v4264_v59 = vrot.slane %v12375_v62, 5 }
 0x860   : > { %v4195_v4 = vsel %vm1290_vm3, %v4191_v29, %v4192_v39  ;;  %v12498_v43 = vmax.f32 %v4085_v11, 0.0  ;;  %v8436_v52 = vpack.i.bf16 %v12489_v7, %v4124_v46  ;;  %v4196_v27 = vsel %vm1290_vm3, %v4190_v44, %v4191_v29 }
 0x861   : > { %8407 = vrot.lane.b32.xlu1 %v8406_v13, %s13627_s1  ;;  %v4159_v58 = vsel %vm1181_vm2, %v4155_v45, %v4156_v42  ;;  %v4263_v2 = vrot.slane %v12327_v25, 5  ;;  %v4336_v22 = vrot.slane %v12375_v62, 7  ;;  %v4300_v30 = vrot.slane %v12375_v62, 6 }
 0x862   : > { %8417 = vrot.lane.b32.xlu0 %v8416_v28, %s13628_s19  ;;  %v8190_v1 = vunpack.i.h.bf16 %v8188_v54  ;;  %v8189_v5 = vunpack.i.l.bf16 %v8188_v54  ;;  %v8426_v26 = vpack.i.bf16 %v4195_v4, %v4196_v27  ;;  %v4160_v44 = vsel %vm1181_vm2, %v4154_v51, %v4155_v45 }
 0x863   : > { %v4267_v21 = vsel %vm1508_vm5, %v4263_v2, %v4264_v59  ;;  %v4335_v31 = vrot.slane %v12327_v25, 7  ;;  %v4299_v53 = vrot.slane %v12327_v25, 6  ;;  %v8150_v57 = vunpack.i.h.bf16 %v12304_v40 }
 0x864   : > { %v8446_v60 = vpack.i.bf16 %v4159_v58, %v4160_v44  ;;  %v4268_v18 = vsel %vm1508_vm5, %v4262_v9, %v4263_v2  ;;  %v4193_v19 = vrot.slane %v12498_v43, 3  ;;  %v8149_v63 = vunpack.i.l.bf16 %v12304_v40 }
 0x865   : > { %8432 = vrot.lane.b32.xlu1 %v8431_v37, %s8658_s4  ;;  %v4339_v51 = vsel %vm1726_vm7, %v4335_v31, %v4336_v22  ;;  %v4303_v24 = vsel %vm1617_vm6, %v4299_v53, %v4300_v30  ;;  %v5101_v13 = vsel %vm5097_vm11, %v8185_v56, %v8190_v1  ;;  %v5100_v9 = vsel %vm5097_vm11, %v8184_v0, %v8189_v5 }
 0x866   : > { %8422 = vrot.lane.b32.xlu0 %v8421_v12, %s8662_s25  ;;  %v8441_v28 = vpack.i.bf16 %v4267_v21, %v4268_v18  ;;  %v4340_v11 = vsel %vm1726_vm7, %v4334_v35, %v4335_v31  ;;  %v4304_v40 = vsel %vm1617_vm6, %v4298_v47, %v4299_v53  ;;  %v4229_v32 = vrot.slane %v12498_v43, 4 }
 0x867   : > { %v12514_v15 = vpop.permute.xlu1 %8192  ;;  %v4121_v56 = vrot.slane %v12498_v43, 1  ;;  %v8456_v29 = vpack.i.bf16 %v4339_v51, %v4340_v11  ;;  %v8451_v37 = vpack.i.bf16 %v4303_v24, %v4304_v40  ;;  %v4194_v12 = vsel %vm1290_vm3, %v4192_v39, %v4193_v19 }
 0x868   : > { %v5119_v35 = vsel %vm5116_vm14, %v5100_v9, %v8149_v63  ;;  %v5120_v54 = vsel %vm5116_vm14, %v5101_v13, %v8150_v57  ;;  %v4265_v4 = vrot.slane %v12498_v43, 5  ;;  %v4230_v5 = vsel %vm1399_vm4, %v4228_v55, %v4229_v32 }
 0x869   : > { %8437 = vrot.lane.b32.xlu1 %v8436_v52, %s8653_s3  ;;  %v13636_v52 = vrot.slane %v11594_v8, 3  ;;  %v4122_v21 = vsel %vm1072_vm1, %v4120_v34, %v4121_v56  ;;  %v13638_v31 = vrot.slane %v11594_v8, 1  ;;  %v4157_v55 = vrot.slane %v12498_v43, 2 }
 0x86a   : > { %8427 = vrot.lane.b32.xlu0 %v8426_v26, %s8657_s5  ;;  %v12548_v38 = vpop.permute.xlu0 %8207  ;;  %v13637_v26 = vrot.slane %v11594_v8, 4  ;;  %v8471_v34 = vpack.i.bf16 %v4122_v21, %v12489_v7  ;;  %v4301_v63 = vrot.slane %v12498_v43, 6  ;;  %v13639_v11 = vrot.slane %v11594_v8, 5 }
 0x86b   : > { %v8198_v46 = vpop.permute.xlu1 %8197  ;;  %v4211_v27 = vsel %vm1290_vm3, %v4193_v19, %v13636_v52  ;;  %v12592_v53 = vsel %vm1072_vm1, %v4121_v56, %v13638_v31  ;;  %v4266_v19 = vsel %vm1508_vm5, %v4264_v59, %v4265_v4  ;;  %v4158_v59 = vsel %vm1181_vm2, %v4156_v42, %v4157_v55 }
 0x86c   : > { %v8200_v0 = vunpack.i.h.bf16 %v8198_v46  ;;  %v8199_v10 = vunpack.i.l.bf16 %v8198_v46  ;;  %v4247_v44 = vsel %vm1399_vm4, %v4229_v32, %v13637_v26  ;;  %v8461_v18 = vpack.i.bf16 %v4211_v27, %v4194_v12 }
 0x86d   : > { %8447 = vrot.lane.b32.xlu1 %v8446_v60, %s13626_s0  ;;  %v8466_v51 = vpack.i.bf16 %v4247_v44, %v4230_v5  ;;  %v8476_v46 = vpack.i.bf16 %v12592_v53, %v4122_v21  ;;  %v4283_v40 = vsel %vm1508_vm5, %v4265_v4, %v13639_v11  ;;  %v13640_v56 = vrot.slane %v11594_v8, 2 }
 0x86e   : > { %8442 = vrot.lane.b32.xlu0 %v8441_v28, %s8659_s7  ;;  %v5161_v47 = vpack.c.bf16 %v8200_v0, %v8199_v10  ;;  %v8213_v45 = vpop.permute.xlu0 %8212  ;;  %v5138_v58 = vsel %vm5135_vm0, %v5119_v35, %v8199_v10  ;;  %v5139_v2 = vsel %vm5135_vm0, %v5120_v54, %v8200_v0  ;;  %v8210_v35 = vunpack.i.h.bf16 %v12548_v38 }
 0x86f   : > { %v8203_v39 = vpop.permute.xlu1 %8202  ;;  %v5160_v1 = vpack.c.bf16 %v5139_v2, %v5138_v58  ;;  %v8215_v57 = vunpack.i.h.bf16 %v8213_v45  ;;  %v8214_v60 = vunpack.i.l.bf16 %v8213_v45  ;;  %v4175_v0 = vsel %vm1181_vm2, %v4157_v55, %v13640_v56 }
 0x870   : > { %6979 = vmatprep.mubr.msk.bf16.mxu1 %vm5397_vm15, %v5161_v47  ;;  %v8205_v7 = vunpack.i.h.bf16 %v8203_v39  ;;  %v8204_v32 = vunpack.i.l.bf16 %v8203_v39  ;;  %v8209_v54 = vunpack.i.l.bf16 %v12548_v38  ;;  %v8481_v45 = vpack.i.bf16 %v4283_v40, %v4266_v19 }
 0x871   : > { %8457 = vrot.lane.b32.xlu1 %v8456_v29, %s8661_s2  ;;  %5571 = vmatmul.mubr.bf16.gmra.mrb[112].mxu1 %v5160_v1  ;;  %v4991_v10 = vsel %vm2367_vm12, %v11873_v61, %v8215_v57  ;;  %v4990_v29 = vsel %vm2367_vm12, %v11763_v23, %v8214_v60  ;;  %v8486_v52 = vpack.i.bf16 %v4175_v0, %v4158_v59  ;;  %v4337_v61 = vrot.slane %v12498_v43, 7 }
 0x872   : > { %8452 = vrot.lane.b32.xlu0 %v8451_v37, %s13627_s1  ;;  %v8223_v24 = vpop.permute.xlu0 %8222  ;;  %vm13641_vm2 = vcmask 261120   ;;  %vm13643_vm4 = vcmask 588800   ;;  %v4302_v26 = vsel %vm1617_vm6, %v4300_v30, %v4301_v63  ;;  %v13645_v44 = vrot.slane %v11594_v8, 6 }
 0x873   : > { %v8225_v13 = vunpack.i.h.bf16 %v8223_v24  ;;  %v8224_v9 = vunpack.i.l.bf16 %v8223_v24  ;;  %v8218_v28 = vpop.permute.xlu1 %8217  ;;  %v5045_v27 = vsel %vm13641_vm2, %v8204_v32, %v8209_v54  ;;  %vm13642_vm3 = vmmov %vm13641_vm2  ;;  %v4338_v60 = vsel %vm1726_vm7, %v4336_v22, %v4337_v61 }
 0x874   : > { %v8220_v37 = vunpack.i.h.bf16 %v8218_v28  ;;  %v8219_v12 = vunpack.i.l.bf16 %v8218_v28  ;;  %v5046_v23 = vsel %vm13642_vm3, %v8205_v7, %v8210_v35  ;;  %vm13644_vm5 = vmmov %vm13643_vm4  ;;  %v4319_v21 = vsel %vm1617_vm6, %v4301_v63, %v13645_v44 }
 0x875   : > { %8462 = vrot.lane.b32.xlu1 %v8461_v18, %s8657_s5  ;;  %v5008_v4 = vsel %vm3800_vm8, %v4990_v29, %v8224_v9  ;;  %v5009_v42 = vsel %vm3800_vm8, %v4991_v10, %v8225_v13  ;;  %v13647_v18 = vrot.slane %v11594_v8, 7  ;;  %v8491_v24 = vpack.i.bf16 %v4319_v21, %v4302_v26  ;;  %vm13648_vm6 = vmmov %vm13641_vm2  ;;  %s13686_s5 = sld [smem:[#allocation33_spill]] }
 0x876   : > { %8467 = vrot.lane.b32.xlu0 %v8466_v51, %s8658_s4  ;;  %v5064_v38 = vsel %vm13643_vm4, %v5045_v27, %v8219_v12  ;;  %v5065_v39 = vsel %vm13644_vm5, %v5046_v23, %v8220_v37  ;;  %v5026_v1 = vsel %vm3895_vm9, %v5008_v4, %v8204_v32  ;;  %v5027_v5 = vsel %vm3895_vm9, %v5009_v42, %v8205_v7  ;;  %v8233_v63 = vpop.permute.xlu0 %8232 }
 0x877   : > { %v8228_v47 = vpop.permute.xlu1 %8227  ;;  %v4355_v30 = vsel %vm1726_vm7, %v4337_v61, %v13647_v18  ;;  %v5162_v51 = vpack.c.bf16 %v5027_v5, %v5026_v1  ;;  %v8496_v19 = vpack.i.bf16 %v11594_v8, %v12498_v43  ;;  %v8506_v22 = vpack.i.bf16 %v11688_v3, %v12592_v53  ;;  %vm13649_vm7 = vmmov %vm13641_vm2 }
 0x878   : > { %v8230_v58 = vunpack.i.h.bf16 %v8228_v47  ;;  %v8229_v2 = vunpack.i.l.bf16 %v8228_v47  ;;  %v8235_v13 = vunpack.i.h.bf16 %v8233_v63  ;;  %v8234_v9 = vunpack.i.l.bf16 %v8233_v63  ;;  %vm13650_vm2 = vmmov %vm13643_vm4 }
 0x879   : > { %8472 = vrot.lane.b32.xlu1 %v8471_v34, %s8662_s25  ;;  %v8501_v34 = vpack.i.bf16 %v4355_v30, %v4338_v60  ;;  %v8195_v7 = vunpack.i.h.bf16 %v12514_v15  ;;  %v8194_v8 = vunpack.i.l.bf16 %v12514_v15  ;;  %vm13651_vm3 = vmmov %vm13650_vm2 }
 0x87a   : > { %8477 = vrot.lane.b32.xlu0 %v8476_v46, %s8653_s3  ;;  %v5083_v31 = vsel %vm13632_vm10, %v5064_v38, %v8229_v2  ;;  %v5084_v55 = vsel %vm13646_vm13, %v5065_v39, %v8230_v58  ;;  %v5102_v46 = vsel %vm5097_vm11, %v8229_v2, %v8234_v9  ;;  %v5103_v11 = vsel %vm5097_vm11, %v8230_v58, %v8235_v13  ;;  %vm13652_vm4 = vmmov %vm13632_vm10  ;;  %v8572_v9 = vld [vmem:[%s13398_s14 + $0x8] sm:$0xff]  }
 0x87b   : > { %v5163_v57 = vpack.c.bf16 %v5084_v55, %v5083_v31  ;;  %v5121_v59 = vsel %vm5116_vm14, %v5102_v46, %v8194_v8  ;;  %v5122_v56 = vsel %vm5116_vm14, %v5103_v11, %v8195_v7  ;;  %vm13653_vm5 = vmmov %vm13652_vm4 }
 0x87c   : > { %vm13654_vm10 = vmmov %vm13648_vm6 }
 0x87d   : > { %8482 = vrot.lane.b32.xlu1 %v8481_v45, %s8659_s7  ;;  %5473 = vmatprep.mubr.bf16.mxu0 %v5163_v57  ;;  %vm13655_vm13 = vmmov %vm13648_vm6 }
 0x87e   : > { %8487 = vrot.lane.b32.xlu0 %v8486_v52, %s13626_s0  ;;  %5474 = vmatmul.mubr.bf16.gmra.mrb[80].mxu0 %v5162_v51 }
 0x881   : > { %8492 = vrot.lane.b32.xlu1 %v8491_v24, %s13627_s1  ;;  %v8571_v24 = vld [vmem:[%s13398_s14] sm:$0xff]  }
 0x882   : > { %8502 = vrot.lane.b32.xlu0 %v8501_v34, %s8661_s2  ;;  %7465 = vmatpush3.bf16.msra.mxu0 %v8571_v24  ;;  %s6877_s2 = sshll.u32 %s13690_s28, 2 }
 0x883   : > { %7466 = vmatprep.subr.bf16.mxu0 %v13571_v50  ;;  %s737_s4 = scalar_lea.vmem %s13408_s24, %s6877_s2 }
 0x885   : > { %8497 = vrot.lane.b32.xlu1 %v8496_v19, %s13628_s19 }
 0x886   : > { %8507 = vrot.lane.b32.xlu0 %v8506_v22, %s8662_s25  ;;  %7467 = vmatpush3.bf16.msra.mxu0 %v8572_v9 }
 0x887   : > { %7468 = vmatprep.subr.bf16.mxu0 %v13571_v50 }
 0x88c   : > { %v12661_v28 = vpop.permute.xlu0 %8237 }
 0x88d   : > { %v8240_v7 = vunpack.i.h.bf16 %v12661_v28  ;;  %v8239_v8 = vunpack.i.l.bf16 %v12661_v28 }
 0x88f   : > { %v8253_v40 = vpop.permute.xlu1 %8252 }
 0x890   : > { %v8243_v32 = vpop.permute.xlu0 %8242  ;;  %v8255_v58 = vunpack.i.h.bf16 %v8253_v40  ;;  %v8254_v2 = vunpack.i.l.bf16 %v8253_v40 }
 0x891   : > { %v8245_v3 = vunpack.i.h.bf16 %v8243_v32  ;;  %v8244_v53 = vunpack.i.l.bf16 %v8243_v32 }
 0x893   : > { %v5165_v0 = vpack.c.bf16 %v8245_v3, %v8244_v53  ;;  %v8258_v10 = vpop.permute.xlu1 %8257  ;;  %v5140_v29 = vsel %vm5135_vm0, %v5121_v59, %v8244_v53  ;;  %v5141_v37 = vsel %vm5135_vm0, %v5122_v56, %v8245_v3  ;;  %v8573_v56 = vld [vmem:[%s13398_s14 + $0x10] sm:$0xff]  }
 0x894   : > { %v8248_v12 = vpop.permute.xlu0 %8247  ;;  %v5164_v35 = vpack.c.bf16 %v5141_v37, %v5140_v29  ;;  %v8260_v54 = vunpack.i.h.bf16 %v8258_v10  ;;  %v8259_v4 = vunpack.i.l.bf16 %v8258_v10  ;;  %7469 = vmatpush3.bf16.msra.mxu0 %v8573_v56 }
 0x895   : > { %6980 = vmatprep.mubr.msk.bf16.mxu1 %vm5397_vm15, %v5165_v0  ;;  %v8250_v42 = vunpack.i.h.bf16 %v8248_v12  ;;  %v8249_v47 = vunpack.i.l.bf16 %v8248_v12  ;;  %7470 = vmatprep.subr.bf16.mxu0 %v13571_v50 }
 0x896   : > { %5579 = vmatmul.mubr.bf16.gmra.mrb[116].mxu1 %v5164_v35  ;;  %v4993_v38 = vsel %vm2367_vm12, %v11969_v49, %v8260_v54  ;;  %v4992_v39 = vsel %vm2367_vm12, %v11875_v17, %v8259_v4 }
 0x897   : > { %v8268_v15 = vpop.permute.xlu1 %8267  ;;  %v5048_v44 = vsel %vm13648_vm6, %v8250_v42, %v8255_v58  ;;  %v5047_v21 = vsel %vm13649_vm7, %v8249_v47, %v8254_v2  ;;  %vm13656_vm6 = vmmov %vm13650_vm2 }
 0x898   : > { %v8270_v45 = vunpack.i.h.bf16 %v8268_v15  ;;  %v8269_v52 = vunpack.i.l.bf16 %v8268_v15  ;;  %v8263_v61 = vpop.permute.xlu0 %8262  ;;  %vm13657_vm7 = vmmov %vm13650_vm2 }
 0x899   : > { %v8265_v27 = vunpack.i.h.bf16 %v8263_v61  ;;  %v8264_v23 = vunpack.i.l.bf16 %v8263_v61 }
 0x89a   : > { %v5010_v1 = vsel %vm3800_vm8, %v4992_v39, %v8269_v52  ;;  %v5011_v5 = vsel %vm3800_vm8, %v4993_v38, %v8270_v45 }
 0x89b   : > { %v8278_v26 = vpop.permute.xlu1 %8277  ;;  %v5066_v55 = vsel %vm13650_vm2, %v5047_v21, %v8264_v23  ;;  %v5067_v57 = vsel %vm13651_vm3, %v5048_v44, %v8265_v27  ;;  %v5028_v17 = vsel %vm3895_vm9, %v5010_v1, %v8249_v47  ;;  %v5029_v51 = vsel %vm3895_vm9, %v5011_v5, %v8250_v42  ;;  %v8574_v27 = vld [vmem:[%s13398_s14 + $0x18] sm:$0xff]   ;;  %v8575_v21 = vld [vmem:[%s13398_s14 + $0x20] sm:$0xff]   ;;  %vm13658_vm2 = vmmov %vm13652_vm4 }
 0x89c   : > { %v8273_v31 = vpop.permute.xlu0 %8272  ;;  %v8280_v49 = vunpack.i.h.bf16 %v8278_v26  ;;  %v8279_v30 = vunpack.i.l.bf16 %v8278_v26  ;;  %v5166_v46 = vpack.c.bf16 %v5029_v51, %v5028_v17  ;;  %7471 = vmatpush3.bf16.msra.mxu0 %v8574_v27  ;;  %vm13659_vm3 = vmmov %vm13658_vm2 }
 0x89d   : > { %v8275_v60 = vunpack.i.h.bf16 %v8273_v31  ;;  %v8274_v18 = vunpack.i.l.bf16 %v8273_v31  ;;  %7472 = vmatprep.subr.bf16.mxu0 %v13571_v50 }
 0x89f   : > { %v12687_v34 = vpop.permute.xlu1 %8282  ;;  %v5085_v19 = vsel %vm13652_vm4, %v5066_v55, %v8274_v18  ;;  %v5086_v22 = vsel %vm13653_vm5, %v5067_v57, %v8275_v60  ;;  %v5105_v11 = vsel %vm5097_vm11, %v8275_v60, %v8280_v49  ;;  %v5104_v40 = vsel %vm5097_vm11, %v8274_v18, %v8279_v30  ;;  %vm13660_vm4 = vmmov %vm13654_vm10 }
 0x8a0   : > { %v8298_v63 = vpop.permute.xlu0 %8297  ;;  %v5167_v13 = vpack.c.bf16 %v5086_v22, %v5085_v19  ;;  %v5123_v0 = vsel %vm5116_vm14, %v5104_v40, %v8239_v8  ;;  %v5124_v10 = vsel %vm5116_vm14, %v5105_v11, %v8240_v7  ;;  %7473 = vmatpush3.bf16.msra.mxu0 %v8575_v21  ;;  %v8285_v11 = vunpack.i.h.bf16 %v12687_v34  ;;  %vm13661_vm5 = vmmov %vm13660_vm4 }
 0x8a1   : > { %v8300_v23 = vunpack.i.h.bf16 %v8298_v63  ;;  %v8299_v58 = vunpack.i.l.bf16 %v8298_v63  ;;  %7556 = vmatprep.subr.bf16.mxu0 %v13571_v50  ;;  %v8284_v40 = vunpack.i.l.bf16 %v12687_v34 }
 0x8a2   : > { %5481 = vmatprep.mubr.bf16.mxu0 %v5167_v13 }
 0x8a3   : > { %v8288_v32 = vpop.permute.xlu1 %8287  ;;  %5482 = vmatmul.mubr.bf16.gmra.mrb[84].mxu0 %v5166_v46 }
 0x8a4   : > { %v8290_v3 = vunpack.i.h.bf16 %v8288_v32  ;;  %v8289_v53 = vunpack.i.l.bf16 %v8288_v32  ;;  %v8303_v59 = vpop.permute.xlu0 %8302 }
 0x8a5   : > { %v8305_v54 = vunpack.i.h.bf16 %v8303_v59  ;;  %v8304_v4 = vunpack.i.l.bf16 %v8303_v59 }
 0x8a6   : > { %v5169_v29 = vpack.c.bf16 %v8290_v3, %v8289_v53  ;;  %v5142_v37 = vsel %vm5135_vm0, %v5123_v0, %v8289_v53  ;;  %v5143_v28 = vsel %vm5135_vm0, %v5124_v10, %v8290_v3 }
 0x8a7   : > { %v8293_v12 = vpop.permute.xlu1 %8292  ;;  %v5168_v35 = vpack.c.bf16 %v5143_v28, %v5142_v37  ;;  %v4995_v2 = vsel %vm2367_vm12, %v12048_v20, %v8305_v54  ;;  %v4994_v38 = vsel %vm2367_vm12, %v11971_v48, %v8304_v4 }
 0x8a8   : > { %v8313_v15 = vpop.permute.xlu0 %8312  ;;  %6981 = vmatprep.mubr.msk.bf16.mxu1 %vm5397_vm15, %v5169_v29  ;;  %v8295_v45 = vunpack.i.h.bf16 %v8293_v12  ;;  %v8294_v52 = vunpack.i.l.bf16 %v8293_v12 }
 0x8a9   : > { %v8315_v42 = vunpack.i.h.bf16 %v8313_v15  ;;  %v8314_v47 = vunpack.i.l.bf16 %v8313_v15  ;;  %5587 = vmatmul.mubr.bf16.gmra.mrb[120].mxu1 %v5168_v35 }
 0x8aa   : > { %v5049_v31 = vsel %vm13654_vm10, %v8294_v52, %v8299_v58  ;;  %v5050_v20 = vsel %vm13655_vm13, %v8295_v45, %v8300_v23  ;;  %vm13662_vm10 = vmmov %vm13656_vm6 }
 0x8ab   : > { %v8308_v61 = vpop.permute.xlu1 %8307  ;;  %v5012_v1 = vsel %vm3800_vm8, %v4994_v38, %v8314_v47  ;;  %v5013_v5 = vsel %vm3800_vm8, %v4995_v2, %v8315_v42  ;;  %vm13663_vm13 = vmmov %vm13656_vm6 }
 0x8ac   : > { %v8323_v39 = vpop.permute.xlu0 %8322  ;;  %v8310_v26 = vunpack.i.h.bf16 %v8308_v61  ;;  %v8309_v44 = vunpack.i.l.bf16 %v8308_v61  ;;  %v5030_v18 = vsel %vm3895_vm9, %v5012_v1, %v8294_v52  ;;  %v5031_v49 = vsel %vm3895_vm9, %v5013_v5, %v8295_v45 }
 0x8ad   : > { %v8325_v51 = vunpack.i.h.bf16 %v8323_v39  ;;  %v8324_v24 = vunpack.i.l.bf16 %v8323_v39  ;;  %v5170_v8 = vpack.c.bf16 %v5031_v49, %v5030_v18 }
 0x8ae   : > { %v5068_v30 = vsel %vm13656_vm6, %v5049_v31, %v8309_v44  ;;  %v5069_v17 = vsel %vm13657_vm7, %v5050_v20, %v8310_v26  ;;  %vm13664_vm6 = vmmov %vm13658_vm2 }
 0x8af   : > { %v8318_v55 = vpop.permute.xlu1 %8317  ;;  %vm13665_vm7 = vmmov %vm13658_vm2 }
 0x8b0   : > { %v8320_v48 = vunpack.i.h.bf16 %v8318_v55  ;;  %v8319_v57 = vunpack.i.l.bf16 %v8318_v55  ;;  %v12724_v60 = vpop.permute.xlu0 %8327 }
 0x8b2   : > { %v5087_v19 = vsel %vm13658_vm2, %v5068_v30, %v8319_v57  ;;  %v5088_v22 = vsel %vm13659_vm3, %v5069_v17, %v8320_v48  ;;  %v5106_v63 = vsel %vm5097_vm11, %v8319_v57, %v8324_v24  ;;  %v5107_v13 = vsel %vm5097_vm11, %v8320_v48, %v8325_v51  ;;  %vm13666_vm2 = vmmov %vm13660_vm4 }
 0x8b3   : > { %v8343_v9 = vpop.permute.xlu1 %8342  ;;  %v5171_v46 = vpack.c.bf16 %v5088_v22, %v5087_v19  ;;  %v5125_v53 = vsel %vm5116_vm14, %v5106_v63, %v8284_v40  ;;  %v5126_v59 = vsel %vm5116_vm14, %v5107_v13, %v8285_v11  ;;  %v8330_v22 = vunpack.i.h.bf16 %v12724_v60  ;;  %vm13667_vm3 = vmmov %vm13666_vm2 }
 0x8b4   : > { %v8333_v7 = vpop.permute.xlu0 %8332  ;;  %v8345_v61 = vunpack.i.h.bf16 %v8343_v9  ;;  %v8344_v27 = vunpack.i.l.bf16 %v8343_v9  ;;  %v8329_v63 = vunpack.i.l.bf16 %v12724_v60 }
 0x8b5   : > { %v8335_v32 = vunpack.i.h.bf16 %v8333_v7  ;;  %v8334_v3 = vunpack.i.l.bf16 %v8333_v7  ;;  %5489 = vmatprep.mubr.bf16.mxu0 %v5171_v46 }
 0x8b6   : > { %5490 = vmatmul.mubr.bf16.gmra.mrb[88].mxu0 %v5170_v8 }
 0x8b7   : > { %v5173_v56 = vpack.c.bf16 %v8335_v32, %v8334_v3  ;;  %v8348_v0 = vpop.permute.xlu1 %8347  ;;  %v5144_v10 = vsel %vm5135_vm0, %v5125_v53, %v8334_v3  ;;  %v5145_v29 = vsel %vm5135_vm0, %v5126_v59, %v8335_v32 }
 0x8b8   : > { %v8338_v37 = vpop.permute.xlu0 %8337  ;;  %v5172_v28 = vpack.c.bf16 %v5145_v29, %v5144_v10  ;;  %v8350_v34 = vunpack.i.h.bf16 %v8348_v0  ;;  %v8349_v12 = vunpack.i.l.bf16 %v8348_v0 }
 0x8b9   : > { %6982 = vmatprep.mubr.msk.bf16.mxu1 %vm5397_vm15, %v5173_v56  ;;  %v8340_v54 = vunpack.i.h.bf16 %v8338_v37  ;;  %v8339_v4 = vunpack.i.l.bf16 %v8338_v37 }
 0x8ba   : > { %5595 = vmatmul.mubr.bf16.gmra.mrb[124].mxu1 %v5172_v28  ;;  %v4997_v23 = vsel %vm2367_vm12, %v12136_v14, %v8350_v34  ;;  %v4996_v58 = vsel %vm2367_vm12, %v12043_v36, %v8349_v12 }
 0x8bb   : > { %v8358_v35 = vpop.permute.xlu1 %8357  ;;  %v5052_v1 = vsel %vm13660_vm4, %v8340_v54, %v8345_v61  ;;  %v5051_v5 = vsel %vm13661_vm5, %v8339_v4, %v8344_v27  ;;  %vm13668_vm4 = vmmov %vm13662_vm10 }
 0x8bc   : > { %v8360_v15 = vunpack.i.h.bf16 %v8358_v35  ;;  %v8359_v42 = vunpack.i.l.bf16 %v8358_v35  ;;  %v8353_v47 = vpop.permute.xlu0 %8352  ;;  %vm13669_vm5 = vmmov %vm13668_vm4 }
 0x8bd   : > { %v8355_v45 = vunpack.i.h.bf16 %v8353_v47  ;;  %v8354_v52 = vunpack.i.l.bf16 %v8353_v47 }
 0x8be   : > { %v5014_v2 = vsel %vm3800_vm8, %v4996_v58, %v8359_v42  ;;  %v5015_v38 = vsel %vm3800_vm8, %v4997_v23, %v8360_v15 }
 0x8bf   : > { %v8368_v39 = vpop.permute.xlu1 %8367  ;;  %v5070_v44 = vsel %vm13662_vm10, %v5051_v5, %v8354_v52  ;;  %v5071_v21 = vsel %vm13663_vm13, %v5052_v1, %v8355_v45  ;;  %v5032_v36 = vsel %vm3895_vm9, %v5014_v2, %v8339_v4  ;;  %v5033_v48 = vsel %vm3895_vm9, %v5015_v38, %v8340_v54  ;;  %vm13670_vm10 = vmmov %vm13664_vm6 }
 0x8c0   : > { %v8363_v26 = vpop.permute.xlu0 %8362  ;;  %v8370_v14 = vunpack.i.h.bf16 %v8368_v39  ;;  %v8369_v55 = vunpack.i.l.bf16 %v8368_v39  ;;  %v5174_v51 = vpack.c.bf16 %v5033_v48, %v5032_v36  ;;  %vm13671_vm13 = vmmov %vm13664_vm6 }
 0x8c1   : > { %v8365_v31 = vunpack.i.h.bf16 %v8363_v26  ;;  %v8364_v20 = vunpack.i.l.bf16 %v8363_v26 }
 0x8c3   : > { %v12754_v57 = vpop.permute.xlu1 %8372  ;;  %v5089_v18 = vsel %vm13664_vm6, %v5070_v44, %v8364_v20  ;;  %v5090_v49 = vsel %vm13665_vm7, %v5071_v21, %v8365_v31  ;;  %v5109_v24 = vsel %vm5097_vm11, %v8365_v31, %v8370_v14  ;;  %v5108_v19 = vsel %vm5097_vm11, %v8364_v20, %v8369_v55  ;;  %vm13672_vm6 = vmmov %vm13666_vm2 }
 0x8c4   : > { %v8388_v30 = vpop.permute.xlu0 %8387  ;;  %v5175_v17 = vpack.c.bf16 %v5090_v49, %v5089_v18  ;;  %v5127_v40 = vsel %vm5116_vm14, %v5108_v19, %v8329_v63  ;;  %v5128_v7 = vsel %vm5116_vm14, %v5109_v24, %v8330_v22  ;;  %v8375_v36 = vunpack.i.h.bf16 %v12754_v57  ;;  %vm13673_vm7 = vmmov %vm13666_vm2 }
 0x8c5   : > { %v8390_v12 = vunpack.i.h.bf16 %v8388_v30  ;;  %v8389_v35 = vunpack.i.l.bf16 %v8388_v30  ;;  %v8374_v48 = vunpack.i.l.bf16 %v12754_v57 }
 0x8c6   : > { %5497 = vmatprep.mubr.bf16.mxu0 %v5175_v17 }
 0x8c7   : > { %v8378_v13 = vpop.permute.xlu1 %8377  ;;  %5498 = vmatmul.mubr.bf16.gmra.mrb[92].mxu0 %v5174_v51 }
 0x8c8   : > { %v8380_v9 = vunpack.i.h.bf16 %v8378_v13  ;;  %v8379_v46 = vunpack.i.l.bf16 %v8378_v13  ;;  %v8393_v11 = vpop.permute.xlu0 %8392 }
 0x8c9   : > { %v8395_v56 = vunpack.i.h.bf16 %v8393_v11  ;;  %v8394_v0 = vunpack.i.l.bf16 %v8393_v11 }
 0x8ca   : > { %v5177_v8 = vpack.c.bf16 %v8380_v9, %v8379_v46  ;;  %v5146_v32 = vsel %vm5135_vm0, %v5127_v40, %v8379_v46  ;;  %v5147_v3 = vsel %vm5135_vm0, %v5128_v7, %v8380_v9 }
 0x8cb   : > { %v8383_v53 = vpop.permute.xlu1 %8382  ;;  %v5176_v59 = vpack.c.bf16 %v5147_v3, %v5146_v32  ;;  %v4999_v54 = vsel %vm2367_vm12, %v12228_v16, %v8395_v56  ;;  %v4998_v4 = vsel %vm2367_vm12, %v12147_v6, %v8394_v0 }
 0x8cc   : > { %v8403_v10 = vpop.permute.xlu0 %8402  ;;  %6983 = vmatprep.mubr.msk.bf16.mxu1 %vm5397_vm15, %v5177_v8  ;;  %v8385_v37 = vunpack.i.h.bf16 %v8383_v53  ;;  %v8384_v28 = vunpack.i.l.bf16 %v8383_v53 }
 0x8cd   : > { %v8405_v60 = vunpack.i.h.bf16 %v8403_v10  ;;  %v8404_v29 = vunpack.i.l.bf16 %v8403_v10  ;;  %5603 = vmatmul.mubr.bf16.gmra.mrb[128].mxu1 %v5176_v59 }
 0x8ce   : > { %v5053_v61 = vsel %vm13666_vm2, %v8384_v28, %v8389_v35  ;;  %v5054_v27 = vsel %vm13667_vm3, %v8385_v37, %v8390_v12  ;;  %vm13674_vm2 = vmmov %vm13668_vm4 }
 0x8cf   : > { %v8398_v34 = vpop.permute.xlu1 %8397  ;;  %v5016_v42 = vsel %vm3800_vm8, %v4998_v4, %v8404_v29  ;;  %v5017_v47 = vsel %vm3800_vm8, %v4999_v54, %v8405_v60  ;;  %vm13675_vm3 = vmmov %vm13674_vm2 }
 0x8d0   : > { %v8413_v15 = vpop.permute.xlu0 %8412  ;;  %v8400_v45 = vunpack.i.h.bf16 %v8398_v34  ;;  %v8399_v52 = vunpack.i.l.bf16 %v8398_v34  ;;  %v5034_v16 = vsel %vm3895_vm9, %v5016_v42, %v8384_v28  ;;  %v5035_v6 = vsel %vm3895_vm9, %v5017_v47, %v8385_v37 }
 0x8d1   : > { %v8415_v5 = vunpack.i.h.bf16 %v8413_v15  ;;  %v8414_v26 = vunpack.i.l.bf16 %v8413_v15  ;;  %v5178_v49 = vpack.c.bf16 %v5035_v6, %v5034_v16 }
 0x8d2   : > { %v5072_v39 = vsel %vm13668_vm4, %v5053_v61, %v8399_v52  ;;  %v5073_v1 = vsel %vm13669_vm5, %v5054_v27, %v8400_v45  ;;  %vm13676_vm4 = vmmov %vm13670_vm10 }
 0x8d3   : > { %v8408_v23 = vpop.permute.xlu1 %8407  ;;  %vm13677_vm5 = vmmov %vm13676_vm4 }
 0x8d4   : > { %v8410_v58 = vunpack.i.h.bf16 %v8408_v23  ;;  %v8409_v2 = vunpack.i.l.bf16 %v8408_v23  ;;  %v12775_v38 = vpop.permute.xlu0 %8417 }
 0x8d6   : > { %v5091_v44 = vsel %vm13670_vm10, %v5072_v39, %v8409_v2  ;;  %v5092_v21 = vsel %vm13671_vm13, %v5073_v1, %v8410_v58  ;;  %v5110_v31 = vsel %vm5097_vm11, %v8409_v2, %v8414_v26  ;;  %v5111_v20 = vsel %vm5097_vm11, %v8410_v58, %v8415_v5  ;;  %vm13678_vm10 = vmmov %vm13672_vm6 }
 0x8d7   : > { %v8433_v14 = vpop.permute.xlu1 %8432  ;;  %v5179_v55 = vpack.c.bf16 %v5092_v21, %v5091_v44  ;;  %v5129_v51 = vsel %vm5116_vm14, %v5110_v31, %v8374_v48  ;;  %v5130_v24 = vsel %vm5116_vm14, %v5111_v20, %v8375_v36  ;;  %v8420_v1 = vunpack.i.h.bf16 %v12775_v38  ;;  %vm13679_vm13 = vmmov %vm13672_vm6 }
 0x8d8   : > { %v8423_v18 = vpop.permute.xlu0 %8422  ;;  %v8435_v0 = vunpack.i.h.bf16 %v8433_v14  ;;  %v8434_v10 = vunpack.i.l.bf16 %v8433_v14  ;;  %v8419_v5 = vunpack.i.l.bf16 %v12775_v38 }
 0x8d9   : > { %v8425_v30 = vunpack.i.h.bf16 %v8423_v18  ;;  %v8424_v17 = vunpack.i.l.bf16 %v8423_v18  ;;  %5505 = vmatprep.mubr.bf16.mxu0 %v5179_v55 }
 0x8da   : > { %5506 = vmatmul.mubr.bf16.gmra.mrb[96].mxu0 %v5178_v49 }
 0x8db   : > { %v5181_v19 = vpack.c.bf16 %v8425_v30, %v8424_v17  ;;  %v8438_v22 = vpop.permute.xlu1 %8437  ;;  %v5148_v63 = vsel %vm5135_vm0, %v5129_v51, %v8424_v17  ;;  %v5149_v13 = vsel %vm5135_vm0, %v5130_v24, %v8425_v30 }
 0x8dc   : > { %v8428_v9 = vpop.permute.xlu0 %8427  ;;  %v5180_v46 = vpack.c.bf16 %v5149_v13, %v5148_v63  ;;  %v8440_v57 = vunpack.i.h.bf16 %v8438_v22  ;;  %v8439_v11 = vunpack.i.l.bf16 %v8438_v22 }
 0x8dd   : > { %6984 = vmatprep.mubr.msk.bf16.mxu1 %vm5397_vm15, %v5181_v19  ;;  %v8430_v7 = vunpack.i.h.bf16 %v8428_v9  ;;  %v8429_v8 = vunpack.i.l.bf16 %v8428_v9 }
 0x8de   : > { %5611 = vmatmul.mubr.bf16.gmra.mrb[132].mxu1 %v5180_v46  ;;  %v5001_v60 = vsel %vm2367_vm12, %v12327_v25, %v8440_v57  ;;  %v5000_v29 = vsel %vm2367_vm12, %v12286_v33, %v8439_v11 }
 0x8df   : > { %v8448_v40 = vpop.permute.xlu1 %8447  ;;  %v5056_v12 = vsel %vm13672_vm6, %v8430_v7, %v8435_v0  ;;  %v5055_v35 = vsel %vm13673_vm7, %v8429_v8, %v8434_v10  ;;  %vm13680_vm6 = vmmov %vm13674_vm2 }
 0x8e0   : > { %v8450_v32 = vunpack.i.h.bf16 %v8448_v40  ;;  %v8449_v3 = vunpack.i.l.bf16 %v8448_v40  ;;  %v8443_v53 = vpop.permute.xlu0 %8442  ;;  %vm13681_vm7 = vmmov %vm13674_vm2 }
 0x8e1   : > { %v8445_v59 = vunpack.i.h.bf16 %v8443_v53  ;;  %v8444_v56 = vunpack.i.l.bf16 %v8443_v53 }
 0x8e2   : > { %v5018_v37 = vsel %vm3800_vm8, %v5000_v29, %v8449_v3  ;;  %v5019_v28 = vsel %vm3800_vm8, %v5001_v60, %v8450_v32 }
 0x8e3   : > { %v8458_v34 = vpop.permute.xlu1 %8457  ;;  %v5074_v4 = vsel %vm13674_vm2, %v5055_v35, %v8444_v56  ;;  %v5075_v15 = vsel %vm13675_vm3, %v5056_v12, %v8445_v59  ;;  %v5036_v33 = vsel %vm3895_vm9, %v5018_v37, %v8429_v8  ;;  %v5037_v52 = vsel %vm3895_vm9, %v5019_v28, %v8430_v7  ;;  %vm13683_vm2 = vmmov %vm13676_vm4 }
 0x8e4   : > { %v8453_v54 = vpop.permute.xlu0 %8452  ;;  %v8460_v25 = vunpack.i.h.bf16 %v8458_v34  ;;  %v8459_v45 = vunpack.i.l.bf16 %v8458_v34  ;;  %v5182_v16 = vpack.c.bf16 %v5037_v52, %v5036_v33 }
 0x8e5   : > { %v8455_v42 = vunpack.i.h.bf16 %v8453_v54  ;;  %v8454_v47 = vunpack.i.l.bf16 %v8453_v54 }
 0x8e7   : > { %v8463_v61 = vpop.permute.xlu1 %8462  ;;  %v5093_v27 = vsel %vm13676_vm4, %v5074_v4, %v8454_v47  ;;  %v5094_v23 = vsel %vm13677_vm5, %v5075_v15, %v8455_v42  ;;  %v5112_v6 = vsel %vm5097_vm11, %v8454_v47, %v8459_v45  ;;  %v5113_v39 = vsel %vm5097_vm11, %v8455_v42, %v8460_v25 }
 0x8e8   : > { %v8468_v58 = vpop.permute.xlu0 %8467  ;;  %v5183_v2 = vpack.c.bf16 %v5094_v23, %v5093_v27  ;;  %v8465_v20 = vunpack.i.h.bf16 %v8463_v61  ;;  %v5131_v55 = vsel %vm5116_vm14, %v5112_v6, %v8419_v5  ;;  %v5132_v36 = vsel %vm5116_vm14, %v5113_v39, %v8420_v1 }
 0x8e9   : > { %v8464_v17 = vunpack.i.l.bf16 %v8463_v61  ;;  %v8470_v51 = vunpack.i.h.bf16 %v8468_v58  ;;  %v8469_v38 = vunpack.i.l.bf16 %v8468_v58 }
 0x8ea   : > { %5513 = vmatprep.mubr.bf16.mxu0 %v5183_v2 }
 0x8eb   : > { %5514 = vmatmul.mubr.bf16.gmra.mrb[100].mxu0 %v5182_v16  ;;  %v8473_v26 = vpop.permute.xlu1 %8472  ;;  %v5057_v40 = vsel %vm13678_vm10, %v8464_v17, %v8469_v38  ;;  %v5058_v7 = vsel %vm13679_vm13, %v8465_v20, %v8470_v51 }
 0x8ec   : > { %v8475_v44 = vunpack.i.h.bf16 %v8473_v26  ;;  %v8474_v21 = vunpack.i.l.bf16 %v8473_v26  ;;  %v8478_v31 = vpop.permute.xlu0 %8477  ;;  %v12843_v26 = vld [vmem:[%s13397_s13] ss:$0 sm:$0xff] }
 0x8ed   : > { %v8480_v14 = vunpack.i.h.bf16 %v8478_v31  ;;  %v8479_v18 = vunpack.i.l.bf16 %v8478_v31 }
 0x8ee   : > { %v5185_v48 = vpack.c.bf16 %v8475_v44, %v8474_v21  ;;  %v5150_v49 = vsel %vm5135_vm0, %v5131_v55, %v8474_v21  ;;  %v5151_v30 = vsel %vm5135_vm0, %v5132_v36, %v8475_v44 }
 0x8ef   : > { %v8483_v24 = vpop.permute.xlu1 %8482  ;;  %v5184_v19 = vpack.c.bf16 %v5151_v30, %v5150_v49  ;;  %v5003_v57 = vsel %vm2367_vm12, %v12498_v43, %v8480_v14  ;;  %v5002_v11 = vsel %vm2367_vm12, %v12375_v62, %v8479_v18  ;;  %vm13682_vm12 = vmmov %vm13676_vm4 }
 0x8f0   : > { %v8485_v22 = vunpack.i.h.bf16 %v8483_v24  ;;  %v8484_v63 = vunpack.i.l.bf16 %v8483_v24  ;;  %v8488_v13 = vpop.permute.xlu0 %8487  ;;  %6985 = vmatprep.mubr.msk.bf16.mxu1 %vm5397_vm15, %v5185_v48 }
 0x8f1   : > { %v8490_v9 = vunpack.i.h.bf16 %v8488_v13  ;;  %v8489_v46 = vunpack.i.l.bf16 %v8488_v13  ;;  %5619 = vmatmul.mubr.bf16.gmra.mrb[136].mxu1 %v5184_v19 }
 0x8f2   : > { %v5077_v53 = vsel %vm13680_vm6, %v5058_v7, %v8485_v22  ;;  %v5076_v59 = vsel %vm13681_vm7, %v5057_v40, %v8484_v63 }
 0x8f3   : > { %v5020_v8 = vsel %vm3800_vm8, %v5002_v11, %v8489_v46  ;;  %v5021_v32 = vsel %vm3800_vm8, %v5003_v57, %v8490_v9  ;;  %v8493_v3 = vpop.permute.xlu1 %8492 }
 0x8f4   : > { %v8495_v56 = vunpack.i.h.bf16 %v8493_v3  ;;  %v8494_v0 = vunpack.i.l.bf16 %v8493_v3  ;;  %v8503_v10 = vpop.permute.xlu0 %8502  ;;  %v5038_v62 = vsel %vm3895_vm9, %v5020_v8, %v8464_v17  ;;  %v5039_v29 = vsel %vm3895_vm9, %v5021_v32, %v8465_v20 }
 0x8f5   : > { %v8505_v43 = vunpack.i.h.bf16 %v8503_v10  ;;  %v8504_v60 = vunpack.i.l.bf16 %v8503_v10  ;;  %v5186_v15 = vpack.c.bf16 %v5039_v29, %v5038_v62  ;;  %vm13684_vm9 = vmmov 0  }
 0x8f6   : > { %v5095_v37 = vsel %vm13682_vm12, %v5076_v59, %v8494_v0  ;;  %v5096_v28 = vsel %vm13683_vm2, %v5077_v53, %v8495_v56 }
 0x8f7   : > { %v8498_v34 = vpop.permute.xlu1 %8497  ;;  %v5187_v12 = vpack.c.bf16 %v5096_v28, %v5095_v37  ;;  %v5114_v42 = vsel %vm5097_vm11, %v8494_v0, %v8504_v60  ;;  %v5115_v47 = vsel %vm5097_vm11, %v8495_v56, %v8505_v43  ;;  %vm13688_vm11 = vcmask 244736  }
 0x8f8   : > { %v8500_v35 = vunpack.i.h.bf16 %v8498_v34  ;;  %v8499_v54 = vunpack.i.l.bf16 %v8498_v34  ;;  %v8508_v4 = vpop.permute.xlu0 %8507 }
 0x8f9   : > { %v8510_v25 = vunpack.i.h.bf16 %v8508_v4  ;;  %v8509_v45 = vunpack.i.l.bf16 %v8508_v4  ;;  %5521 = vmatprep.mubr.bf16.mxu0 %v5187_v12 }
 0x8fa   : > { %v5133_v33 = vsel %vm5116_vm14, %v5114_v42, %v8499_v54  ;;  %v5134_v52 = vsel %vm5116_vm14, %v5115_v47, %v8500_v35  ;;  %5522 = vmatmul.mubr.bf16.gmra.mrb[104].mxu0 %v5186_v15  ;;  %vm6816_vm14 = vcmask 26624  }
 0x8fb   : > { %v5189_v61 = vpack.c.bf16 %v8510_v25, %v8509_v45  ;;  %v5152_v27 = vsel %vm5135_vm0, %v5133_v33, %v8509_v45  ;;  %v5153_v23 = vsel %vm5135_vm0, %v5134_v52, %v8510_v25  ;;  %7474 = vmatprep.mubr.msk.bf16.mxu0 %vm13684_vm9, %v13571_v50  ;;  %vm6415_vm0 = vcmask 23552  }
 0x8fc   : > { %v5188_v58 = vpack.c.bf16 %v5153_v23, %v5152_v27 }
 0x8fd   : > { %6986 = vmatprep.mubr.msk.bf16.mxu1 %vm5397_vm15, %v5189_v61 }
 0x8fe   : > { %5627 = vmatmul.mubr.bf16.gmra.mrb[140].mxu1 %v5188_v58 }
 0x8ff   : > { %7520 = vmatprep.mubr.msk.bf16.mxu1 %vm13684_vm9, %v13571_v50 }
 0x918   : > { %v7131_v2 = vpop.f32.mrb[72].mxu0 }
 0x919   : > { %v7132_v16 = vpop.f32.mrb[73].mxu0 }
 0x91a   : > { %v7133_v6 = vadd.f32 %v7132_v16, %v7131_v2  ;;  %v7134_v39 = vpop.f32.mrb[74].mxu0 }
 0x91b   : > { %v7135_v1 = vpop.f32.mrb[75].mxu0 }
 0x91c   : > { %v7136_v5 = vadd.f32 %v7135_v1, %v7134_v39  ;;  %v5460_v44 = vadd.f32 %v7133_v6, %v12843_v26 }
 0x91e   : > { %v5463_v14 = vadd.f32 %v7136_v5, %v12843_v26 }
 0x924   : > { %v5564_v21 = vpop.f32.mrb[108].mxu1 }
 0x925   : > { %v5565_v31 = vadd.f32 %v5564_v21, %v5460_v44  ;;  %v5566_v20 = vpop.f32.mrb[109].mxu1 }
 0x926   : > { %v5567_v55 = vpop.f32.mrb[110].mxu1  ;;  %v8576_v20 = vld [vmem:[%s13400_s16] sm:$0xff]  }
 0x927   : > { %v5568_v36 = vadd.f32 %v5567_v55, %v5463_v14  ;;  %v5569_v48 = vpop.f32.mrb[111].mxu1  ;;  %v5635_v18 = vmax.f32 %v5565_v31, 0.0  ;;  %7511 = vmatpush3.bf16.msra.mxu1 %v8576_v20 }
 0x928   : > { %v8577_v48 = vld [vmem:[%s13400_s16 + $0x8] sm:$0xff]   ;;  %7512 = vmatprep.subr.bf16.mxu1 %v13571_v50 }
 0x929   : > { %v5636_v49 = vmax.f32 %v5568_v36, 0.0 }
 0x92b   : > { %v5653_v30 = vpack.c.bf16 %v5636_v49, %v5635_v18  ;;  %7513 = vmatpush3.bf16.msra.mxu1 %v8577_v48 }
 0x92c   : > { %7514 = vmatprep.subr.bf16.mxu1 %v13571_v50 }
 0x92d   : > { %7475 = vmatmul.mubr.msk.bf16.vlgmr.msra.gmra.mrb[108].mxu0 %vm3800_vm8, %v5653_v30 }
 0x92e   : > { %7478 = vmatprep.mubr.msk.bf16.mxu0 %vm13684_vm9, %v13571_v50 }
 0x931   : > { %v7137_v17 = vpop.f32.mrb[76].mxu0 }
 0x932   : > { %v7138_v51 = vpop.f32.mrb[77].mxu0 }
 0x933   : > { %v7139_v38 = vadd.f32 %v7138_v51, %v7137_v17  ;;  %v7140_v24 = vpop.f32.mrb[78].mxu0 }
 0x934   : > { %v7141_v19 = vpop.f32.mrb[79].mxu0 }
 0x935   : > { %v7142_v22 = vadd.f32 %v7141_v19, %v7140_v24  ;;  %v5468_v63 = vadd.f32 %v7139_v38, %v12843_v26 }
 0x937   : > { %v5471_v57 = vadd.f32 %v7142_v22, %v12843_v26 }
 0x944   : > { %v5572_v13 = vpop.f32.mrb[112].mxu1 }
 0x945   : > { %v5573_v9 = vadd.f32 %v5572_v13, %v5468_v63  ;;  %v5574_v46 = vpop.f32.mrb[113].mxu1 }
 0x946   : > { %v5575_v11 = vpop.f32.mrb[114].mxu1 }
 0x947   : > { %v5576_v40 = vadd.f32 %v5575_v11, %v5471_v57  ;;  %v5577_v7 = vpop.f32.mrb[115].mxu1  ;;  %v5637_v8 = vmax.f32 %v5573_v9, 0.0 }
 0x949   : > { %v5638_v32 = vmax.f32 %v5576_v40, 0.0 }
 0x94b   : > { %v5654_v3 = vpack.c.bf16 %v5638_v32, %v5637_v8 }
 0x94d   : > { %7479 = vmatmul.mubr.msk.bf16.gmra.mrb[112].mxu0 %vm3800_vm8, %v5654_v3 }
 0x94e   : > { %7482 = vmatprep.mubr.msk.bf16.mxu0 %vm13684_vm9, %v13571_v50 }
 0x951   : > { %v7143_v53 = vpop.f32.mrb[80].mxu0 }
 0x952   : > { %v7144_v59 = vpop.f32.mrb[81].mxu0 }
 0x953   : > { %v7145_v56 = vadd.f32 %v7144_v59, %v7143_v53  ;;  %v7146_v0 = vpop.f32.mrb[82].mxu0 }
 0x954   : > { %v7147_v10 = vpop.f32.mrb[83].mxu0 }
 0x955   : > { %v7148_v43 = vadd.f32 %v7147_v10, %v7146_v0  ;;  %v5476_v60 = vadd.f32 %v7145_v56, %v12843_v26 }
 0x957   : > { %v5479_v28 = vadd.f32 %v7148_v43, %v12843_v26 }
 0x969   : > { %v5580_v62 = vpop.f32.mrb[116].mxu1 }
 0x96a   : > { %v5581_v29 = vadd.f32 %v5580_v62, %v5476_v60  ;;  %v5582_v37 = vpop.f32.mrb[117].mxu1 }
 0x96b   : > { %v5583_v34 = vpop.f32.mrb[118].mxu1  ;;  %v8578_v37 = vld [vmem:[%s13400_s16 + $0x10] sm:$0xff]  }
 0x96c   : > { %v5584_v12 = vadd.f32 %v5583_v34, %v5479_v28  ;;  %v5585_v35 = vpop.f32.mrb[119].mxu1  ;;  %v5639_v54 = vmax.f32 %v5581_v29, 0.0  ;;  %7515 = vmatpush3.bf16.msra.mxu1 %v8578_v37 }
 0x96d   : > { %7516 = vmatprep.subr.bf16.mxu1 %v13571_v50 }
 0x96e   : > { %v5640_v4 = vmax.f32 %v5584_v12, 0.0  ;;  %v8579_v12 = vld [vmem:[%s13400_s16 + $0x18] sm:$0xff]  }
 0x970   : > { %v5655_v15 = vpack.c.bf16 %v5640_v4, %v5639_v54  ;;  %7517 = vmatpush3.bf16.msra.mxu1 %v8579_v12 }
 0x971   : > { %7518 = vmatprep.subr.bf16.mxu1 %v13571_v50 }
 0x972   : > { %7483 = vmatmul.mubr.msk.bf16.gmra.mrb[116].mxu0 %vm3800_vm8, %v5655_v15 }
 0x973   : > { %7486 = vmatprep.mubr.msk.bf16.mxu0 %vm13684_vm9, %v13571_v50 }
 0x976   : > { %v7149_v42 = vpop.f32.mrb[84].mxu0 }
 0x977   : > { %v7150_v47 = vpop.f32.mrb[85].mxu0 }
 0x978   : > { %v7151_v25 = vadd.f32 %v7150_v47, %v7149_v42  ;;  %v7152_v45 = vpop.f32.mrb[86].mxu0 }
 0x979   : > { %v7153_v33 = vpop.f32.mrb[87].mxu0 }
 0x97a   : > { %v7154_v52 = vadd.f32 %v7153_v33, %v7152_v45  ;;  %v5484_v61 = vadd.f32 %v7151_v25, %v12843_v26  ;;  %v8580_v45 = vld [vmem:[%s13400_s16 + $0x20] sm:$0xff]  }
 0x97b   : > { %7519 = vmatpush3.bf16.msra.mxu1 %v8580_v45 }
 0x97c   : > { %v5588_v27 = vpop.f32.mrb[120].mxu1  ;;  %v5487_v23 = vadd.f32 %v7154_v52, %v12843_v26 }
 0x97d   : > { %v5589_v58 = vadd.f32 %v5588_v27, %v5484_v61  ;;  %v5590_v2 = vpop.f32.mrb[121].mxu1 }
 0x97e   : > { %v5591_v16 = vpop.f32.mrb[122].mxu1 }
 0x97f   : > { %v5592_v6 = vadd.f32 %v5591_v16, %v5487_v23  ;;  %v5593_v39 = vpop.f32.mrb[123].mxu1  ;;  %v5641_v1 = vmax.f32 %v5589_v58, 0.0  ;;  %v13685_v16 = vmov 0  }
 0x980   : > { %6615 = vmatprep.subr.bf16.mxu1 %v13685_v16 }
 0x981   : > { %v5642_v5 = vmax.f32 %v5592_v6, 0.0 }
 0x983   : > { %v5656_v44 = vpack.c.bf16 %v5642_v5, %v5641_v1 }
 0x985   : > { %7487 = vmatmul.mubr.msk.bf16.gmra.mrb[120].mxu0 %vm3800_vm8, %v5656_v44 }
 0x986   : > { %7490 = vmatprep.mubr.msk.bf16.mxu0 %vm13684_vm9, %v13571_v50 }
 0x989   : > { %v7155_v21 = vpop.f32.mrb[88].mxu0 }
 0x98a   : > { %v7156_v31 = vpop.f32.mrb[89].mxu0 }
 0x98b   : > { %v7157_v14 = vadd.f32 %v7156_v31, %v7155_v21  ;;  %v7158_v55 = vpop.f32.mrb[90].mxu0 }
 0x98c   : > { %v7159_v36 = vpop.f32.mrb[91].mxu0 }
 0x98d   : > { %v7160_v18 = vadd.f32 %v7159_v36, %v7158_v55  ;;  %v5492_v49 = vadd.f32 %v7157_v14, %v12843_v26  ;;  %v5596_v30 = vpop.f32.mrb[124].mxu1 }
 0x98e   : > { %v5598_v17 = vpop.f32.mrb[125].mxu1 }
 0x98f   : > { %v5597_v51 = vadd.f32 %v5596_v30, %v5492_v49  ;;  %v5495_v38 = vadd.f32 %v7160_v18, %v12843_v26  ;;  %v5599_v24 = vpop.f32.mrb[126].mxu1 }
 0x990   : > { %v5601_v19 = vpop.f32.mrb[127].mxu1 }
 0x991   : > { %v5600_v22 = vadd.f32 %v5599_v24, %v5495_v38  ;;  %v5643_v63 = vmax.f32 %v5597_v51, 0.0 }
 0x993   : > { %v5644_v13 = vmax.f32 %v5600_v22, 0.0 }
 0x995   : > { %v5657_v9 = vpack.c.bf16 %v5644_v13, %v5643_v63 }
 0x997   : > { %7491 = vmatmul.mubr.msk.bf16.gmra.mrb[124].mxu0 %vm3800_vm8, %v5657_v9 }
 0x998   : > { %7494 = vmatprep.mubr.msk.bf16.mxu0 %vm13684_vm9, %v13571_v50 }
 0x99a   : > { %v7161_v46 = vpop.f32.mrb[92].mxu0 }
 0x99b   : > { %v7162_v57 = vpop.f32.mrb[93].mxu0 }
 0x99c   : > { %v7163_v11 = vadd.f32 %v7162_v57, %v7161_v46  ;;  %v7164_v40 = vpop.f32.mrb[94].mxu0 }
 0x99d   : > { %v7165_v7 = vpop.f32.mrb[95].mxu0 }
 0x99e   : > { %v7166_v8 = vadd.f32 %v7165_v7, %v7164_v40  ;;  %v5500_v32 = vadd.f32 %v7163_v11, %v12843_v26 }
 0x9a0   : > { %v5604_v3 = vpop.f32.mrb[128].mxu1  ;;  %v5503_v53 = vadd.f32 %v7166_v8, %v12843_v26 }
 0x9a1   : > { %v5605_v59 = vadd.f32 %v5604_v3, %v5500_v32  ;;  %v5606_v56 = vpop.f32.mrb[129].mxu1 }
 0x9a2   : > { %v5607_v0 = vpop.f32.mrb[130].mxu1 }
 0x9a3   : > { %v5608_v10 = vadd.f32 %v5607_v0, %v5503_v53  ;;  %v5609_v43 = vpop.f32.mrb[131].mxu1  ;;  %v5645_v60 = vmax.f32 %v5605_v59, 0.0  ;;  %v12913_v0 = vld [vmem:[%s13399_s15] ss:$0 sm:$0xff] }
 0x9a5   : > { %v5646_v62 = vmax.f32 %v5608_v10, 0.0 }
 0x9a7   : > { %v5658_v29 = vpack.c.bf16 %v5646_v62, %v5645_v60 }
 0x9a9   : > { %7495 = vmatmul.mubr.msk.bf16.gmra.mrb[128].mxu0 %vm3800_vm8, %v5658_v29 }
 0x9aa   : > { %7498 = vmatprep.mubr.msk.bf16.mxu0 %vm13684_vm9, %v13571_v50 }
 0x9ad   : > { %v7167_v28 = vpop.f32.mrb[96].mxu0 }
 0x9ae   : > { %v7168_v34 = vpop.f32.mrb[97].mxu0 }
 0x9af   : > { %v7169_v35 = vadd.f32 %v7168_v34, %v7167_v28  ;;  %v7170_v54 = vpop.f32.mrb[98].mxu0 }
 0x9b0   : > { %v7171_v4 = vpop.f32.mrb[99].mxu0 }
 0x9b1   : > { %v7172_v15 = vadd.f32 %v7171_v4, %v7170_v54  ;;  %v5508_v42 = vadd.f32 %v7169_v35, %v12843_v26  ;;  %v5612_v47 = vpop.f32.mrb[132].mxu1 }
 0x9b2   : > { %v5614_v25 = vpop.f32.mrb[133].mxu1 }
 0x9b3   : > { %v5613_v33 = vadd.f32 %v5612_v47, %v5508_v42  ;;  %v5511_v52 = vadd.f32 %v7172_v15, %v12843_v26  ;;  %v5615_v61 = vpop.f32.mrb[134].mxu1 }
 0x9b4   : > { %v5617_v27 = vpop.f32.mrb[135].mxu1 }
 0x9b5   : > { %v5616_v23 = vadd.f32 %v5615_v61, %v5511_v52  ;;  %v5647_v58 = vmax.f32 %v5613_v33, 0.0 }
 0x9b7   : > { %v5648_v2 = vmax.f32 %v5616_v23, 0.0 }
 0x9b9   : > { %v5659_v6 = vpack.c.bf16 %v5648_v2, %v5647_v58 }
 0x9bb   : > { %7499 = vmatmul.mubr.msk.bf16.gmra.mrb[132].mxu0 %vm3800_vm8, %v5659_v6  ;;  %v8581_v6 = vld [vmem:[%s13402_s18] sm:$0xff]  }
 0x9bc   : > { %7502 = vmatprep.mubr.msk.bf16.mxu0 %vm13684_vm9, %v13571_v50  ;;  %7557 = vmatpush3.bf16.msra.mxu0 %v8581_v6  ;;  %v8584_v6 = vld [vmem:[%s13402_s18 + $0x18] sm:$0xff]  }
 0x9bd   : > { %7558 = vmatprep.subr.bf16.mxu0 %v13571_v50 }
 0x9be   : > { %v7173_v39 = vpop.f32.mrb[100].mxu0 }
 0x9bf   : > { %v7174_v1 = vpop.f32.mrb[101].mxu0 }
 0x9c0   : > { %v7175_v5 = vadd.f32 %v7174_v1, %v7173_v39  ;;  %v7176_v44 = vpop.f32.mrb[102].mxu0  ;;  %v8582_v39 = vld [vmem:[%s13402_s18 + $0x8] sm:$0xff]  }
 0x9c1   : > { %v7177_v21 = vpop.f32.mrb[103].mxu0  ;;  %7559 = vmatpush3.bf16.msra.mxu0 %v8582_v39 }
 0x9c2   : > { %v7178_v31 = vadd.f32 %v7177_v21, %v7176_v44  ;;  %v5516_v20 = vadd.f32 %v7175_v5, %v12843_v26  ;;  %7560 = vmatprep.subr.bf16.mxu0 %v13571_v50 }
 0x9c4   : > { %v5620_v14 = vpop.f32.mrb[136].mxu1  ;;  %v5519_v55 = vadd.f32 %v7178_v31, %v12843_v26 }
 0x9c5   : > { %v5621_v36 = vadd.f32 %v5620_v14, %v5516_v20  ;;  %v5622_v48 = vpop.f32.mrb[137].mxu1 }
 0x9c6   : > { %v5623_v18 = vpop.f32.mrb[138].mxu1 }
 0x9c7   : > { %v5624_v49 = vadd.f32 %v5623_v18, %v5519_v55  ;;  %v5625_v30 = vpop.f32.mrb[139].mxu1  ;;  %v5649_v17 = vmax.f32 %v5621_v36, 0.0  ;;  %v8583_v55 = vld [vmem:[%s13402_s18 + $0x10] sm:$0xff]  }
 0x9c8   : > { %7561 = vmatpush3.bf16.msra.mxu0 %v8583_v55 }
 0x9c9   : > { %v5650_v51 = vmax.f32 %v5624_v49, 0.0  ;;  %7562 = vmatprep.subr.bf16.mxu0 %v13571_v50 }
 0x9cb   : > { %v5660_v38 = vpack.c.bf16 %v5650_v51, %v5649_v17 }
 0x9cc   : > { %7563 = vmatpush3.bf16.msra.mxu0 %v8584_v6 }
 0x9cd   : > { %v7179_v24 = vpop.f32.mrb[104].mxu0  ;;  %7503 = vmatmul.mubr.msk.bf16.gmra.mrb[136].mxu0 %vm3800_vm8, %v5660_v38  ;;  %7564 = vmatprep.subr.bf16.mxu0 %v13571_v50 }
 0x9ce   : > { %v7180_v19 = vpop.f32.mrb[105].mxu0  ;;  %7506 = vmatprep.mubr.msk.bf16.mxu0 %vm13684_vm9, %v13571_v50 }
 0x9cf   : > { %v7181_v22 = vadd.f32 %v7180_v19, %v7179_v24  ;;  %v7182_v63 = vpop.f32.mrb[106].mxu0 }
 0x9d0   : > { %v7183_v13 = vpop.f32.mrb[107].mxu0 }
 0x9d1   : > { %v7184_v9 = vadd.f32 %v7183_v13, %v7182_v63  ;;  %v5524_v46 = vadd.f32 %v7181_v22, %v12843_v26  ;;  %v5628_v57 = vpop.f32.mrb[140].mxu1 }
 0x9d2   : > { %v5630_v11 = vpop.f32.mrb[141].mxu1 }
 0x9d3   : > { %v5629_v40 = vadd.f32 %v5628_v57, %v5524_v46  ;;  %v5527_v7 = vadd.f32 %v7184_v9, %v12843_v26  ;;  %v5631_v8 = vpop.f32.mrb[142].mxu1 }
 0x9d4   : > { %v5633_v32 = vpop.f32.mrb[143].mxu1 }
 0x9d5   : > { %v5632_v3 = vadd.f32 %v5631_v8, %v5527_v7  ;;  %v5651_v53 = vmax.f32 %v5629_v40, 0.0 }
 0x9d7   : > { %v5652_v59 = vmax.f32 %v5632_v3, 0.0 }
 0x9d9   : > { %v5661_v56 = vpack.c.bf16 %v5652_v59, %v5651_v53 }
 0x9db   : > { %7507 = vmatmul.mubr.msk.bf16.gmra.mrb[140].mxu0 %vm3800_vm8, %v5661_v56 }
 0x9dc   : > { %7566 = vmatprep.mubr.msk.bf16.mxu0 %vm13684_vm9, %v13571_v50 }
 0xa00   : > { %v5770_v10 = vpop.f32.mrb[108].mxu0 }
 0xa01   : > { %v12916_v43 = vadd.f32 %v12913_v0, %v5770_v10  ;;  %v7476_v26 = vpop.f32.mrb[109].mxu0 }
 0xa02   : > { %v5773_v60 = vpop.f32.mrb[110].mxu0 }
 0xa03   : > { %v5774_v62 = vadd.f32 %v12913_v0, %v5773_v60  ;;  %v7477_v29 = vpop.f32.mrb[111].mxu0  ;;  %v5841_v37 = vrot.slane %v12916_v43, 1 }
 0xa05   : > { %v5842_v28 = vrot.slane %v5774_v62, 1 }
 0xa07   : > { %v5875_v34 = vsel %vm1072_vm1, %v5841_v37, %v5842_v28 }
 0xa08   : > { %v5877_v12 = vmax.f32 %v12916_v43, %v5875_v34 }
 0xa0a   : > { %v5895_v27 = vmax.f32 %v5877_v12, 0.0 }
 0xa20   : > { %v5778_v35 = vpop.f32.mrb[112].mxu0 }
 0xa21   : > { %v5779_v54 = vadd.f32 %v12913_v0, %v5778_v35  ;;  %v7480_v4 = vpop.f32.mrb[113].mxu0 }
 0xa22   : > { %v5781_v15 = vpop.f32.mrb[114].mxu0 }
 0xa23   : > { %v5843_v42 = vrot.slane %v5779_v54, 1  ;;  %v5782_v47 = vadd.f32 %v12913_v0, %v5781_v15  ;;  %v7481_v25 = vpop.f32.mrb[115].mxu0 }
 0xa25   : > { %v5874_v45 = vsel %vm1072_vm1, %v5842_v28, %v5843_v42  ;;  %v5844_v33 = vrot.slane %v5782_v47, 1 }
 0xa26   : > { %v5878_v52 = vmax.f32 %v5774_v62, %v5874_v45 }
 0xa27   : > { %v5873_v61 = vsel %vm1072_vm1, %v5843_v42, %v5844_v33 }
 0xa28   : > { %v5896_v23 = vmax.f32 %v5878_v52, 0.0  ;;  %v5879_v58 = vmax.f32 %v5779_v54, %v5873_v61 }
 0xa2a   : > { %v5913_v2 = vpack.c.bf16 %v5896_v23, %v5895_v27  ;;  %v5897_v30 = vmax.f32 %v5879_v58, 0.0 }
 0xa2c   : > { %7521 = vmatmul.mubr.msk.bf16.vlgmr.msra.gmra.mrb[144].mxu1 %vm3800_vm8, %v5913_v2 }
 0xa2d   : > { %7524 = vmatprep.mubr.msk.bf16.mxu1 %vm13684_vm9, %v13571_v50 }
 0xa45   : > { %v5786_v1 = vpop.f32.mrb[116].mxu0 }
 0xa46   : > { %v5787_v5 = vadd.f32 %v12913_v0, %v5786_v1  ;;  %v7484_v44 = vpop.f32.mrb[117].mxu0 }
 0xa47   : > { %v5789_v21 = vpop.f32.mrb[118].mxu0 }
 0xa48   : > { %v5845_v31 = vrot.slane %v5787_v5, 1  ;;  %v5790_v20 = vadd.f32 %v12913_v0, %v5789_v21  ;;  %v7485_v14 = vpop.f32.mrb[119].mxu0 }
 0xa4a   : > { %v5872_v36 = vsel %vm1072_vm1, %v5844_v33, %v5845_v31  ;;  %v5846_v48 = vrot.slane %v5790_v20, 1 }
 0xa4b   : > { %v5880_v18 = vmax.f32 %v5782_v47, %v5872_v36 }
 0xa4c   : > { %v5871_v49 = vsel %vm1072_vm1, %v5845_v31, %v5846_v48  ;;  %v8585_v31 = vld [vmem:[%s13402_s18 + $0x20] sm:$0xff]  }
 0xa4d   : > { %v5898_v17 = vmax.f32 %v5880_v18, 0.0  ;;  %v5881_v51 = vmax.f32 %v5787_v5, %v5871_v49  ;;  %7565 = vmatpush3.bf16.msra.mxu0 %v8585_v31 }
 0xa4e   : > { %7602 = vmatprep.subr.bf16.mxu0 %v13571_v50 }
 0xa4f   : > { %v5914_v38 = vpack.c.bf16 %v5898_v17, %v5897_v30  ;;  %v5899_v8 = vmax.f32 %v5881_v51, 0.0 }
 0xa51   : > { %7525 = vmatmul.mubr.msk.bf16.gmra.mrb[148].mxu1 %vm3800_vm8, %v5914_v38 }
 0xa52   : > { %7528 = vmatprep.mubr.msk.bf16.mxu1 %vm13684_vm9, %v13571_v50 }
 0xa58   : > { %v5794_v24 = vpop.f32.mrb[120].mxu0 }
 0xa59   : > { %v5795_v19 = vadd.f32 %v12913_v0, %v5794_v24  ;;  %v7488_v22 = vpop.f32.mrb[121].mxu0 }
 0xa5a   : > { %v5797_v63 = vpop.f32.mrb[122].mxu0 }
 0xa5b   : > { %v5847_v13 = vrot.slane %v5795_v19, 1  ;;  %v5798_v9 = vadd.f32 %v12913_v0, %v5797_v63  ;;  %v7489_v46 = vpop.f32.mrb[123].mxu0 }
 0xa5d   : > { %v5870_v57 = vsel %vm1072_vm1, %v5846_v48, %v5847_v13  ;;  %v5848_v11 = vrot.slane %v5798_v9, 1 }
 0xa5e   : > { %v5882_v40 = vmax.f32 %v5790_v20, %v5870_v57 }
 0xa5f   : > { %v5869_v7 = vsel %vm1072_vm1, %v5847_v13, %v5848_v11 }
 0xa60   : > { %v5900_v32 = vmax.f32 %v5882_v40, 0.0  ;;  %v5883_v3 = vmax.f32 %v5795_v19, %v5869_v7 }
 0xa62   : > { %v5915_v53 = vpack.c.bf16 %v5900_v32, %v5899_v8  ;;  %v5901_v54 = vmax.f32 %v5883_v3, 0.0 }
 0xa64   : > { %7529 = vmatmul.mubr.msk.bf16.gmra.mrb[152].mxu1 %vm3800_vm8, %v5915_v53 }
 0xa65   : > { %7532 = vmatprep.mubr.msk.bf16.mxu1 %vm13684_vm9, %v13571_v50 }
 0xa6a   : > { %v5802_v59 = vpop.f32.mrb[124].mxu0 }
 0xa6b   : > { %v5803_v56 = vadd.f32 %v12913_v0, %v5802_v59  ;;  %v7492_v10 = vpop.f32.mrb[125].mxu0 }
 0xa6c   : > { %v5805_v26 = vpop.f32.mrb[126].mxu0 }
 0xa6d   : > { %v5849_v60 = vrot.slane %v5803_v56, 1  ;;  %v5806_v62 = vadd.f32 %v12913_v0, %v5805_v26  ;;  %v7493_v29 = vpop.f32.mrb[127].mxu0 }
 0xa6f   : > { %v5868_v28 = vsel %vm1072_vm1, %v5848_v11, %v5849_v60  ;;  %v5850_v34 = vrot.slane %v5806_v62, 1 }
 0xa70   : > { %v5884_v12 = vmax.f32 %v5798_v9, %v5868_v28 }
 0xa71   : > { %v5867_v35 = vsel %vm1072_vm1, %v5849_v60, %v5850_v34 }
 0xa72   : > { %v5902_v4 = vmax.f32 %v5884_v12, 0.0  ;;  %v5885_v15 = vmax.f32 %v5803_v56, %v5867_v35 }
 0xa74   : > { %v5916_v42 = vpack.c.bf16 %v5902_v4, %v5901_v54  ;;  %v5903_v1 = vmax.f32 %v5885_v15, 0.0 }
 0xa76   : > { %7533 = vmatmul.mubr.msk.bf16.gmra.mrb[156].mxu1 %vm3800_vm8, %v5916_v42 }
 0xa77   : > { %7536 = vmatprep.mubr.msk.bf16.mxu1 %vm13684_vm9, %v13571_v50 }
 0xa7c   : > { %v5810_v47 = vpop.f32.mrb[128].mxu0 }
 0xa7d   : > { %v5811_v25 = vadd.f32 %v12913_v0, %v5810_v47  ;;  %v7496_v45 = vpop.f32.mrb[129].mxu0 }
 0xa7e   : > { %v5813_v33 = vpop.f32.mrb[130].mxu0 }
 0xa7f   : > { %v5851_v52 = vrot.slane %v5811_v25, 1  ;;  %v5814_v61 = vadd.f32 %v12913_v0, %v5813_v33  ;;  %v7497_v27 = vpop.f32.mrb[131].mxu0 }
 0xa81   : > { %v5866_v23 = vsel %vm1072_vm1, %v5850_v34, %v5851_v52  ;;  %v5852_v58 = vrot.slane %v5814_v61, 1 }
 0xa82   : > { %v5886_v2 = vmax.f32 %v5806_v62, %v5866_v23 }
 0xa83   : > { %v5865_v39 = vsel %vm1072_vm1, %v5851_v52, %v5852_v58 }
 0xa84   : > { %v5904_v5 = vmax.f32 %v5886_v2, 0.0  ;;  %v5887_v44 = vmax.f32 %v5811_v25, %v5865_v39 }
 0xa86   : > { %v5917_v21 = vpack.c.bf16 %v5904_v5, %v5903_v1  ;;  %v5905_v24 = vmax.f32 %v5887_v44, 0.0 }
 0xa88   : > { %7537 = vmatmul.mubr.msk.bf16.gmra.mrb[160].mxu1 %vm3800_vm8, %v5917_v21 }
 0xa89   : > { %7540 = vmatprep.mubr.msk.bf16.mxu1 %vm13684_vm9, %v13571_v50 }
 0xa8e   : > { %v5818_v20 = vpop.f32.mrb[132].mxu0 }
 0xa8f   : > { %v5819_v14 = vadd.f32 %v12913_v0, %v5818_v20  ;;  %v7500_v55 = vpop.f32.mrb[133].mxu0 }
 0xa90   : > { %v5821_v36 = vpop.f32.mrb[134].mxu0 }
 0xa91   : > { %v5853_v48 = vrot.slane %v5819_v14, 1  ;;  %v5822_v18 = vadd.f32 %v12913_v0, %v5821_v36  ;;  %v7501_v49 = vpop.f32.mrb[135].mxu0 }
 0xa93   : > { %v5864_v30 = vsel %vm1072_vm1, %v5852_v58, %v5853_v48  ;;  %v5854_v17 = vrot.slane %v5822_v18, 1 }
 0xa94   : > { %v5888_v51 = vmax.f32 %v5814_v61, %v5864_v30 }
 0xa95   : > { %v5863_v38 = vsel %vm1072_vm1, %v5853_v48, %v5854_v17 }
 0xa96   : > { %v5906_v19 = vmax.f32 %v5888_v51, 0.0  ;;  %v5889_v22 = vmax.f32 %v5819_v14, %v5863_v38 }
 0xa98   : > { %v5918_v63 = vpack.c.bf16 %v5906_v19, %v5905_v24  ;;  %v5907_v59 = vmax.f32 %v5889_v22, 0.0 }
 0xa9a   : > { %7541 = vmatmul.mubr.msk.bf16.gmra.mrb[164].mxu1 %vm3800_vm8, %v5918_v63 }
 0xa9b   : > { %7544 = vmatprep.mubr.msk.bf16.mxu1 %vm13684_vm9, %v13571_v50 }
 0xaa0   : > { %v5826_v13 = vpop.f32.mrb[136].mxu0 }
 0xaa1   : > { %v5827_v9 = vadd.f32 %v12913_v0, %v5826_v13  ;;  %v7504_v46 = vpop.f32.mrb[137].mxu0 }
 0xaa2   : > { %v5829_v57 = vpop.f32.mrb[138].mxu0 }
 0xaa3   : > { %v5855_v11 = vrot.slane %v5827_v9, 1  ;;  %v5830_v40 = vadd.f32 %v12913_v0, %v5829_v57  ;;  %v7505_v7 = vpop.f32.mrb[139].mxu0 }
 0xaa5   : > { %v5862_v8 = vsel %vm1072_vm1, %v5854_v17, %v5855_v11  ;;  %v5856_v32 = vrot.slane %v5830_v40, 1 }
 0xaa6   : > { %v5890_v3 = vmax.f32 %v5822_v18, %v5862_v8 }
 0xaa7   : > { %v5861_v53 = vsel %vm1072_vm1, %v5855_v11, %v5856_v32 }
 0xaa8   : > { %v5908_v56 = vmax.f32 %v5890_v3, 0.0  ;;  %v5891_v10 = vmax.f32 %v5827_v9, %v5861_v53 }
 0xaaa   : > { %v5919_v26 = vpack.c.bf16 %v5908_v56, %v5907_v59  ;;  %v5909_v25 = vmax.f32 %v5891_v10, 0.0 }
 0xaac   : > { %7545 = vmatmul.mubr.msk.bf16.gmra.mrb[168].mxu1 %vm3800_vm8, %v5919_v26 }
 0xaad   : > { %7548 = vmatprep.mubr.msk.bf16.mxu1 %vm13684_vm9, %v13571_v50 }
 0xaae   : > { %v5834_v60 = vpop.f32.mrb[140].mxu0 }
 0xaaf   : > { %v5835_v62 = vadd.f32 %v12913_v0, %v5834_v60  ;;  %v7508_v29 = vpop.f32.mrb[141].mxu0 }
 0xab0   : > { %v5837_v28 = vpop.f32.mrb[142].mxu0 }
 0xab1   : > { %v5857_v34 = vrot.slane %v5835_v62, 1  ;;  %v5838_v12 = vadd.f32 %v12913_v0, %v5837_v28  ;;  %v7509_v35 = vpop.f32.mrb[143].mxu0 }
 0xab3   : > { %v5860_v54 = vsel %vm1072_vm1, %v5856_v32, %v5857_v34  ;;  %v5858_v4 = vrot.slane %v5838_v12, 1 }
 0xab4   : > { %v5892_v15 = vmax.f32 %v5830_v40, %v5860_v54 }
 0xab5   : > { %v5859_v42 = vsel %vm1072_vm1, %v5857_v34, %v5858_v4  ;;  %v5876_v47 = vsel %vm1072_vm1, %v5858_v4, %v5841_v37  ;;  %vm13687_vm1 = vcmask 1046528  }
 0xab6   : > { %v5910_v45 = vmax.f32 %v5892_v15, 0.0  ;;  %v5893_v33 = vmax.f32 %v5835_v62, %v5859_v42  ;;  %v5894_v52 = vmax.f32 %v5838_v12, %v5876_v47 }
 0xab8   : > { %v5911_v61 = vmax.f32 %v5893_v33, 0.0  ;;  %v5912_v0 = vmax.f32 %v5894_v52, 0.0  ;;  %v5920_v27 = vpack.c.bf16 %v5910_v45, %v5909_v25 }
 0xaba   : > { %v5921_v23 = vpack.c.bf16 %v5912_v0, %v5911_v61  ;;  %7549 = vmatmul.mubr.msk.bf16.gmra.mrb[172].mxu1 %vm3800_vm8, %v5920_v27 }
 0xabb   : > { %7552 = vmatprep.mubr.msk.bf16.mxu1 %vm13684_vm9, %v13571_v50 }
 0xac2   : > { %7553 = vmatmul.mubr.msk.bf16.gmra.mrb[176].mxu1 %vm3800_vm8, %v5921_v23 }
 0xaff   : > { %v6030_v43 = vpop.f32.mrb[144].mxu1 }
 0xb00   : > { %v7522_v37 = vpop.f32.mrb[145].mxu1  ;;  %v6031_v2 = vadd.f32 %v13025_v41, %v6030_v43 }
 0xb01   : > { %v6033_v58 = vpop.f32.mrb[146].mxu1 }
 0xb02   : > { %v6034_v6 = vadd.f32 %v13025_v41, %v6033_v58  ;;  %v7523_v39 = vpop.f32.mrb[147].mxu1  ;;  %v13081_v58 = vld [vmem:[#allocation2] ss:$0 sm:$0xff] }
 0xb04   : > { %v6101_v1 = vpack.c.bf16 %v6034_v6, %v6031_v2 }
 0xb06   : > { %7567 = vmatmul.mubr.msk.bf16.vlgmr.msra.gmra.mrb[144].mxu0 %vm3800_vm8, %v6101_v1  ;;  %6616 = vmatpush1.bf16.msra.mxu1 %v6101_v1 }
 0xb07   : > { %7570 = vmatprep.mubr.msk.bf16.mxu0 %vm13684_vm9, %v13571_v50  ;;  %6617 = vmatprep.subr.bf16.mxu1 %v13685_v16 }
 0xb24   : > { %v6038_v5 = vpop.f32.mrb[148].mxu1 }
 0xb25   : > { %v7526_v44 = vpop.f32.mrb[149].mxu1  ;;  %v6039_v31 = vadd.f32 %v13025_v41, %v6038_v5 }
 0xb26   : > { %v6041_v21 = vpop.f32.mrb[150].mxu1 }
 0xb27   : > { %v6042_v20 = vadd.f32 %v13025_v41, %v6041_v21  ;;  %v7527_v14 = vpop.f32.mrb[151].mxu1 }
 0xb29   : > { %v6102_v55 = vpack.c.bf16 %v6042_v20, %v6039_v31 }
 0xb2b   : > { %7571 = vmatmul.mubr.msk.bf16.gmra.mrb[148].mxu0 %vm3800_vm8, %v6102_v55  ;;  %6618 = vmatpush1.bf16.msra.mxu1 %v6102_v55 }
 0xb2c   : > { %7574 = vmatprep.mubr.msk.bf16.mxu0 %vm13684_vm9, %v13571_v50  ;;  %6619 = vmatprep.subr.bf16.mxu1 %v13685_v16 }
 0xb37   : > { %v6046_v36 = vpop.f32.mrb[152].mxu1 }
 0xb38   : > { %v7530_v48 = vpop.f32.mrb[153].mxu1  ;;  %v6047_v49 = vadd.f32 %v13025_v41, %v6046_v36 }
 0xb39   : > { %v6049_v18 = vpop.f32.mrb[154].mxu1 }
 0xb3a   : > { %v6050_v30 = vadd.f32 %v13025_v41, %v6049_v18  ;;  %v7531_v17 = vpop.f32.mrb[155].mxu1 }
 0xb3c   : > { %v6103_v51 = vpack.c.bf16 %v6050_v30, %v6047_v49 }
 0xb3e   : > { %7575 = vmatmul.mubr.msk.bf16.gmra.mrb[152].mxu0 %vm3800_vm8, %v6103_v51  ;;  %6620 = vmatpush1.bf16.msra.mxu1 %v6103_v51 }
 0xb3f   : > { %7578 = vmatprep.mubr.msk.bf16.mxu0 %vm13684_vm9, %v13571_v50  ;;  %6621 = vmatprep.subr.bf16.mxu1 %v13685_v16 }
 0xb49   : > { %v6054_v38 = vpop.f32.mrb[156].mxu1 }
 0xb4a   : > { %v7534_v24 = vpop.f32.mrb[157].mxu1  ;;  %v6055_v22 = vadd.f32 %v13025_v41, %v6054_v38 }
 0xb4b   : > { %v6057_v19 = vpop.f32.mrb[158].mxu1 }
 0xb4c   : > { %v6058_v63 = vadd.f32 %v13025_v41, %v6057_v19  ;;  %v7535_v13 = vpop.f32.mrb[159].mxu1 }
 0xb4e   : > { %v6104_v9 = vpack.c.bf16 %v6058_v63, %v6055_v22 }
 0xb50   : > { %7579 = vmatmul.mubr.msk.bf16.gmra.mrb[156].mxu0 %vm3800_vm8, %v6104_v9  ;;  %6622 = vmatpush1.bf16.msra.mxu1 %v6104_v9 }
 0xb51   : > { %7582 = vmatprep.mubr.msk.bf16.mxu0 %vm13684_vm9, %v13571_v50  ;;  %6623 = vmatprep.subr.bf16.mxu1 %v13685_v16 }
 0xb5b   : > { %v6062_v46 = vpop.f32.mrb[160].mxu1 }
 0xb5c   : > { %v7538_v57 = vpop.f32.mrb[161].mxu1  ;;  %v6063_v40 = vadd.f32 %v13025_v41, %v6062_v46 }
 0xb5d   : > { %v6065_v11 = vpop.f32.mrb[162].mxu1 }
 0xb5e   : > { %v6066_v7 = vadd.f32 %v13025_v41, %v6065_v11  ;;  %v7539_v8 = vpop.f32.mrb[163].mxu1 }
 0xb60   : > { %v6105_v32 = vpack.c.bf16 %v6066_v7, %v6063_v40 }
 0xb62   : > { %7583 = vmatmul.mubr.msk.bf16.gmra.mrb[160].mxu0 %vm3800_vm8, %v6105_v32  ;;  %6624 = vmatpush1.bf16.msra.mxu1 %v6105_v32 }
 0xb63   : > { %7586 = vmatprep.mubr.msk.bf16.mxu0 %vm13684_vm9, %v13571_v50  ;;  %6625 = vmatprep.subr.bf16.mxu1 %v13685_v16 }
 0xb6d   : > { %v6070_v3 = vpop.f32.mrb[164].mxu1 }
 0xb6e   : > { %v7542_v53 = vpop.f32.mrb[165].mxu1  ;;  %v6071_v56 = vadd.f32 %v13025_v41, %v6070_v3 }
 0xb6f   : > { %v6073_v59 = vpop.f32.mrb[166].mxu1 }
 0xb70   : > { %v6074_v10 = vadd.f32 %v13025_v41, %v6073_v59  ;;  %v7543_v26 = vpop.f32.mrb[167].mxu1 }
 0xb72   : > { %v6106_v60 = vpack.c.bf16 %v6074_v10, %v6071_v56 }
 0xb74   : > { %7587 = vmatmul.mubr.msk.bf16.gmra.mrb[164].mxu0 %vm3800_vm8, %v6106_v60  ;;  %6626 = vmatpush1.bf16.msra.mxu1 %v6106_v60 }
 0xb75   : > { %7590 = vmatprep.mubr.msk.bf16.mxu0 %vm13684_vm9, %v13571_v50  ;;  %6627 = vmatprep.subr.bf16.mxu1 %v13685_v16 }
 0xb7f   : > { %v6078_v62 = vpop.f32.mrb[168].mxu1 }
 0xb80   : > { %v7546_v29 = vpop.f32.mrb[169].mxu1  ;;  %v6079_v34 = vadd.f32 %v13025_v41, %v6078_v62 }
 0xb81   : > { %v6081_v28 = vpop.f32.mrb[170].mxu1 }
 0xb82   : > { %v6082_v12 = vadd.f32 %v13025_v41, %v6081_v28  ;;  %v7547_v35 = vpop.f32.mrb[171].mxu1 }
 0xb84   : > { %v6107_v54 = vpack.c.bf16 %v6082_v12, %v6079_v34 }
 0xb86   : > { %7591 = vmatmul.mubr.msk.bf16.gmra.mrb[168].mxu0 %vm3800_vm8, %v6107_v54  ;;  %6628 = vmatpush1.bf16.msra.mxu1 %v6107_v54 }
 0xb87   : > { %7594 = vmatprep.mubr.msk.bf16.mxu0 %vm13684_vm9, %v13571_v50  ;;  %6629 = vmatprep.subr.bf16.mxu1 %v13685_v16 }
 0xb8d   : > { %v6086_v4 = vpop.f32.mrb[172].mxu1 }
 0xb8e   : > { %v7550_v15 = vpop.f32.mrb[173].mxu1  ;;  %v6087_v47 = vadd.f32 %v13025_v41, %v6086_v4 }
 0xb8f   : > { %v6089_v42 = vpop.f32.mrb[174].mxu1 }
 0xb90   : > { %v6090_v25 = vadd.f32 %v13025_v41, %v6089_v42  ;;  %v7551_v45 = vpop.f32.mrb[175].mxu1 }
 0xb92   : > { %v6108_v33 = vpack.c.bf16 %v6090_v25, %v6087_v47 }
 0xb94   : > { %7595 = vmatmul.mubr.msk.bf16.gmra.mrb[172].mxu0 %vm3800_vm8, %v6108_v33  ;;  %6630 = vmatpush1.bf16.msra.mxu1 %v6108_v33 }
 0xb95   : > { %v6094_v52 = vpop.f32.mrb[176].mxu1  ;;  %7598 = vmatprep.mubr.msk.bf16.mxu0 %vm13684_vm9, %v13571_v50  ;;  %6631 = vmatprep.subr.bf16.mxu1 %v13685_v16 }
 0xb96   : > { %v7554_v61 = vpop.f32.mrb[177].mxu1  ;;  %v6095_v27 = vadd.f32 %v13025_v41, %v6094_v52 }
 0xb97   : > { %v6097_v0 = vpop.f32.mrb[178].mxu1 }
 0xb98   : > { %v6098_v23 = vadd.f32 %v13025_v41, %v6097_v0  ;;  %v7555_v43 = vpop.f32.mrb[179].mxu1 }
 0xb9a   : > { %v6109_v37 = vpack.c.bf16 %v6098_v23, %v6095_v27 }
 0xb9c   : > { %7599 = vmatmul.mubr.msk.bf16.gmra.mrb[176].mxu0 %vm3800_vm8, %v6109_v37  ;;  %6632 = vmatpush1.bf16.msra.mxu1 %v6109_v37 }
 0xb9d   : > { %7612 = vmatprep.mubr.msk.bf16.mxu0 %vm13684_vm9, %v13571_v50  ;;  %7616 = vmatprep.subr.bf16.mxu1 %v13571_v50 }
 0xbd9   : > { %v6218_v2 = vpop.f32.mrb[144].mxu0 }
 0xbda   : > { %v6219_v16 = vadd.f32 %v13081_v58, %v6218_v2  ;;  %v7568_v6 = vpop.f32.mrb[145].mxu0 }
 0xbdb   : > { %v6221_v39 = vpop.f32.mrb[146].mxu0 }
 0xbdc   : > { %v6222_v1 = vadd.f32 %v13081_v58, %v6221_v39  ;;  %6309 = vperm.xlu1 %8511, %v6219_v16   ;;  %v7569_v41 = vpop.f32.mrb[147].mxu0 }
 0xbdd   : > { %v6294_v41 = vld [vmem:[%s13686_s5 + $0x28] sm:$0xff] }
 0xbde   : > { %6314 = vperm.xlu0 %8512, %v6222_v1   ;;  %v6289_v1 = vld [vmem:[%s13686_s5] sm:$0xff] }
 0xbfe   : > { %v6226_v5 = vpop.f32.mrb[148].mxu0 }
 0xbff   : > { %v6227_v44 = vadd.f32 %v13081_v58, %v6226_v5  ;;  %v7572_v21 = vpop.f32.mrb[149].mxu0  ;;  %v6290_v5 = vld [vmem:[%s13686_s5 + $0x8] sm:$0xff] }
 0xc00   : > { %v6229_v31 = vpop.f32.mrb[150].mxu0 }
 0xc01   : > { %v6230_v20 = vadd.f32 %v13081_v58, %v6229_v31  ;;  %6319 = vperm.xlu0 %8512, %v6227_v44   ;;  %v7573_v14 = vpop.f32.mrb[151].mxu0  ;;  %v6296_v44 = vld [vmem:[%s13686_s5 + $0x38] sm:$0xff]  ;;  %v6291_v31 = vld [vmem:[%s13686_s5 + $0x10] sm:$0xff] }
 0xc02   : > { %v6295_v14 = vld [vmem:[%s13686_s5 + $0x30] sm:$0xff] }
 0xc03   : > { %6324 = vperm.xlu1 %8511, %v6230_v20   ;;  %v6292_v20 = vld [vmem:[%s13686_s5 + $0x18] sm:$0xff] }
 0xc11   : > { %v6234_v55 = vpop.f32.mrb[152].mxu0 }
 0xc12   : > { %v6235_v36 = vadd.f32 %v13081_v58, %v6234_v55  ;;  %v7576_v48 = vpop.f32.mrb[153].mxu0 }
 0xc13   : > { %v6237_v18 = vpop.f32.mrb[154].mxu0 }
 0xc14   : > { %6329 = vperm.xlu1 %8511, %v6235_v36   ;;  %v7577_v49 = vpop.f32.mrb[155].mxu0  ;;  %v6238_v30 = vadd.f32 %v13081_v58, %v6237_v18  ;;  %v6297_v18 = vld [vmem:[%s13686_s5 + $0x40] sm:$0xff] }
 0xc15   : > { %v6298_v49 = vld [vmem:[%s13686_s5 + $0x48] sm:$0xff] }
 0xc18   : > { %6334 = vperm.xlu1 %8511, %v6238_v30   ;;  %v6300_v30 = vld [vmem:[%s13686_s5 + $0x58] sm:$0xff] }
 0xc23   : > { %v6242_v17 = vpop.f32.mrb[156].mxu0 }
 0xc24   : > { %v6243_v51 = vadd.f32 %v13081_v58, %v6242_v17  ;;  %v7580_v38 = vpop.f32.mrb[157].mxu0 }
 0xc25   : > { %v6245_v24 = vpop.f32.mrb[158].mxu0  ;;  %v6299_v38 = vld [vmem:[%s13686_s5 + $0x50] sm:$0xff] }
 0xc26   : > { %v6246_v19 = vadd.f32 %v13081_v58, %v6245_v24  ;;  %6339 = vperm.xlu0 %8512, %v6243_v51   ;;  %v7581_v22 = vpop.f32.mrb[159].mxu0 }
 0xc28   : > { %6344 = vperm.xlu1 %8511, %v6246_v19  }
 0xc35   : > { %v6250_v63 = vpop.f32.mrb[160].mxu0 }
 0xc36   : > { %v6251_v13 = vadd.f32 %v13081_v58, %v6250_v63  ;;  %v7584_v9 = vpop.f32.mrb[161].mxu0 }
 0xc37   : > { %v6253_v46 = vpop.f32.mrb[162].mxu0  ;;  %v6302_v9 = vld [vmem:[%s13686_s5 + $0x68] sm:$0xff] }
 0xc38   : > { %v6254_v57 = vadd.f32 %v13081_v58, %v6253_v46  ;;  %6349 = vperm.xlu0 %8512, %v6251_v13   ;;  %v7585_v11 = vpop.f32.mrb[163].mxu0  ;;  %v6301_v13 = vld [vmem:[%s13686_s5 + $0x60] sm:$0xff]  ;;  %v6304_v46 = vld [vmem:[%s13686_s5 + $0x78] sm:$0xff] }
 0xc3a   : > { %6354 = vperm.xlu1 %8511, %v6254_v57  }
 0xc47   : > { %v6258_v40 = vpop.f32.mrb[164].mxu0 }
 0xc48   : > { %v6259_v7 = vadd.f32 %v13081_v58, %v6258_v40  ;;  %v7588_v8 = vpop.f32.mrb[165].mxu0 }
 0xc49   : > { %v6261_v32 = vpop.f32.mrb[166].mxu0 }
 0xc4a   : > { %v6262_v3 = vadd.f32 %v13081_v58, %v6261_v32  ;;  %6359 = vperm.xlu0 %8512, %v6259_v7   ;;  %v7589_v53 = vpop.f32.mrb[167].mxu0 }
 0xc4c   : > { %6364 = vperm.xlu1 %8511, %v6262_v3  }
 0xc59   : > { %v6266_v59 = vpop.f32.mrb[168].mxu0 }
 0xc5a   : > { %v6267_v56 = vadd.f32 %v13081_v58, %v6266_v59  ;;  %v7592_v10 = vpop.f32.mrb[169].mxu0  ;;  %v6303_v59 = vld [vmem:[%s13686_s5 + $0x70] sm:$0xff] }
 0xc5b   : > { %v6269_v26 = vpop.f32.mrb[170].mxu0  ;;  %v6310_v33 = vpop.permute.xlu1 %6309 }
 0xc5c   : > { %v6270_v60 = vadd.f32 %v13081_v58, %v6269_v26  ;;  %6369 = vperm.xlu0 %8512, %v6267_v56   ;;  %v7593_v62 = vpop.f32.mrb[171].mxu0  ;;  %v13125_v55 = vadd.f32 %v6310_v33, %v6289_v1 }
 0xc5d   : > { %v6315_v0 = vpop.permute.xlu0 %6314 }
 0xc5e   : > { %6374 = vperm.xlu1 %8511, %v6270_v60   ;;  %v13145_v24 = vadd.f32 %v6315_v0, %v6290_v5  ;;  %v6416_v8 = vsel %vm6415_vm0, %v13125_v55, -inf }
 0xc67   : > { %v6274_v29 = vpop.f32.mrb[172].mxu0 }
 0xc68   : > { %v6275_v28 = vadd.f32 %v13081_v58, %v6274_v29  ;;  %v7596_v34 = vpop.f32.mrb[173].mxu0  ;;  %v6417_v29 = vsel %vm6415_vm0, %v13145_v24, -inf }
 0xc69   : > { %v6277_v12 = vpop.f32.mrb[174].mxu0 }
 0xc6a   : > { %v6278_v35 = vadd.f32 %v13081_v58, %v6277_v12  ;;  %6379 = vperm.xlu0 %8512, %v6275_v28   ;;  %v7597_v54 = vpop.f32.mrb[175].mxu0 }
 0xc6c   : > { %6384 = vperm.xlu1 %8511, %v6278_v35   ;;  %v6305_v35 = vld [vmem:[%s13686_s5 + $0x80] sm:$0xff] }
 0xc6f   : > { %v6282_v4 = vpop.f32.mrb[176].mxu0 }
 0xc70   : > { %v6283_v15 = vadd.f32 %v13081_v58, %v6282_v4  ;;  %v7600_v42 = vpop.f32.mrb[177].mxu0 }
 0xc71   : > { %v6285_v47 = vpop.f32.mrb[178].mxu0 }
 0xc72   : > { %v6286_v25 = vadd.f32 %v13081_v58, %v6285_v47  ;;  %6389 = vperm.xlu0 %8512, %v6283_v15   ;;  %v7601_v45 = vpop.f32.mrb[179].mxu0  ;;  %v6293_v58 = vld [vmem:[%s13686_s5 + $0x20] sm:$0xff] }
 0xc74   : > { %6394 = vperm.xlu1 %8511, %v6286_v25  }
 0xc80   : > { %v6320_v23 = vpop.permute.xlu0 %6319 }
 0xc81   : > { %v13147_v19 = vadd.f32 %v6320_v23, %v6291_v31 }
 0xc82   : > { %v6325_v52 = vpop.permute.xlu1 %6324 }
 0xc83   : > { %v13149_v22 = vadd.f32 %v6325_v52, %v6292_v20  ;;  %v6418_v28 = vsel %vm6415_vm0, %v13147_v19, -inf }
 0xc85   : > { %v6419_v34 = vsel %vm6415_vm0, %v13149_v22, -inf }
 0xc93   : > { %v6330_v61 = vpop.permute.xlu1 %6329 }
 0xc94   : > { %v13127_v36 = vadd.f32 %v6330_v61, %v6293_v58  ;;  %v6306_v61 = vld [vmem:[%s13686_s5 + $0x88] sm:$0xff] }
 0xc96   : > { %v6420_v32 = vsel %vm6415_vm0, %v13127_v36, -inf }
 0xc97   : > { %v6335_v27 = vpop.permute.xlu1 %6334  ;;  %v6421_v47 = vmax.f32 %v6416_v8, %v6420_v32 }
 0xc98   : > { %v13129_v48 = vadd.f32 %v6335_v27, %v6294_v41 }
 0xc9a   : > { %v6422_v3 = vsel %vm6415_vm0, %v13129_v48, -inf }
 0xc9b   : > { %v6423_v25 = vmax.f32 %v6417_v29, %v6422_v3 }
 0xca5   : > { %v6340_v37 = vpop.permute.xlu0 %6339 }
 0xca6   : > { %v13151_v63 = vadd.f32 %v6340_v37, %v6295_v14 }
 0xca7   : > { %v6345_v43 = vpop.permute.xlu1 %6344 }
 0xca8   : > { %v13140_v51 = vadd.f32 %v6345_v43, %v6296_v44  ;;  %v6424_v12 = vsel %vm6415_vm0, %v13151_v63, -inf }
 0xca9   : > { %v6425_v37 = vmax.f32 %v6418_v28, %v6424_v12 }
 0xcaa   : > { %v6426_v10 = vsel %vm6415_vm0, %v13140_v51, -inf }
 0xcab   : > { %v6427_v45 = vmax.f32 %v6419_v34, %v6426_v10 }
 0xcb7   : > { %v6350_v16 = vpop.permute.xlu0 %6349 }
 0xcb8   : > { %v13162_v11 = vadd.f32 %v6350_v16, %v6297_v18 }
 0xcb9   : > { %v6355_v2 = vpop.permute.xlu1 %6354 }
 0xcba   : > { %v13164_v40 = vadd.f32 %v6355_v2, %v6298_v49  ;;  %v6428_v54 = vsel %vm6415_vm0, %v13162_v11, -inf }
 0xcbb   : > { %v6429_v2 = vmax.f32 %v6421_v47, %v6428_v54 }
 0xcbc   : > { %v6430_v4 = vsel %vm6415_vm0, %v13164_v40, -inf }
 0xcbd   : > { %v6431_v16 = vmax.f32 %v6423_v25, %v6430_v4 }
 0xcc9   : > { %v6360_v39 = vpop.permute.xlu0 %6359 }
 0xcca   : > { %v13174_v53 = vadd.f32 %v6360_v39, %v6299_v38 }
 0xccb   : > { %v6365_v6 = vpop.permute.xlu1 %6364 }
 0xccc   : > { %v13166_v7 = vadd.f32 %v6365_v6, %v6300_v30  ;;  %v6432_v33 = vsel %vm6415_vm0, %v13174_v53, -inf }
 0xccd   : > { %v6433_v5 = vmax.f32 %v6425_v37, %v6432_v33 }
 0xcce   : > { %v6434_v15 = vsel %vm6415_vm0, %v13166_v7, -inf }
 0xccf   : > { %v6435_v6 = vmax.f32 %v6427_v45, %v6434_v15 }
 0xcdb   : > { %v6370_v17 = vpop.permute.xlu0 %6369 }
 0xcdc   : > { %v13181_v26 = vadd.f32 %v6370_v17, %v6301_v13 }
 0xcdd   : > { %v6375_v21 = vpop.permute.xlu1 %6374 }
 0xcde   : > { %v13183_v60 = vadd.f32 %v6375_v21, %v6302_v9  ;;  %v6436_v0 = vsel %vm6415_vm0, %v13181_v26, -inf }
 0xcdf   : > { %v6437_v44 = vmax.f32 %v6429_v2, %v6436_v0 }
 0xce0   : > { %v6438_v27 = vsel %vm6415_vm0, %v13183_v60, -inf }
 0xce1   : > { %v6439_v21 = vmax.f32 %v6431_v16, %v6438_v27 }
 0xce9   : > { %v6380_v56 = vpop.permute.xlu0 %6379 }
 0xcea   : > { %v13204_v42 = vadd.f32 %v6380_v56, %v6303_v59 }
 0xceb   : > { %v6385_v57 = vpop.permute.xlu1 %6384 }
 0xcec   : > { %v13185_v62 = vadd.f32 %v6385_v57, %v6304_v46  ;;  %v6440_v1 = vsel %vm6415_vm0, %v13204_v42, -inf }
 0xced   : > { %v6441_v14 = vmax.f32 %v6433_v5, %v6440_v1 }
 0xcee   : > { %v6442_v23 = vsel %vm6415_vm0, %v13185_v62, -inf }
 0xcef   : > { %v6443_v31 = vmax.f32 %v6435_v6, %v6442_v23 }
 0xcf1   : > { %v6390_v52 = vpop.permute.xlu0 %6389  ;;  %v6449_v30 = vmax.f32 %v6441_v14, %v6443_v31 }
 0xcf2   : > { %v13217_v43 = vadd.f32 %v6390_v52, %v6305_v35 }
 0xcf3   : > { %v6395_v39 = vpop.permute.xlu1 %6394 }
 0xcf4   : > { %v6444_v58 = vsel %vm6415_vm0, %v13217_v43, -inf  ;;  %v13223_v41 = vadd.f32 %v6395_v39, %v6306_v61 }
 0xcf5   : > { %v6445_v18 = vmax.f32 %v6437_v44, %v6444_v58 }
 0xcf6   : > { %v6446_v20 = vsel %vm6415_vm0, %v13223_v41, -inf }
 0xcf7   : > { %v6447_v49 = vmax.f32 %v6439_v21, %v6446_v20 }
 0xcf9   : > { %v6448_v17 = vmax.f32 %v6445_v18, %v6447_v49 }
 0xcfb   : > { %v6450_v38 = vmax.f32 %v6448_v17, %v6449_v30 }
 0xcfd   : > { %v6451_v13 = vrot.slane %v6450_v38, 4 }
 0xcff   : > { %v6452_v9 = vmax.f32 %v6450_v38, %v6451_v13 }
 0xd01   : > { %v6453_v46 = vrot.slane %v6452_v9, 2 }
 0xd03   : > { %v6454_v57 = vmax.f32 %v6452_v9, %v6453_v46 }
 0xd05   : > { %v6455_v8 = vrot.slane %v6454_v57, 1 }
 0xd07   : > { %v13227_v32 = vmax.f32 %v6454_v57, %v6455_v8 }
 0xd09   : > { %v6457_v3 = vsub.f32 %v13125_v55, %v13227_v32  ;;  %v6458_v59 = vsub.f32 %v13145_v24, %v13227_v32  ;;  %v6459_v56 = vsub.f32 %v13147_v19, %v13227_v32  ;;  %v6460_v10 = vsub.f32 %v13149_v22, %v13227_v32 }
 0xd0a   : > { %v6461_v29 = vsub.f32 %v13127_v36, %v13227_v32  ;;  %v6462_v12 = vsub.f32 %v13129_v48, %v13227_v32  ;;  %v6463_v55 = vsub.f32 %v13151_v63, %v13227_v32  ;;  %v6464_v19 = vsub.f32 %v13140_v51, %v13227_v32 }
 0xd0b   : > { %v6475_v28 = vmul.f32 1.442695, %v6457_v3  ;;  %v6477_v34 = vmul.f32 1.442695, %v6458_v59  ;;  %v6479_v35 = vmul.f32 1.442695, %v6459_v56  ;;  %v6465_v36 = vsub.f32 %v13162_v11, %v13227_v32 }
 0xd0c   : > { %v6481_v54 = vmul.f32 1.442695, %v6460_v10  ;;  %v6483_v24 = vmul.f32 1.442695, %v6461_v29  ;;  %v6485_v22 = vmul.f32 1.442695, %v6462_v12  ;;  %v6466_v48 = vsub.f32 %v13164_v40, %v13227_v32 }
 0xd0d   : > { %8593 = vpow2.f32 %v6475_v28  ;;  %v6487_v4 = vmul.f32 1.442695, %v6463_v55  ;;  %v6489_v15 = vmul.f32 1.442695, %v6464_v19  ;;  %v6467_v63 = vsub.f32 %v13174_v53, %v13227_v32 }
 0xd0e   : > { %8595 = vpow2.f32 %v6477_v34  ;;  %v6491_v47 = vmul.f32 1.442695, %v6465_v36  ;;  %v6468_v45 = vsub.f32 %v13166_v7, %v13227_v32  ;;  %v6493_v11 = vmul.f32 1.442695, %v6466_v48 }
 0xd0f   : > { %8597 = vpow2.f32 %v6479_v35  ;;  %v6469_v61 = vsub.f32 %v13181_v26, %v13227_v32  ;;  %v6495_v0 = vmul.f32 1.442695, %v6467_v63  ;;  %v6470_v37 = vsub.f32 %v13183_v60, %v13227_v32 }
 0xd10   : > { %8599 = vpow2.f32 %v6481_v54  ;;  %v6497_v2 = vmul.f32 1.442695, %v6468_v45  ;;  %v6471_v26 = vsub.f32 %v13204_v42, %v13227_v32  ;;  %v6472_v60 = vsub.f32 %v13185_v62, %v13227_v32 }
 0xd11   : > { %8601 = vpow2.f32 %v6483_v24  ;;  %v6499_v1 = vmul.f32 1.442695, %v6469_v61  ;;  %v6501_v21 = vmul.f32 1.442695, %v6470_v37  ;;  %v6473_v42 = vsub.f32 %v13217_v43, %v13227_v32  ;;  %v8586_v37 = vld [vmem:[%s13404_s20] sm:$0xff]  }
 0xd12   : > { %8603 = vpow2.f32 %v6485_v22  ;;  %v6503_v18 = vmul.f32 1.442695, %v6471_v26  ;;  %v6474_v62 = vsub.f32 %v13223_v41, %v13227_v32  ;;  %v6505_v38 = vmul.f32 1.442695, %v6472_v60  ;;  %7603 = vmatpush3.bf16.msra.mxu0 %v8586_v37  ;;  %v8590_v60 = vld [vmem:[%s13404_s20 + $0x20] sm:$0xff]  }
 0xd13   : > { %8605 = vpow2.f32 %v6487_v4  ;;  %v6507_v43 = vmul.f32 1.442695, %v6473_v42  ;;  %7604 = vmatprep.subr.bf16.mxu0 %v13571_v50 }
 0xd14   : > { %8607 = vpow2.f32 %v6489_v15  ;;  %v6509_v59 = vmul.f32 1.442695, %v6474_v62 }
 0xd15   : > { %8609 = vpow2.f32 %v6491_v47 }
 0xd16   : > { %8611 = vpow2.f32 %v6493_v11 }
 0xd17   : > { %v13251_v25 = vpop.eup %8593  ;;  %8613 = vpow2.f32 %v6495_v0 }
 0xd18   : > { %v13253_v51 = vpop.eup %8595  ;;  %v6511_v33 = vsel %vm6415_vm0, %v13251_v25, 0.0  ;;  %8615 = vpow2.f32 %v6497_v2 }
 0xd19   : > { %v13259_v40 = vpop.eup %8597  ;;  %v6512_v52 = vsel %vm6415_vm0, %v13253_v51, 0.0  ;;  %8617 = vpow2.f32 %v6499_v1  ;;  %v8588_v1 = vld [vmem:[%s13404_s20 + $0x10] sm:$0xff]  }
 0xd1a   : > { %v13263_v53 = vpop.eup %8599  ;;  %v6513_v27 = vadd.f32 %v6512_v52, %v6511_v33  ;;  %v6514_v7 = vsel %vm6415_vm0, %v13259_v40, 0.0  ;;  %8619 = vpow2.f32 %v6501_v21 }
 0xd1b   : > { %v13269_v23 = vpop.eup %8601  ;;  %v6516_v6 = vsel %vm6415_vm0, %v13263_v53, 0.0  ;;  %8621 = vpow2.f32 %v6503_v18 }
 0xd1c   : > { %v6515_v16 = vadd.f32 %v6514_v7, %v6513_v27  ;;  %v13275_v39 = vpop.eup %8603  ;;  %v6518_v5 = vsel %vm6415_vm0, %v13269_v23, 0.0  ;;  %8623 = vpow2.f32 %v6505_v38 }
 0xd1d   : > { %v13281_v44 = vpop.eup %8605  ;;  %v6520_v20 = vsel %vm6415_vm0, %v13275_v39, 0.0  ;;  %8625 = vpow2.f32 %v6507_v43 }
 0xd1e   : > { %v6517_v58 = vadd.f32 %v6516_v6, %v6515_v16  ;;  %v13287_v14 = vpop.eup %8607  ;;  %v6522_v30 = vsel %vm6415_vm0, %v13281_v44, 0.0  ;;  %8627 = vpow2.f32 %v6509_v59  ;;  %v8587_v16 = vld [vmem:[%s13404_s20 + $0x8] sm:$0xff]  }
 0xd1f   : > { %v13293_v17 = vpop.eup %8609  ;;  %v6524_v9 = vsel %vm6415_vm0, %v13287_v14, 0.0  ;;  %7605 = vmatpush3.bf16.msra.mxu0 %v8587_v16 }
 0xd20   : > { %v6519_v31 = vadd.f32 %v6518_v5, %v6517_v58  ;;  %v13299_v46 = vpop.eup %8611  ;;  %v6526_v8 = vsel %vm6415_vm0, %v13293_v17, 0.0  ;;  %7606 = vmatprep.subr.bf16.mxu0 %v13571_v50  ;;  %v8589_v5 = vld [vmem:[%s13404_s20 + $0x18] sm:$0xff]  }
 0xd21   : > { %v13303_v3 = vpop.eup %8613  ;;  %v6528_v41 = vsel %vm6415_vm0, %v13299_v46, 0.0 }
 0xd22   : > { %v6521_v49 = vadd.f32 %v6520_v20, %v6519_v31  ;;  %v13307_v32 = vpop.eup %8615  ;;  %v6530_v29 = vsel %vm6415_vm0, %v13303_v3, 0.0 }
 0xd23   : > { %v13311_v28 = vpop.eup %8617  ;;  %v6532_v12 = vsel %vm6415_vm0, %v13307_v32, 0.0  ;;  %7607 = vmatpush3.bf16.msra.mxu0 %v8588_v1 }
 0xd24   : > { %v6523_v13 = vadd.f32 %v6522_v30, %v6521_v49  ;;  %v13315_v35 = vpop.eup %8619  ;;  %v6534_v55 = vsel %vm6415_vm0, %v13311_v28, 0.0  ;;  %7608 = vmatprep.subr.bf16.mxu0 %v13571_v50 }
 0xd25   : > { %v8622_v24 = vpop.eup %8621  ;;  %v6536_v22 = vsel %vm6415_vm0, %v13315_v35, 0.0 }
 0xd26   : > { %v6525_v57 = vadd.f32 %v6524_v9, %v6523_v13  ;;  %v8624_v36 = vpop.eup %8623  ;;  %v6538_v48 = vsel %vm6415_vm0, %v8622_v24, 0.0 }
 0xd27   : > { %v8626_v15 = vpop.eup %8625  ;;  %v6540_v47 = vsel %vm6415_vm0, %v8624_v36, 0.0  ;;  %7609 = vmatpush3.bf16.msra.mxu0 %v8589_v5 }
 0xd28   : > { %v6527_v56 = vadd.f32 %v6526_v8, %v6525_v57  ;;  %v8628_v45 = vpop.eup %8627  ;;  %v6542_v33 = vsel %vm6415_vm0, %v8626_v15, 0.0  ;;  %7610 = vmatprep.subr.bf16.mxu0 %v13571_v50 }
 0xd29   : > { %v6544_v61 = vsel %vm6415_vm0, %v8628_v45, 0.0 }
 0xd2a   : > { %v6529_v10 = vadd.f32 %v6528_v41, %v6527_v56 }
 0xd2b   : > { %7611 = vmatpush3.bf16.msra.mxu0 %v8590_v60 }
 0xd2c   : > { %v6531_v34 = vadd.f32 %v6530_v29, %v6529_v10 }
 0xd2e   : > { %v6533_v54 = vadd.f32 %v6532_v12, %v6531_v34 }
 0xd30   : > { %v6535_v19 = vadd.f32 %v6534_v55, %v6533_v54  ;;  %v8592_v55 = vld [vmem:[%s13406_s22 + $0x8] sm:$0x7f]  }
 0xd32   : > { %v6537_v4 = vadd.f32 %v6536_v22, %v6535_v19  ;;  %v7033_v19 = vld [vmem:[%s13405_s21] ss:$0 sm:$0xff] }
 0xd34   : > { %v6539_v63 = vadd.f32 %v6538_v48, %v6537_v4 }
 0xd36   : > { %v6541_v11 = vadd.f32 %v6540_v47, %v6539_v63  ;;  %v7040_v47 = vld [vmem:[%s13407_s23] ss:$0 sm:$0xff] }
 0xd38   : > { %v6543_v52 = vadd.f32 %v6542_v33, %v6541_v11 }
 0xd3a   : > { %v6545_v0 = vadd.f32 %v6544_v61, %v6543_v52 }
 0xd3c   : > { %v6546_v27 = vrot.slane %v6545_v0, 4 }
 0xd3e   : > { %v6547_v7 = vadd.f32 %v6546_v27, %v6545_v0 }
 0xd40   : > { %v6548_v2 = vrot.slane %v6547_v7, 2 }
 0xd42   : > { %v6549_v6 = vadd.f32 %v6548_v2, %v6547_v7 }
 0xd44   : > { %v6550_v26 = vrot.slane %v6549_v6, 1 }
 0xd46   : > { %v6551_v58 = vadd.f32 %v6550_v26, %v6549_v6 }
 0xd48   : > { %8629 = vrcp.f32 %v6551_v58 }
 0xd52   : > { %v8630_v21 = vpop.eup %8629 }
 0xd53   : > { %v6569_v31 = vmul.f32 %v8630_v21, %v8626_v15  ;;  %v6570_v20 = vmul.f32 %v8630_v21, %v8628_v45  ;;  %v6553_v42 = vmul.f32 %v8630_v21, %v13251_v25  ;;  %v6554_v18 = vmul.f32 %v8630_v21, %v13253_v51 }
 0xd54   : > { %v6555_v49 = vmul.f32 %v8630_v21, %v13259_v40  ;;  %v6556_v30 = vmul.f32 %v8630_v21, %v13263_v53  ;;  %v6557_v62 = vmul.f32 %v8630_v21, %v13269_v23  ;;  %v6558_v38 = vmul.f32 %v8630_v21, %v13275_v39 }
 0xd55   : > { %v6579_v13 = vpack.c.bf16 %v6570_v20, %v6569_v31  ;;  %v6571_v9 = vpack.c.bf16 %v6554_v18, %v6553_v42  ;;  %v6559_v43 = vmul.f32 %v8630_v21, %v13281_v44  ;;  %v6560_v57 = vmul.f32 %v8630_v21, %v13287_v14 }
 0xd56   : > { %v6572_v8 = vpack.c.bf16 %v6556_v30, %v6555_v49  ;;  %v6573_v59 = vpack.c.bf16 %v6558_v38, %v6557_v62  ;;  %v6561_v25 = vmul.f32 %v8630_v21, %v13293_v17  ;;  %v6562_v51 = vmul.f32 %v8630_v21, %v13299_v46 }
 0xd57   : > { %6596 = vxpose.xlu0.c.b16.start.end [1/1] (short) (narrow) %v6579_v13, 16  ;;  %6580 = vxpose.xlu1.c.b16.start [1/8] (narrow) %v6571_v9, 16  ;;  %v6574_v40 = vpack.c.bf16 %v6560_v57, %v6559_v43  ;;  %v6563_v53 = vmul.f32 %v8630_v21, %v13303_v3  ;;  %v6564_v23 = vmul.f32 %v8630_v21, %v13307_v32  ;;  %v8591_v32 = vld [vmem:[%s13406_s22] sm:$0xff]  }
 0xd58   : > { %v6575_v39 = vpack.c.bf16 %v6562_v51, %v6561_v25  ;;  %v6565_v56 = vmul.f32 %v8630_v21, %v13311_v28  ;;  %v6566_v44 = vmul.f32 %v8630_v21, %v13315_v35  ;;  %v6567_v41 = vmul.f32 %v8630_v21, %v8622_v24 }
 0xd59   : > { %v6576_v14 = vpack.c.bf16 %v6564_v23, %v6563_v53  ;;  %v6568_v10 = vmul.f32 %v8630_v21, %v8624_v36  ;;  %v6774_v24 = vsel %vm13687_vm1, %v8592_v55, 0 }
 0xd5a   : > { %v6577_v29 = vpack.c.bf16 %v6566_v44, %v6565_v56 }
 0xd5b   : > { %6581 = vxpose.xlu1.c.b16.cont [2/8] (narrow) %v6572_v8, 16  ;;  %v6578_v17 = vpack.c.bf16 %v6568_v10, %v6567_v41 }
 0xd5f   : > { %6582 = vxpose.xlu1.c.b16.cont [3/8] (narrow) %v6573_v59, 16 }
 0xd63   : > { %6583 = vxpose.xlu1.c.b16.cont [4/8] (narrow) %v6574_v40, 16 }
 0xd67   : > { %6584 = vxpose.xlu1.c.b16.cont [5/8] (narrow) %v6575_v39, 16 }
 0xd6b   : > { %6585 = vxpose.xlu1.c.b16.cont [6/8] (narrow) %v6576_v14, 16 }
 0xd6f   : > { %6586 = vxpose.xlu1.c.b16.cont [7/8] (narrow) %v6577_v29, 16 }
 0xd73   : > { %6587 = vxpose.xlu1.c.b16.end [8/8] (narrow) %v6578_v17, 16 }
 0xdbd   : > { %v6604_v46 = vpop.trf.xlu0  ;;  %v6588_v3 = vpop.trf.xlu1 }
 0xdbe   : > { %7032 = vmatprep.mubr.msk.bf16.mxu1 %vm5397_vm15, %v6604_v46 }
 0xdbf   : > { %6648 = vmatmul.mubr.bf16.vlgmr.msra.gmra.mrb[180].mxu1 %v6588_v3 }
 0xdc0   : > { %7620 = vmatprep.mubr.msk.bf16.mxu1 %vm13684_vm9, %v13571_v50  ;;  %7617 = vmatpush3.bf16.msra.mxu1 %v8591_v32 }
 0xdc1   : > { %7618 = vmatprep.subr.bf16.mxu1 %v13571_v50 }
 0xdc4   : > { %7619 = vmatpush3.bf16.msra.mxu1 %v6774_v24 }
 0xe92   : > { %v6649_v28 = vpop.f32.mrb[180].mxu1 }
 0xe93   : > { %v6655_v34 = vpack.c.bf16 %v6649_v28, %v6649_v28  ;;  %v6651_v12 = vpop.f32.mrb[181].mxu1 }
 0xe94   : > { %v6652_v35 = vpop.f32.mrb[182].mxu1 }
 0xe95   : > { %v6653_v54 = vpop.f32.mrb[183].mxu1  ;;  %7613 = vmatmul.mubr.msk.bf16.vlgmr.msra.gmra.mrb[180].mxu0 %vm3800_vm8, %v6655_v34 }
 0xf68   : > { %v6740_v50 = vpop.f32.mrb[180].mxu0 }
 0xf69   : > { %v6741_v22 = vadd.f32 %v7033_v19, %v6740_v50  ;;  %v7614_v36 = vpop.f32.mrb[181].mxu0 }
 0xf6a   : > { %v6743_v4 = vpop.f32.mrb[182].mxu0 }
 0xf6b   : > { %v6746_v48 = vmax.f32 %v6741_v22, 0.0  ;;  %v7615_v15 = vpop.f32.mrb[183].mxu0 }
 0xf6d   : > { %v6747_v63 = vpack.c.bf16 %v6746_v48, %v6746_v48 }
 0xf6f   : > { %7621 = vmatmul.mubr.msk.bf16.vlgmr.msra.gmra.mrb[184].mxu1 %vm13688_vm11, %v6747_v63 }
0x1042   : > { %v6810_v45 = vpop.f32.mrb[184].mxu1 }
0x1043   : > { %v6811_v11 = vadd.f32 %v7040_v47, %v6810_v45  ;;  %v7622_v33 = vpop.f32.mrb[185].mxu1 }
0x1044   : > { %v6813_v52 = vpop.f32.mrb[186].mxu1 }
0x1045   : > { %6817 = vst.msk [vmem:[%s737_s4] sm:$0x7] %vm6816_vm14, %v6811_v11  ;;  %v7623_v61 = vpop.f32.mrb[187].mxu1 }
0x1046 PF: > { %s36_s27 = sadd.s32 1, %s8638_s27  }
0x1047   : > { %p33_p4 = scmp.ge.s32.totalorder %s36_s27, 4  }
0x1049   :  { %35 = sbr.rel (!%p33_p4) target bundleno = 11 (0xb), region = 146 }

</bundles_post_ra>
